<compile_context>
chip_gen: v5e
topology: v5e:2x2
jax: 0.10.0
libtpu: 0.0.40
codegen_flags: <defaults>
</compile_context>

<pallas_src>
import functools

import jax
import jax.numpy as jnp
from jax import lax
from jax.experimental import pallas as pl
from jax.experimental.pallas import tpu as pltpu

NEG_INF = -1e30          # python float literal (inlined, NOT a captured traced constant)
BF16 = jnp.bfloat16


# --------------------------------------------------------------------------
# Linear (used for the fused bi-GRU input projection)
# --------------------------------------------------------------------------
def _linear_kernel(x_ref, w_ref, b_ref, o_ref, *, act):
    y = jnp.dot(x_ref[...].astype(BF16), w_ref[...],
                preferred_element_type=jnp.float32) + b_ref[...]
    if act == "relu":
        y = jnp.maximum(y, 0.0)
    elif act == "tanh":
        y = jnp.tanh(y)
    elif act == "sigmoid":
        y = jax.nn.sigmoid(y)
    o_ref[...] = y


def linear(x2d, w_t, b, act=None):
    """y = act(x @ w_t + b).  x2d: (N, In), w_t: (In, Out), b: (1, Out)."""
    n = x2d.shape[0]
    out = w_t.shape[1]
    # TODO(synk): add row tiling (grid + BlockSpec) before scaling N beyond VMEM capacity.
    return pl.pallas_call(
        functools.partial(_linear_kernel, act=act),
        out_shape=jax.ShapeDtypeStruct((n, out), jnp.float32),
    )(x2d, w_t.astype(BF16), b)


# --------------------------------------------------------------------------
# Fused bidirectional GRU recurrence (both directions in one kernel, one launch)
# --------------------------------------------------------------------------
def _bigru_kernel(xg_ref, v_ref, whh_ref, bhh_ref, o_ref, h_ref, *, hidden2, seq_len):
    G = hidden2                                   # 2H (fwd | bwd halves)
    h_ref[...] = jnp.zeros_like(h_ref)            # (B, 2H)
    whh = whh_ref[...]                            # (2H, 6H) bf16 block-diagonal
    bhh = bhh_ref[...]                            # (1, 6H)  f32

    def step(t, carry):
        h = h_ref[...]                            # (B, 2H)
        xg = xg_ref[t]                            # (B, 6H)  W_ih x + b_ih (both dirs)
        v = v_ref[t]                              # (B, 2H)  validity per direction
        hg = jnp.dot(h.astype(BF16), whh, preferred_element_type=jnp.float32) + bhh
        r = jax.nn.sigmoid(xg[:, 0:G] + hg[:, 0:G])
        z = jax.nn.sigmoid(xg[:, G:2 * G] + hg[:, G:2 * G])
        n = jnp.tanh(xg[:, 2 * G:3 * G] + r * hg[:, 2 * G:3 * G])
        h_new = (1.0 - z) * n + z * h
        # masked recurrence == packed-sequence semantics for length-style masks
        h_ref[...] = jnp.where(v > 0, h_new, h)
        o_ref[t] = jnp.where(v > 0, h_new, jnp.zeros_like(h_new))   # pads output zeros
        return carry

    lax.fori_loop(0, seq_len, step, 0, unroll=True)


def bigru(x, mask, p):
    """StackedBRNN (1 layer, bidirectional GRU, concat of directions), packed-eq semantics."""
    B, T, In = x.shape
    H = p["fwd"]["whh_t"].shape[0]
    G = 2 * H

    # ---- pack per-direction weights into the fused layout (glue JAX) -------
    def reorder(wf, wb):
        # (..., 3H) [r|z|n] per direction -> (..., 6H) [r_f r_b z_f z_b n_f n_b]
        parts = []
        for g in range(3):
            parts.append(wf[..., g * H:(g + 1) * H])
            parts.append(wb[..., g * H:(g + 1) * H])
        return jnp.concatenate(parts, axis=-1)

    wih_cat = reorder(p["fwd"]["wih_t"], p["bwd"]["wih_t"])          # (In, 6H)
    bih_cat = reorder(p["fwd"]["bih"], p["bwd"]["bih"])              # (1, 6H)
    bhh_cat = reorder(p["fwd"]["bhh"], p["bwd"]["bhh"])              # (1, 6H)
    zero_h = jnp.zeros_like(p["fwd"]["whh_t"])
    whh_bd = jnp.concatenate([reorder(p["fwd"]["whh_t"], zero_h),
                              reorder(zero_h, p["bwd"]["whh_t"])], axis=0)  # (2H, 6H)

    # ---- input projection for both directions in one matmul ----------------
    xg = linear(x.reshape(B * T, In), wih_cat, bih_cat)              # (B*T, 6H)
    xg = xg.reshape(B, T, 6 * H).transpose(1, 0, 2)                  # (T, B, 6H)

    # fwd columns keep time order, bwd columns are time-reversed
    col = jnp.arange(6 * H)
    fwd_col = ((col // H) % 2 == 0).astype(jnp.float32)
    xg_comb = xg * fwd_col + jnp.flip(xg, axis=0) * (1.0 - fwd_col)  # (T, B, 6H)

    valid = (1.0 - mask.astype(jnp.float32)).T                       # (T, B)
    v_f = jnp.broadcast_to(valid[:, :, None], (T, B, H))
    v_b = jnp.broadcast_to(jnp.flip(valid, axis=0)[:, :, None], (T, B, H))
    v_full = jnp.concatenate([v_f, v_b], axis=-1)                    # (T, B, 2H)

    out = pl.pallas_call(
        functools.partial(_bigru_kernel, hidden2=G, seq_len=T),
        out_shape=jax.ShapeDtypeStruct((T, B, G), jnp.float32),
        scratch_shapes=[pltpu.VMEM((B, G), jnp.float32)],
    )(xg_comb, v_full, whh_bd.astype(BF16), bhh_cat)

    h_fwd = out[:, :, :H].transpose(1, 0, 2)                         # (B, T, H)
    h_bwd = jnp.flip(out[:, :, H:], axis=0).transpose(1, 0, 2)       # (B, T, H)
    return jnp.concatenate([h_fwd, h_bwd], axis=2)                   # (B, T, 2H)


# --------------------------------------------------------------------------
# Fused SeqAttnMatch + interactive SFU  (whole batch, one launch)
# --------------------------------------------------------------------------
def _interactive_kernel(c_ref, q_ref, m_ref, w_ref, b_ref, o_ref):
    c = c_ref[...]                                   # (B, S, D)
    q = q_ref[...]                                   # (B, T, D)
    m = m_ref[...]                                   # (B, 1, T)   1 == pad
    D = c.shape[2]
    cb = c.astype(BF16)
    qb = q.astype(BF16)
    s = lax.dot_general(cb, qb, (((2,), (2,)), ((0,), (0,))),
                        preferred_element_type=jnp.float32)          # (B, S, T)
    s = jnp.where(m > 0, NEG_INF, s)
    s = s - jnp.max(s, axis=2, keepdims=True)
    e = jnp.exp(s)
    p = e / jnp.maximum(jnp.sum(e, axis=2, keepdims=True), 1e-30)
    qt = lax.dot_general(p.astype(BF16), qb, (((2,), (1,)), ((0,), (0,))),
                         preferred_element_type=jnp.float32)         # (B, S, D)
    # SFU on [c, q~, c*q~, c-q~]
    xf = jnp.concatenate([c, qt, c * qt, c - qt], axis=2)            # (B, S, 4D)
    rg = lax.dot_general(xf.astype(BF16), w_ref[...], (((2,), (0,)), ((), ())),
                         preferred_element_type=jnp.float32) + b_ref[...]   # (B, S, 2D)
    r = jnp.tanh(rg[..., :D])
    g = jax.nn.sigmoid(rg[..., D:])
    o_ref[...] = g * r + (1.0 - g) * c


def interactive_align_fuse(c, q, q_mask3, sfu_p):
    B, S, D = c.shape
    return pl.pallas_call(
        _interactive_kernel,
        out_shape=jax.ShapeDtypeStruct((B, S, D), jnp.float32),
    )(c, q, q_mask3, sfu_p["w_rg"].astype(BF16), sfu_p["b_rg"].reshape(1, 1, -1))


# --------------------------------------------------------------------------
# Fused SelfAttnMatch (diag=False) + self SFU  (whole batch, one launch)
# --------------------------------------------------------------------------
def _self_fuse_kernel(x_ref, m_ref, w_ref, b_ref, o_ref):
    x = x_ref[...]                                   # (B, S, D)  (= c_bar)
    m = m_ref[...]                                   # (B, 1, S)
    B, S, D = x.shape
    xb = x.astype(BF16)
    s = lax.dot_general(xb, xb, (((2,), (2,)), ((0,), (0,))),
                        preferred_element_type=jnp.float32)          # (B, S, S)
    row = lax.broadcasted_iota(jnp.int32, (B, S, S), 1)
    col = lax.broadcasted_iota(jnp.int32, (B, S, S), 2)
    s = jnp.where(row == col, 0.0, s)                # diag=False: zero diagonal score
    s = jnp.where(m > 0, NEG_INF, s)
    s = s - jnp.max(s, axis=2, keepdims=True)
    e = jnp.exp(s)
    p = e / jnp.maximum(jnp.sum(e, axis=2, keepdims=True), 1e-30)
    ct = lax.dot_general(p.astype(BF16), xb, (((2,), (1,)), ((0,), (0,))),
                         preferred_element_type=jnp.float32)         # (B, S, D)
    xf = jnp.concatenate([x, ct, x * ct, x - ct], axis=2)            # (B, S, 4D)
    rg = lax.dot_general(xf.astype(BF16), w_ref[...], (((2,), (0,)), ((), ())),
                         preferred_element_type=jnp.float32) + b_ref[...]
    r = jnp.tanh(rg[..., :D])
    g = jax.nn.sigmoid(rg[..., D:])
    o_ref[...] = g * r + (1.0 - g) * x


def self_align_fuse(x, x_mask3, sfu_p):
    B, S, D = x.shape
    return pl.pallas_call(
        _self_fuse_kernel,
        out_shape=jax.ShapeDtypeStruct((B, S, D), jnp.float32),
    )(x, x_mask3, sfu_p["w_rg"].astype(BF16), sfu_p["b_rg"].reshape(1, 1, -1))


# --------------------------------------------------------------------------
# Fused MemoryAnsPointer step: FFN + masked softmax + attend + SFU
# --------------------------------------------------------------------------
def _pointer_kernel(c_ref, z_ref, m_ref, w1_ref, b1_ref, w2_ref, b2_ref,
                    wsfu_ref, bsfu_ref, p_ref, znew_ref):
    c = c_ref[...]                                   # (B, S, D)
    z = z_ref[...]                                   # (B, 1, D)
    m = m_ref[...]                                   # (B, S, 1)
    B, S, D = c.shape
    zr = jnp.broadcast_to(z, (B, S, D))
    feat = jnp.concatenate([c, zr, c * zr], axis=2)  # (B, S, 3D)
    h1 = lax.dot_general(feat.astype(BF16), w1_ref[...], (((2,), (0,)), ((), ())),
                         preferred_element_type=jnp.float32) + b1_ref[...]
    h1 = jnp.maximum(h1, 0.0)                        # (B, S, Hh)
    # scores: VPU multiply + lane reduce (avoids a 1-lane MXU matmul)
    sc = jnp.sum(h1 * w2_ref[...], axis=2, keepdims=True) + b2_ref[...]   # (B, S, 1)
    sc = jnp.where(m > 0, NEG_INF, sc)
    sc = sc - jnp.max(sc, axis=1, keepdims=True)
    e = jnp.exp(sc)
    p = e / jnp.maximum(jnp.sum(e, axis=1, keepdims=True), 1e-30)         # (B, S, 1)
    p_ref[...] = p
    u = jnp.sum(p * c, axis=1, keepdims=True)        # (B, 1, D)
    # SFU(z, u)
    zu = jnp.concatenate([z, u], axis=2)             # (B, 1, 2D)
    rg = lax.dot_general(zu.astype(BF16), wsfu_ref[...], (((2,), (0,)), ((), ())),
                         preferred_element_type=jnp.float32) + bsfu_ref[...]   # (B, 1, 2D)
    r = jnp.tanh(rg[..., :D])
    g = jax.nn.sigmoid(rg[..., D:])
    znew_ref[...] = g * r + (1.0 - g) * z


def pointer_step(c, z, x_mask_bs1, ffn_p, sfu_p):
    B, S, D = c.shape
    Hh = ffn_p["w1_t"].shape[1]
    p, z_new = pl.pallas_call(
        _pointer_kernel,
        out_shape=(jax.ShapeDtypeStruct((B, S, 1), jnp.float32),
                   jax.ShapeDtypeStruct((B, 1, D), jnp.float32)),
    )(c, z, x_mask_bs1,
      ffn_p["w1_t"].astype(BF16), ffn_p["b1"].reshape(1, 1, Hh),
      ffn_p["w2_t"].reshape(1, 1, Hh), ffn_p["b2"].reshape(1, 1, 1),
      sfu_p["w_rg"].astype(BF16), sfu_p["b_rg"].reshape(1, 1, -1))
    return p, z_new


# --------------------------------------------------------------------------
# Parameters (deterministic, synthetic)
# --------------------------------------------------------------------------
def init_params(key, args):
    keys = jax.random.split(key, 256)
    it = iter(range(256))

    def nrm(shape, scale=0.1):
        return (scale * jax.random.normal(keys[next(it)], shape)).astype(jnp.float32)

    H = args.hidden_size
    D = 2 * H  # doc hidden size

    def gru_params(in_size):
        def one_dir():
            return dict(wih_t=nrm((in_size, 3 * H)), bih=nrm((1, 3 * H), 0.05),
                        whh_t=nrm((H, 3 * H)), bhh=nrm((1, 3 * H), 0.05))
        return dict(fwd=one_dir(), bwd=one_dir())

    def sfu_params(x_size, fusion_size):
        # packed [Wr | Wg] : one matmul inside the kernels
        return dict(w_rg=nrm((x_size + fusion_size, 2 * x_size)),
                    b_rg=nrm((1, 2 * x_size), 0.05))

    def ffn_params(in_size, hid, out):
        return dict(w1_t=nrm((in_size, hid)), b1=nrm((1, hid), 0.05),
                    w2_t=nrm((hid, out)), b2=nrm((1, out), 0.05))

    emb = nrm((args.vocab_size, args.embedding_dim), 0.5)
    emb = emb.at[0].set(0.0)  # padding_idx=0

    return dict(
        embedding=emb,
        encoding_rnn=gru_params(args.embedding_dim + args.num_features),
        hops=[dict(i_sfu=sfu_params(D, 3 * D),
                   s_sfu=sfu_params(D, 3 * D),
                   agg_rnn=gru_params(D)) for _ in range(args.hop)],
        ptr=dict(
            ffn_s=[ffn_params(D + D + 2 * H, H, 1) for _ in range(args.hop)],
            sfu_s=[sfu_params(D, 2 * H) for _ in range(args.hop)],
            ffn_e=[ffn_params(D + D + 2 * H, H, 1) for _ in range(args.hop)],
            sfu_e=[sfu_params(D, 2 * H) for _ in range(args.hop)],
        ),
    )


# --------------------------------------------------------------------------
# Forward (PlayReader.forward), eval mode (dropout = identity, normalize=True)
# --------------------------------------------------------------------------
def play_reader_forward(params, x1, x1_c, x1_f, x1_mask, x2, x2_c, x2_f, x2_mask):
    del x1_c, x2_c  # char indices are accepted but unused by PlayReader.forward
    hop = len(params["hops"])
    emb = params["embedding"]
    x1_emb = jnp.take(emb, x1, axis=0)   # embedding gather (glue)
    x2_emb = jnp.take(emb, x2, axis=0)

    c_in = jnp.concatenate([x1_emb, x1_f], axis=2)      # (B, S, In)
    q_in = jnp.concatenate([x2_emb, x2_f], axis=2)      # (B, T, In)

    B, S = x1.shape
    T = x2.shape[1]
    L = max(S, T)

    def pad_seq(x):
        return jnp.pad(x, ((0, 0), (0, L - x.shape[1]), (0, 0)))

    def pad_mask(m):
        return jnp.pad(m, ((0, 0), (0, L - m.shape[1])), constant_values=1)

    # single encoder call for both context and question (stacked on batch axis)
    enc_in = jnp.concatenate([pad_seq(c_in), pad_seq(q_in)], axis=0)             # (2B, L, In)
    enc_mask = jnp.concatenate([pad_mask(x1_mask), pad_mask(x2_mask)], axis=0)   # (2B, L)
    enc = bigru(enc_in, enc_mask, params["encoding_rnn"])                        # (2B, L, D)
    c = enc[:B, :S]
    q = enc[B:, :T]

    D = c.shape[2]
    x1m3 = x1_mask.astype(jnp.float32).reshape(B, 1, S)
    x2m3 = x2_mask.astype(jnp.float32).reshape(B, 1, T)
    x1m_bs1 = x1_mask.astype(jnp.float32).reshape(B, S, 1)

    c_check = c
    for i in range(hop):
        hp = params["hops"][i]
        c_bar = interactive_align_fuse(c_check, q, x2m3, hp["i_sfu"])   # attn + SFU fused
        c_hat = self_align_fuse(c_bar, x1m3, hp["s_sfu"])               # self-attn + SFU fused
        c_check = bigru(c_hat, x1_mask, hp["agg_rnn"])

    # Memory-based answer pointer
    mp = params["ptr"]
    z = q[:, -1:, :]                       # (B, 1, D)
    p_s = None
    p_e = None
    for i in range(hop):
        p_s, z = pointer_step(c_check, z, x1m_bs1, mp["ffn_s"][i], mp["sfu_s"][i])
        p_e, z = pointer_step(c_check, z, x1m_bs1, mp["ffn_e"][i], mp["sfu_e"][i])

    # normalize=True, eval mode -> plain softmax (already computed with masking)
    return p_s.reshape(B, S), p_e.reshape(B, S)


# --------------------------------------------------------------------------
# Main
# --------------------------------------------------------------------------
if __name__ == "__main__":
    class Args:
        pass

    args = Args()
    args.vocab_size = 50
    args.embedding_dim = 32
    args.num_features = 4
    args.hidden_size = 16
    args.hop = 2
    args.rnn_type = "gru"           # RNN_TYPES['gru']  (bidirectional, 1 layer)
    args.dropout_rnn = 0.0
    args.dropout_rnn_output = False
    args.dropout_emb = 0.0
    args.rnn_padding = True

    B, Ld, Lq, MC = 2, 16, 8, 4

    key = jax.random.PRNGKey(0)
    kp, k1, k2, k3, k4 = jax.random.split(key, 5)
    params = init_params(kp, args)

    len1 = jnp.array([16, 12], dtype=jnp.int32)
    len2 = jnp.array([8, 5], dtype=jnp.int32)
    x1_mask = (jnp.arange(Ld)[None, :] >= len1[:, None]).astype(jnp.int32)   # 1 == pad
    x2_mask = (jnp.arange(Lq)[None, :] >= len2[:, None]).astype(jnp.int32)
    x1 = jax.random.randint(k1, (B, Ld), 1, args.vocab_size) * (1 - x1_mask)
    x2 = jax.random.randint(k2, (B, Lq), 1, args.vocab_size) * (1 - x2_mask)
    x1_f = 0.1 * jax.random.normal(k3, (B, Ld, args.num_features), dtype=jnp.float32)
    x2_f = 0.1 * jax.random.normal(k4, (B, Lq, args.num_features), dtype=jnp.float32)
    x1_c = jnp.zeros((B, Ld, MC), jnp.int32)   # unused by forward
    x2_c = jnp.zeros((B, Lq, MC), jnp.int32)   # unused by forward

    fwd = jax.jit(play_reader_forward)
    start_scores, end_scores = fwd(params, x1, x1_c, x1_f, x1_mask,
                                   x2, x2_c, x2_f, x2_mask)
    jax.block_until_ready((start_scores, end_scores))

    assert start_scores.shape == (B, Ld) and end_scores.shape == (B, Ld)
    assert bool(jnp.all(jnp.isfinite(start_scores)))
    assert bool(jnp.all(jnp.isfinite(end_scores)))
    # probabilities should sum to ~1 over the document axis
    assert bool(jnp.allclose(jnp.sum(start_scores, axis=1), 1.0, atol=1e-3))
    assert bool(jnp.allclose(jnp.sum(end_scores, axis=1), 1.0, atol=1e-3))
    print("KERNEL_OK")
</pallas_src>

<mosaic_0001>
module attributes {stable_mosaic.version = 11 : i64} {
  func.func @_linear_kernel(%arg0: memref<64x36xf32, #tpu.memory_space<vmem>>, %arg1: memref<36x96xbf16, #tpu.memory_space<vmem>>, %arg2: memref<1x96xf32, #tpu.memory_space<vmem>>, %arg3: memref<64x96xf32, #tpu.memory_space<vmem>>) attributes {dimension_semantics = [], scalar_prefetch = 0 : i64, scratch_operands = 0 : i64, tpu.core_type = #tpu.core_type<tc>} {
    %c0 = arith.constant 0 : index
    %c0_0 = arith.constant 0 : index
    %0 = vector.load %arg0[%c0, %c0_0] : memref<64x36xf32, #tpu.memory_space<vmem>>, vector<64x36xf32>
    %1 = arith.truncf %0 : vector<64x36xf32> to vector<64x36xbf16>
    %c0_1 = arith.constant 0 : index
    %c0_2 = arith.constant 0 : index
    %2 = vector.load %arg1[%c0_1, %c0_2] : memref<36x96xbf16, #tpu.memory_space<vmem>>, vector<36x96xbf16>
    %cst = arith.constant dense<0.000000e+00> : vector<64x96xf32>
    %3 = tpu.matmul %1, %2, %cst {dimension_numbers = #tpu.dot_dimension_numbers<[1], [0], [0], [1], [0, 0, 1, 1], [], []>} : vector<64x36xbf16>, vector<36x96xbf16>, vector<64x96xf32> -> vector<64x96xf32>
    %c0_3 = arith.constant 0 : index
    %c0_4 = arith.constant 0 : index
    %4 = vector.load %arg2[%c0_3, %c0_4] : memref<1x96xf32, #tpu.memory_space<vmem>>, vector<1x96xf32>
    %5 = vector.broadcast %4 : vector<1x96xf32> to vector<64x96xf32>
    %6 = arith.addf %3, %5 : vector<64x96xf32>
    %c0_5 = arith.constant 0 : index
    %c0_6 = arith.constant 0 : index
    %7 = vector.load %arg3[%c0_5, %c0_6] : memref<64x96xf32, #tpu.memory_space<vmem>>, vector<64x96xf32>
    tpu.vector_store %arg3[%c0_5, %c0_6], %6 {strides = array<i32>} : memref<64x96xf32, #tpu.memory_space<vmem>>, vector<64x96xf32>,
    return
  }
}

module attributes {stable_mosaic.version = 11 : i64} {
  func.func @_bigru_kernel(%arg0: memref<16x4x96xf32, #tpu.memory_space<vmem>>, %arg1: memref<16x4x32xf32, #tpu.memory_space<vmem>>, %arg2: memref<32x96xbf16, #tpu.memory_space<vmem>>, %arg3: memref<1x96xf32, #tpu.memory_space<vmem>>, %arg4: memref<16x4x32xf32, #tpu.memory_space<vmem>>, %arg5: memref<4x32xf32, #tpu.memory_space<vmem>>) attributes {dimension_semantics = [], scalar_prefetch = 0 : i64, scratch_operands = 1 : i64, tpu.core_type = #tpu.core_type<tc>} {
    %cst = arith.constant 0.000000e+00 : f32
    %0 = vector.broadcast %cst : f32 to vector<4x32xf32>
    %c0 = arith.constant 0 : index
    %c0_0 = arith.constant 0 : index
    %1 = vector.load %arg5[%c0, %c0_0] : memref<4x32xf32, #tpu.memory_space<vmem>>, vector<4x32xf32>
    tpu.vector_store %arg5[%c0, %c0_0], %0 {strides = array<i32>} : memref<4x32xf32, #tpu.memory_space<vmem>>, vector<4x32xf32>,
    %c0_1 = arith.constant 0 : index
    %c0_2 = arith.constant 0 : index
    %2 = vector.load %arg2[%c0_1, %c0_2] : memref<32x96xbf16, #tpu.memory_space<vmem>>, vector<32x96xbf16>
    %c0_3 = arith.constant 0 : index
    %c0_4 = arith.constant 0 : index
    %3 = vector.load %arg3[%c0_3, %c0_4] : memref<1x96xf32, #tpu.memory_space<vmem>>, vector<1x96xf32>
    %c0_i32 = arith.constant 0 : i32
    %c0_5 = arith.constant 0 : index
    %c0_6 = arith.constant 0 : index
    %4 = vector.load %arg5[%c0_5, %c0_6] : memref<4x32xf32, #tpu.memory_space<vmem>>, vector<4x32xf32>
    %5 = arith.index_cast %c0_i32 : i32 to index
    %c0_7 = arith.constant 0 : index
    %c0_8 = arith.constant 0 : index
    %6 = vector.load %arg0[%5, %c0_7, %c0_8] : memref<16x4x96xf32, #tpu.memory_space<vmem>>, vector<1x4x96xf32>
    %7 = vector.shape_cast %6 : vector<1x4x96xf32> to vector<4x96xf32>
    %8 = arith.index_cast %c0_i32 : i32 to index
    %c0_9 = arith.constant 0 : index
    %c0_10 = arith.constant 0 : index
    %9 = vector.load %arg1[%8, %c0_9, %c0_10] : memref<16x4x32xf32, #tpu.memory_space<vmem>>, vector<1x4x32xf32>
    %10 = vector.shape_cast %9 : vector<1x4x32xf32> to vector<4x32xf32>
    %11 = arith.truncf %4 : vector<4x32xf32> to vector<4x32xbf16>
    %cst_11 = arith.constant dense<0.000000e+00> : vector<4x96xf32>
    %12 = tpu.matmul %11, %2, %cst_11 {dimension_numbers = #tpu.dot_dimension_numbers<[1], [0], [0], [1], [0, 0, 1, 1], [], []>} : vector<4x32xbf16>, vector<32x96xbf16>, vector<4x96xf32> -> vector<4x96xf32>
    %13 = vector.broadcast %3 : vector<1x96xf32> to vector<4x96xf32>
    %14 = arith.addf %12, %13 : vector<4x96xf32>
    %15 = vector.extract_strided_slice %7 {offsets = [0, 0], sizes = [4, 32], strides = [1, 1]} : vector<4x96xf32> to vector<4x32xf32>
    %16 = vector.extract_strided_slice %14 {offsets = [0, 0], sizes = [4, 32], strides = [1, 1]} : vector<4x96xf32> to vector<4x32xf32>
    %17 = arith.addf %15, %16 : vector<4x32xf32>
    %18 = arith.negf %17 : vector<4x32xf32>
    %19 = math.exp %18 : vector<4x32xf32>
    %cst_12 = arith.constant 1.000000e+00 : f32
    %20 = vector.broadcast %cst_12 : f32 to vector<4x32xf32>
    %21 = arith.addf %20, %19 : vector<4x32xf32>
    %22 = arith.divf %20, %21 : vector<4x32xf32>
    %23 = vector.extract_strided_slice %7 {offsets = [0, 32], sizes = [4, 32], strides = [1, 1]} : vector<4x96xf32> to vector<4x32xf32>
    %24 = vector.extract_strided_slice %14 {offsets = [0, 32], sizes = [4, 32], strides = [1, 1]} : vector<4x96xf32> to vector<4x32xf32>
    %25 = arith.addf %23, %24 : vector<4x32xf32>
    %26 = arith.negf %25 : vector<4x32xf32>
    %27 = math.exp %26 : vector<4x32xf32>
    %cst_13 = arith.constant 1.000000e+00 : f32
    %28 = vector.broadcast %cst_13 : f32 to vector<4x32xf32>
    %29 = arith.addf %28, %27 : vector<4x32xf32>
    %30 = arith.divf %28, %29 : vector<4x32xf32>
    %31 = vector.extract_strided_slice %7 {offsets = [0, 64], sizes = [4, 32], strides = [1, 1]} : vector<4x96xf32> to vector<4x32xf32>
    %32 = vector.extract_strided_slice %14 {offsets = [0, 64], sizes = [4, 32], strides = [1, 1]} : vector<4x96xf32> to vector<4x32xf32>
    %33 = arith.mulf %22, %32 : vector<4x32xf32>
    %34 = arith.addf %31, %33 : vector<4x32xf32>
    %35 = math.tanh %34 : vector<4x32xf32>
    %cst_14 = arith.constant 1.000000e+00 : f32
    %36 = vector.broadcast %cst_14 : f32 to vector<4x32xf32>
    %37 = arith.subf %36, %30 : vector<4x32xf32>
    %38 = arith.mulf %37, %35 : vector<4x32xf32>
    %39 = arith.mulf %30, %4 : vector<4x32xf32>
    %40 = arith.addf %38, %39 : vector<4x32xf32>
    %cst_15 = arith.constant 0.000000e+00 : f32
    %41 = vector.broadcast %cst_15 : f32 to vector<4x32xf32>
    %42 = arith.cmpf ogt, %10, %41 : vector<4x32xf32>
    %43 = arith.select %42, %40, %4 : vector<4x32xi1>, vector<4x32xf32>
    %c0_16 = arith.constant 0 : index
    %c0_17 = arith.constant 0 : index
    %44 = vector.load %arg5[%c0_16, %c0_17] : memref<4x32xf32, #tpu.memory_space<vmem>>, vector<4x32xf32>
    tpu.vector_store %arg5[%c0_16, %c0_17], %43 {strides = array<i32>} : memref<4x32xf32, #tpu.memory_space<vmem>>, vector<4x32xf32>,
    %cst_18 = arith.constant 0.000000e+00 : f32
    %45 = vector.broadcast %cst_18 : f32 to vector<4x32xf32>
    %46 = arith.cmpf ogt, %10, %45 : vector<4x32xf32>
    %cst_19 = arith.constant 0.000000e+00 : f32
    %47 = vector.broadcast %cst_19 : f32 to vector<4x32xf32>
    %48 = arith.select %46, %40, %47 : vector<4x32xi1>, vector<4x32xf32>
    %49 = arith.index_cast %c0_i32 : i32 to index
    %c0_20 = arith.constant 0 : index
    %c0_21 = arith.constant 0 : index
    %50 = vector.load %arg4[%49, %c0_20, %c0_21] : memref<16x4x32xf32, #tpu.memory_space<vmem>>, vector<1x4x32xf32>
    %51 = vector.shape_cast %50 : vector<1x4x32xf32> to vector<4x32xf32>
    %52 = vector.shape_cast %48 : vector<4x32xf32> to vector<1x4x32xf32>
    tpu.vector_store %arg4[%49, %c0_20, %c0_21], %52 {strides = array<i32>} : memref<16x4x32xf32, #tpu.memory_space<vmem>>, vector<1x4x32xf32>,
    %c1_i32 = arith.constant 1 : i32
    %c0_22 = arith.constant 0 : index
    %c0_23 = arith.constant 0 : index
    %53 = vector.load %arg5[%c0_22, %c0_23] : memref<4x32xf32, #tpu.memory_space<vmem>>, vector<4x32xf32>
    %54 = arith.index_cast %c1_i32 : i32 to index
    %c0_24 = arith.constant 0 : index
    %c0_25 = arith.constant 0 : index
    %55 = vector.load %arg0[%54, %c0_24, %c0_25] : memref<16x4x96xf32, #tpu.memory_space<vmem>>, vector<1x4x96xf32>
    %56 = vector.shape_cast %55 : vector<1x4x96xf32> to vector<4x96xf32>
    %57 = arith.index_cast %c1_i32 : i32 to index
    %c0_26 = arith.constant 0 : index
    %c0_27 = arith.constant 0 : index
    %58 = vector.load %arg1[%57, %c0_26, %c0_27] : memref<16x4x32xf32, #tpu.memory_space<vmem>>, vector<1x4x32xf32>
    %59 = vector.shape_cast %58 : vector<1x4x32xf32> to vector<4x32xf32>
    %60 = arith.truncf %53 : vector<4x32xf32> to vector<4x32xbf16>
    %cst_28 = arith.constant dense<0.000000e+00> : vector<4x96xf32>
    %61 = tpu.matmul %60, %2, %cst_28 {dimension_numbers = #tpu.dot_dimension_numbers<[1], [0], [0], [1], [0, 0, 1, 1], [], []>} : vector<4x32xbf16>, vector<32x96xbf16>, vector<4x96xf32> -> vector<4x96xf32>
    %62 = vector.broadcast %3 : vector<1x96xf32> to vector<4x96xf32>
    %63 = arith.addf %61, %62 : vector<4x96xf32>
    %64 = vector.extract_strided_slice %56 {offsets = [0, 0], sizes = [4, 32], strides = [1, 1]} : vector<4x96xf32> to vector<4x32xf32>
    %65 = vector.extract_strided_slice %63 {offsets = [0, 0], sizes = [4, 32], strides = [1, 1]} : vector<4x96xf32> to vector<4x32xf32>
    %66 = arith.addf %64, %65 : vector<4x32xf32>
    %67 = arith.negf %66 : vector<4x32xf32>
    %68 = math.exp %67 : vector<4x32xf32>
    %cst_29 = arith.constant 1.000000e+00 : f32
    %69 = vector.broadcast %cst_29 : f32 to vector<4x32xf32>
    %70 = arith.addf %69, %68 : vector<4x32xf32>
    %71 = arith.divf %69, %70 : vector<4x32xf32>
    %72 = vector.extract_strided_slice %56 {offsets = [0, 32], sizes = [4, 32], strides = [1, 1]} : vector<4x96xf32> to vector<4x32xf32>
    %73 = vector.extract_strided_slice %63 {offsets = [0, 32], sizes = [4, 32], strides = [1, 1]} : vector<4x96xf32> to vector<4x32xf32>
    %74 = arith.addf %72, %73 : vector<4x32xf32>
    %75 = arith.negf %74 : vector<4x32xf32>
    %76 = math.exp %75 : vector<4x32xf32>
    %cst_30 = arith.constant 1.000000e+00 : f32
    %77 = vector.broadcast %cst_30 : f32 to vector<4x32xf32>
    %78 = arith.addf %77, %76 : vector<4x32xf32>
    %79 = arith.divf %77, %78 : vector<4x32xf32>
    %80 = vector.extract_strided_slice %56 {offsets = [0, 64], sizes = [4, 32], strides = [1, 1]} : vector<4x96xf32> to vector<4x32xf32>
    %81 = vector.extract_strided_slice %63 {offsets = [0, 64], sizes = [4, 32], strides = [1, 1]} : vector<4x96xf32> to vector<4x32xf32>
    %82 = arith.mulf %71, %81 : vector<4x32xf32>
    %83 = arith.addf %80, %82 : vector<4x32xf32>
    %84 = math.tanh %83 : vector<4x32xf32>
    %cst_31 = arith.constant 1.000000e+00 : f32
    %85 = vector.broadcast %cst_31 : f32 to vector<4x32xf32>
    %86 = arith.subf %85, %79 : vector<4x32xf32>
    %87 = arith.mulf %86, %84 : vector<4x32xf32>
    %88 = arith.mulf %79, %53 : vector<4x32xf32>
    %89 = arith.addf %87, %88 : vector<4x32xf32>
    %cst_32 = arith.constant 0.000000e+00 : f32
    %90 = vector.broadcast %cst_32 : f32 to vector<4x32xf32>
    %91 = arith.cmpf ogt, %59, %90 : vector<4x32xf32>
    %92 = arith.select %91, %89, %53 : vector<4x32xi1>, vector<4x32xf32>
    %c0_33 = arith.constant 0 : index
    %c0_34 = arith.constant 0 : index
    %93 = vector.load %arg5[%c0_33, %c0_34] : memref<4x32xf32, #tpu.memory_space<vmem>>, vector<4x32xf32>
    tpu.vector_store %arg5[%c0_33, %c0_34], %92 {strides = array<i32>} : memref<4x32xf32, #tpu.memory_space<vmem>>, vector<4x32xf32>,
    %cst_35 = arith.constant 0.000000e+00 : f32
    %94 = vector.broadcast %cst_35 : f32 to vector<4x32xf32>
    %95 = arith.cmpf ogt, %59, %94 : vector<4x32xf32>
    %cst_36 = arith.constant 0.000000e+00 : f32
    %96 = vector.broadcast %cst_36 : f32 to vector<4x32xf32>
    %97 = arith.select %95, %89, %96 : vector<4x32xi1>, vector<4x32xf32>
    %98 = arith.index_cast %c1_i32 : i32 to index
    %c0_37 = arith.constant 0 : index
    %c0_38 = arith.constant 0 : index
    %99 = vector.load %arg4[%98, %c0_37, %c0_38] : memref<16x4x32xf32, #tpu.memory_space<vmem>>, vector<1x4x32xf32>
    %100 = vector.shape_cast %99 : vector<1x4x32xf32> to vector<4x32xf32>
    %101 = vector.shape_cast %97 : vector<4x32xf32> to vector<1x4x32xf32>
    tpu.vector_store %arg4[%98, %c0_37, %c0_38], %101 {strides = array<i32>} : memref<16x4x32xf32, #tpu.memory_space<vmem>>, vector<1x4x32xf32>,
    %c2_i32 = arith.constant 2 : i32
    %c0_39 = arith.constant 0 : index
    %c0_40 = arith.constant 0 : index
    %102 = vector.load %arg5[%c0_39, %c0_40] : memref<4x32xf32, #tpu.memory_space<vmem>>, vector<4x32xf32>
    %103 = arith.index_cast %c2_i32 : i32 to index
    %c0_41 = arith.constant 0 : index
    %c0_42 = arith.constant 0 : index
    %104 = vector.load %arg0[%103, %c0_41, %c0_42] : memref<16x4x96xf32, #tpu.memory_space<vmem>>, vector<1x4x96xf32>
    %105 = vector.shape_cast %104 : vector<1x4x96xf32> to vector<4x96xf32>
    %106 = arith.index_cast %c2_i32 : i32 to index
    %c0_43 = arith.constant 0 : index
    %c0_44 = arith.constant 0 : index
    %107 = vector.load %arg1[%106, %c0_43, %c0_44] : memref<16x4x32xf32, #tpu.memory_space<vmem>>, vector<1x4x32xf32>
    %108 = vector.shape_cast %107 : vector<1x4x32xf32> to vector<4x32xf32>
    %109 = arith.truncf %102 : vector<4x32xf32> to vector<4x32xbf16>
    %cst_45 = arith.constant dense<0.000000e+00> : vector<4x96xf32>
    %110 = tpu.matmul %109, %2, %cst_45 {dimension_numbers = #tpu.dot_dimension_numbers<[1], [0], [0], [1], [0, 0, 1, 1], [], []>} : vector<4x32xbf16>, vector<32x96xbf16>, vector<4x96xf32> -> vector<4x96xf32>
    %111 = vector.broadcast %3 : vector<1x96xf32> to vector<4x96xf32>
    %112 = arith.addf %110, %111 : vector<4x96xf32>
    %113 = vector.extract_strided_slice %105 {offsets = [0, 0], sizes = [4, 32], strides = [1, 1]} : vector<4x96xf32> to vector<4x32xf32>
    %114 = vector.extract_strided_slice %112 {offsets = [0, 0], sizes = [4, 32], strides = [1, 1]} : vector<4x96xf32> to vector<4x32xf32>
    %115 = arith.addf %113, %114 : vector<4x32xf32>
    %116 = arith.negf %115 : vector<4x32xf32>
    %117 = math.exp %116 : vector<4x32xf32>
    %cst_46 = arith.constant 1.000000e+00 : f32
    %118 = vector.broadcast %cst_46 : f32 to vector<4x32xf32>
    %119 = arith.addf %118, %117 : vector<4x32xf32>
    %120 = arith.divf %118, %119 : vector<4x32xf32>
    %121 = vector.extract_strided_slice %105 {offsets = [0, 32], sizes = [4, 32], strides = [1, 1]} : vector<4x96xf32> to vector<4x32xf32>
    %122 = vector.extract_strided_slice %112 {offsets = [0, 32], sizes = [4, 32], strides = [1, 1]} : vector<4x96xf32> to vector<4x32xf32>
    %123 = arith.addf %121, %122 : vector<4x32xf32>
    %124 = arith.negf %123 : vector<4x32xf32>
    %125 = math.exp %124 : vector<4x32xf32>
    %cst_47 = arith.constant 1.000000e+00 : f32
    %126 = vector.broadcast %cst_47 : f32 to vector<4x32xf32>
    %127 = arith.addf %126, %125 : vector<4x32xf32>
    %128 = arith.divf %126, %127 : vector<4x32xf32>
    %129 = vector.extract_strided_slice %105 {offsets = [0, 64], sizes = [4, 32], strides = [1, 1]} : vector<4x96xf32> to vector<4x32xf32>
    %130 = vector.extract_strided_slice %112 {offsets = [0, 64], sizes = [4, 32], strides = [1, 1]} : vector<4x96xf32> to vector<4x32xf32>
    %131 = arith.mulf %120, %130 : vector<4x32xf32>
    %132 = arith.addf %129, %131 : vector<4x32xf32>
    %133 = math.tanh %132 : vector<4x32xf32>
    %cst_48 = arith.constant 1.000000e+00 : f32
    %134 = vector.broadcast %cst_48 : f32 to vector<4x32xf32>
    %135 = arith.subf %134, %128 : vector<4x32xf32>
    %136 = arith.mulf %135, %133 : vector<4x32xf32>
    %137 = arith.mulf %128, %102 : vector<4x32xf32>
    %138 = arith.addf %136, %137 : vector<4x32xf32>
    %cst_49 = arith.constant 0.000000e+00 : f32
    %139 = vector.broadcast %cst_49 : f32 to vector<4x32xf32>
    %140 = arith.cmpf ogt, %108, %139 : vector<4x32xf32>
    %141 = arith.select %140, %138, %102 : vector<4x32xi1>, vector<4x32xf32>
    %c0_50 = arith.constant 0 : index
    %c0_51 = arith.constant 0 : index
    %142 = vector.load %arg5[%c0_50, %c0_51] : memref<4x32xf32, #tpu.memory_space<vmem>>, vector<4x32xf32>
    tpu.vector_store %arg5[%c0_50, %c0_51], %141 {strides = array<i32>} : memref<4x32xf32, #tpu.memory_space<vmem>>, vector<4x32xf32>,
    %cst_52 = arith.constant 0.000000e+00 : f32
    %143 = vector.broadcast %cst_52 : f32 to vector<4x32xf32>
    %144 = arith.cmpf ogt, %108, %143 : vector<4x32xf32>
    %cst_53 = arith.constant 0.000000e+00 : f32
    %145 = vector.broadcast %cst_53 : f32 to vector<4x32xf32>
    %146 = arith.select %144, %138, %145 : vector<4x32xi1>, vector<4x32xf32>
    %147 = arith.index_cast %c2_i32 : i32 to index
    %c0_54 = arith.constant 0 : index
    %c0_55 = arith.constant 0 : index
    %148 = vector.load %arg4[%147, %c0_54, %c0_55] : memref<16x4x32xf32, #tpu.memory_space<vmem>>, vector<1x4x32xf32>
    %149 = vector.shape_cast %148 : vector<1x4x32xf32> to vector<4x32xf32>
    %150 = vector.shape_cast %146 : vector<4x32xf32> to vector<1x4x32xf32>
    tpu.vector_store %arg4[%147, %c0_54, %c0_55], %150 {strides = array<i32>} : memref<16x4x32xf32, #tpu.memory_space<vmem>>, vector<1x4x32xf32>,
    %c3_i32 = arith.constant 3 : i32
    %c0_56 = arith.constant 0 : index
    %c0_57 = arith.constant 0 : index
    %151 = vector.load %arg5[%c0_56, %c0_57] : memref<4x32xf32, #tpu.memory_space<vmem>>, vector<4x32xf32>
    %152 = arith.index_cast %c3_i32 : i32 to index
    %c0_58 = arith.constant 0 : index
    %c0_59 = arith.constant 0 : index
    %153 = vector.load %arg0[%152, %c0_58, %c0_59] : memref<16x4x96xf32, #tpu.memory_space<vmem>>, vector<1x4x96xf32>
    %154 = vector.shape_cast %153 : vector<1x4x96xf32> to vector<4x96xf32>
    %155 = arith.index_cast %c3_i32 : i32 to index
    %c0_60 = arith.constant 0 : index
    %c0_61 = arith.constant 0 : index
    %156 = vector.load %arg1[%155, %c0_60, %c0_61] : memref<16x4x32xf32, #tpu.memory_space<vmem>>, vector<1x4x32xf32>
    %157 = vector.shape_cast %156 : vector<1x4x32xf32> to vector<4x32xf32>
    %158 = arith.truncf %151 : vector<4x32xf32> to vector<4x32xbf16>
    %cst_62 = arith.constant dense<0.000000e+00> : vector<4x96xf32>
    %159 = tpu.matmul %158, %2, %cst_62 {dimension_numbers = #tpu.dot_dimension_numbers<[1], [0], [0], [1], [0, 0, 1, 1], [], []>} : vector<4x32xbf16>, vector<32x96xbf16>, vector<4x96xf32> -> vector<4x96xf32>
    %160 = vector.broadcast %3 : vector<1x96xf32> to vector<4x96xf32>
    %161 = arith.addf %159, %160 : vector<4x96xf32>
    %162 = vector.extract_strided_slice %154 {offsets = [0, 0], sizes = [4, 32], strides = [1, 1]} : vector<4x96xf32> to vector<4x32xf32>
    %163 = vector.extract_strided_slice %161 {offsets = [0, 0], sizes = [4, 32], strides = [1, 1]} : vector<4x96xf32> to vector<4x32xf32>
    %164 = arith.addf %162, %163 : vector<4x32xf32>
    %165 = arith.negf %164 : vector<4x32xf32>
    %166 = math.exp %165 : vector<4x32xf32>
    %cst_63 = arith.constant 1.000000e+00 : f32
    %167 = vector.broadcast %cst_63 : f32 to vector<4x32xf32>
    %168 = arith.addf %167, %166 : vector<4x32xf32>
    %169 = arith.divf %167, %168 : vector<4x32xf32>
    %170 = vector.extract_strided_slice %154 {offsets = [0, 32], sizes = [4, 32], strides = [1, 1]} : vector<4x96xf32> to vector<4x32xf32>
    %171 = vector.extract_strided_slice %161 {offsets = [0, 32], sizes = [4, 32], strides = [1, 1]} : vector<4x96xf32> to vector<4x32xf32>
    %172 = arith.addf %170, %171 : vector<4x32xf32>
    %173 = arith.negf %172 : vector<4x32xf32>
    %174 = math.exp %173 : vector<4x32xf32>
    %cst_64 = arith.constant 1.000000e+00 : f32
    %175 = vector.broadcast %cst_64 : f32 to vector<4x32xf32>
    %176 = arith.addf %175, %174 : vector<4x32xf32>
    %177 = arith.divf %175, %176 : vector<4x32xf32>
    %178 = vector.extract_strided_slice %154 {offsets = [0, 64], sizes = [4, 32], strides = [1, 1]} : vector<4x96xf32> to vector<4x32xf32>
    %179 = vector.extract_strided_slice %161 {offsets = [0, 64], sizes = [4, 32], strides = [1, 1]} : vector<4x96xf32> to vector<4x32xf32>
    %180 = arith.mulf %169, %179 : vector<4x32xf32>
    %181 = arith.addf %178, %180 : vector<4x32xf32>
    %182 = math.tanh %181 : vector<4x32xf32>
    %cst_65 = arith.constant 1.000000e+00 : f32
    %183 = vector.broadcast %cst_65 : f32 to vector<4x32xf32>
    %184 = arith.subf %183, %177 : vector<4x32xf32>
    %185 = arith.mulf %184, %182 : vector<4x32xf32>
    %186 = arith.mulf %177, %151 : vector<4x32xf32>
    %187 = arith.addf %185, %186 : vector<4x32xf32>
    %cst_66 = arith.constant 0.000000e+00 : f32
    %188 = vector.broadcast %cst_66 : f32 to vector<4x32xf32>
    %189 = arith.cmpf ogt, %157, %188 : vector<4x32xf32>
    %190 = arith.select %189, %187, %151 : vector<4x32xi1>, vector<4x32xf32>
    %c0_67 = arith.constant 0 : index
    %c0_68 = arith.constant 0 : index
    %191 = vector.load %arg5[%c0_67, %c0_68] : memref<4x32xf32, #tpu.memory_space<vmem>>, vector<4x32xf32>
    tpu.vector_store %arg5[%c0_67, %c0_68], %190 {strides = array<i32>} : memref<4x32xf32, #tpu.memory_space<vmem>>, vector<4x32xf32>,
    %cst_69 = arith.constant 0.000000e+00 : f32
    %192 = vector.broadcast %cst_69 : f32 to vector<4x32xf32>
    %193 = arith.cmpf ogt, %157, %192 : vector<4x32xf32>
    %cst_70 = arith.constant 0.000000e+00 : f32
    %194 = vector.broadcast %cst_70 : f32 to vector<4x32xf32>
    %195 = arith.select %193, %187, %194 : vector<4x32xi1>, vector<4x32xf32>
    %196 = arith.index_cast %c3_i32 : i32 to index
    %c0_71 = arith.constant 0 : index
    %c0_72 = arith.constant 0 : index
    %197 = vector.load %arg4[%196, %c0_71, %c0_72] : memref<16x4x32xf32, #tpu.memory_space<vmem>>, vector<1x4x32xf32>
    %198 = vector.shape_cast %197 : vector<1x4x32xf32> to vector<4x32xf32>
    %199 = vector.shape_cast %195 : vector<4x32xf32> to vector<1x4x32xf32>
    tpu.vector_store %arg4[%196, %c0_71, %c0_72], %199 {strides = array<i32>} : memref<16x4x32xf32, #tpu.memory_space<vmem>>, vector<1x4x32xf32>,
    %c4_i32 = arith.constant 4 : i32
    %c0_73 = arith.constant 0 : index
    %c0_74 = arith.constant 0 : index
    %200 = vector.load %arg5[%c0_73, %c0_74] : memref<4x32xf32, #tpu.memory_space<vmem>>, vector<4x32xf32>
    %201 = arith.index_cast %c4_i32 : i32 to index
    %c0_75 = arith.constant 0 : index
    %c0_76 = arith.constant 0 : index
    %202 = vector.load %arg0[%201, %c0_75, %c0_76] : memref<16x4x96xf32, #tpu.memory_space<vmem>>, vector<1x4x96xf32>
    %203 = vector.shape_cast %202 : vector<1x4x96xf32> to vector<4x96xf32>
    %204 = arith.index_cast %c4_i32 : i32 to index
    %c0_77 = arith.constant 0 : index
    %c0_78 = arith.constant 0 : index
    %205 = vector.load %arg1[%204, %c0_77, %c0_78] : memref<16x4x32xf32, #tpu.memory_space<vmem>>, vector<1x4x32xf32>
    %206 = vector.shape_cast %205 : vector<1x4x32xf32> to vector<4x32xf32>
    %207 = arith.truncf %200 : vector<4x32xf32> to vector<4x32xbf16>
    %cst_79 = arith.constant dense<0.000000e+00> : vector<4x96xf32>
    %208 = tpu.matmul %207, %2, %cst_79 {dimension_numbers = #tpu.dot_dimension_numbers<[1], [0], [0], [1], [0, 0, 1, 1], [], []>} : vector<4x32xbf16>, vector<32x96xbf16>, vector<4x96xf32> -> vector<4x96xf32>
    %209 = vector.broadcast %3 : vector<1x96xf32> to vector<4x96xf32>
    %210 = arith.addf %208, %209 : vector<4x96xf32>
    %211 = vector.extract_strided_slice %203 {offsets = [0, 0], sizes = [4, 32], strides = [1, 1]} : vector<4x96xf32> to vector<4x32xf32>
    %212 = vector.extract_strided_slice %210 {offsets = [0, 0], sizes = [4, 32], strides = [1, 1]} : vector<4x96xf32> to vector<4x32xf32>
    %213 = arith.addf %211, %212 : vector<4x32xf32>
    %214 = arith.negf %213 : vector<4x32xf32>
    %215 = math.exp %214 : vector<4x32xf32>
    %cst_80 = arith.constant 1.000000e+00 : f32
    %216 = vector.broadcast %cst_80 : f32 to vector<4x32xf32>
    %217 = arith.addf %216, %215 : vector<4x32xf32>
    %218 = arith.divf %216, %217 : vector<4x32xf32>
    %219 = vector.extract_strided_slice %203 {offsets = [0, 32], sizes = [4, 32], strides = [1, 1]} : vector<4x96xf32> to vector<4x32xf32>
    %220 = vector.extract_strided_slice %210 {offsets = [0, 32], sizes = [4, 32], strides = [1, 1]} : vector<4x96xf32> to vector<4x32xf32>
    %221 = arith.addf %219, %220 : vector<4x32xf32>
    %222 = arith.negf %221 : vector<4x32xf32>
    %223 = math.exp %222 : vector<4x32xf32>
    %cst_81 = arith.constant 1.000000e+00 : f32
    %224 = vector.broadcast %cst_81 : f32 to vector<4x32xf32>
    %225 = arith.addf %224, %223 : vector<4x32xf32>
    %226 = arith.divf %224, %225 : vector<4x32xf32>
    %227 = vector.extract_strided_slice %203 {offsets = [0, 64], sizes = [4, 32], strides = [1, 1]} : vector<4x96xf32> to vector<4x32xf32>
    %228 = vector.extract_strided_slice %210 {offsets = [0, 64], sizes = [4, 32], strides = [1, 1]} : vector<4x96xf32> to vector<4x32xf32>
    %229 = arith.mulf %218, %228 : vector<4x32xf32>
    %230 = arith.addf %227, %229 : vector<4x32xf32>
    %231 = math.tanh %230 : vector<4x32xf32>
    %cst_82 = arith.constant 1.000000e+00 : f32
    %232 = vector.broadcast %cst_82 : f32 to vector<4x32xf32>
    %233 = arith.subf %232, %226 : vector<4x32xf32>
    %234 = arith.mulf %233, %231 : vector<4x32xf32>
    %235 = arith.mulf %226, %200 : vector<4x32xf32>
    %236 = arith.addf %234, %235 : vector<4x32xf32>
    %cst_83 = arith.constant 0.000000e+00 : f32
    %237 = vector.broadcast %cst_83 : f32 to vector<4x32xf32>
    %238 = arith.cmpf ogt, %206, %237 : vector<4x32xf32>
    %239 = arith.select %238, %236, %200 : vector<4x32xi1>, vector<4x32xf32>
    %c0_84 = arith.constant 0 : index
    %c0_85 = arith.constant 0 : index
    %240 = vector.load %arg5[%c0_84, %c0_85] : memref<4x32xf32, #tpu.memory_space<vmem>>, vector<4x32xf32>
    tpu.vector_store %arg5[%c0_84, %c0_85], %239 {strides = array<i32>} : memref<4x32xf32, #tpu.memory_space<vmem>>, vector<4x32xf32>,
    %cst_86 = arith.constant 0.000000e+00 : f32
    %241 = vector.broadcast %cst_86 : f32 to vector<4x32xf32>
    %242 = arith.cmpf ogt, %206, %241 : vector<4x32xf32>
    %cst_87 = arith.constant 0.000000e+00 : f32
    %243 = vector.broadcast %cst_87 : f32 to vector<4x32xf32>
    %244 = arith.select %242, %236, %243 : vector<4x32xi1>, vector<4x32xf32>
    %245 = arith.index_cast %c4_i32 : i32 to index
    %c0_88 = arith.constant 0 : index
    %c0_89 = arith.constant 0 : index
    %246 = vector.load %arg4[%245, %c0_88, %c0_89] : memref<16x4x32xf32, #tpu.memory_space<vmem>>, vector<1x4x32xf32>
    %247 = vector.shape_cast %246 : vector<1x4x32xf32> to vector<4x32xf32>
    %248 = vector.shape_cast %244 : vector<4x32xf32> to vector<1x4x32xf32>
    tpu.vector_store %arg4[%245, %c0_88, %c0_89], %248 {strides = array<i32>} : memref<16x4x32xf32, #tpu.memory_space<vmem>>, vector<1x4x32xf32>,
    %c5_i32 = arith.constant 5 : i32
    %c0_90 = arith.constant 0 : index
    %c0_91 = arith.constant 0 : index
    %249 = vector.load %arg5[%c0_90, %c0_91] : memref<4x32xf32, #tpu.memory_space<vmem>>, vector<4x32xf32>
    %250 = arith.index_cast %c5_i32 : i32 to index
    %c0_92 = arith.constant 0 : index
    %c0_93 = arith.constant 0 : index
    %251 = vector.load %arg0[%250, %c0_92, %c0_93] : memref<16x4x96xf32, #tpu.memory_space<vmem>>, vector<1x4x96xf32>
    %252 = vector.shape_cast %251 : vector<1x4x96xf32> to vector<4x96xf32>
    %253 = arith.index_cast %c5_i32 : i32 to index
    %c0_94 = arith.constant 0 : index
    %c0_95 = arith.constant 0 : index
    %254 = vector.load %arg1[%253, %c0_94, %c0_95] : memref<16x4x32xf32, #tpu.memory_space<vmem>>, vector<1x4x32xf32>
    %255 = vector.shape_cast %254 : vector<1x4x32xf32> to vector<4x32xf32>
    %256 = arith.truncf %249 : vector<4x32xf32> to vector<4x32xbf16>
    %cst_96 = arith.constant dense<0.000000e+00> : vector<4x96xf32>
    %257 = tpu.matmul %256, %2, %cst_96 {dimension_numbers = #tpu.dot_dimension_numbers<[1], [0], [0], [1], [0, 0, 1, 1], [], []>} : vector<4x32xbf16>, vector<32x96xbf16>, vector<4x96xf32> -> vector<4x96xf32>
    %258 = vector.broadcast %3 : vector<1x96xf32> to vector<4x96xf32>
    %259 = arith.addf %257, %258 : vector<4x96xf32>
    %260 = vector.extract_strided_slice %252 {offsets = [0, 0], sizes = [4, 32], strides = [1, 1]} : vector<4x96xf32> to vector<4x32xf32>
    %261 = vector.extract_strided_slice %259 {offsets = [0, 0], sizes = [4, 32], strides = [1, 1]} : vector<4x96xf32> to vector<4x32xf32>
    %262 = arith.addf %260, %261 : vector<4x32xf32>
    %263 = arith.negf %262 : vector<4x32xf32>
    %264 = math.exp %263 : vector<4x32xf32>
    %cst_97 = arith.constant 1.000000e+00 : f32
    %265 = vector.broadcast %cst_97 : f32 to vector<4x32xf32>
    %266 = arith.addf %265, %264 : vector<4x32xf32>
    %267 = arith.divf %265, %266 : vector<4x32xf32>
    %268 = vector.extract_strided_slice %252 {offsets = [0, 32], sizes = [4, 32], strides = [1, 1]} : vector<4x96xf32> to vector<4x32xf32>
    %269 = vector.extract_strided_slice %259 {offsets = [0, 32], sizes = [4, 32], strides = [1, 1]} : vector<4x96xf32> to vector<4x32xf32>
    %270 = arith.addf %268, %269 : vector<4x32xf32>
    %271 = arith.negf %270 : vector<4x32xf32>
    %272 = math.exp %271 : vector<4x32xf32>
    %cst_98 = arith.constant 1.000000e+00 : f32
    %273 = vector.broadcast %cst_98 : f32 to vector<4x32xf32>
    %274 = arith.addf %273, %272 : vector<4x32xf32>
    %275 = arith.divf %273, %274 : vector<4x32xf32>
    %276 = vector.extract_strided_slice %252 {offsets = [0, 64], sizes = [4, 32], strides = [1, 1]} : vector<4x96xf32> to vector<4x32xf32>
    %277 = vector.extract_strided_slice %259 {offsets = [0, 64], sizes = [4, 32], strides = [1, 1]} : vector<4x96xf32> to vector<4x32xf32>
    %278 = arith.mulf %267, %277 : vector<4x32xf32>
    %279 = arith.addf %276, %278 : vector<4x32xf32>
    %280 = math.tanh %279 : vector<4x32xf32>
    %cst_99 = arith.constant 1.000000e+00 : f32
    %281 = vector.broadcast %cst_99 : f32 to vector<4x32xf32>
    %282 = arith.subf %281, %275 : vector<4x32xf32>
    %283 = arith.mulf %282, %280 : vector<4x32xf32>
    %284 = arith.mulf %275, %249 : vector<4x32xf32>
    %285 = arith.addf %283, %284 : vector<4x32xf32>
    %cst_100 = arith.constant 0.000000e+00 : f32
    %286 = vector.broadcast %cst_100 : f32 to vector<4x32xf32>
    %287 = arith.cmpf ogt, %255, %286 : vector<4x32xf32>
    %288 = arith.select %287, %285, %249 : vector<4x32xi1>, vector<4x32xf32>
    %c0_101 = arith.constant 0 : index
    %c0_102 = arith.constant 0 : index
    %289 = vector.load %arg5[%c0_101, %c0_102] : memref<4x32xf32, #tpu.memory_space<vmem>>, vector<4x32xf32>
    tpu.vector_store %arg5[%c0_101, %c0_102], %288 {strides = array<i32>} : memref<4x32xf32, #tpu.memory_space<vmem>>, vector<4x32xf32>,
    %cst_103 = arith.constant 0.000000e+00 : f32
    %290 = vector.broadcast %cst_103 : f32 to vector<4x32xf32>
    %291 = arith.cmpf ogt, %255, %290 : vector<4x32xf32>
    %cst_104 = arith.constant 0.000000e+00 : f32
    %292 = vector.broadcast %cst_104 : f32 to vector<4x32xf32>
    %293 = arith.select %291, %285, %292 : vector<4x32xi1>, vector<4x32xf32>
    %294 = arith.index_cast %c5_i32 : i32 to index
    %c0_105 = arith.constant 0 : index
    %c0_106 = arith.constant 0 : index
    %295 = vector.load %arg4[%294, %c0_105, %c0_106] : memref<16x4x32xf32, #tpu.memory_space<vmem>>, vector<1x4x32xf32>
    %296 = vector.shape_cast %295 : vector<1x4x32xf32> to vector<4x32xf32>
    %297 = vector.shape_cast %293 : vector<4x32xf32> to vector<1x4x32xf32>
    tpu.vector_store %arg4[%294, %c0_105, %c0_106], %297 {strides = array<i32>} : memref<16x4x32xf32, #tpu.memory_space<vmem>>, vector<1x4x32xf32>,
    %c6_i32 = arith.constant 6 : i32
    %c0_107 = arith.constant 0 : index
    %c0_108 = arith.constant 0 : index
    %298 = vector.load %arg5[%c0_107, %c0_108] : memref<4x32xf32, #tpu.memory_space<vmem>>, vector<4x32xf32>
    %299 = arith.index_cast %c6_i32 : i32 to index
    %c0_109 = arith.constant 0 : index
    %c0_110 = arith.constant 0 : index
    %300 = vector.load %arg0[%299, %c0_109, %c0_110] : memref<16x4x96xf32, #tpu.memory_space<vmem>>, vector<1x4x96xf32>
    %301 = vector.shape_cast %300 : vector<1x4x96xf32> to vector<4x96xf32>
    %302 = arith.index_cast %c6_i32 : i32 to index
    %c0_111 = arith.constant 0 : index
    %c0_112 = arith.constant 0 : index
    %303 = vector.load %arg1[%302, %c0_111, %c0_112] : memref<16x4x32xf32, #tpu.memory_space<vmem>>, vector<1x4x32xf32>
    %304 = vector.shape_cast %303 : vector<1x4x32xf32> to vector<4x32xf32>
    %305 = arith.truncf %298 : vector<4x32xf32> to vector<4x32xbf16>
    %cst_113 = arith.constant dense<0.000000e+00> : vector<4x96xf32>
    %306 = tpu.matmul %305, %2, %cst_113 {dimension_numbers = #tpu.dot_dimension_numbers<[1], [0], [0], [1], [0, 0, 1, 1], [], []>} : vector<4x32xbf16>, vector<32x96xbf16>, vector<4x96xf32> -> vector<4x96xf32>
    %307 = vector.broadcast %3 : vector<1x96xf32> to vector<4x96xf32>
    %308 = arith.addf %306, %307 : vector<4x96xf32>
    %309 = vector.extract_strided_slice %301 {offsets = [0, 0], sizes = [4, 32], strides = [1, 1]} : vector<4x96xf32> to vector<4x32xf32>
    %310 = vector.extract_strided_slice %308 {offsets = [0, 0], sizes = [4, 32], strides = [1, 1]} : vector<4x96xf32> to vector<4x32xf32>
    %311 = arith.addf %309, %310 : vector<4x32xf32>
    %312 = arith.negf %311 : vector<4x32xf32>
    %313 = math.exp %312 : vector<4x32xf32>
    %cst_114 = arith.constant 1.000000e+00 : f32
    %314 = vector.broadcast %cst_114 : f32 to vector<4x32xf32>
    %315 = arith.addf %314, %313 : vector<4x32xf32>
    %316 = arith.divf %314, %315 : vector<4x32xf32>
    %317 = vector.extract_strided_slice %301 {offsets = [0, 32], sizes = [4, 32], strides = [1, 1]} : vector<4x96xf32> to vector<4x32xf32>
    %318 = vector.extract_strided_slice %308 {offsets = [0, 32], sizes = [4, 32], strides = [1, 1]} : vector<4x96xf32> to vector<4x32xf32>
    %319 = arith.addf %317, %318 : vector<4x32xf32>
    %320 = arith.negf %319 : vector<4x32xf32>
    %321 = math.exp %320 : vector<4x32xf32>
    %cst_115 = arith.constant 1.000000e+00 : f32
    %322 = vector.broadcast %cst_115 : f32 to vector<4x32xf32>
    %323 = arith.addf %322, %321 : vector<4x32xf32>
    %324 = arith.divf %322, %323 : vector<4x32xf32>
    %325 = vector.extract_strided_slice %301 {offsets = [0, 64], sizes = [4, 32], strides = [1, 1]} : vector<4x96xf32> to vector<4x32xf32>
    %326 = vector.extract_strided_slice %308 {offsets = [0, 64], sizes = [4, 32], strides = [1, 1]} : vector<4x96xf32> to vector<4x32xf32>
    %327 = arith.mulf %316, %326 : vector<4x32xf32>
    %328 = arith.addf %325, %327 : vector<4x32xf32>
    %329 = math.tanh %328 : vector<4x32xf32>
    %cst_116 = arith.constant 1.000000e+00 : f32
    %330 = vector.broadcast %cst_116 : f32 to vector<4x32xf32>
    %331 = arith.subf %330, %324 : vector<4x32xf32>
    %332 = arith.mulf %331, %329 : vector<4x32xf32>
    %333 = arith.mulf %324, %298 : vector<4x32xf32>
    %334 = arith.addf %332, %333 : vector<4x32xf32>
    %cst_117 = arith.constant 0.000000e+00 : f32
    %335 = vector.broadcast %cst_117 : f32 to vector<4x32xf32>
    %336 = arith.cmpf ogt, %304, %335 : vector<4x32xf32>
    %337 = arith.select %336, %334, %298 : vector<4x32xi1>, vector<4x32xf32>
    %c0_118 = arith.constant 0 : index
    %c0_119 = arith.constant 0 : index
    %338 = vector.load %arg5[%c0_118, %c0_119] : memref<4x32xf32, #tpu.memory_space<vmem>>, vector<4x32xf32>
    tpu.vector_store %arg5[%c0_118, %c0_119], %337 {strides = array<i32>} : memref<4x32xf32, #tpu.memory_space<vmem>>, vector<4x32xf32>,
    %cst_120 = arith.constant 0.000000e+00 : f32
    %339 = vector.broadcast %cst_120 : f32 to vector<4x32xf32>
    %340 = arith.cmpf ogt, %304, %339 : vector<4x32xf32>
    %cst_121 = arith.constant 0.000000e+00 : f32
    %341 = vector.broadcast %cst_121 : f32 to vector<4x32xf32>
    %342 = arith.select %340, %334, %341 : vector<4x32xi1>, vector<4x32xf32>
    %343 = arith.index_cast %c6_i32 : i32 to index
    %c0_122 = arith.constant 0 : index
    %c0_123 = arith.constant 0 : index
    %344 = vector.load %arg4[%343, %c0_122, %c0_123] : memref<16x4x32xf32, #tpu.memory_space<vmem>>, vector<1x4x32xf32>
    %345 = vector.shape_cast %344 : vector<1x4x32xf32> to vector<4x32xf32>
    %346 = vector.shape_cast %342 : vector<4x32xf32> to vector<1x4x32xf32>
    tpu.vector_store %arg4[%343, %c0_122, %c0_123], %346 {strides = array<i32>} : memref<16x4x32xf32, #tpu.memory_space<vmem>>, vector<1x4x32xf32>,
    %c7_i32 = arith.constant 7 : i32
    %c0_124 = arith.constant 0 : index
    %c0_125 = arith.constant 0 : index
    %347 = vector.load %arg5[%c0_124, %c0_125] : memref<4x32xf32, #tpu.memory_space<vmem>>, vector<4x32xf32>
    %348 = arith.index_cast %c7_i32 : i32 to index
    %c0_126 = arith.constant 0 : index
    %c0_127 = arith.constant 0 : index
    %349 = vector.load %arg0[%348, %c0_126, %c0_127] : memref<16x4x96xf32, #tpu.memory_space<vmem>>, vector<1x4x96xf32>
    %350 = vector.shape_cast %349 : vector<1x4x96xf32> to vector<4x96xf32>
    %351 = arith.index_cast %c7_i32 : i32 to index
    %c0_128 = arith.constant 0 : index
    %c0_129 = arith.constant 0 : index
    %352 = vector.load %arg1[%351, %c0_128, %c0_129] : memref<16x4x32xf32, #tpu.memory_space<vmem>>, vector<1x4x32xf32>
    %353 = vector.shape_cast %352 : vector<1x4x32xf32> to vector<4x32xf32>
    %354 = arith.truncf %347 : vector<4x32xf32> to vector<4x32xbf16>
    %cst_130 = arith.constant dense<0.000000e+00> : vector<4x96xf32>
    %355 = tpu.matmul %354, %2, %cst_130 {dimension_numbers = #tpu.dot_dimension_numbers<[1], [0], [0], [1], [0, 0, 1, 1], [], []>} : vector<4x32xbf16>, vector<32x96xbf16>, vector<4x96xf32> -> vector<4x96xf32>
    %356 = vector.broadcast %3 : vector<1x96xf32> to vector<4x96xf32>
    %357 = arith.addf %355, %356 : vector<4x96xf32>
    %358 = vector.extract_strided_slice %350 {offsets = [0, 0], sizes = [4, 32], strides = [1, 1]} : vector<4x96xf32> to vector<4x32xf32>
    %359 = vector.extract_strided_slice %357 {offsets = [0, 0], sizes = [4, 32], strides = [1, 1]} : vector<4x96xf32> to vector<4x32xf32>
    %360 = arith.addf %358, %359 : vector<4x32xf32>
    %361 = arith.negf %360 : vector<4x32xf32>
    %362 = math.exp %361 : vector<4x32xf32>
    %cst_131 = arith.constant 1.000000e+00 : f32
    %363 = vector.broadcast %cst_131 : f32 to vector<4x32xf32>
    %364 = arith.addf %363, %362 : vector<4x32xf32>
    %365 = arith.divf %363, %364 : vector<4x32xf32>
    %366 = vector.extract_strided_slice %350 {offsets = [0, 32], sizes = [4, 32], strides = [1, 1]} : vector<4x96xf32> to vector<4x32xf32>
    %367 = vector.extract_strided_slice %357 {offsets = [0, 32], sizes = [4, 32], strides = [1, 1]} : vector<4x96xf32> to vector<4x32xf32>
    %368 = arith.addf %366, %367 : vector<4x32xf32>
    %369 = arith.negf %368 : vector<4x32xf32>
    %370 = math.exp %369 : vector<4x32xf32>
    %cst_132 = arith.constant 1.000000e+00 : f32
    %371 = vector.broadcast %cst_132 : f32 to vector<4x32xf32>
    %372 = arith.addf %371, %370 : vector<4x32xf32>
    %373 = arith.divf %371, %372 : vector<4x32xf32>
    %374 = vector.extract_strided_slice %350 {offsets = [0, 64], sizes = [4, 32], strides = [1, 1]} : vector<4x96xf32> to vector<4x32xf32>
    %375 = vector.extract_strided_slice %357 {offsets = [0, 64], sizes = [4, 32], strides = [1, 1]} : vector<4x96xf32> to vector<4x32xf32>
    %376 = arith.mulf %365, %375 : vector<4x32xf32>
    %377 = arith.addf %374, %376 : vector<4x32xf32>
    %378 = math.tanh %377 : vector<4x32xf32>
    %cst_133 = arith.constant 1.000000e+00 : f32
    %379 = vector.broadcast %cst_133 : f32 to vector<4x32xf32>
    %380 = arith.subf %379, %373 : vector<4x32xf32>
    %381 = arith.mulf %380, %378 : vector<4x32xf32>
    %382 = arith.mulf %373, %347 : vector<4x32xf32>
    %383 = arith.addf %381, %382 : vector<4x32xf32>
    %cst_134 = arith.constant 0.000000e+00 : f32
    %384 = vector.broadcast %cst_134 : f32 to vector<4x32xf32>
    %385 = arith.cmpf ogt, %353, %384 : vector<4x32xf32>
    %386 = arith.select %385, %383, %347 : vector<4x32xi1>, vector<4x32xf32>
    %c0_135 = arith.constant 0 : index
    %c0_136 = arith.constant 0 : index
    %387 = vector.load %arg5[%c0_135, %c0_136] : memref<4x32xf32, #tpu.memory_space<vmem>>, vector<4x32xf32>
    tpu.vector_store %arg5[%c0_135, %c0_136], %386 {strides = array<i32>} : memref<4x32xf32, #tpu.memory_space<vmem>>, vector<4x32xf32>,
    %cst_137 = arith.constant 0.000000e+00 : f32
    %388 = vector.broadcast %cst_137 : f32 to vector<4x32xf32>
    %389 = arith.cmpf ogt, %353, %388 : vector<4x32xf32>
    %cst_138 = arith.constant 0.000000e+00 : f32
    %390 = vector.broadcast %cst_138 : f32 to vector<4x32xf32>
    %391 = arith.select %389, %383, %390 : vector<4x32xi1>, vector<4x32xf32>
    %392 = arith.index_cast %c7_i32 : i32 to index
    %c0_139 = arith.constant 0 : index
    %c0_140 = arith.constant 0 : index
    %393 = vector.load %arg4[%392, %c0_139, %c0_140] : memref<16x4x32xf32, #tpu.memory_space<vmem>>, vector<1x4x32xf32>
    %394 = vector.shape_cast %393 : vector<1x4x32xf32> to vector<4x32xf32>
    %395 = vector.shape_cast %391 : vector<4x32xf32> to vector<1x4x32xf32>
    tpu.vector_store %arg4[%392, %c0_139, %c0_140], %395 {strides = array<i32>} : memref<16x4x32xf32, #tpu.memory_space<vmem>>, vector<1x4x32xf32>,
    %c8_i32 = arith.constant 8 : i32
    %c0_141 = arith.constant 0 : index
    %c0_142 = arith.constant 0 : index
    %396 = vector.load %arg5[%c0_141, %c0_142] : memref<4x32xf32, #tpu.memory_space<vmem>>, vector<4x32xf32>
    %397 = arith.index_cast %c8_i32 : i32 to index
    %c0_143 = arith.constant 0 : index
    %c0_144 = arith.constant 0 : index
    %398 = vector.load %arg0[%397, %c0_143, %c0_144] : memref<16x4x96xf32, #tpu.memory_space<vmem>>, vector<1x4x96xf32>
    %399 = vector.shape_cast %398 : vector<1x4x96xf32> to vector<4x96xf32>
    %400 = arith.index_cast %c8_i32 : i32 to index
    %c0_145 = arith.constant 0 : index
    %c0_146 = arith.constant 0 : index
    %401 = vector.load %arg1[%400, %c0_145, %c0_146] : memref<16x4x32xf32, #tpu.memory_space<vmem>>, vector<1x4x32xf32>
    %402 = vector.shape_cast %401 : vector<1x4x32xf32> to vector<4x32xf32>
    %403 = arith.truncf %396 : vector<4x32xf32> to vector<4x32xbf16>
    %cst_147 = arith.constant dense<0.000000e+00> : vector<4x96xf32>
    %404 = tpu.matmul %403, %2, %cst_147 {dimension_numbers = #tpu.dot_dimension_numbers<[1], [0], [0], [1], [0, 0, 1, 1], [], []>} : vector<4x32xbf16>, vector<32x96xbf16>, vector<4x96xf32> -> vector<4x96xf32>
    %405 = vector.broadcast %3 : vector<1x96xf32> to vector<4x96xf32>
    %406 = arith.addf %404, %405 : vector<4x96xf32>
    %407 = vector.extract_strided_slice %399 {offsets = [0, 0], sizes = [4, 32], strides = [1, 1]} : vector<4x96xf32> to vector<4x32xf32>
    %408 = vector.extract_strided_slice %406 {offsets = [0, 0], sizes = [4, 32], strides = [1, 1]} : vector<4x96xf32> to vector<4x32xf32>
    %409 = arith.addf %407, %408 : vector<4x32xf32>
    %410 = arith.negf %409 : vector<4x32xf32>
    %411 = math.exp %410 : vector<4x32xf32>
    %cst_148 = arith.constant 1.000000e+00 : f32
    %412 = vector.broadcast %cst_148 : f32 to vector<4x32xf32>
    %413 = arith.addf %412, %411 : vector<4x32xf32>
    %414 = arith.divf %412, %413 : vector<4x32xf32>
    %415 = vector.extract_strided_slice %399 {offsets = [0, 32], sizes = [4, 32], strides = [1, 1]} : vector<4x96xf32> to vector<4x32xf32>
    %416 = vector.extract_strided_slice %406 {offsets = [0, 32], sizes = [4, 32], strides = [1, 1]} : vector<4x96xf32> to vector<4x32xf32>
    %417 = arith.addf %415, %416 : vector<4x32xf32>
    %418 = arith.negf %417 : vector<4x32xf32>
    %419 = math.exp %418 : vector<4x32xf32>
    %cst_149 = arith.constant 1.000000e+00 : f32
    %420 = vector.broadcast %cst_149 : f32 to vector<4x32xf32>
    %421 = arith.addf %420, %419 : vector<4x32xf32>
    %422 = arith.divf %420, %421 : vector<4x32xf32>
    %423 = vector.extract_strided_slice %399 {offsets = [0, 64], sizes = [4, 32], strides = [1, 1]} : vector<4x96xf32> to vector<4x32xf32>
    %424 = vector.extract_strided_slice %406 {offsets = [0, 64], sizes = [4, 32], strides = [1, 1]} : vector<4x96xf32> to vector<4x32xf32>
    %425 = arith.mulf %414, %424 : vector<4x32xf32>
    %426 = arith.addf %423, %425 : vector<4x32xf32>
    %427 = math.tanh %426 : vector<4x32xf32>
    %cst_150 = arith.constant 1.000000e+00 : f32
    %428 = vector.broadcast %cst_150 : f32 to vector<4x32xf32>
    %429 = arith.subf %428, %422 : vector<4x32xf32>
    %430 = arith.mulf %429, %427 : vector<4x32xf32>
    %431 = arith.mulf %422, %396 : vector<4x32xf32>
    %432 = arith.addf %430, %431 : vector<4x32xf32>
    %cst_151 = arith.constant 0.000000e+00 : f32
    %433 = vector.broadcast %cst_151 : f32 to vector<4x32xf32>
    %434 = arith.cmpf ogt, %402, %433 : vector<4x32xf32>
    %435 = arith.select %434, %432, %396 : vector<4x32xi1>, vector<4x32xf32>
    %c0_152 = arith.constant 0 : index
    %c0_153 = arith.constant 0 : index
    %436 = vector.load %arg5[%c0_152, %c0_153] : memref<4x32xf32, #tpu.memory_space<vmem>>, vector<4x32xf32>
    tpu.vector_store %arg5[%c0_152, %c0_153], %435 {strides = array<i32>} : memref<4x32xf32, #tpu.memory_space<vmem>>, vector<4x32xf32>,
    %cst_154 = arith.constant 0.000000e+00 : f32
    %437 = vector.broadcast %cst_154 : f32 to vector<4x32xf32>
    %438 = arith.cmpf ogt, %402, %437 : vector<4x32xf32>
    %cst_155 = arith.constant 0.000000e+00 : f32
    %439 = vector.broadcast %cst_155 : f32 to vector<4x32xf32>
    %440 = arith.select %438, %432, %439 : vector<4x32xi1>, vector<4x32xf32>
    %441 = arith.index_cast %c8_i32 : i32 to index
    %c0_156 = arith.constant 0 : index
    %c0_157 = arith.constant 0 : index
    %442 = vector.load %arg4[%441, %c0_156, %c0_157] : memref<16x4x32xf32, #tpu.memory_space<vmem>>, vector<1x4x32xf32>
    %443 = vector.shape_cast %442 : vector<1x4x32xf32> to vector<4x32xf32>
    %444 = vector.shape_cast %440 : vector<4x32xf32> to vector<1x4x32xf32>
    tpu.vector_store %arg4[%441, %c0_156, %c0_157], %444 {strides = array<i32>} : memref<16x4x32xf32, #tpu.memory_space<vmem>>, vector<1x4x32xf32>,
    %c9_i32 = arith.constant 9 : i32
    %c0_158 = arith.constant 0 : index
    %c0_159 = arith.constant 0 : index
    %445 = vector.load %arg5[%c0_158, %c0_159] : memref<4x32xf32, #tpu.memory_space<vmem>>, vector<4x32xf32>
    %446 = arith.index_cast %c9_i32 : i32 to index
    %c0_160 = arith.constant 0 : index
    %c0_161 = arith.constant 0 : index
    %447 = vector.load %arg0[%446, %c0_160, %c0_161] : memref<16x4x96xf32, #tpu.memory_space<vmem>>, vector<1x4x96xf32>
    %448 = vector.shape_cast %447 : vector<1x4x96xf32> to vector<4x96xf32>
    %449 = arith.index_cast %c9_i32 : i32 to index
    %c0_162 = arith.constant 0 : index
    %c0_163 = arith.constant 0 : index
    %450 = vector.load %arg1[%449, %c0_162, %c0_163] : memref<16x4x32xf32, #tpu.memory_space<vmem>>, vector<1x4x32xf32>
    %451 = vector.shape_cast %450 : vector<1x4x32xf32> to vector<4x32xf32>
    %452 = arith.truncf %445 : vector<4x32xf32> to vector<4x32xbf16>
    %cst_164 = arith.constant dense<0.000000e+00> : vector<4x96xf32>
    %453 = tpu.matmul %452, %2, %cst_164 {dimension_numbers = #tpu.dot_dimension_numbers<[1], [0], [0], [1], [0, 0, 1, 1], [], []>} : vector<4x32xbf16>, vector<32x96xbf16>, vector<4x96xf32> -> vector<4x96xf32>
    %454 = vector.broadcast %3 : vector<1x96xf32> to vector<4x96xf32>
    %455 = arith.addf %453, %454 : vector<4x96xf32>
    %456 = vector.extract_strided_slice %448 {offsets = [0, 0], sizes = [4, 32], strides = [1, 1]} : vector<4x96xf32> to vector<4x32xf32>
    %457 = vector.extract_strided_slice %455 {offsets = [0, 0], sizes = [4, 32], strides = [1, 1]} : vector<4x96xf32> to vector<4x32xf32>
    %458 = arith.addf %456, %457 : vector<4x32xf32>
    %459 = arith.negf %458 : vector<4x32xf32>
    %460 = math.exp %459 : vector<4x32xf32>
    %cst_165 = arith.constant 1.000000e+00 : f32
    %461 = vector.broadcast %cst_165 : f32 to vector<4x32xf32>
    %462 = arith.addf %461, %460 : vector<4x32xf32>
    %463 = arith.divf %461, %462 : vector<4x32xf32>
    %464 = vector.extract_strided_slice %448 {offsets = [0, 32], sizes = [4, 32], strides = [1, 1]} : vector<4x96xf32> to vector<4x32xf32>
    %465 = vector.extract_strided_slice %455 {offsets = [0, 32], sizes = [4, 32], strides = [1, 1]} : vector<4x96xf32> to vector<4x32xf32>
    %466 = arith.addf %464, %465 : vector<4x32xf32>
    %467 = arith.negf %466 : vector<4x32xf32>
    %468 = math.exp %467 : vector<4x32xf32>
    %cst_166 = arith.constant 1.000000e+00 : f32
    %469 = vector.broadcast %cst_166 : f32 to vector<4x32xf32>
    %470 = arith.addf %469, %468 : vector<4x32xf32>
    %471 = arith.divf %469, %470 : vector<4x32xf32>
    %472 = vector.extract_strided_slice %448 {offsets = [0, 64], sizes = [4, 32], strides = [1, 1]} : vector<4x96xf32> to vector<4x32xf32>
    %473 = vector.extract_strided_slice %455 {offsets = [0, 64], sizes = [4, 32], strides = [1, 1]} : vector<4x96xf32> to vector<4x32xf32>
    %474 = arith.mulf %463, %473 : vector<4x32xf32>
    %475 = arith.addf %472, %474 : vector<4x32xf32>
    %476 = math.tanh %475 : vector<4x32xf32>
    %cst_167 = arith.constant 1.000000e+00 : f32
    %477 = vector.broadcast %cst_167 : f32 to vector<4x32xf32>
    %478 = arith.subf %477, %471 : vector<4x32xf32>
    %479 = arith.mulf %478, %476 : vector<4x32xf32>
    %480 = arith.mulf %471, %445 : vector<4x32xf32>
    %481 = arith.addf %479, %480 : vector<4x32xf32>
    %cst_168 = arith.constant 0.000000e+00 : f32
    %482 = vector.broadcast %cst_168 : f32 to vector<4x32xf32>
    %483 = arith.cmpf ogt, %451, %482 : vector<4x32xf32>
    %484 = arith.select %483, %481, %445 : vector<4x32xi1>, vector<4x32xf32>
    %c0_169 = arith.constant 0 : index
    %c0_170 = arith.constant 0 : index
    %485 = vector.load %arg5[%c0_169, %c0_170] : memref<4x32xf32, #tpu.memory_space<vmem>>, vector<4x32xf32>
    tpu.vector_store %arg5[%c0_169, %c0_170], %484 {strides = array<i32>} : memref<4x32xf32, #tpu.memory_space<vmem>>, vector<4x32xf32>,
    %cst_171 = arith.constant 0.000000e+00 : f32
    %486 = vector.broadcast %cst_171 : f32 to vector<4x32xf32>
    %487 = arith.cmpf ogt, %451, %486 : vector<4x32xf32>
    %cst_172 = arith.constant 0.000000e+00 : f32
    %488 = vector.broadcast %cst_172 : f32 to vector<4x32xf32>
    %489 = arith.select %487, %481, %488 : vector<4x32xi1>, vector<4x32xf32>
    %490 = arith.index_cast %c9_i32 : i32 to index
    %c0_173 = arith.constant 0 : index
    %c0_174 = arith.constant 0 : index
    %491 = vector.load %arg4[%490, %c0_173, %c0_174] : memref<16x4x32xf32, #tpu.memory_space<vmem>>, vector<1x4x32xf32>
    %492 = vector.shape_cast %491 : vector<1x4x32xf32> to vector<4x32xf32>
    %493 = vector.shape_cast %489 : vector<4x32xf32> to vector<1x4x32xf32>
    tpu.vector_store %arg4[%490, %c0_173, %c0_174], %493 {strides = array<i32>} : memref<16x4x32xf32, #tpu.memory_space<vmem>>, vector<1x4x32xf32>,
    %c10_i32 = arith.constant 10 : i32
    %c0_175 = arith.constant 0 : index
    %c0_176 = arith.constant 0 : index
    %494 = vector.load %arg5[%c0_175, %c0_176] : memref<4x32xf32, #tpu.memory_space<vmem>>, vector<4x32xf32>
    %495 = arith.index_cast %c10_i32 : i32 to index
    %c0_177 = arith.constant 0 : index
    %c0_178 = arith.constant 0 : index
    %496 = vector.load %arg0[%495, %c0_177, %c0_178] : memref<16x4x96xf32, #tpu.memory_space<vmem>>, vector<1x4x96xf32>
    %497 = vector.shape_cast %496 : vector<1x4x96xf32> to vector<4x96xf32>
    %498 = arith.index_cast %c10_i32 : i32 to index
    %c0_179 = arith.constant 0 : index
    %c0_180 = arith.constant 0 : index
    %499 = vector.load %arg1[%498, %c0_179, %c0_180] : memref<16x4x32xf32, #tpu.memory_space<vmem>>, vector<1x4x32xf32>
    %500 = vector.shape_cast %499 : vector<1x4x32xf32> to vector<4x32xf32>
    %501 = arith.truncf %494 : vector<4x32xf32> to vector<4x32xbf16>
    %cst_181 = arith.constant dense<0.000000e+00> : vector<4x96xf32>
    %502 = tpu.matmul %501, %2, %cst_181 {dimension_numbers = #tpu.dot_dimension_numbers<[1], [0], [0], [1], [0, 0, 1, 1], [], []>} : vector<4x32xbf16>, vector<32x96xbf16>, vector<4x96xf32> -> vector<4x96xf32>
    %503 = vector.broadcast %3 : vector<1x96xf32> to vector<4x96xf32>
    %504 = arith.addf %502, %503 : vector<4x96xf32>
    %505 = vector.extract_strided_slice %497 {offsets = [0, 0], sizes = [4, 32], strides = [1, 1]} : vector<4x96xf32> to vector<4x32xf32>
    %506 = vector.extract_strided_slice %504 {offsets = [0, 0], sizes = [4, 32], strides = [1, 1]} : vector<4x96xf32> to vector<4x32xf32>
    %507 = arith.addf %505, %506 : vector<4x32xf32>
    %508 = arith.negf %507 : vector<4x32xf32>
    %509 = math.exp %508 : vector<4x32xf32>
    %cst_182 = arith.constant 1.000000e+00 : f32
    %510 = vector.broadcast %cst_182 : f32 to vector<4x32xf32>
    %511 = arith.addf %510, %509 : vector<4x32xf32>
    %512 = arith.divf %510, %511 : vector<4x32xf32>
    %513 = vector.extract_strided_slice %497 {offsets = [0, 32], sizes = [4, 32], strides = [1, 1]} : vector<4x96xf32> to vector<4x32xf32>
    %514 = vector.extract_strided_slice %504 {offsets = [0, 32], sizes = [4, 32], strides = [1, 1]} : vector<4x96xf32> to vector<4x32xf32>
    %515 = arith.addf %513, %514 : vector<4x32xf32>
    %516 = arith.negf %515 : vector<4x32xf32>
    %517 = math.exp %516 : vector<4x32xf32>
    %cst_183 = arith.constant 1.000000e+00 : f32
    %518 = vector.broadcast %cst_183 : f32 to vector<4x32xf32>
    %519 = arith.addf %518, %517 : vector<4x32xf32>
    %520 = arith.divf %518, %519 : vector<4x32xf32>
    %521 = vector.extract_strided_slice %497 {offsets = [0, 64], sizes = [4, 32], strides = [1, 1]} : vector<4x96xf32> to vector<4x32xf32>
    %522 = vector.extract_strided_slice %504 {offsets = [0, 64], sizes = [4, 32], strides = [1, 1]} : vector<4x96xf32> to vector<4x32xf32>
    %523 = arith.mulf %512, %522 : vector<4x32xf32>
    %524 = arith.addf %521, %523 : vector<4x32xf32>
    %525 = math.tanh %524 : vector<4x32xf32>
    %cst_184 = arith.constant 1.000000e+00 : f32
    %526 = vector.broadcast %cst_184 : f32 to vector<4x32xf32>
    %527 = arith.subf %526, %520 : vector<4x32xf32>
    %528 = arith.mulf %527, %525 : vector<4x32xf32>
    %529 = arith.mulf %520, %494 : vector<4x32xf32>
    %530 = arith.addf %528, %529 : vector<4x32xf32>
    %cst_185 = arith.constant 0.000000e+00 : f32
    %531 = vector.broadcast %cst_185 : f32 to vector<4x32xf32>
    %532 = arith.cmpf ogt, %500, %531 : vector<4x32xf32>
    %533 = arith.select %532, %530, %494 : vector<4x32xi1>, vector<4x32xf32>
    %c0_186 = arith.constant 0 : index
    %c0_187 = arith.constant 0 : index
    %534 = vector.load %arg5[%c0_186, %c0_187] : memref<4x32xf32, #tpu.memory_space<vmem>>, vector<4x32xf32>
    tpu.vector_store %arg5[%c0_186, %c0_187], %533 {strides = array<i32>} : memref<4x32xf32, #tpu.memory_space<vmem>>, vector<4x32xf32>,
    %cst_188 = arith.constant 0.000000e+00 : f32
    %535 = vector.broadcast %cst_188 : f32 to vector<4x32xf32>
    %536 = arith.cmpf ogt, %500, %535 : vector<4x32xf32>
    %cst_189 = arith.constant 0.000000e+00 : f32
    %537 = vector.broadcast %cst_189 : f32 to vector<4x32xf32>
    %538 = arith.select %536, %530, %537 : vector<4x32xi1>, vector<4x32xf32>
    %539 = arith.index_cast %c10_i32 : i32 to index
    %c0_190 = arith.constant 0 : index
    %c0_191 = arith.constant 0 : index
    %540 = vector.load %arg4[%539, %c0_190, %c0_191] : memref<16x4x32xf32, #tpu.memory_space<vmem>>, vector<1x4x32xf32>
    %541 = vector.shape_cast %540 : vector<1x4x32xf32> to vector<4x32xf32>
    %542 = vector.shape_cast %538 : vector<4x32xf32> to vector<1x4x32xf32>
    tpu.vector_store %arg4[%539, %c0_190, %c0_191], %542 {strides = array<i32>} : memref<16x4x32xf32, #tpu.memory_space<vmem>>, vector<1x4x32xf32>,
    %c11_i32 = arith.constant 11 : i32
    %c0_192 = arith.constant 0 : index
    %c0_193 = arith.constant 0 : index
    %543 = vector.load %arg5[%c0_192, %c0_193] : memref<4x32xf32, #tpu.memory_space<vmem>>, vector<4x32xf32>
    %544 = arith.index_cast %c11_i32 : i32 to index
    %c0_194 = arith.constant 0 : index
    %c0_195 = arith.constant 0 : index
    %545 = vector.load %arg0[%544, %c0_194, %c0_195] : memref<16x4x96xf32, #tpu.memory_space<vmem>>, vector<1x4x96xf32>
    %546 = vector.shape_cast %545 : vector<1x4x96xf32> to vector<4x96xf32>
    %547 = arith.index_cast %c11_i32 : i32 to index
    %c0_196 = arith.constant 0 : index
    %c0_197 = arith.constant 0 : index
    %548 = vector.load %arg1[%547, %c0_196, %c0_197] : memref<16x4x32xf32, #tpu.memory_space<vmem>>, vector<1x4x32xf32>
    %549 = vector.shape_cast %548 : vector<1x4x32xf32> to vector<4x32xf32>
    %550 = arith.truncf %543 : vector<4x32xf32> to vector<4x32xbf16>
    %cst_198 = arith.constant dense<0.000000e+00> : vector<4x96xf32>
    %551 = tpu.matmul %550, %2, %cst_198 {dimension_numbers = #tpu.dot_dimension_numbers<[1], [0], [0], [1], [0, 0, 1, 1], [], []>} : vector<4x32xbf16>, vector<32x96xbf16>, vector<4x96xf32> -> vector<4x96xf32>
    %552 = vector.broadcast %3 : vector<1x96xf32> to vector<4x96xf32>
    %553 = arith.addf %551, %552 : vector<4x96xf32>
    %554 = vector.extract_strided_slice %546 {offsets = [0, 0], sizes = [4, 32], strides = [1, 1]} : vector<4x96xf32> to vector<4x32xf32>
    %555 = vector.extract_strided_slice %553 {offsets = [0, 0], sizes = [4, 32], strides = [1, 1]} : vector<4x96xf32> to vector<4x32xf32>
    %556 = arith.addf %554, %555 : vector<4x32xf32>
    %557 = arith.negf %556 : vector<4x32xf32>
    %558 = math.exp %557 : vector<4x32xf32>
    %cst_199 = arith.constant 1.000000e+00 : f32
    %559 = vector.broadcast %cst_199 : f32 to vector<4x32xf32>
    %560 = arith.addf %559, %558 : vector<4x32xf32>
    %561 = arith.divf %559, %560 : vector<4x32xf32>
    %562 = vector.extract_strided_slice %546 {offsets = [0, 32], sizes = [4, 32], strides = [1, 1]} : vector<4x96xf32> to vector<4x32xf32>
    %563 = vector.extract_strided_slice %553 {offsets = [0, 32], sizes = [4, 32], strides = [1, 1]} : vector<4x96xf32> to vector<4x32xf32>
    %564 = arith.addf %562, %563 : vector<4x32xf32>
    %565 = arith.negf %564 : vector<4x32xf32>
    %566 = math.exp %565 : vector<4x32xf32>
    %cst_200 = arith.constant 1.000000e+00 : f32
    %567 = vector.broadcast %cst_200 : f32 to vector<4x32xf32>
    %568 = arith.addf %567, %566 : vector<4x32xf32>
    %569 = arith.divf %567, %568 : vector<4x32xf32>
    %570 = vector.extract_strided_slice %546 {offsets = [0, 64], sizes = [4, 32], strides = [1, 1]} : vector<4x96xf32> to vector<4x32xf32>
    %571 = vector.extract_strided_slice %553 {offsets = [0, 64], sizes = [4, 32], strides = [1, 1]} : vector<4x96xf32> to vector<4x32xf32>
    %572 = arith.mulf %561, %571 : vector<4x32xf32>
    %573 = arith.addf %570, %572 : vector<4x32xf32>
    %574 = math.tanh %573 : vector<4x32xf32>
    %cst_201 = arith.constant 1.000000e+00 : f32
    %575 = vector.broadcast %cst_201 : f32 to vector<4x32xf32>
    %576 = arith.subf %575, %569 : vector<4x32xf32>
    %577 = arith.mulf %576, %574 : vector<4x32xf32>
    %578 = arith.mulf %569, %543 : vector<4x32xf32>
    %579 = arith.addf %577, %578 : vector<4x32xf32>
    %cst_202 = arith.constant 0.000000e+00 : f32
    %580 = vector.broadcast %cst_202 : f32 to vector<4x32xf32>
    %581 = arith.cmpf ogt, %549, %580 : vector<4x32xf32>
    %582 = arith.select %581, %579, %543 : vector<4x32xi1>, vector<4x32xf32>
    %c0_203 = arith.constant 0 : index
    %c0_204 = arith.constant 0 : index
    %583 = vector.load %arg5[%c0_203, %c0_204] : memref<4x32xf32, #tpu.memory_space<vmem>>, vector<4x32xf32>
    tpu.vector_store %arg5[%c0_203, %c0_204], %582 {strides = array<i32>} : memref<4x32xf32, #tpu.memory_space<vmem>>, vector<4x32xf32>,
    %cst_205 = arith.constant 0.000000e+00 : f32
    %584 = vector.broadcast %cst_205 : f32 to vector<4x32xf32>
    %585 = arith.cmpf ogt, %549, %584 : vector<4x32xf32>
    %cst_206 = arith.constant 0.000000e+00 : f32
    %586 = vector.broadcast %cst_206 : f32 to vector<4x32xf32>
    %587 = arith.select %585, %579, %586 : vector<4x32xi1>, vector<4x32xf32>
    %588 = arith.index_cast %c11_i32 : i32 to index
    %c0_207 = arith.constant 0 : index
    %c0_208 = arith.constant 0 : index
    %589 = vector.load %arg4[%588, %c0_207, %c0_208] : memref<16x4x32xf32, #tpu.memory_space<vmem>>, vector<1x4x32xf32>
    %590 = vector.shape_cast %589 : vector<1x4x32xf32> to vector<4x32xf32>
    %591 = vector.shape_cast %587 : vector<4x32xf32> to vector<1x4x32xf32>
    tpu.vector_store %arg4[%588, %c0_207, %c0_208], %591 {strides = array<i32>} : memref<16x4x32xf32, #tpu.memory_space<vmem>>, vector<1x4x32xf32>,
    %c12_i32 = arith.constant 12 : i32
    %c0_209 = arith.constant 0 : index
    %c0_210 = arith.constant 0 : index
    %592 = vector.load %arg5[%c0_209, %c0_210] : memref<4x32xf32, #tpu.memory_space<vmem>>, vector<4x32xf32>
    %593 = arith.index_cast %c12_i32 : i32 to index
    %c0_211 = arith.constant 0 : index
    %c0_212 = arith.constant 0 : index
    %594 = vector.load %arg0[%593, %c0_211, %c0_212] : memref<16x4x96xf32, #tpu.memory_space<vmem>>, vector<1x4x96xf32>
    %595 = vector.shape_cast %594 : vector<1x4x96xf32> to vector<4x96xf32>
    %596 = arith.index_cast %c12_i32 : i32 to index
    %c0_213 = arith.constant 0 : index
    %c0_214 = arith.constant 0 : index
    %597 = vector.load %arg1[%596, %c0_213, %c0_214] : memref<16x4x32xf32, #tpu.memory_space<vmem>>, vector<1x4x32xf32>
    %598 = vector.shape_cast %597 : vector<1x4x32xf32> to vector<4x32xf32>
    %599 = arith.truncf %592 : vector<4x32xf32> to vector<4x32xbf16>
    %cst_215 = arith.constant dense<0.000000e+00> : vector<4x96xf32>
    %600 = tpu.matmul %599, %2, %cst_215 {dimension_numbers = #tpu.dot_dimension_numbers<[1], [0], [0], [1], [0, 0, 1, 1], [], []>} : vector<4x32xbf16>, vector<32x96xbf16>, vector<4x96xf32> -> vector<4x96xf32>
    %601 = vector.broadcast %3 : vector<1x96xf32> to vector<4x96xf32>
    %602 = arith.addf %600, %601 : vector<4x96xf32>
    %603 = vector.extract_strided_slice %595 {offsets = [0, 0], sizes = [4, 32], strides = [1, 1]} : vector<4x96xf32> to vector<4x32xf32>
    %604 = vector.extract_strided_slice %602 {offsets = [0, 0], sizes = [4, 32], strides = [1, 1]} : vector<4x96xf32> to vector<4x32xf32>
    %605 = arith.addf %603, %604 : vector<4x32xf32>
    %606 = arith.negf %605 : vector<4x32xf32>
    %607 = math.exp %606 : vector<4x32xf32>
    %cst_216 = arith.constant 1.000000e+00 : f32
    %608 = vector.broadcast %cst_216 : f32 to vector<4x32xf32>
    %609 = arith.addf %608, %607 : vector<4x32xf32>
    %610 = arith.divf %608, %609 : vector<4x32xf32>
    %611 = vector.extract_strided_slice %595 {offsets = [0, 32], sizes = [4, 32], strides = [1, 1]} : vector<4x96xf32> to vector<4x32xf32>
    %612 = vector.extract_strided_slice %602 {offsets = [0, 32], sizes = [4, 32], strides = [1, 1]} : vector<4x96xf32> to vector<4x32xf32>
    %613 = arith.addf %611, %612 : vector<4x32xf32>
    %614 = arith.negf %613 : vector<4x32xf32>
    %615 = math.exp %614 : vector<4x32xf32>
    %cst_217 = arith.constant 1.000000e+00 : f32
    %616 = vector.broadcast %cst_217 : f32 to vector<4x32xf32>
    %617 = arith.addf %616, %615 : vector<4x32xf32>
    %618 = arith.divf %616, %617 : vector<4x32xf32>
    %619 = vector.extract_strided_slice %595 {offsets = [0, 64], sizes = [4, 32], strides = [1, 1]} : vector<4x96xf32> to vector<4x32xf32>
    %620 = vector.extract_strided_slice %602 {offsets = [0, 64], sizes = [4, 32], strides = [1, 1]} : vector<4x96xf32> to vector<4x32xf32>
    %621 = arith.mulf %610, %620 : vector<4x32xf32>
    %622 = arith.addf %619, %621 : vector<4x32xf32>
    %623 = math.tanh %622 : vector<4x32xf32>
    %cst_218 = arith.constant 1.000000e+00 : f32
    %624 = vector.broadcast %cst_218 : f32 to vector<4x32xf32>
    %625 = arith.subf %624, %618 : vector<4x32xf32>
    %626 = arith.mulf %625, %623 : vector<4x32xf32>
    %627 = arith.mulf %618, %592 : vector<4x32xf32>
    %628 = arith.addf %626, %627 : vector<4x32xf32>
    %cst_219 = arith.constant 0.000000e+00 : f32
    %629 = vector.broadcast %cst_219 : f32 to vector<4x32xf32>
    %630 = arith.cmpf ogt, %598, %629 : vector<4x32xf32>
    %631 = arith.select %630, %628, %592 : vector<4x32xi1>, vector<4x32xf32>
    %c0_220 = arith.constant 0 : index
    %c0_221 = arith.constant 0 : index
    %632 = vector.load %arg5[%c0_220, %c0_221] : memref<4x32xf32, #tpu.memory_space<vmem>>, vector<4x32xf32>
    tpu.vector_store %arg5[%c0_220, %c0_221], %631 {strides = array<i32>} : memref<4x32xf32, #tpu.memory_space<vmem>>, vector<4x32xf32>,
    %cst_222 = arith.constant 0.000000e+00 : f32
    %633 = vector.broadcast %cst_222 : f32 to vector<4x32xf32>
    %634 = arith.cmpf ogt, %598, %633 : vector<4x32xf32>
    %cst_223 = arith.constant 0.000000e+00 : f32
    %635 = vector.broadcast %cst_223 : f32 to vector<4x32xf32>
    %636 = arith.select %634, %628, %635 : vector<4x32xi1>, vector<4x32xf32>
    %637 = arith.index_cast %c12_i32 : i32 to index
    %c0_224 = arith.constant 0 : index
    %c0_225 = arith.constant 0 : index
    %638 = vector.load %arg4[%637, %c0_224, %c0_225] : memref<16x4x32xf32, #tpu.memory_space<vmem>>, vector<1x4x32xf32>
    %639 = vector.shape_cast %638 : vector<1x4x32xf32> to vector<4x32xf32>
    %640 = vector.shape_cast %636 : vector<4x32xf32> to vector<1x4x32xf32>
    tpu.vector_store %arg4[%637, %c0_224, %c0_225], %640 {strides = array<i32>} : memref<16x4x32xf32, #tpu.memory_space<vmem>>, vector<1x4x32xf32>,
    %c13_i32 = arith.constant 13 : i32
    %c0_226 = arith.constant 0 : index
    %c0_227 = arith.constant 0 : index
    %641 = vector.load %arg5[%c0_226, %c0_227] : memref<4x32xf32, #tpu.memory_space<vmem>>, vector<4x32xf32>
    %642 = arith.index_cast %c13_i32 : i32 to index
    %c0_228 = arith.constant 0 : index
    %c0_229 = arith.constant 0 : index
    %643 = vector.load %arg0[%642, %c0_228, %c0_229] : memref<16x4x96xf32, #tpu.memory_space<vmem>>, vector<1x4x96xf32>
    %644 = vector.shape_cast %643 : vector<1x4x96xf32> to vector<4x96xf32>
    %645 = arith.index_cast %c13_i32 : i32 to index
    %c0_230 = arith.constant 0 : index
    %c0_231 = arith.constant 0 : index
    %646 = vector.load %arg1[%645, %c0_230, %c0_231] : memref<16x4x32xf32, #tpu.memory_space<vmem>>, vector<1x4x32xf32>
    %647 = vector.shape_cast %646 : vector<1x4x32xf32> to vector<4x32xf32>
    %648 = arith.truncf %641 : vector<4x32xf32> to vector<4x32xbf16>
    %cst_232 = arith.constant dense<0.000000e+00> : vector<4x96xf32>
    %649 = tpu.matmul %648, %2, %cst_232 {dimension_numbers = #tpu.dot_dimension_numbers<[1], [0], [0], [1], [0, 0, 1, 1], [], []>} : vector<4x32xbf16>, vector<32x96xbf16>, vector<4x96xf32> -> vector<4x96xf32>
    %650 = vector.broadcast %3 : vector<1x96xf32> to vector<4x96xf32>
    %651 = arith.addf %649, %650 : vector<4x96xf32>
    %652 = vector.extract_strided_slice %644 {offsets = [0, 0], sizes = [4, 32], strides = [1, 1]} : vector<4x96xf32> to vector<4x32xf32>
    %653 = vector.extract_strided_slice %651 {offsets = [0, 0], sizes = [4, 32], strides = [1, 1]} : vector<4x96xf32> to vector<4x32xf32>
    %654 = arith.addf %652, %653 : vector<4x32xf32>
    %655 = arith.negf %654 : vector<4x32xf32>
    %656 = math.exp %655 : vector<4x32xf32>
    %cst_233 = arith.constant 1.000000e+00 : f32
    %657 = vector.broadcast %cst_233 : f32 to vector<4x32xf32>
    %658 = arith.addf %657, %656 : vector<4x32xf32>
    %659 = arith.divf %657, %658 : vector<4x32xf32>
    %660 = vector.extract_strided_slice %644 {offsets = [0, 32], sizes = [4, 32], strides = [1, 1]} : vector<4x96xf32> to vector<4x32xf32>
    %661 = vector.extract_strided_slice %651 {offsets = [0, 32], sizes = [4, 32], strides = [1, 1]} : vector<4x96xf32> to vector<4x32xf32>
    %662 = arith.addf %660, %661 : vector<4x32xf32>
    %663 = arith.negf %662 : vector<4x32xf32>
    %664 = math.exp %663 : vector<4x32xf32>
    %cst_234 = arith.constant 1.000000e+00 : f32
    %665 = vector.broadcast %cst_234 : f32 to vector<4x32xf32>
    %666 = arith.addf %665, %664 : vector<4x32xf32>
    %667 = arith.divf %665, %666 : vector<4x32xf32>
    %668 = vector.extract_strided_slice %644 {offsets = [0, 64], sizes = [4, 32], strides = [1, 1]} : vector<4x96xf32> to vector<4x32xf32>
    %669 = vector.extract_strided_slice %651 {offsets = [0, 64], sizes = [4, 32], strides = [1, 1]} : vector<4x96xf32> to vector<4x32xf32>
    %670 = arith.mulf %659, %669 : vector<4x32xf32>
    %671 = arith.addf %668, %670 : vector<4x32xf32>
    %672 = math.tanh %671 : vector<4x32xf32>
    %cst_235 = arith.constant 1.000000e+00 : f32
    %673 = vector.broadcast %cst_235 : f32 to vector<4x32xf32>
    %674 = arith.subf %673, %667 : vector<4x32xf32>
    %675 = arith.mulf %674, %672 : vector<4x32xf32>
    %676 = arith.mulf %667, %641 : vector<4x32xf32>
    %677 = arith.addf %675, %676 : vector<4x32xf32>
    %cst_236 = arith.constant 0.000000e+00 : f32
    %678 = vector.broadcast %cst_236 : f32 to vector<4x32xf32>
    %679 = arith.cmpf ogt, %647, %678 : vector<4x32xf32>
    %680 = arith.select %679, %677, %641 : vector<4x32xi1>, vector<4x32xf32>
    %c0_237 = arith.constant 0 : index
    %c0_238 = arith.constant 0 : index
    %681 = vector.load %arg5[%c0_237, %c0_238] : memref<4x32xf32, #tpu.memory_space<vmem>>, vector<4x32xf32>
    tpu.vector_store %arg5[%c0_237, %c0_238], %680 {strides = array<i32>} : memref<4x32xf32, #tpu.memory_space<vmem>>, vector<4x32xf32>,
    %cst_239 = arith.constant 0.000000e+00 : f32
    %682 = vector.broadcast %cst_239 : f32 to vector<4x32xf32>
    %683 = arith.cmpf ogt, %647, %682 : vector<4x32xf32>
    %cst_240 = arith.constant 0.000000e+00 : f32
    %684 = vector.broadcast %cst_240 : f32 to vector<4x32xf32>
    %685 = arith.select %683, %677, %684 : vector<4x32xi1>, vector<4x32xf32>
    %686 = arith.index_cast %c13_i32 : i32 to index
    %c0_241 = arith.constant 0 : index
    %c0_242 = arith.constant 0 : index
    %687 = vector.load %arg4[%686, %c0_241, %c0_242] : memref<16x4x32xf32, #tpu.memory_space<vmem>>, vector<1x4x32xf32>
    %688 = vector.shape_cast %687 : vector<1x4x32xf32> to vector<4x32xf32>
    %689 = vector.shape_cast %685 : vector<4x32xf32> to vector<1x4x32xf32>
    tpu.vector_store %arg4[%686, %c0_241, %c0_242], %689 {strides = array<i32>} : memref<16x4x32xf32, #tpu.memory_space<vmem>>, vector<1x4x32xf32>,
    %c14_i32 = arith.constant 14 : i32
    %c0_243 = arith.constant 0 : index
    %c0_244 = arith.constant 0 : index
    %690 = vector.load %arg5[%c0_243, %c0_244] : memref<4x32xf32, #tpu.memory_space<vmem>>, vector<4x32xf32>
    %691 = arith.index_cast %c14_i32 : i32 to index
    %c0_245 = arith.constant 0 : index
    %c0_246 = arith.constant 0 : index
    %692 = vector.load %arg0[%691, %c0_245, %c0_246] : memref<16x4x96xf32, #tpu.memory_space<vmem>>, vector<1x4x96xf32>
    %693 = vector.shape_cast %692 : vector<1x4x96xf32> to vector<4x96xf32>
    %694 = arith.index_cast %c14_i32 : i32 to index
    %c0_247 = arith.constant 0 : index
    %c0_248 = arith.constant 0 : index
    %695 = vector.load %arg1[%694, %c0_247, %c0_248] : memref<16x4x32xf32, #tpu.memory_space<vmem>>, vector<1x4x32xf32>
    %696 = vector.shape_cast %695 : vector<1x4x32xf32> to vector<4x32xf32>
    %697 = arith.truncf %690 : vector<4x32xf32> to vector<4x32xbf16>
    %cst_249 = arith.constant dense<0.000000e+00> : vector<4x96xf32>
    %698 = tpu.matmul %697, %2, %cst_249 {dimension_numbers = #tpu.dot_dimension_numbers<[1], [0], [0], [1], [0, 0, 1, 1], [], []>} : vector<4x32xbf16>, vector<32x96xbf16>, vector<4x96xf32> -> vector<4x96xf32>
    %699 = vector.broadcast %3 : vector<1x96xf32> to vector<4x96xf32>
    %700 = arith.addf %698, %699 : vector<4x96xf32>
    %701 = vector.extract_strided_slice %693 {offsets = [0, 0], sizes = [4, 32], strides = [1, 1]} : vector<4x96xf32> to vector<4x32xf32>
    %702 = vector.extract_strided_slice %700 {offsets = [0, 0], sizes = [4, 32], strides = [1, 1]} : vector<4x96xf32> to vector<4x32xf32>
    %703 = arith.addf %701, %702 : vector<4x32xf32>
    %704 = arith.negf %703 : vector<4x32xf32>
    %705 = math.exp %704 : vector<4x32xf32>
    %cst_250 = arith.constant 1.000000e+00 : f32
    %706 = vector.broadcast %cst_250 : f32 to vector<4x32xf32>
    %707 = arith.addf %706, %705 : vector<4x32xf32>
    %708 = arith.divf %706, %707 : vector<4x32xf32>
    %709 = vector.extract_strided_slice %693 {offsets = [0, 32], sizes = [4, 32], strides = [1, 1]} : vector<4x96xf32> to vector<4x32xf32>
    %710 = vector.extract_strided_slice %700 {offsets = [0, 32], sizes = [4, 32], strides = [1, 1]} : vector<4x96xf32> to vector<4x32xf32>
    %711 = arith.addf %709, %710 : vector<4x32xf32>
    %712 = arith.negf %711 : vector<4x32xf32>
    %713 = math.exp %712 : vector<4x32xf32>
    %cst_251 = arith.constant 1.000000e+00 : f32
    %714 = vector.broadcast %cst_251 : f32 to vector<4x32xf32>
    %715 = arith.addf %714, %713 : vector<4x32xf32>
    %716 = arith.divf %714, %715 : vector<4x32xf32>
    %717 = vector.extract_strided_slice %693 {offsets = [0, 64], sizes = [4, 32], strides = [1, 1]} : vector<4x96xf32> to vector<4x32xf32>
    %718 = vector.extract_strided_slice %700 {offsets = [0, 64], sizes = [4, 32], strides = [1, 1]} : vector<4x96xf32> to vector<4x32xf32>
    %719 = arith.mulf %708, %718 : vector<4x32xf32>
    %720 = arith.addf %717, %719 : vector<4x32xf32>
    %721 = math.tanh %720 : vector<4x32xf32>
    %cst_252 = arith.constant 1.000000e+00 : f32
    %722 = vector.broadcast %cst_252 : f32 to vector<4x32xf32>
    %723 = arith.subf %722, %716 : vector<4x32xf32>
    %724 = arith.mulf %723, %721 : vector<4x32xf32>
    %725 = arith.mulf %716, %690 : vector<4x32xf32>
    %726 = arith.addf %724, %725 : vector<4x32xf32>
    %cst_253 = arith.constant 0.000000e+00 : f32
    %727 = vector.broadcast %cst_253 : f32 to vector<4x32xf32>
    %728 = arith.cmpf ogt, %696, %727 : vector<4x32xf32>
    %729 = arith.select %728, %726, %690 : vector<4x32xi1>, vector<4x32xf32>
    %c0_254 = arith.constant 0 : index
    %c0_255 = arith.constant 0 : index
    %730 = vector.load %arg5[%c0_254, %c0_255] : memref<4x32xf32, #tpu.memory_space<vmem>>, vector<4x32xf32>
    tpu.vector_store %arg5[%c0_254, %c0_255], %729 {strides = array<i32>} : memref<4x32xf32, #tpu.memory_space<vmem>>, vector<4x32xf32>,
    %cst_256 = arith.constant 0.000000e+00 : f32
    %731 = vector.broadcast %cst_256 : f32 to vector<4x32xf32>
    %732 = arith.cmpf ogt, %696, %731 : vector<4x32xf32>
    %cst_257 = arith.constant 0.000000e+00 : f32
    %733 = vector.broadcast %cst_257 : f32 to vector<4x32xf32>
    %734 = arith.select %732, %726, %733 : vector<4x32xi1>, vector<4x32xf32>
    %735 = arith.index_cast %c14_i32 : i32 to index
    %c0_258 = arith.constant 0 : index
    %c0_259 = arith.constant 0 : index
    %736 = vector.load %arg4[%735, %c0_258, %c0_259] : memref<16x4x32xf32, #tpu.memory_space<vmem>>, vector<1x4x32xf32>
    %737 = vector.shape_cast %736 : vector<1x4x32xf32> to vector<4x32xf32>
    %738 = vector.shape_cast %734 : vector<4x32xf32> to vector<1x4x32xf32>
    tpu.vector_store %arg4[%735, %c0_258, %c0_259], %738 {strides = array<i32>} : memref<16x4x32xf32, #tpu.memory_space<vmem>>, vector<1x4x32xf32>,
    %c15_i32 = arith.constant 15 : i32
    %c0_260 = arith.constant 0 : index
    %c0_261 = arith.constant 0 : index
    %739 = vector.load %arg5[%c0_260, %c0_261] : memref<4x32xf32, #tpu.memory_space<vmem>>, vector<4x32xf32>
    %740 = arith.index_cast %c15_i32 : i32 to index
    %c0_262 = arith.constant 0 : index
    %c0_263 = arith.constant 0 : index
    %741 = vector.load %arg0[%740, %c0_262, %c0_263] : memref<16x4x96xf32, #tpu.memory_space<vmem>>, vector<1x4x96xf32>
    %742 = vector.shape_cast %741 : vector<1x4x96xf32> to vector<4x96xf32>
    %743 = arith.index_cast %c15_i32 : i32 to index
    %c0_264 = arith.constant 0 : index
    %c0_265 = arith.constant 0 : index
    %744 = vector.load %arg1[%743, %c0_264, %c0_265] : memref<16x4x32xf32, #tpu.memory_space<vmem>>, vector<1x4x32xf32>
    %745 = vector.shape_cast %744 : vector<1x4x32xf32> to vector<4x32xf32>
    %746 = arith.truncf %739 : vector<4x32xf32> to vector<4x32xbf16>
    %cst_266 = arith.constant dense<0.000000e+00> : vector<4x96xf32>
    %747 = tpu.matmul %746, %2, %cst_266 {dimension_numbers = #tpu.dot_dimension_numbers<[1], [0], [0], [1], [0, 0, 1, 1], [], []>} : vector<4x32xbf16>, vector<32x96xbf16>, vector<4x96xf32> -> vector<4x96xf32>
    %748 = vector.broadcast %3 : vector<1x96xf32> to vector<4x96xf32>
    %749 = arith.addf %747, %748 : vector<4x96xf32>
    %750 = vector.extract_strided_slice %742 {offsets = [0, 0], sizes = [4, 32], strides = [1, 1]} : vector<4x96xf32> to vector<4x32xf32>
    %751 = vector.extract_strided_slice %749 {offsets = [0, 0], sizes = [4, 32], strides = [1, 1]} : vector<4x96xf32> to vector<4x32xf32>
    %752 = arith.addf %750, %751 : vector<4x32xf32>
    %753 = arith.negf %752 : vector<4x32xf32>
    %754 = math.exp %753 : vector<4x32xf32>
    %cst_267 = arith.constant 1.000000e+00 : f32
    %755 = vector.broadcast %cst_267 : f32 to vector<4x32xf32>
    %756 = arith.addf %755, %754 : vector<4x32xf32>
    %757 = arith.divf %755, %756 : vector<4x32xf32>
    %758 = vector.extract_strided_slice %742 {offsets = [0, 32], sizes = [4, 32], strides = [1, 1]} : vector<4x96xf32> to vector<4x32xf32>
    %759 = vector.extract_strided_slice %749 {offsets = [0, 32], sizes = [4, 32], strides = [1, 1]} : vector<4x96xf32> to vector<4x32xf32>
    %760 = arith.addf %758, %759 : vector<4x32xf32>
    %761 = arith.negf %760 : vector<4x32xf32>
    %762 = math.exp %761 : vector<4x32xf32>
    %cst_268 = arith.constant 1.000000e+00 : f32
    %763 = vector.broadcast %cst_268 : f32 to vector<4x32xf32>
    %764 = arith.addf %763, %762 : vector<4x32xf32>
    %765 = arith.divf %763, %764 : vector<4x32xf32>
    %766 = vector.extract_strided_slice %742 {offsets = [0, 64], sizes = [4, 32], strides = [1, 1]} : vector<4x96xf32> to vector<4x32xf32>
    %767 = vector.extract_strided_slice %749 {offsets = [0, 64], sizes = [4, 32], strides = [1, 1]} : vector<4x96xf32> to vector<4x32xf32>
    %768 = arith.mulf %757, %767 : vector<4x32xf32>
    %769 = arith.addf %766, %768 : vector<4x32xf32>
    %770 = math.tanh %769 : vector<4x32xf32>
    %cst_269 = arith.constant 1.000000e+00 : f32
    %771 = vector.broadcast %cst_269 : f32 to vector<4x32xf32>
    %772 = arith.subf %771, %765 : vector<4x32xf32>
    %773 = arith.mulf %772, %770 : vector<4x32xf32>
    %774 = arith.mulf %765, %739 : vector<4x32xf32>
    %775 = arith.addf %773, %774 : vector<4x32xf32>
    %cst_270 = arith.constant 0.000000e+00 : f32
    %776 = vector.broadcast %cst_270 : f32 to vector<4x32xf32>
    %777 = arith.cmpf ogt, %745, %776 : vector<4x32xf32>
    %778 = arith.select %777, %775, %739 : vector<4x32xi1>, vector<4x32xf32>
    %c0_271 = arith.constant 0 : index
    %c0_272 = arith.constant 0 : index
    %779 = vector.load %arg5[%c0_271, %c0_272] : memref<4x32xf32, #tpu.memory_space<vmem>>, vector<4x32xf32>
    tpu.vector_store %arg5[%c0_271, %c0_272], %778 {strides = array<i32>} : memref<4x32xf32, #tpu.memory_space<vmem>>, vector<4x32xf32>,
    %cst_273 = arith.constant 0.000000e+00 : f32
    %780 = vector.broadcast %cst_273 : f32 to vector<4x32xf32>
    %781 = arith.cmpf ogt, %745, %780 : vector<4x32xf32>
    %cst_274 = arith.constant 0.000000e+00 : f32
    %782 = vector.broadcast %cst_274 : f32 to vector<4x32xf32>
    %783 = arith.select %781, %775, %782 : vector<4x32xi1>, vector<4x32xf32>
    %784 = arith.index_cast %c15_i32 : i32 to index
    %c0_275 = arith.constant 0 : index
    %c0_276 = arith.constant 0 : index
    %785 = vector.load %arg4[%784, %c0_275, %c0_276] : memref<16x4x32xf32, #tpu.memory_space<vmem>>, vector<1x4x32xf32>
    %786 = vector.shape_cast %785 : vector<1x4x32xf32> to vector<4x32xf32>
    %787 = vector.shape_cast %783 : vector<4x32xf32> to vector<1x4x32xf32>
    tpu.vector_store %arg4[%784, %c0_275, %c0_276], %787 {strides = array<i32>} : memref<16x4x32xf32, #tpu.memory_space<vmem>>, vector<1x4x32xf32>,
    %c16_i32 = arith.constant 16 : i32
    return
  }
}

module attributes {stable_mosaic.version = 11 : i64} {
  func.func @_self_fuse_kernel(%arg0: memref<2x16x32xf32, #tpu.memory_space<vmem>>, %arg1: memref<2x1x16xf32, #tpu.memory_space<vmem>>, %arg2: memref<128x64xbf16, #tpu.memory_space<vmem>>, %arg3: memref<1x1x64xf32, #tpu.memory_space<vmem>>, %arg4: memref<2x16x32xf32, #tpu.memory_space<vmem>>) attributes {dimension_semantics = [], scalar_prefetch = 0 : i64, scratch_operands = 0 : i64, tpu.core_type = #tpu.core_type<tc>} {
    %c0 = arith.constant 0 : index
    %c0_0 = arith.constant 0 : index
    %c0_1 = arith.constant 0 : index
    %0 = vector.load %arg0[%c0, %c0_0, %c0_1] : memref<2x16x32xf32, #tpu.memory_space<vmem>>, vector<2x16x32xf32>
    %c0_2 = arith.constant 0 : index
    %c0_3 = arith.constant 0 : index
    %c0_4 = arith.constant 0 : index
    %1 = vector.load %arg1[%c0_2, %c0_3, %c0_4] : memref<2x1x16xf32, #tpu.memory_space<vmem>>, vector<2x1x16xf32>
    %2 = arith.truncf %0 : vector<2x16x32xf32> to vector<2x16x32xbf16>
    %cst = arith.constant dense<0.000000e+00> : vector<2x16x16xf32>
    %3 = tpu.matmul %2, %2, %cst {dimension_numbers = #tpu.dot_dimension_numbers<[2], [2], [1], [1], [0, 0, 0, 1, 1, 1], [0], [0]>} : vector<2x16x32xbf16>, vector<2x16x32xbf16>, vector<2x16x16xf32> -> vector<2x16x16xf32>
    %4 = tpu.iota {dimensions = array<i32: 1>} : vector<2x16x16xi32>
    %5 = tpu.iota {dimensions = array<i32: 2>} : vector<2x16x16xi32>
    %6 = arith.cmpi eq, %4, %5 : vector<2x16x16xi32>
    %cst_5 = arith.constant 0.000000e+00 : f32
    %7 = vector.broadcast %cst_5 : f32 to vector<2x16x16xf32>
    %8 = arith.select %6, %7, %3 : vector<2x16x16xi1>, vector<2x16x16xf32>
    %cst_6 = arith.constant 0.000000e+00 : f32
    %9 = vector.broadcast %cst_6 : f32 to vector<2x1x16xf32>
    %10 = arith.cmpf ogt, %1, %9 : vector<2x1x16xf32>
    %cst_7 = arith.constant -1.000000e+30 : f32
    %11 = vector.shape_cast %10 : vector<2x1x16xi1> to vector<2x1x16xi1>
    %12 = vector.broadcast %11 : vector<2x1x16xi1> to vector<2x16x16xi1>
    %13 = vector.broadcast %cst_7 : f32 to vector<2x16x16xf32>
    %14 = arith.select %12, %13, %8 : vector<2x16x16xi1>, vector<2x16x16xf32>
    %cst_8 = arith.constant dense<0xFF800000> : vector<2x16xf32>
    %15 = vector.multi_reduction <maximumf>, %14, %cst_8 [2] : vector<2x16x16xf32> to vector<2x16xf32>
    %16 = vector.shape_cast %15 : vector<2x16xf32> to vector<2x16x1xf32>
    %17 = vector.broadcast %16 : vector<2x16x1xf32> to vector<2x16x16xf32>
    %18 = arith.subf %14, %17 : vector<2x16x16xf32>
    %19 = math.exp %18 : vector<2x16x16xf32>
    %cst_9 = arith.constant dense<0.000000e+00> : vector<2x16xf32>
    %20 = vector.multi_reduction <add>, %19, %cst_9 [2] : vector<2x16x16xf32> to vector<2x16xf32>
    %21 = vector.shape_cast %20 : vector<2x16xf32> to vector<2x16x1xf32>
    %cst_10 = arith.constant 1.000000e-30 : f32
    %22 = vector.broadcast %cst_10 : f32 to vector<2x16x1xf32>
    %23 = arith.maximumf %21, %22 : vector<2x16x1xf32>
    %24 = vector.broadcast %23 : vector<2x16x1xf32> to vector<2x16x16xf32>
    %25 = arith.divf %19, %24 : vector<2x16x16xf32>
    %26 = arith.truncf %25 : vector<2x16x16xf32> to vector<2x16x16xbf16>
    %cst_11 = arith.constant dense<0.000000e+00> : vector<2x16x32xf32>
    %27 = tpu.matmul %26, %2, %cst_11 {dimension_numbers = #tpu.dot_dimension_numbers<[2], [1], [1], [2], [0, 0, 0, 1, 1, 2], [0], [0]>} : vector<2x16x16xbf16>, vector<2x16x32xbf16>, vector<2x16x32xf32> -> vector<2x16x32xf32>
    %28 = arith.mulf %0, %27 : vector<2x16x32xf32>
    %29 = arith.subf %0, %27 : vector<2x16x32xf32>
    %30 = tpu.concatenate %0, %27, %28, %29 in 2 : vector<2x16x32xf32>, vector<2x16x32xf32>, vector<2x16x32xf32>, vector<2x16x32xf32> -> vector<2x16x128xf32>
    %31 = arith.truncf %30 : vector<2x16x128xf32> to vector<2x16x128xbf16>
    %c0_12 = arith.constant 0 : index
    %c0_13 = arith.constant 0 : index
    %32 = vector.load %arg2[%c0_12, %c0_13] : memref<128x64xbf16, #tpu.memory_space<vmem>>, vector<128x64xbf16>
    %cst_14 = arith.constant dense<0.000000e+00> : vector<2x16x64xf32>
    %33 = tpu.matmul %31, %32, %cst_14 {dimension_numbers = #tpu.dot_dimension_numbers<[2], [0], [0, 1], [1], [0, 0, 0, 1, 1, 1], [], []>} : vector<2x16x128xbf16>, vector<128x64xbf16>, vector<2x16x64xf32> -> vector<2x16x64xf32>
    %c0_15 = arith.constant 0 : index
    %c0_16 = arith.constant 0 : index
    %c0_17 = arith.constant 0 : index
    %34 = vector.load %arg3[%c0_15, %c0_16, %c0_17] : memref<1x1x64xf32, #tpu.memory_space<vmem>>, vector<1x1x64xf32>
    %35 = vector.broadcast %34 : vector<1x1x64xf32> to vector<2x16x64xf32>
    %36 = arith.addf %33, %35 : vector<2x16x64xf32>
    %37 = vector.extract_strided_slice %36 {offsets = [0, 0, 0], sizes = [2, 16, 32], strides = [1, 1, 1]} : vector<2x16x64xf32> to vector<2x16x32xf32>
    %38 = math.tanh %37 : vector<2x16x32xf32>
    %39 = vector.extract_strided_slice %36 {offsets = [0, 0, 32], sizes = [2, 16, 32], strides = [1, 1, 1]} : vector<2x16x64xf32> to vector<2x16x32xf32>
    %40 = arith.negf %39 : vector<2x16x32xf32>
    %41 = math.exp %40 : vector<2x16x32xf32>
    %cst_18 = arith.constant 1.000000e+00 : f32
    %42 = vector.broadcast %cst_18 : f32 to vector<2x16x32xf32>
    %43 = arith.addf %42, %41 : vector<2x16x32xf32>
    %44 = arith.divf %42, %43 : vector<2x16x32xf32>
    %45 = arith.mulf %44, %38 : vector<2x16x32xf32>
    %cst_19 = arith.constant 1.000000e+00 : f32
    %46 = vector.broadcast %cst_19 : f32 to vector<2x16x32xf32>
    %47 = arith.subf %46, %44 : vector<2x16x32xf32>
    %48 = arith.mulf %47, %0 : vector<2x16x32xf32>
    %49 = arith.addf %45, %48 : vector<2x16x32xf32>
    %c0_20 = arith.constant 0 : index
    %c0_21 = arith.constant 0 : index
    %c0_22 = arith.constant 0 : index
    %50 = vector.load %arg4[%c0_20, %c0_21, %c0_22] : memref<2x16x32xf32, #tpu.memory_space<vmem>>, vector<2x16x32xf32>
    tpu.vector_store %arg4[%c0_20, %c0_21, %c0_22], %49 {strides = array<i32>} : memref<2x16x32xf32, #tpu.memory_space<vmem>>, vector<2x16x32xf32>,
    return
  }
}

module attributes {stable_mosaic.version = 11 : i64} {
  func.func @_interactive_kernel(%arg0: memref<2x16x32xf32, #tpu.memory_space<vmem>>, %arg1: memref<2x8x32xf32, #tpu.memory_space<vmem>>, %arg2: memref<2x1x8xf32, #tpu.memory_space<vmem>>, %arg3: memref<128x64xbf16, #tpu.memory_space<vmem>>, %arg4: memref<1x1x64xf32, #tpu.memory_space<vmem>>, %arg5: memref<2x16x32xf32, #tpu.memory_space<vmem>>) attributes {dimension_semantics = [], scalar_prefetch = 0 : i64, scratch_operands = 0 : i64, tpu.core_type = #tpu.core_type<tc>} {
    %c0 = arith.constant 0 : index
    %c0_0 = arith.constant 0 : index
    %c0_1 = arith.constant 0 : index
    %0 = vector.load %arg0[%c0, %c0_0, %c0_1] : memref<2x16x32xf32, #tpu.memory_space<vmem>>, vector<2x16x32xf32>
    %c0_2 = arith.constant 0 : index
    %c0_3 = arith.constant 0 : index
    %c0_4 = arith.constant 0 : index
    %1 = vector.load %arg1[%c0_2, %c0_3, %c0_4] : memref<2x8x32xf32, #tpu.memory_space<vmem>>, vector<2x8x32xf32>
    %c0_5 = arith.constant 0 : index
    %c0_6 = arith.constant 0 : index
    %c0_7 = arith.constant 0 : index
    %2 = vector.load %arg2[%c0_5, %c0_6, %c0_7] : memref<2x1x8xf32, #tpu.memory_space<vmem>>, vector<2x1x8xf32>
    %3 = arith.truncf %0 : vector<2x16x32xf32> to vector<2x16x32xbf16>
    %4 = arith.truncf %1 : vector<2x8x32xf32> to vector<2x8x32xbf16>
    %cst = arith.constant dense<0.000000e+00> : vector<2x16x8xf32>
    %5 = tpu.matmul %3, %4, %cst {dimension_numbers = #tpu.dot_dimension_numbers<[2], [2], [1], [1], [0, 0, 0, 1, 1, 1], [0], [0]>} : vector<2x16x32xbf16>, vector<2x8x32xbf16>, vector<2x16x8xf32> -> vector<2x16x8xf32>
    %cst_8 = arith.constant 0.000000e+00 : f32
    %6 = vector.broadcast %cst_8 : f32 to vector<2x1x8xf32>
    %7 = arith.cmpf ogt, %2, %6 : vector<2x1x8xf32>
    %cst_9 = arith.constant -1.000000e+30 : f32
    %8 = vector.shape_cast %7 : vector<2x1x8xi1> to vector<2x1x8xi1>
    %9 = vector.broadcast %8 : vector<2x1x8xi1> to vector<2x16x8xi1>
    %10 = vector.broadcast %cst_9 : f32 to vector<2x16x8xf32>
    %11 = arith.select %9, %10, %5 : vector<2x16x8xi1>, vector<2x16x8xf32>
    %cst_10 = arith.constant dense<0xFF800000> : vector<2x16xf32>
    %12 = vector.multi_reduction <maximumf>, %11, %cst_10 [2] : vector<2x16x8xf32> to vector<2x16xf32>
    %13 = vector.shape_cast %12 : vector<2x16xf32> to vector<2x16x1xf32>
    %14 = vector.broadcast %13 : vector<2x16x1xf32> to vector<2x16x8xf32>
    %15 = arith.subf %11, %14 : vector<2x16x8xf32>
    %16 = math.exp %15 : vector<2x16x8xf32>
    %cst_11 = arith.constant dense<0.000000e+00> : vector<2x16xf32>
    %17 = vector.multi_reduction <add>, %16, %cst_11 [2] : vector<2x16x8xf32> to vector<2x16xf32>
    %18 = vector.shape_cast %17 : vector<2x16xf32> to vector<2x16x1xf32>
    %cst_12 = arith.constant 1.000000e-30 : f32
    %19 = vector.broadcast %cst_12 : f32 to vector<2x16x1xf32>
    %20 = arith.maximumf %18, %19 : vector<2x16x1xf32>
    %21 = vector.broadcast %20 : vector<2x16x1xf32> to vector<2x16x8xf32>
    %22 = arith.divf %16, %21 : vector<2x16x8xf32>
    %23 = arith.truncf %22 : vector<2x16x8xf32> to vector<2x16x8xbf16>
    %cst_13 = arith.constant dense<0.000000e+00> : vector<2x16x32xf32>
    %24 = tpu.matmul %23, %4, %cst_13 {dimension_numbers = #tpu.dot_dimension_numbers<[2], [1], [1], [2], [0, 0, 0, 1, 1, 2], [0], [0]>} : vector<2x16x8xbf16>, vector<2x8x32xbf16>, vector<2x16x32xf32> -> vector<2x16x32xf32>
    %25 = arith.mulf %0, %24 : vector<2x16x32xf32>
    %26 = arith.subf %0, %24 : vector<2x16x32xf32>
    %27 = tpu.concatenate %0, %24, %25, %26 in 2 : vector<2x16x32xf32>, vector<2x16x32xf32>, vector<2x16x32xf32>, vector<2x16x32xf32> -> vector<2x16x128xf32>
    %28 = arith.truncf %27 : vector<2x16x128xf32> to vector<2x16x128xbf16>
    %c0_14 = arith.constant 0 : index
    %c0_15 = arith.constant 0 : index
    %29 = vector.load %arg3[%c0_14, %c0_15] : memref<128x64xbf16, #tpu.memory_space<vmem>>, vector<128x64xbf16>
    %cst_16 = arith.constant dense<0.000000e+00> : vector<2x16x64xf32>
    %30 = tpu.matmul %28, %29, %cst_16 {dimension_numbers = #tpu.dot_dimension_numbers<[2], [0], [0, 1], [1], [0, 0, 0, 1, 1, 1], [], []>} : vector<2x16x128xbf16>, vector<128x64xbf16>, vector<2x16x64xf32> -> vector<2x16x64xf32>
    %c0_17 = arith.constant 0 : index
    %c0_18 = arith.constant 0 : index
    %c0_19 = arith.constant 0 : index
    %31 = vector.load %arg4[%c0_17, %c0_18, %c0_19] : memref<1x1x64xf32, #tpu.memory_space<vmem>>, vector<1x1x64xf32>
    %32 = vector.broadcast %31 : vector<1x1x64xf32> to vector<2x16x64xf32>
    %33 = arith.addf %30, %32 : vector<2x16x64xf32>
    %34 = vector.extract_strided_slice %33 {offsets = [0, 0, 0], sizes = [2, 16, 32], strides = [1, 1, 1]} : vector<2x16x64xf32> to vector<2x16x32xf32>
    %35 = math.tanh %34 : vector<2x16x32xf32>
    %36 = vector.extract_strided_slice %33 {offsets = [0, 0, 32], sizes = [2, 16, 32], strides = [1, 1, 1]} : vector<2x16x64xf32> to vector<2x16x32xf32>
    %37 = arith.negf %36 : vector<2x16x32xf32>
    %38 = math.exp %37 : vector<2x16x32xf32>
    %cst_20 = arith.constant 1.000000e+00 : f32
    %39 = vector.broadcast %cst_20 : f32 to vector<2x16x32xf32>
    %40 = arith.addf %39, %38 : vector<2x16x32xf32>
    %41 = arith.divf %39, %40 : vector<2x16x32xf32>
    %42 = arith.mulf %41, %35 : vector<2x16x32xf32>
    %cst_21 = arith.constant 1.000000e+00 : f32
    %43 = vector.broadcast %cst_21 : f32 to vector<2x16x32xf32>
    %44 = arith.subf %43, %41 : vector<2x16x32xf32>
    %45 = arith.mulf %44, %0 : vector<2x16x32xf32>
    %46 = arith.addf %42, %45 : vector<2x16x32xf32>
    %c0_22 = arith.constant 0 : index
    %c0_23 = arith.constant 0 : index
    %c0_24 = arith.constant 0 : index
    %47 = vector.load %arg5[%c0_22, %c0_23, %c0_24] : memref<2x16x32xf32, #tpu.memory_space<vmem>>, vector<2x16x32xf32>
    tpu.vector_store %arg5[%c0_22, %c0_23, %c0_24], %46 {strides = array<i32>} : memref<2x16x32xf32, #tpu.memory_space<vmem>>, vector<2x16x32xf32>,
    return
  }
}

module attributes {stable_mosaic.version = 11 : i64} {
  func.func @_linear_kernel(%arg0: memref<32x32xf32, #tpu.memory_space<vmem>>, %arg1: memref<32x96xbf16, #tpu.memory_space<vmem>>, %arg2: memref<1x96xf32, #tpu.memory_space<vmem>>, %arg3: memref<32x96xf32, #tpu.memory_space<vmem>>) attributes {dimension_semantics = [], scalar_prefetch = 0 : i64, scratch_operands = 0 : i64, tpu.core_type = #tpu.core_type<tc>} {
    %c0 = arith.constant 0 : index
    %c0_0 = arith.constant 0 : index
    %0 = vector.load %arg0[%c0, %c0_0] : memref<32x32xf32, #tpu.memory_space<vmem>>, vector<32x32xf32>
    %1 = arith.truncf %0 : vector<32x32xf32> to vector<32x32xbf16>
    %c0_1 = arith.constant 0 : index
    %c0_2 = arith.constant 0 : index
    %2 = vector.load %arg1[%c0_1, %c0_2] : memref<32x96xbf16, #tpu.memory_space<vmem>>, vector<32x96xbf16>
    %cst = arith.constant dense<0.000000e+00> : vector<32x96xf32>
    %3 = tpu.matmul %1, %2, %cst {dimension_numbers = #tpu.dot_dimension_numbers<[1], [0], [0], [1], [0, 0, 1, 1], [], []>} : vector<32x32xbf16>, vector<32x96xbf16>, vector<32x96xf32> -> vector<32x96xf32>
    %c0_3 = arith.constant 0 : index
    %c0_4 = arith.constant 0 : index
    %4 = vector.load %arg2[%c0_3, %c0_4] : memref<1x96xf32, #tpu.memory_space<vmem>>, vector<1x96xf32>
    %5 = vector.broadcast %4 : vector<1x96xf32> to vector<32x96xf32>
    %6 = arith.addf %3, %5 : vector<32x96xf32>
    %c0_5 = arith.constant 0 : index
    %c0_6 = arith.constant 0 : index
    %7 = vector.load %arg3[%c0_5, %c0_6] : memref<32x96xf32, #tpu.memory_space<vmem>>, vector<32x96xf32>
    tpu.vector_store %arg3[%c0_5, %c0_6], %6 {strides = array<i32>} : memref<32x96xf32, #tpu.memory_space<vmem>>, vector<32x96xf32>,
    return
  }
}

module attributes {stable_mosaic.version = 11 : i64} {
  func.func @_bigru_kernel(%arg0: memref<16x2x96xf32, #tpu.memory_space<vmem>>, %arg1: memref<16x2x32xf32, #tpu.memory_space<vmem>>, %arg2: memref<32x96xbf16, #tpu.memory_space<vmem>>, %arg3: memref<1x96xf32, #tpu.memory_space<vmem>>, %arg4: memref<16x2x32xf32, #tpu.memory_space<vmem>>, %arg5: memref<2x32xf32, #tpu.memory_space<vmem>>) attributes {dimension_semantics = [], scalar_prefetch = 0 : i64, scratch_operands = 1 : i64, tpu.core_type = #tpu.core_type<tc>} {
    %cst = arith.constant 0.000000e+00 : f32
    %0 = vector.broadcast %cst : f32 to vector<2x32xf32>
    %c0 = arith.constant 0 : index
    %c0_0 = arith.constant 0 : index
    %1 = vector.load %arg5[%c0, %c0_0] : memref<2x32xf32, #tpu.memory_space<vmem>>, vector<2x32xf32>
    tpu.vector_store %arg5[%c0, %c0_0], %0 {strides = array<i32>} : memref<2x32xf32, #tpu.memory_space<vmem>>, vector<2x32xf32>,
    %c0_1 = arith.constant 0 : index
    %c0_2 = arith.constant 0 : index
    %2 = vector.load %arg2[%c0_1, %c0_2] : memref<32x96xbf16, #tpu.memory_space<vmem>>, vector<32x96xbf16>
    %c0_3 = arith.constant 0 : index
    %c0_4 = arith.constant 0 : index
    %3 = vector.load %arg3[%c0_3, %c0_4] : memref<1x96xf32, #tpu.memory_space<vmem>>, vector<1x96xf32>
    %c0_i32 = arith.constant 0 : i32
    %c0_5 = arith.constant 0 : index
    %c0_6 = arith.constant 0 : index
    %4 = vector.load %arg5[%c0_5, %c0_6] : memref<2x32xf32, #tpu.memory_space<vmem>>, vector<2x32xf32>
    %5 = arith.index_cast %c0_i32 : i32 to index
    %c0_7 = arith.constant 0 : index
    %c0_8 = arith.constant 0 : index
    %6 = vector.load %arg0[%5, %c0_7, %c0_8] : memref<16x2x96xf32, #tpu.memory_space<vmem>>, vector<1x2x96xf32>
    %7 = vector.shape_cast %6 : vector<1x2x96xf32> to vector<2x96xf32>
    %8 = arith.index_cast %c0_i32 : i32 to index
    %c0_9 = arith.constant 0 : index
    %c0_10 = arith.constant 0 : index
    %9 = vector.load %arg1[%8, %c0_9, %c0_10] : memref<16x2x32xf32, #tpu.memory_space<vmem>>, vector<1x2x32xf32>
    %10 = vector.shape_cast %9 : vector<1x2x32xf32> to vector<2x32xf32>
    %11 = arith.truncf %4 : vector<2x32xf32> to vector<2x32xbf16>
    %cst_11 = arith.constant dense<0.000000e+00> : vector<2x96xf32>
    %12 = tpu.matmul %11, %2, %cst_11 {dimension_numbers = #tpu.dot_dimension_numbers<[1], [0], [0], [1], [0, 0, 1, 1], [], []>} : vector<2x32xbf16>, vector<32x96xbf16>, vector<2x96xf32> -> vector<2x96xf32>
    %13 = vector.broadcast %3 : vector<1x96xf32> to vector<2x96xf32>
    %14 = arith.addf %12, %13 : vector<2x96xf32>
    %15 = vector.extract_strided_slice %7 {offsets = [0, 0], sizes = [2, 32], strides = [1, 1]} : vector<2x96xf32> to vector<2x32xf32>
    %16 = vector.extract_strided_slice %14 {offsets = [0, 0], sizes = [2, 32], strides = [1, 1]} : vector<2x96xf32> to vector<2x32xf32>
    %17 = arith.addf %15, %16 : vector<2x32xf32>
    %18 = arith.negf %17 : vector<2x32xf32>
    %19 = math.exp %18 : vector<2x32xf32>
    %cst_12 = arith.constant 1.000000e+00 : f32
    %20 = vector.broadcast %cst_12 : f32 to vector<2x32xf32>
    %21 = arith.addf %20, %19 : vector<2x32xf32>
    %22 = arith.divf %20, %21 : vector<2x32xf32>
    %23 = vector.extract_strided_slice %7 {offsets = [0, 32], sizes = [2, 32], strides = [1, 1]} : vector<2x96xf32> to vector<2x32xf32>
    %24 = vector.extract_strided_slice %14 {offsets = [0, 32], sizes = [2, 32], strides = [1, 1]} : vector<2x96xf32> to vector<2x32xf32>
    %25 = arith.addf %23, %24 : vector<2x32xf32>
    %26 = arith.negf %25 : vector<2x32xf32>
    %27 = math.exp %26 : vector<2x32xf32>
    %cst_13 = arith.constant 1.000000e+00 : f32
    %28 = vector.broadcast %cst_13 : f32 to vector<2x32xf32>
    %29 = arith.addf %28, %27 : vector<2x32xf32>
    %30 = arith.divf %28, %29 : vector<2x32xf32>
    %31 = vector.extract_strided_slice %7 {offsets = [0, 64], sizes = [2, 32], strides = [1, 1]} : vector<2x96xf32> to vector<2x32xf32>
    %32 = vector.extract_strided_slice %14 {offsets = [0, 64], sizes = [2, 32], strides = [1, 1]} : vector<2x96xf32> to vector<2x32xf32>
    %33 = arith.mulf %22, %32 : vector<2x32xf32>
    %34 = arith.addf %31, %33 : vector<2x32xf32>
    %35 = math.tanh %34 : vector<2x32xf32>
    %cst_14 = arith.constant 1.000000e+00 : f32
    %36 = vector.broadcast %cst_14 : f32 to vector<2x32xf32>
    %37 = arith.subf %36, %30 : vector<2x32xf32>
    %38 = arith.mulf %37, %35 : vector<2x32xf32>
    %39 = arith.mulf %30, %4 : vector<2x32xf32>
    %40 = arith.addf %38, %39 : vector<2x32xf32>
    %cst_15 = arith.constant 0.000000e+00 : f32
    %41 = vector.broadcast %cst_15 : f32 to vector<2x32xf32>
    %42 = arith.cmpf ogt, %10, %41 : vector<2x32xf32>
    %43 = arith.select %42, %40, %4 : vector<2x32xi1>, vector<2x32xf32>
    %c0_16 = arith.constant 0 : index
    %c0_17 = arith.constant 0 : index
    %44 = vector.load %arg5[%c0_16, %c0_17] : memref<2x32xf32, #tpu.memory_space<vmem>>, vector<2x32xf32>
    tpu.vector_store %arg5[%c0_16, %c0_17], %43 {strides = array<i32>} : memref<2x32xf32, #tpu.memory_space<vmem>>, vector<2x32xf32>,
    %cst_18 = arith.constant 0.000000e+00 : f32
    %45 = vector.broadcast %cst_18 : f32 to vector<2x32xf32>
    %46 = arith.cmpf ogt, %10, %45 : vector<2x32xf32>
    %cst_19 = arith.constant 0.000000e+00 : f32
    %47 = vector.broadcast %cst_19 : f32 to vector<2x32xf32>
    %48 = arith.select %46, %40, %47 : vector<2x32xi1>, vector<2x32xf32>
    %49 = arith.index_cast %c0_i32 : i32 to index
    %c0_20 = arith.constant 0 : index
    %c0_21 = arith.constant 0 : index
    %50 = vector.load %arg4[%49, %c0_20, %c0_21] : memref<16x2x32xf32, #tpu.memory_space<vmem>>, vector<1x2x32xf32>
    %51 = vector.shape_cast %50 : vector<1x2x32xf32> to vector<2x32xf32>
    %52 = vector.shape_cast %48 : vector<2x32xf32> to vector<1x2x32xf32>
    tpu.vector_store %arg4[%49, %c0_20, %c0_21], %52 {strides = array<i32>} : memref<16x2x32xf32, #tpu.memory_space<vmem>>, vector<1x2x32xf32>,
    %c1_i32 = arith.constant 1 : i32
    %c0_22 = arith.constant 0 : index
    %c0_23 = arith.constant 0 : index
    %53 = vector.load %arg5[%c0_22, %c0_23] : memref<2x32xf32, #tpu.memory_space<vmem>>, vector<2x32xf32>
    %54 = arith.index_cast %c1_i32 : i32 to index
    %c0_24 = arith.constant 0 : index
    %c0_25 = arith.constant 0 : index
    %55 = vector.load %arg0[%54, %c0_24, %c0_25] : memref<16x2x96xf32, #tpu.memory_space<vmem>>, vector<1x2x96xf32>
    %56 = vector.shape_cast %55 : vector<1x2x96xf32> to vector<2x96xf32>
    %57 = arith.index_cast %c1_i32 : i32 to index
    %c0_26 = arith.constant 0 : index
    %c0_27 = arith.constant 0 : index
    %58 = vector.load %arg1[%57, %c0_26, %c0_27] : memref<16x2x32xf32, #tpu.memory_space<vmem>>, vector<1x2x32xf32>
    %59 = vector.shape_cast %58 : vector<1x2x32xf32> to vector<2x32xf32>
    %60 = arith.truncf %53 : vector<2x32xf32> to vector<2x32xbf16>
    %cst_28 = arith.constant dense<0.000000e+00> : vector<2x96xf32>
    %61 = tpu.matmul %60, %2, %cst_28 {dimension_numbers = #tpu.dot_dimension_numbers<[1], [0], [0], [1], [0, 0, 1, 1], [], []>} : vector<2x32xbf16>, vector<32x96xbf16>, vector<2x96xf32> -> vector<2x96xf32>
    %62 = vector.broadcast %3 : vector<1x96xf32> to vector<2x96xf32>
    %63 = arith.addf %61, %62 : vector<2x96xf32>
    %64 = vector.extract_strided_slice %56 {offsets = [0, 0], sizes = [2, 32], strides = [1, 1]} : vector<2x96xf32> to vector<2x32xf32>
    %65 = vector.extract_strided_slice %63 {offsets = [0, 0], sizes = [2, 32], strides = [1, 1]} : vector<2x96xf32> to vector<2x32xf32>
    %66 = arith.addf %64, %65 : vector<2x32xf32>
    %67 = arith.negf %66 : vector<2x32xf32>
    %68 = math.exp %67 : vector<2x32xf32>
    %cst_29 = arith.constant 1.000000e+00 : f32
    %69 = vector.broadcast %cst_29 : f32 to vector<2x32xf32>
    %70 = arith.addf %69, %68 : vector<2x32xf32>
    %71 = arith.divf %69, %70 : vector<2x32xf32>
    %72 = vector.extract_strided_slice %56 {offsets = [0, 32], sizes = [2, 32], strides = [1, 1]} : vector<2x96xf32> to vector<2x32xf32>
    %73 = vector.extract_strided_slice %63 {offsets = [0, 32], sizes = [2, 32], strides = [1, 1]} : vector<2x96xf32> to vector<2x32xf32>
    %74 = arith.addf %72, %73 : vector<2x32xf32>
    %75 = arith.negf %74 : vector<2x32xf32>
    %76 = math.exp %75 : vector<2x32xf32>
    %cst_30 = arith.constant 1.000000e+00 : f32
    %77 = vector.broadcast %cst_30 : f32 to vector<2x32xf32>
    %78 = arith.addf %77, %76 : vector<2x32xf32>
    %79 = arith.divf %77, %78 : vector<2x32xf32>
    %80 = vector.extract_strided_slice %56 {offsets = [0, 64], sizes = [2, 32], strides = [1, 1]} : vector<2x96xf32> to vector<2x32xf32>
    %81 = vector.extract_strided_slice %63 {offsets = [0, 64], sizes = [2, 32], strides = [1, 1]} : vector<2x96xf32> to vector<2x32xf32>
    %82 = arith.mulf %71, %81 : vector<2x32xf32>
    %83 = arith.addf %80, %82 : vector<2x32xf32>
    %84 = math.tanh %83 : vector<2x32xf32>
    %cst_31 = arith.constant 1.000000e+00 : f32
    %85 = vector.broadcast %cst_31 : f32 to vector<2x32xf32>
    %86 = arith.subf %85, %79 : vector<2x32xf32>
    %87 = arith.mulf %86, %84 : vector<2x32xf32>
    %88 = arith.mulf %79, %53 : vector<2x32xf32>
    %89 = arith.addf %87, %88 : vector<2x32xf32>
    %cst_32 = arith.constant 0.000000e+00 : f32
    %90 = vector.broadcast %cst_32 : f32 to vector<2x32xf32>
    %91 = arith.cmpf ogt, %59, %90 : vector<2x32xf32>
    %92 = arith.select %91, %89, %53 : vector<2x32xi1>, vector<2x32xf32>
    %c0_33 = arith.constant 0 : index
    %c0_34 = arith.constant 0 : index
    %93 = vector.load %arg5[%c0_33, %c0_34] : memref<2x32xf32, #tpu.memory_space<vmem>>, vector<2x32xf32>
    tpu.vector_store %arg5[%c0_33, %c0_34], %92 {strides = array<i32>} : memref<2x32xf32, #tpu.memory_space<vmem>>, vector<2x32xf32>,
    %cst_35 = arith.constant 0.000000e+00 : f32
    %94 = vector.broadcast %cst_35 : f32 to vector<2x32xf32>
    %95 = arith.cmpf ogt, %59, %94 : vector<2x32xf32>
    %cst_36 = arith.constant 0.000000e+00 : f32
    %96 = vector.broadcast %cst_36 : f32 to vector<2x32xf32>
    %97 = arith.select %95, %89, %96 : vector<2x32xi1>, vector<2x32xf32>
    %98 = arith.index_cast %c1_i32 : i32 to index
    %c0_37 = arith.constant 0 : index
    %c0_38 = arith.constant 0 : index
    %99 = vector.load %arg4[%98, %c0_37, %c0_38] : memref<16x2x32xf32, #tpu.memory_space<vmem>>, vector<1x2x32xf32>
    %100 = vector.shape_cast %99 : vector<1x2x32xf32> to vector<2x32xf32>
    %101 = vector.shape_cast %97 : vector<2x32xf32> to vector<1x2x32xf32>
    tpu.vector_store %arg4[%98, %c0_37, %c0_38], %101 {strides = array<i32>} : memref<16x2x32xf32, #tpu.memory_space<vmem>>, vector<1x2x32xf32>,
    %c2_i32 = arith.constant 2 : i32
    %c0_39 = arith.constant 0 : index
    %c0_40 = arith.constant 0 : index
    %102 = vector.load %arg5[%c0_39, %c0_40] : memref<2x32xf32, #tpu.memory_space<vmem>>, vector<2x32xf32>
    %103 = arith.index_cast %c2_i32 : i32 to index
    %c0_41 = arith.constant 0 : index
    %c0_42 = arith.constant 0 : index
    %104 = vector.load %arg0[%103, %c0_41, %c0_42] : memref<16x2x96xf32, #tpu.memory_space<vmem>>, vector<1x2x96xf32>
    %105 = vector.shape_cast %104 : vector<1x2x96xf32> to vector<2x96xf32>
    %106 = arith.index_cast %c2_i32 : i32 to index
    %c0_43 = arith.constant 0 : index
    %c0_44 = arith.constant 0 : index
    %107 = vector.load %arg1[%106, %c0_43, %c0_44] : memref<16x2x32xf32, #tpu.memory_space<vmem>>, vector<1x2x32xf32>
    %108 = vector.shape_cast %107 : vector<1x2x32xf32> to vector<2x32xf32>
    %109 = arith.truncf %102 : vector<2x32xf32> to vector<2x32xbf16>
    %cst_45 = arith.constant dense<0.000000e+00> : vector<2x96xf32>
    %110 = tpu.matmul %109, %2, %cst_45 {dimension_numbers = #tpu.dot_dimension_numbers<[1], [0], [0], [1], [0, 0, 1, 1], [], []>} : vector<2x32xbf16>, vector<32x96xbf16>, vector<2x96xf32> -> vector<2x96xf32>
    %111 = vector.broadcast %3 : vector<1x96xf32> to vector<2x96xf32>
    %112 = arith.addf %110, %111 : vector<2x96xf32>
    %113 = vector.extract_strided_slice %105 {offsets = [0, 0], sizes = [2, 32], strides = [1, 1]} : vector<2x96xf32> to vector<2x32xf32>
    %114 = vector.extract_strided_slice %112 {offsets = [0, 0], sizes = [2, 32], strides = [1, 1]} : vector<2x96xf32> to vector<2x32xf32>
    %115 = arith.addf %113, %114 : vector<2x32xf32>
    %116 = arith.negf %115 : vector<2x32xf32>
    %117 = math.exp %116 : vector<2x32xf32>
    %cst_46 = arith.constant 1.000000e+00 : f32
    %118 = vector.broadcast %cst_46 : f32 to vector<2x32xf32>
    %119 = arith.addf %118, %117 : vector<2x32xf32>
    %120 = arith.divf %118, %119 : vector<2x32xf32>
    %121 = vector.extract_strided_slice %105 {offsets = [0, 32], sizes = [2, 32], strides = [1, 1]} : vector<2x96xf32> to vector<2x32xf32>
    %122 = vector.extract_strided_slice %112 {offsets = [0, 32], sizes = [2, 32], strides = [1, 1]} : vector<2x96xf32> to vector<2x32xf32>
    %123 = arith.addf %121, %122 : vector<2x32xf32>
    %124 = arith.negf %123 : vector<2x32xf32>
    %125 = math.exp %124 : vector<2x32xf32>
    %cst_47 = arith.constant 1.000000e+00 : f32
    %126 = vector.broadcast %cst_47 : f32 to vector<2x32xf32>
    %127 = arith.addf %126, %125 : vector<2x32xf32>
    %128 = arith.divf %126, %127 : vector<2x32xf32>
    %129 = vector.extract_strided_slice %105 {offsets = [0, 64], sizes = [2, 32], strides = [1, 1]} : vector<2x96xf32> to vector<2x32xf32>
    %130 = vector.extract_strided_slice %112 {offsets = [0, 64], sizes = [2, 32], strides = [1, 1]} : vector<2x96xf32> to vector<2x32xf32>
    %131 = arith.mulf %120, %130 : vector<2x32xf32>
    %132 = arith.addf %129, %131 : vector<2x32xf32>
    %133 = math.tanh %132 : vector<2x32xf32>
    %cst_48 = arith.constant 1.000000e+00 : f32
    %134 = vector.broadcast %cst_48 : f32 to vector<2x32xf32>
    %135 = arith.subf %134, %128 : vector<2x32xf32>
    %136 = arith.mulf %135, %133 : vector<2x32xf32>
    %137 = arith.mulf %128, %102 : vector<2x32xf32>
    %138 = arith.addf %136, %137 : vector<2x32xf32>
    %cst_49 = arith.constant 0.000000e+00 : f32
    %139 = vector.broadcast %cst_49 : f32 to vector<2x32xf32>
    %140 = arith.cmpf ogt, %108, %139 : vector<2x32xf32>
    %141 = arith.select %140, %138, %102 : vector<2x32xi1>, vector<2x32xf32>
    %c0_50 = arith.constant 0 : index
    %c0_51 = arith.constant 0 : index
    %142 = vector.load %arg5[%c0_50, %c0_51] : memref<2x32xf32, #tpu.memory_space<vmem>>, vector<2x32xf32>
    tpu.vector_store %arg5[%c0_50, %c0_51], %141 {strides = array<i32>} : memref<2x32xf32, #tpu.memory_space<vmem>>, vector<2x32xf32>,
    %cst_52 = arith.constant 0.000000e+00 : f32
    %143 = vector.broadcast %cst_52 : f32 to vector<2x32xf32>
    %144 = arith.cmpf ogt, %108, %143 : vector<2x32xf32>
    %cst_53 = arith.constant 0.000000e+00 : f32
    %145 = vector.broadcast %cst_53 : f32 to vector<2x32xf32>
    %146 = arith.select %144, %138, %145 : vector<2x32xi1>, vector<2x32xf32>
    %147 = arith.index_cast %c2_i32 : i32 to index
    %c0_54 = arith.constant 0 : index
    %c0_55 = arith.constant 0 : index
    %148 = vector.load %arg4[%147, %c0_54, %c0_55] : memref<16x2x32xf32, #tpu.memory_space<vmem>>, vector<1x2x32xf32>
    %149 = vector.shape_cast %148 : vector<1x2x32xf32> to vector<2x32xf32>
    %150 = vector.shape_cast %146 : vector<2x32xf32> to vector<1x2x32xf32>
    tpu.vector_store %arg4[%147, %c0_54, %c0_55], %150 {strides = array<i32>} : memref<16x2x32xf32, #tpu.memory_space<vmem>>, vector<1x2x32xf32>,
    %c3_i32 = arith.constant 3 : i32
    %c0_56 = arith.constant 0 : index
    %c0_57 = arith.constant 0 : index
    %151 = vector.load %arg5[%c0_56, %c0_57] : memref<2x32xf32, #tpu.memory_space<vmem>>, vector<2x32xf32>
    %152 = arith.index_cast %c3_i32 : i32 to index
    %c0_58 = arith.constant 0 : index
    %c0_59 = arith.constant 0 : index
    %153 = vector.load %arg0[%152, %c0_58, %c0_59] : memref<16x2x96xf32, #tpu.memory_space<vmem>>, vector<1x2x96xf32>
    %154 = vector.shape_cast %153 : vector<1x2x96xf32> to vector<2x96xf32>
    %155 = arith.index_cast %c3_i32 : i32 to index
    %c0_60 = arith.constant 0 : index
    %c0_61 = arith.constant 0 : index
    %156 = vector.load %arg1[%155, %c0_60, %c0_61] : memref<16x2x32xf32, #tpu.memory_space<vmem>>, vector<1x2x32xf32>
    %157 = vector.shape_cast %156 : vector<1x2x32xf32> to vector<2x32xf32>
    %158 = arith.truncf %151 : vector<2x32xf32> to vector<2x32xbf16>
    %cst_62 = arith.constant dense<0.000000e+00> : vector<2x96xf32>
    %159 = tpu.matmul %158, %2, %cst_62 {dimension_numbers = #tpu.dot_dimension_numbers<[1], [0], [0], [1], [0, 0, 1, 1], [], []>} : vector<2x32xbf16>, vector<32x96xbf16>, vector<2x96xf32> -> vector<2x96xf32>
    %160 = vector.broadcast %3 : vector<1x96xf32> to vector<2x96xf32>
    %161 = arith.addf %159, %160 : vector<2x96xf32>
    %162 = vector.extract_strided_slice %154 {offsets = [0, 0], sizes = [2, 32], strides = [1, 1]} : vector<2x96xf32> to vector<2x32xf32>
    %163 = vector.extract_strided_slice %161 {offsets = [0, 0], sizes = [2, 32], strides = [1, 1]} : vector<2x96xf32> to vector<2x32xf32>
    %164 = arith.addf %162, %163 : vector<2x32xf32>
    %165 = arith.negf %164 : vector<2x32xf32>
    %166 = math.exp %165 : vector<2x32xf32>
    %cst_63 = arith.constant 1.000000e+00 : f32
    %167 = vector.broadcast %cst_63 : f32 to vector<2x32xf32>
    %168 = arith.addf %167, %166 : vector<2x32xf32>
    %169 = arith.divf %167, %168 : vector<2x32xf32>
    %170 = vector.extract_strided_slice %154 {offsets = [0, 32], sizes = [2, 32], strides = [1, 1]} : vector<2x96xf32> to vector<2x32xf32>
    %171 = vector.extract_strided_slice %161 {offsets = [0, 32], sizes = [2, 32], strides = [1, 1]} : vector<2x96xf32> to vector<2x32xf32>
    %172 = arith.addf %170, %171 : vector<2x32xf32>
    %173 = arith.negf %172 : vector<2x32xf32>
    %174 = math.exp %173 : vector<2x32xf32>
    %cst_64 = arith.constant 1.000000e+00 : f32
    %175 = vector.broadcast %cst_64 : f32 to vector<2x32xf32>
    %176 = arith.addf %175, %174 : vector<2x32xf32>
    %177 = arith.divf %175, %176 : vector<2x32xf32>
    %178 = vector.extract_strided_slice %154 {offsets = [0, 64], sizes = [2, 32], strides = [1, 1]} : vector<2x96xf32> to vector<2x32xf32>
    %179 = vector.extract_strided_slice %161 {offsets = [0, 64], sizes = [2, 32], strides = [1, 1]} : vector<2x96xf32> to vector<2x32xf32>
    %180 = arith.mulf %169, %179 : vector<2x32xf32>
    %181 = arith.addf %178, %180 : vector<2x32xf32>
    %182 = math.tanh %181 : vector<2x32xf32>
    %cst_65 = arith.constant 1.000000e+00 : f32
    %183 = vector.broadcast %cst_65 : f32 to vector<2x32xf32>
    %184 = arith.subf %183, %177 : vector<2x32xf32>
    %185 = arith.mulf %184, %182 : vector<2x32xf32>
    %186 = arith.mulf %177, %151 : vector<2x32xf32>
    %187 = arith.addf %185, %186 : vector<2x32xf32>
    %cst_66 = arith.constant 0.000000e+00 : f32
    %188 = vector.broadcast %cst_66 : f32 to vector<2x32xf32>
    %189 = arith.cmpf ogt, %157, %188 : vector<2x32xf32>
    %190 = arith.select %189, %187, %151 : vector<2x32xi1>, vector<2x32xf32>
    %c0_67 = arith.constant 0 : index
    %c0_68 = arith.constant 0 : index
    %191 = vector.load %arg5[%c0_67, %c0_68] : memref<2x32xf32, #tpu.memory_space<vmem>>, vector<2x32xf32>
    tpu.vector_store %arg5[%c0_67, %c0_68], %190 {strides = array<i32>} : memref<2x32xf32, #tpu.memory_space<vmem>>, vector<2x32xf32>,
    %cst_69 = arith.constant 0.000000e+00 : f32
    %192 = vector.broadcast %cst_69 : f32 to vector<2x32xf32>
    %193 = arith.cmpf ogt, %157, %192 : vector<2x32xf32>
    %cst_70 = arith.constant 0.000000e+00 : f32
    %194 = vector.broadcast %cst_70 : f32 to vector<2x32xf32>
    %195 = arith.select %193, %187, %194 : vector<2x32xi1>, vector<2x32xf32>
    %196 = arith.index_cast %c3_i32 : i32 to index
    %c0_71 = arith.constant 0 : index
    %c0_72 = arith.constant 0 : index
    %197 = vector.load %arg4[%196, %c0_71, %c0_72] : memref<16x2x32xf32, #tpu.memory_space<vmem>>, vector<1x2x32xf32>
    %198 = vector.shape_cast %197 : vector<1x2x32xf32> to vector<2x32xf32>
    %199 = vector.shape_cast %195 : vector<2x32xf32> to vector<1x2x32xf32>
    tpu.vector_store %arg4[%196, %c0_71, %c0_72], %199 {strides = array<i32>} : memref<16x2x32xf32, #tpu.memory_space<vmem>>, vector<1x2x32xf32>,
    %c4_i32 = arith.constant 4 : i32
    %c0_73 = arith.constant 0 : index
    %c0_74 = arith.constant 0 : index
    %200 = vector.load %arg5[%c0_73, %c0_74] : memref<2x32xf32, #tpu.memory_space<vmem>>, vector<2x32xf32>
    %201 = arith.index_cast %c4_i32 : i32 to index
    %c0_75 = arith.constant 0 : index
    %c0_76 = arith.constant 0 : index
    %202 = vector.load %arg0[%201, %c0_75, %c0_76] : memref<16x2x96xf32, #tpu.memory_space<vmem>>, vector<1x2x96xf32>
    %203 = vector.shape_cast %202 : vector<1x2x96xf32> to vector<2x96xf32>
    %204 = arith.index_cast %c4_i32 : i32 to index
    %c0_77 = arith.constant 0 : index
    %c0_78 = arith.constant 0 : index
    %205 = vector.load %arg1[%204, %c0_77, %c0_78] : memref<16x2x32xf32, #tpu.memory_space<vmem>>, vector<1x2x32xf32>
    %206 = vector.shape_cast %205 : vector<1x2x32xf32> to vector<2x32xf32>
    %207 = arith.truncf %200 : vector<2x32xf32> to vector<2x32xbf16>
    %cst_79 = arith.constant dense<0.000000e+00> : vector<2x96xf32>
    %208 = tpu.matmul %207, %2, %cst_79 {dimension_numbers = #tpu.dot_dimension_numbers<[1], [0], [0], [1], [0, 0, 1, 1], [], []>} : vector<2x32xbf16>, vector<32x96xbf16>, vector<2x96xf32> -> vector<2x96xf32>
    %209 = vector.broadcast %3 : vector<1x96xf32> to vector<2x96xf32>
    %210 = arith.addf %208, %209 : vector<2x96xf32>
    %211 = vector.extract_strided_slice %203 {offsets = [0, 0], sizes = [2, 32], strides = [1, 1]} : vector<2x96xf32> to vector<2x32xf32>
    %212 = vector.extract_strided_slice %210 {offsets = [0, 0], sizes = [2, 32], strides = [1, 1]} : vector<2x96xf32> to vector<2x32xf32>
    %213 = arith.addf %211, %212 : vector<2x32xf32>
    %214 = arith.negf %213 : vector<2x32xf32>
    %215 = math.exp %214 : vector<2x32xf32>
    %cst_80 = arith.constant 1.000000e+00 : f32
    %216 = vector.broadcast %cst_80 : f32 to vector<2x32xf32>
    %217 = arith.addf %216, %215 : vector<2x32xf32>
    %218 = arith.divf %216, %217 : vector<2x32xf32>
    %219 = vector.extract_strided_slice %203 {offsets = [0, 32], sizes = [2, 32], strides = [1, 1]} : vector<2x96xf32> to vector<2x32xf32>
    %220 = vector.extract_strided_slice %210 {offsets = [0, 32], sizes = [2, 32], strides = [1, 1]} : vector<2x96xf32> to vector<2x32xf32>
    %221 = arith.addf %219, %220 : vector<2x32xf32>
    %222 = arith.negf %221 : vector<2x32xf32>
    %223 = math.exp %222 : vector<2x32xf32>
    %cst_81 = arith.constant 1.000000e+00 : f32
    %224 = vector.broadcast %cst_81 : f32 to vector<2x32xf32>
    %225 = arith.addf %224, %223 : vector<2x32xf32>
    %226 = arith.divf %224, %225 : vector<2x32xf32>
    %227 = vector.extract_strided_slice %203 {offsets = [0, 64], sizes = [2, 32], strides = [1, 1]} : vector<2x96xf32> to vector<2x32xf32>
    %228 = vector.extract_strided_slice %210 {offsets = [0, 64], sizes = [2, 32], strides = [1, 1]} : vector<2x96xf32> to vector<2x32xf32>
    %229 = arith.mulf %218, %228 : vector<2x32xf32>
    %230 = arith.addf %227, %229 : vector<2x32xf32>
    %231 = math.tanh %230 : vector<2x32xf32>
    %cst_82 = arith.constant 1.000000e+00 : f32
    %232 = vector.broadcast %cst_82 : f32 to vector<2x32xf32>
    %233 = arith.subf %232, %226 : vector<2x32xf32>
    %234 = arith.mulf %233, %231 : vector<2x32xf32>
    %235 = arith.mulf %226, %200 : vector<2x32xf32>
    %236 = arith.addf %234, %235 : vector<2x32xf32>
    %cst_83 = arith.constant 0.000000e+00 : f32
    %237 = vector.broadcast %cst_83 : f32 to vector<2x32xf32>
    %238 = arith.cmpf ogt, %206, %237 : vector<2x32xf32>
    %239 = arith.select %238, %236, %200 : vector<2x32xi1>, vector<2x32xf32>
    %c0_84 = arith.constant 0 : index
    %c0_85 = arith.constant 0 : index
    %240 = vector.load %arg5[%c0_84, %c0_85] : memref<2x32xf32, #tpu.memory_space<vmem>>, vector<2x32xf32>
    tpu.vector_store %arg5[%c0_84, %c0_85], %239 {strides = array<i32>} : memref<2x32xf32, #tpu.memory_space<vmem>>, vector<2x32xf32>,
    %cst_86 = arith.constant 0.000000e+00 : f32
    %241 = vector.broadcast %cst_86 : f32 to vector<2x32xf32>
    %242 = arith.cmpf ogt, %206, %241 : vector<2x32xf32>
    %cst_87 = arith.constant 0.000000e+00 : f32
    %243 = vector.broadcast %cst_87 : f32 to vector<2x32xf32>
    %244 = arith.select %242, %236, %243 : vector<2x32xi1>, vector<2x32xf32>
    %245 = arith.index_cast %c4_i32 : i32 to index
    %c0_88 = arith.constant 0 : index
    %c0_89 = arith.constant 0 : index
    %246 = vector.load %arg4[%245, %c0_88, %c0_89] : memref<16x2x32xf32, #tpu.memory_space<vmem>>, vector<1x2x32xf32>
    %247 = vector.shape_cast %246 : vector<1x2x32xf32> to vector<2x32xf32>
    %248 = vector.shape_cast %244 : vector<2x32xf32> to vector<1x2x32xf32>
    tpu.vector_store %arg4[%245, %c0_88, %c0_89], %248 {strides = array<i32>} : memref<16x2x32xf32, #tpu.memory_space<vmem>>, vector<1x2x32xf32>,
    %c5_i32 = arith.constant 5 : i32
    %c0_90 = arith.constant 0 : index
    %c0_91 = arith.constant 0 : index
    %249 = vector.load %arg5[%c0_90, %c0_91] : memref<2x32xf32, #tpu.memory_space<vmem>>, vector<2x32xf32>
    %250 = arith.index_cast %c5_i32 : i32 to index
    %c0_92 = arith.constant 0 : index
    %c0_93 = arith.constant 0 : index
    %251 = vector.load %arg0[%250, %c0_92, %c0_93] : memref<16x2x96xf32, #tpu.memory_space<vmem>>, vector<1x2x96xf32>
    %252 = vector.shape_cast %251 : vector<1x2x96xf32> to vector<2x96xf32>
    %253 = arith.index_cast %c5_i32 : i32 to index
    %c0_94 = arith.constant 0 : index
    %c0_95 = arith.constant 0 : index
    %254 = vector.load %arg1[%253, %c0_94, %c0_95] : memref<16x2x32xf32, #tpu.memory_space<vmem>>, vector<1x2x32xf32>
    %255 = vector.shape_cast %254 : vector<1x2x32xf32> to vector<2x32xf32>
    %256 = arith.truncf %249 : vector<2x32xf32> to vector<2x32xbf16>
    %cst_96 = arith.constant dense<0.000000e+00> : vector<2x96xf32>
    %257 = tpu.matmul %256, %2, %cst_96 {dimension_numbers = #tpu.dot_dimension_numbers<[1], [0], [0], [1], [0, 0, 1, 1], [], []>} : vector<2x32xbf16>, vector<32x96xbf16>, vector<2x96xf32> -> vector<2x96xf32>
    %258 = vector.broadcast %3 : vector<1x96xf32> to vector<2x96xf32>
    %259 = arith.addf %257, %258 : vector<2x96xf32>
    %260 = vector.extract_strided_slice %252 {offsets = [0, 0], sizes = [2, 32], strides = [1, 1]} : vector<2x96xf32> to vector<2x32xf32>
    %261 = vector.extract_strided_slice %259 {offsets = [0, 0], sizes = [2, 32], strides = [1, 1]} : vector<2x96xf32> to vector<2x32xf32>
    %262 = arith.addf %260, %261 : vector<2x32xf32>
    %263 = arith.negf %262 : vector<2x32xf32>
    %264 = math.exp %263 : vector<2x32xf32>
    %cst_97 = arith.constant 1.000000e+00 : f32
    %265 = vector.broadcast %cst_97 : f32 to vector<2x32xf32>
    %266 = arith.addf %265, %264 : vector<2x32xf32>
    %267 = arith.divf %265, %266 : vector<2x32xf32>
    %268 = vector.extract_strided_slice %252 {offsets = [0, 32], sizes = [2, 32], strides = [1, 1]} : vector<2x96xf32> to vector<2x32xf32>
    %269 = vector.extract_strided_slice %259 {offsets = [0, 32], sizes = [2, 32], strides = [1, 1]} : vector<2x96xf32> to vector<2x32xf32>
    %270 = arith.addf %268, %269 : vector<2x32xf32>
    %271 = arith.negf %270 : vector<2x32xf32>
    %272 = math.exp %271 : vector<2x32xf32>
    %cst_98 = arith.constant 1.000000e+00 : f32
    %273 = vector.broadcast %cst_98 : f32 to vector<2x32xf32>
    %274 = arith.addf %273, %272 : vector<2x32xf32>
    %275 = arith.divf %273, %274 : vector<2x32xf32>
    %276 = vector.extract_strided_slice %252 {offsets = [0, 64], sizes = [2, 32], strides = [1, 1]} : vector<2x96xf32> to vector<2x32xf32>
    %277 = vector.extract_strided_slice %259 {offsets = [0, 64], sizes = [2, 32], strides = [1, 1]} : vector<2x96xf32> to vector<2x32xf32>
    %278 = arith.mulf %267, %277 : vector<2x32xf32>
    %279 = arith.addf %276, %278 : vector<2x32xf32>
    %280 = math.tanh %279 : vector<2x32xf32>
    %cst_99 = arith.constant 1.000000e+00 : f32
    %281 = vector.broadcast %cst_99 : f32 to vector<2x32xf32>
    %282 = arith.subf %281, %275 : vector<2x32xf32>
    %283 = arith.mulf %282, %280 : vector<2x32xf32>
    %284 = arith.mulf %275, %249 : vector<2x32xf32>
    %285 = arith.addf %283, %284 : vector<2x32xf32>
    %cst_100 = arith.constant 0.000000e+00 : f32
    %286 = vector.broadcast %cst_100 : f32 to vector<2x32xf32>
    %287 = arith.cmpf ogt, %255, %286 : vector<2x32xf32>
    %288 = arith.select %287, %285, %249 : vector<2x32xi1>, vector<2x32xf32>
    %c0_101 = arith.constant 0 : index
    %c0_102 = arith.constant 0 : index
    %289 = vector.load %arg5[%c0_101, %c0_102] : memref<2x32xf32, #tpu.memory_space<vmem>>, vector<2x32xf32>
    tpu.vector_store %arg5[%c0_101, %c0_102], %288 {strides = array<i32>} : memref<2x32xf32, #tpu.memory_space<vmem>>, vector<2x32xf32>,
    %cst_103 = arith.constant 0.000000e+00 : f32
    %290 = vector.broadcast %cst_103 : f32 to vector<2x32xf32>
    %291 = arith.cmpf ogt, %255, %290 : vector<2x32xf32>
    %cst_104 = arith.constant 0.000000e+00 : f32
    %292 = vector.broadcast %cst_104 : f32 to vector<2x32xf32>
    %293 = arith.select %291, %285, %292 : vector<2x32xi1>, vector<2x32xf32>
    %294 = arith.index_cast %c5_i32 : i32 to index
    %c0_105 = arith.constant 0 : index
    %c0_106 = arith.constant 0 : index
    %295 = vector.load %arg4[%294, %c0_105, %c0_106] : memref<16x2x32xf32, #tpu.memory_space<vmem>>, vector<1x2x32xf32>
    %296 = vector.shape_cast %295 : vector<1x2x32xf32> to vector<2x32xf32>
    %297 = vector.shape_cast %293 : vector<2x32xf32> to vector<1x2x32xf32>
    tpu.vector_store %arg4[%294, %c0_105, %c0_106], %297 {strides = array<i32>} : memref<16x2x32xf32, #tpu.memory_space<vmem>>, vector<1x2x32xf32>,
    %c6_i32 = arith.constant 6 : i32
    %c0_107 = arith.constant 0 : index
    %c0_108 = arith.constant 0 : index
    %298 = vector.load %arg5[%c0_107, %c0_108] : memref<2x32xf32, #tpu.memory_space<vmem>>, vector<2x32xf32>
    %299 = arith.index_cast %c6_i32 : i32 to index
    %c0_109 = arith.constant 0 : index
    %c0_110 = arith.constant 0 : index
    %300 = vector.load %arg0[%299, %c0_109, %c0_110] : memref<16x2x96xf32, #tpu.memory_space<vmem>>, vector<1x2x96xf32>
    %301 = vector.shape_cast %300 : vector<1x2x96xf32> to vector<2x96xf32>
    %302 = arith.index_cast %c6_i32 : i32 to index
    %c0_111 = arith.constant 0 : index
    %c0_112 = arith.constant 0 : index
    %303 = vector.load %arg1[%302, %c0_111, %c0_112] : memref<16x2x32xf32, #tpu.memory_space<vmem>>, vector<1x2x32xf32>
    %304 = vector.shape_cast %303 : vector<1x2x32xf32> to vector<2x32xf32>
    %305 = arith.truncf %298 : vector<2x32xf32> to vector<2x32xbf16>
    %cst_113 = arith.constant dense<0.000000e+00> : vector<2x96xf32>
    %306 = tpu.matmul %305, %2, %cst_113 {dimension_numbers = #tpu.dot_dimension_numbers<[1], [0], [0], [1], [0, 0, 1, 1], [], []>} : vector<2x32xbf16>, vector<32x96xbf16>, vector<2x96xf32> -> vector<2x96xf32>
    %307 = vector.broadcast %3 : vector<1x96xf32> to vector<2x96xf32>
    %308 = arith.addf %306, %307 : vector<2x96xf32>
    %309 = vector.extract_strided_slice %301 {offsets = [0, 0], sizes = [2, 32], strides = [1, 1]} : vector<2x96xf32> to vector<2x32xf32>
    %310 = vector.extract_strided_slice %308 {offsets = [0, 0], sizes = [2, 32], strides = [1, 1]} : vector<2x96xf32> to vector<2x32xf32>
    %311 = arith.addf %309, %310 : vector<2x32xf32>
    %312 = arith.negf %311 : vector<2x32xf32>
    %313 = math.exp %312 : vector<2x32xf32>
    %cst_114 = arith.constant 1.000000e+00 : f32
    %314 = vector.broadcast %cst_114 : f32 to vector<2x32xf32>
    %315 = arith.addf %314, %313 : vector<2x32xf32>
    %316 = arith.divf %314, %315 : vector<2x32xf32>
    %317 = vector.extract_strided_slice %301 {offsets = [0, 32], sizes = [2, 32], strides = [1, 1]} : vector<2x96xf32> to vector<2x32xf32>
    %318 = vector.extract_strided_slice %308 {offsets = [0, 32], sizes = [2, 32], strides = [1, 1]} : vector<2x96xf32> to vector<2x32xf32>
    %319 = arith.addf %317, %318 : vector<2x32xf32>
    %320 = arith.negf %319 : vector<2x32xf32>
    %321 = math.exp %320 : vector<2x32xf32>
    %cst_115 = arith.constant 1.000000e+00 : f32
    %322 = vector.broadcast %cst_115 : f32 to vector<2x32xf32>
    %323 = arith.addf %322, %321 : vector<2x32xf32>
    %324 = arith.divf %322, %323 : vector<2x32xf32>
    %325 = vector.extract_strided_slice %301 {offsets = [0, 64], sizes = [2, 32], strides = [1, 1]} : vector<2x96xf32> to vector<2x32xf32>
    %326 = vector.extract_strided_slice %308 {offsets = [0, 64], sizes = [2, 32], strides = [1, 1]} : vector<2x96xf32> to vector<2x32xf32>
    %327 = arith.mulf %316, %326 : vector<2x32xf32>
    %328 = arith.addf %325, %327 : vector<2x32xf32>
    %329 = math.tanh %328 : vector<2x32xf32>
    %cst_116 = arith.constant 1.000000e+00 : f32
    %330 = vector.broadcast %cst_116 : f32 to vector<2x32xf32>
    %331 = arith.subf %330, %324 : vector<2x32xf32>
    %332 = arith.mulf %331, %329 : vector<2x32xf32>
    %333 = arith.mulf %324, %298 : vector<2x32xf32>
    %334 = arith.addf %332, %333 : vector<2x32xf32>
    %cst_117 = arith.constant 0.000000e+00 : f32
    %335 = vector.broadcast %cst_117 : f32 to vector<2x32xf32>
    %336 = arith.cmpf ogt, %304, %335 : vector<2x32xf32>
    %337 = arith.select %336, %334, %298 : vector<2x32xi1>, vector<2x32xf32>
    %c0_118 = arith.constant 0 : index
    %c0_119 = arith.constant 0 : index
    %338 = vector.load %arg5[%c0_118, %c0_119] : memref<2x32xf32, #tpu.memory_space<vmem>>, vector<2x32xf32>
    tpu.vector_store %arg5[%c0_118, %c0_119], %337 {strides = array<i32>} : memref<2x32xf32, #tpu.memory_space<vmem>>, vector<2x32xf32>,
    %cst_120 = arith.constant 0.000000e+00 : f32
    %339 = vector.broadcast %cst_120 : f32 to vector<2x32xf32>
    %340 = arith.cmpf ogt, %304, %339 : vector<2x32xf32>
    %cst_121 = arith.constant 0.000000e+00 : f32
    %341 = vector.broadcast %cst_121 : f32 to vector<2x32xf32>
    %342 = arith.select %340, %334, %341 : vector<2x32xi1>, vector<2x32xf32>
    %343 = arith.index_cast %c6_i32 : i32 to index
    %c0_122 = arith.constant 0 : index
    %c0_123 = arith.constant 0 : index
    %344 = vector.load %arg4[%343, %c0_122, %c0_123] : memref<16x2x32xf32, #tpu.memory_space<vmem>>, vector<1x2x32xf32>
    %345 = vector.shape_cast %344 : vector<1x2x32xf32> to vector<2x32xf32>
    %346 = vector.shape_cast %342 : vector<2x32xf32> to vector<1x2x32xf32>
    tpu.vector_store %arg4[%343, %c0_122, %c0_123], %346 {strides = array<i32>} : memref<16x2x32xf32, #tpu.memory_space<vmem>>, vector<1x2x32xf32>,
    %c7_i32 = arith.constant 7 : i32
    %c0_124 = arith.constant 0 : index
    %c0_125 = arith.constant 0 : index
    %347 = vector.load %arg5[%c0_124, %c0_125] : memref<2x32xf32, #tpu.memory_space<vmem>>, vector<2x32xf32>
    %348 = arith.index_cast %c7_i32 : i32 to index
    %c0_126 = arith.constant 0 : index
    %c0_127 = arith.constant 0 : index
    %349 = vector.load %arg0[%348, %c0_126, %c0_127] : memref<16x2x96xf32, #tpu.memory_space<vmem>>, vector<1x2x96xf32>
    %350 = vector.shape_cast %349 : vector<1x2x96xf32> to vector<2x96xf32>
    %351 = arith.index_cast %c7_i32 : i32 to index
    %c0_128 = arith.constant 0 : index
    %c0_129 = arith.constant 0 : index
    %352 = vector.load %arg1[%351, %c0_128, %c0_129] : memref<16x2x32xf32, #tpu.memory_space<vmem>>, vector<1x2x32xf32>
    %353 = vector.shape_cast %352 : vector<1x2x32xf32> to vector<2x32xf32>
    %354 = arith.truncf %347 : vector<2x32xf32> to vector<2x32xbf16>
    %cst_130 = arith.constant dense<0.000000e+00> : vector<2x96xf32>
    %355 = tpu.matmul %354, %2, %cst_130 {dimension_numbers = #tpu.dot_dimension_numbers<[1], [0], [0], [1], [0, 0, 1, 1], [], []>} : vector<2x32xbf16>, vector<32x96xbf16>, vector<2x96xf32> -> vector<2x96xf32>
    %356 = vector.broadcast %3 : vector<1x96xf32> to vector<2x96xf32>
    %357 = arith.addf %355, %356 : vector<2x96xf32>
    %358 = vector.extract_strided_slice %350 {offsets = [0, 0], sizes = [2, 32], strides = [1, 1]} : vector<2x96xf32> to vector<2x32xf32>
    %359 = vector.extract_strided_slice %357 {offsets = [0, 0], sizes = [2, 32], strides = [1, 1]} : vector<2x96xf32> to vector<2x32xf32>
    %360 = arith.addf %358, %359 : vector<2x32xf32>
    %361 = arith.negf %360 : vector<2x32xf32>
    %362 = math.exp %361 : vector<2x32xf32>
    %cst_131 = arith.constant 1.000000e+00 : f32
    %363 = vector.broadcast %cst_131 : f32 to vector<2x32xf32>
    %364 = arith.addf %363, %362 : vector<2x32xf32>
    %365 = arith.divf %363, %364 : vector<2x32xf32>
    %366 = vector.extract_strided_slice %350 {offsets = [0, 32], sizes = [2, 32], strides = [1, 1]} : vector<2x96xf32> to vector<2x32xf32>
    %367 = vector.extract_strided_slice %357 {offsets = [0, 32], sizes = [2, 32], strides = [1, 1]} : vector<2x96xf32> to vector<2x32xf32>
    %368 = arith.addf %366, %367 : vector<2x32xf32>
    %369 = arith.negf %368 : vector<2x32xf32>
    %370 = math.exp %369 : vector<2x32xf32>
    %cst_132 = arith.constant 1.000000e+00 : f32
    %371 = vector.broadcast %cst_132 : f32 to vector<2x32xf32>
    %372 = arith.addf %371, %370 : vector<2x32xf32>
    %373 = arith.divf %371, %372 : vector<2x32xf32>
    %374 = vector.extract_strided_slice %350 {offsets = [0, 64], sizes = [2, 32], strides = [1, 1]} : vector<2x96xf32> to vector<2x32xf32>
    %375 = vector.extract_strided_slice %357 {offsets = [0, 64], sizes = [2, 32], strides = [1, 1]} : vector<2x96xf32> to vector<2x32xf32>
    %376 = arith.mulf %365, %375 : vector<2x32xf32>
    %377 = arith.addf %374, %376 : vector<2x32xf32>
    %378 = math.tanh %377 : vector<2x32xf32>
    %cst_133 = arith.constant 1.000000e+00 : f32
    %379 = vector.broadcast %cst_133 : f32 to vector<2x32xf32>
    %380 = arith.subf %379, %373 : vector<2x32xf32>
    %381 = arith.mulf %380, %378 : vector<2x32xf32>
    %382 = arith.mulf %373, %347 : vector<2x32xf32>
    %383 = arith.addf %381, %382 : vector<2x32xf32>
    %cst_134 = arith.constant 0.000000e+00 : f32
    %384 = vector.broadcast %cst_134 : f32 to vector<2x32xf32>
    %385 = arith.cmpf ogt, %353, %384 : vector<2x32xf32>
    %386 = arith.select %385, %383, %347 : vector<2x32xi1>, vector<2x32xf32>
    %c0_135 = arith.constant 0 : index
    %c0_136 = arith.constant 0 : index
    %387 = vector.load %arg5[%c0_135, %c0_136] : memref<2x32xf32, #tpu.memory_space<vmem>>, vector<2x32xf32>
    tpu.vector_store %arg5[%c0_135, %c0_136], %386 {strides = array<i32>} : memref<2x32xf32, #tpu.memory_space<vmem>>, vector<2x32xf32>,
    %cst_137 = arith.constant 0.000000e+00 : f32
    %388 = vector.broadcast %cst_137 : f32 to vector<2x32xf32>
    %389 = arith.cmpf ogt, %353, %388 : vector<2x32xf32>
    %cst_138 = arith.constant 0.000000e+00 : f32
    %390 = vector.broadcast %cst_138 : f32 to vector<2x32xf32>
    %391 = arith.select %389, %383, %390 : vector<2x32xi1>, vector<2x32xf32>
    %392 = arith.index_cast %c7_i32 : i32 to index
    %c0_139 = arith.constant 0 : index
    %c0_140 = arith.constant 0 : index
    %393 = vector.load %arg4[%392, %c0_139, %c0_140] : memref<16x2x32xf32, #tpu.memory_space<vmem>>, vector<1x2x32xf32>
    %394 = vector.shape_cast %393 : vector<1x2x32xf32> to vector<2x32xf32>
    %395 = vector.shape_cast %391 : vector<2x32xf32> to vector<1x2x32xf32>
    tpu.vector_store %arg4[%392, %c0_139, %c0_140], %395 {strides = array<i32>} : memref<16x2x32xf32, #tpu.memory_space<vmem>>, vector<1x2x32xf32>,
    %c8_i32 = arith.constant 8 : i32
    %c0_141 = arith.constant 0 : index
    %c0_142 = arith.constant 0 : index
    %396 = vector.load %arg5[%c0_141, %c0_142] : memref<2x32xf32, #tpu.memory_space<vmem>>, vector<2x32xf32>
    %397 = arith.index_cast %c8_i32 : i32 to index
    %c0_143 = arith.constant 0 : index
    %c0_144 = arith.constant 0 : index
    %398 = vector.load %arg0[%397, %c0_143, %c0_144] : memref<16x2x96xf32, #tpu.memory_space<vmem>>, vector<1x2x96xf32>
    %399 = vector.shape_cast %398 : vector<1x2x96xf32> to vector<2x96xf32>
    %400 = arith.index_cast %c8_i32 : i32 to index
    %c0_145 = arith.constant 0 : index
    %c0_146 = arith.constant 0 : index
    %401 = vector.load %arg1[%400, %c0_145, %c0_146] : memref<16x2x32xf32, #tpu.memory_space<vmem>>, vector<1x2x32xf32>
    %402 = vector.shape_cast %401 : vector<1x2x32xf32> to vector<2x32xf32>
    %403 = arith.truncf %396 : vector<2x32xf32> to vector<2x32xbf16>
    %cst_147 = arith.constant dense<0.000000e+00> : vector<2x96xf32>
    %404 = tpu.matmul %403, %2, %cst_147 {dimension_numbers = #tpu.dot_dimension_numbers<[1], [0], [0], [1], [0, 0, 1, 1], [], []>} : vector<2x32xbf16>, vector<32x96xbf16>, vector<2x96xf32> -> vector<2x96xf32>
    %405 = vector.broadcast %3 : vector<1x96xf32> to vector<2x96xf32>
    %406 = arith.addf %404, %405 : vector<2x96xf32>
    %407 = vector.extract_strided_slice %399 {offsets = [0, 0], sizes = [2, 32], strides = [1, 1]} : vector<2x96xf32> to vector<2x32xf32>
    %408 = vector.extract_strided_slice %406 {offsets = [0, 0], sizes = [2, 32], strides = [1, 1]} : vector<2x96xf32> to vector<2x32xf32>
    %409 = arith.addf %407, %408 : vector<2x32xf32>
    %410 = arith.negf %409 : vector<2x32xf32>
    %411 = math.exp %410 : vector<2x32xf32>
    %cst_148 = arith.constant 1.000000e+00 : f32
    %412 = vector.broadcast %cst_148 : f32 to vector<2x32xf32>
    %413 = arith.addf %412, %411 : vector<2x32xf32>
    %414 = arith.divf %412, %413 : vector<2x32xf32>
    %415 = vector.extract_strided_slice %399 {offsets = [0, 32], sizes = [2, 32], strides = [1, 1]} : vector<2x96xf32> to vector<2x32xf32>
    %416 = vector.extract_strided_slice %406 {offsets = [0, 32], sizes = [2, 32], strides = [1, 1]} : vector<2x96xf32> to vector<2x32xf32>
    %417 = arith.addf %415, %416 : vector<2x32xf32>
    %418 = arith.negf %417 : vector<2x32xf32>
    %419 = math.exp %418 : vector<2x32xf32>
    %cst_149 = arith.constant 1.000000e+00 : f32
    %420 = vector.broadcast %cst_149 : f32 to vector<2x32xf32>
    %421 = arith.addf %420, %419 : vector<2x32xf32>
    %422 = arith.divf %420, %421 : vector<2x32xf32>
    %423 = vector.extract_strided_slice %399 {offsets = [0, 64], sizes = [2, 32], strides = [1, 1]} : vector<2x96xf32> to vector<2x32xf32>
    %424 = vector.extract_strided_slice %406 {offsets = [0, 64], sizes = [2, 32], strides = [1, 1]} : vector<2x96xf32> to vector<2x32xf32>
    %425 = arith.mulf %414, %424 : vector<2x32xf32>
    %426 = arith.addf %423, %425 : vector<2x32xf32>
    %427 = math.tanh %426 : vector<2x32xf32>
    %cst_150 = arith.constant 1.000000e+00 : f32
    %428 = vector.broadcast %cst_150 : f32 to vector<2x32xf32>
    %429 = arith.subf %428, %422 : vector<2x32xf32>
    %430 = arith.mulf %429, %427 : vector<2x32xf32>
    %431 = arith.mulf %422, %396 : vector<2x32xf32>
    %432 = arith.addf %430, %431 : vector<2x32xf32>
    %cst_151 = arith.constant 0.000000e+00 : f32
    %433 = vector.broadcast %cst_151 : f32 to vector<2x32xf32>
    %434 = arith.cmpf ogt, %402, %433 : vector<2x32xf32>
    %435 = arith.select %434, %432, %396 : vector<2x32xi1>, vector<2x32xf32>
    %c0_152 = arith.constant 0 : index
    %c0_153 = arith.constant 0 : index
    %436 = vector.load %arg5[%c0_152, %c0_153] : memref<2x32xf32, #tpu.memory_space<vmem>>, vector<2x32xf32>
    tpu.vector_store %arg5[%c0_152, %c0_153], %435 {strides = array<i32>} : memref<2x32xf32, #tpu.memory_space<vmem>>, vector<2x32xf32>,
    %cst_154 = arith.constant 0.000000e+00 : f32
    %437 = vector.broadcast %cst_154 : f32 to vector<2x32xf32>
    %438 = arith.cmpf ogt, %402, %437 : vector<2x32xf32>
    %cst_155 = arith.constant 0.000000e+00 : f32
    %439 = vector.broadcast %cst_155 : f32 to vector<2x32xf32>
    %440 = arith.select %438, %432, %439 : vector<2x32xi1>, vector<2x32xf32>
    %441 = arith.index_cast %c8_i32 : i32 to index
    %c0_156 = arith.constant 0 : index
    %c0_157 = arith.constant 0 : index
    %442 = vector.load %arg4[%441, %c0_156, %c0_157] : memref<16x2x32xf32, #tpu.memory_space<vmem>>, vector<1x2x32xf32>
    %443 = vector.shape_cast %442 : vector<1x2x32xf32> to vector<2x32xf32>
    %444 = vector.shape_cast %440 : vector<2x32xf32> to vector<1x2x32xf32>
    tpu.vector_store %arg4[%441, %c0_156, %c0_157], %444 {strides = array<i32>} : memref<16x2x32xf32, #tpu.memory_space<vmem>>, vector<1x2x32xf32>,
    %c9_i32 = arith.constant 9 : i32
    %c0_158 = arith.constant 0 : index
    %c0_159 = arith.constant 0 : index
    %445 = vector.load %arg5[%c0_158, %c0_159] : memref<2x32xf32, #tpu.memory_space<vmem>>, vector<2x32xf32>
    %446 = arith.index_cast %c9_i32 : i32 to index
    %c0_160 = arith.constant 0 : index
    %c0_161 = arith.constant 0 : index
    %447 = vector.load %arg0[%446, %c0_160, %c0_161] : memref<16x2x96xf32, #tpu.memory_space<vmem>>, vector<1x2x96xf32>
    %448 = vector.shape_cast %447 : vector<1x2x96xf32> to vector<2x96xf32>
    %449 = arith.index_cast %c9_i32 : i32 to index
    %c0_162 = arith.constant 0 : index
    %c0_163 = arith.constant 0 : index
    %450 = vector.load %arg1[%449, %c0_162, %c0_163] : memref<16x2x32xf32, #tpu.memory_space<vmem>>, vector<1x2x32xf32>
    %451 = vector.shape_cast %450 : vector<1x2x32xf32> to vector<2x32xf32>
    %452 = arith.truncf %445 : vector<2x32xf32> to vector<2x32xbf16>
    %cst_164 = arith.constant dense<0.000000e+00> : vector<2x96xf32>
    %453 = tpu.matmul %452, %2, %cst_164 {dimension_numbers = #tpu.dot_dimension_numbers<[1], [0], [0], [1], [0, 0, 1, 1], [], []>} : vector<2x32xbf16>, vector<32x96xbf16>, vector<2x96xf32> -> vector<2x96xf32>
    %454 = vector.broadcast %3 : vector<1x96xf32> to vector<2x96xf32>
    %455 = arith.addf %453, %454 : vector<2x96xf32>
    %456 = vector.extract_strided_slice %448 {offsets = [0, 0], sizes = [2, 32], strides = [1, 1]} : vector<2x96xf32> to vector<2x32xf32>
    %457 = vector.extract_strided_slice %455 {offsets = [0, 0], sizes = [2, 32], strides = [1, 1]} : vector<2x96xf32> to vector<2x32xf32>
    %458 = arith.addf %456, %457 : vector<2x32xf32>
    %459 = arith.negf %458 : vector<2x32xf32>
    %460 = math.exp %459 : vector<2x32xf32>
    %cst_165 = arith.constant 1.000000e+00 : f32
    %461 = vector.broadcast %cst_165 : f32 to vector<2x32xf32>
    %462 = arith.addf %461, %460 : vector<2x32xf32>
    %463 = arith.divf %461, %462 : vector<2x32xf32>
    %464 = vector.extract_strided_slice %448 {offsets = [0, 32], sizes = [2, 32], strides = [1, 1]} : vector<2x96xf32> to vector<2x32xf32>
    %465 = vector.extract_strided_slice %455 {offsets = [0, 32], sizes = [2, 32], strides = [1, 1]} : vector<2x96xf32> to vector<2x32xf32>
    %466 = arith.addf %464, %465 : vector<2x32xf32>
    %467 = arith.negf %466 : vector<2x32xf32>
    %468 = math.exp %467 : vector<2x32xf32>
    %cst_166 = arith.constant 1.000000e+00 : f32
    %469 = vector.broadcast %cst_166 : f32 to vector<2x32xf32>
    %470 = arith.addf %469, %468 : vector<2x32xf32>
    %471 = arith.divf %469, %470 : vector<2x32xf32>
    %472 = vector.extract_strided_slice %448 {offsets = [0, 64], sizes = [2, 32], strides = [1, 1]} : vector<2x96xf32> to vector<2x32xf32>
    %473 = vector.extract_strided_slice %455 {offsets = [0, 64], sizes = [2, 32], strides = [1, 1]} : vector<2x96xf32> to vector<2x32xf32>
    %474 = arith.mulf %463, %473 : vector<2x32xf32>
    %475 = arith.addf %472, %474 : vector<2x32xf32>
    %476 = math.tanh %475 : vector<2x32xf32>
    %cst_167 = arith.constant 1.000000e+00 : f32
    %477 = vector.broadcast %cst_167 : f32 to vector<2x32xf32>
    %478 = arith.subf %477, %471 : vector<2x32xf32>
    %479 = arith.mulf %478, %476 : vector<2x32xf32>
    %480 = arith.mulf %471, %445 : vector<2x32xf32>
    %481 = arith.addf %479, %480 : vector<2x32xf32>
    %cst_168 = arith.constant 0.000000e+00 : f32
    %482 = vector.broadcast %cst_168 : f32 to vector<2x32xf32>
    %483 = arith.cmpf ogt, %451, %482 : vector<2x32xf32>
    %484 = arith.select %483, %481, %445 : vector<2x32xi1>, vector<2x32xf32>
    %c0_169 = arith.constant 0 : index
    %c0_170 = arith.constant 0 : index
    %485 = vector.load %arg5[%c0_169, %c0_170] : memref<2x32xf32, #tpu.memory_space<vmem>>, vector<2x32xf32>
    tpu.vector_store %arg5[%c0_169, %c0_170], %484 {strides = array<i32>} : memref<2x32xf32, #tpu.memory_space<vmem>>, vector<2x32xf32>,
    %cst_171 = arith.constant 0.000000e+00 : f32
    %486 = vector.broadcast %cst_171 : f32 to vector<2x32xf32>
    %487 = arith.cmpf ogt, %451, %486 : vector<2x32xf32>
    %cst_172 = arith.constant 0.000000e+00 : f32
    %488 = vector.broadcast %cst_172 : f32 to vector<2x32xf32>
    %489 = arith.select %487, %481, %488 : vector<2x32xi1>, vector<2x32xf32>
    %490 = arith.index_cast %c9_i32 : i32 to index
    %c0_173 = arith.constant 0 : index
    %c0_174 = arith.constant 0 : index
    %491 = vector.load %arg4[%490, %c0_173, %c0_174] : memref<16x2x32xf32, #tpu.memory_space<vmem>>, vector<1x2x32xf32>
    %492 = vector.shape_cast %491 : vector<1x2x32xf32> to vector<2x32xf32>
    %493 = vector.shape_cast %489 : vector<2x32xf32> to vector<1x2x32xf32>
    tpu.vector_store %arg4[%490, %c0_173, %c0_174], %493 {strides = array<i32>} : memref<16x2x32xf32, #tpu.memory_space<vmem>>, vector<1x2x32xf32>,
    %c10_i32 = arith.constant 10 : i32
    %c0_175 = arith.constant 0 : index
    %c0_176 = arith.constant 0 : index
    %494 = vector.load %arg5[%c0_175, %c0_176] : memref<2x32xf32, #tpu.memory_space<vmem>>, vector<2x32xf32>
    %495 = arith.index_cast %c10_i32 : i32 to index
    %c0_177 = arith.constant 0 : index
    %c0_178 = arith.constant 0 : index
    %496 = vector.load %arg0[%495, %c0_177, %c0_178] : memref<16x2x96xf32, #tpu.memory_space<vmem>>, vector<1x2x96xf32>
    %497 = vector.shape_cast %496 : vector<1x2x96xf32> to vector<2x96xf32>
    %498 = arith.index_cast %c10_i32 : i32 to index
    %c0_179 = arith.constant 0 : index
    %c0_180 = arith.constant 0 : index
    %499 = vector.load %arg1[%498, %c0_179, %c0_180] : memref<16x2x32xf32, #tpu.memory_space<vmem>>, vector<1x2x32xf32>
    %500 = vector.shape_cast %499 : vector<1x2x32xf32> to vector<2x32xf32>
    %501 = arith.truncf %494 : vector<2x32xf32> to vector<2x32xbf16>
    %cst_181 = arith.constant dense<0.000000e+00> : vector<2x96xf32>
    %502 = tpu.matmul %501, %2, %cst_181 {dimension_numbers = #tpu.dot_dimension_numbers<[1], [0], [0], [1], [0, 0, 1, 1], [], []>} : vector<2x32xbf16>, vector<32x96xbf16>, vector<2x96xf32> -> vector<2x96xf32>
    %503 = vector.broadcast %3 : vector<1x96xf32> to vector<2x96xf32>
    %504 = arith.addf %502, %503 : vector<2x96xf32>
    %505 = vector.extract_strided_slice %497 {offsets = [0, 0], sizes = [2, 32], strides = [1, 1]} : vector<2x96xf32> to vector<2x32xf32>
    %506 = vector.extract_strided_slice %504 {offsets = [0, 0], sizes = [2, 32], strides = [1, 1]} : vector<2x96xf32> to vector<2x32xf32>
    %507 = arith.addf %505, %506 : vector<2x32xf32>
    %508 = arith.negf %507 : vector<2x32xf32>
    %509 = math.exp %508 : vector<2x32xf32>
    %cst_182 = arith.constant 1.000000e+00 : f32
    %510 = vector.broadcast %cst_182 : f32 to vector<2x32xf32>
    %511 = arith.addf %510, %509 : vector<2x32xf32>
    %512 = arith.divf %510, %511 : vector<2x32xf32>
    %513 = vector.extract_strided_slice %497 {offsets = [0, 32], sizes = [2, 32], strides = [1, 1]} : vector<2x96xf32> to vector<2x32xf32>
    %514 = vector.extract_strided_slice %504 {offsets = [0, 32], sizes = [2, 32], strides = [1, 1]} : vector<2x96xf32> to vector<2x32xf32>
    %515 = arith.addf %513, %514 : vector<2x32xf32>
    %516 = arith.negf %515 : vector<2x32xf32>
    %517 = math.exp %516 : vector<2x32xf32>
    %cst_183 = arith.constant 1.000000e+00 : f32
    %518 = vector.broadcast %cst_183 : f32 to vector<2x32xf32>
    %519 = arith.addf %518, %517 : vector<2x32xf32>
    %520 = arith.divf %518, %519 : vector<2x32xf32>
    %521 = vector.extract_strided_slice %497 {offsets = [0, 64], sizes = [2, 32], strides = [1, 1]} : vector<2x96xf32> to vector<2x32xf32>
    %522 = vector.extract_strided_slice %504 {offsets = [0, 64], sizes = [2, 32], strides = [1, 1]} : vector<2x96xf32> to vector<2x32xf32>
    %523 = arith.mulf %512, %522 : vector<2x32xf32>
    %524 = arith.addf %521, %523 : vector<2x32xf32>
    %525 = math.tanh %524 : vector<2x32xf32>
    %cst_184 = arith.constant 1.000000e+00 : f32
    %526 = vector.broadcast %cst_184 : f32 to vector<2x32xf32>
    %527 = arith.subf %526, %520 : vector<2x32xf32>
    %528 = arith.mulf %527, %525 : vector<2x32xf32>
    %529 = arith.mulf %520, %494 : vector<2x32xf32>
    %530 = arith.addf %528, %529 : vector<2x32xf32>
    %cst_185 = arith.constant 0.000000e+00 : f32
    %531 = vector.broadcast %cst_185 : f32 to vector<2x32xf32>
    %532 = arith.cmpf ogt, %500, %531 : vector<2x32xf32>
    %533 = arith.select %532, %530, %494 : vector<2x32xi1>, vector<2x32xf32>
    %c0_186 = arith.constant 0 : index
    %c0_187 = arith.constant 0 : index
    %534 = vector.load %arg5[%c0_186, %c0_187] : memref<2x32xf32, #tpu.memory_space<vmem>>, vector<2x32xf32>
    tpu.vector_store %arg5[%c0_186, %c0_187], %533 {strides = array<i32>} : memref<2x32xf32, #tpu.memory_space<vmem>>, vector<2x32xf32>,
    %cst_188 = arith.constant 0.000000e+00 : f32
    %535 = vector.broadcast %cst_188 : f32 to vector<2x32xf32>
    %536 = arith.cmpf ogt, %500, %535 : vector<2x32xf32>
    %cst_189 = arith.constant 0.000000e+00 : f32
    %537 = vector.broadcast %cst_189 : f32 to vector<2x32xf32>
    %538 = arith.select %536, %530, %537 : vector<2x32xi1>, vector<2x32xf32>
    %539 = arith.index_cast %c10_i32 : i32 to index
    %c0_190 = arith.constant 0 : index
    %c0_191 = arith.constant 0 : index
    %540 = vector.load %arg4[%539, %c0_190, %c0_191] : memref<16x2x32xf32, #tpu.memory_space<vmem>>, vector<1x2x32xf32>
    %541 = vector.shape_cast %540 : vector<1x2x32xf32> to vector<2x32xf32>
    %542 = vector.shape_cast %538 : vector<2x32xf32> to vector<1x2x32xf32>
    tpu.vector_store %arg4[%539, %c0_190, %c0_191], %542 {strides = array<i32>} : memref<16x2x32xf32, #tpu.memory_space<vmem>>, vector<1x2x32xf32>,
    %c11_i32 = arith.constant 11 : i32
    %c0_192 = arith.constant 0 : index
    %c0_193 = arith.constant 0 : index
    %543 = vector.load %arg5[%c0_192, %c0_193] : memref<2x32xf32, #tpu.memory_space<vmem>>, vector<2x32xf32>
    %544 = arith.index_cast %c11_i32 : i32 to index
    %c0_194 = arith.constant 0 : index
    %c0_195 = arith.constant 0 : index
    %545 = vector.load %arg0[%544, %c0_194, %c0_195] : memref<16x2x96xf32, #tpu.memory_space<vmem>>, vector<1x2x96xf32>
    %546 = vector.shape_cast %545 : vector<1x2x96xf32> to vector<2x96xf32>
    %547 = arith.index_cast %c11_i32 : i32 to index
    %c0_196 = arith.constant 0 : index
    %c0_197 = arith.constant 0 : index
    %548 = vector.load %arg1[%547, %c0_196, %c0_197] : memref<16x2x32xf32, #tpu.memory_space<vmem>>, vector<1x2x32xf32>
    %549 = vector.shape_cast %548 : vector<1x2x32xf32> to vector<2x32xf32>
    %550 = arith.truncf %543 : vector<2x32xf32> to vector<2x32xbf16>
    %cst_198 = arith.constant dense<0.000000e+00> : vector<2x96xf32>
    %551 = tpu.matmul %550, %2, %cst_198 {dimension_numbers = #tpu.dot_dimension_numbers<[1], [0], [0], [1], [0, 0, 1, 1], [], []>} : vector<2x32xbf16>, vector<32x96xbf16>, vector<2x96xf32> -> vector<2x96xf32>
    %552 = vector.broadcast %3 : vector<1x96xf32> to vector<2x96xf32>
    %553 = arith.addf %551, %552 : vector<2x96xf32>
    %554 = vector.extract_strided_slice %546 {offsets = [0, 0], sizes = [2, 32], strides = [1, 1]} : vector<2x96xf32> to vector<2x32xf32>
    %555 = vector.extract_strided_slice %553 {offsets = [0, 0], sizes = [2, 32], strides = [1, 1]} : vector<2x96xf32> to vector<2x32xf32>
    %556 = arith.addf %554, %555 : vector<2x32xf32>
    %557 = arith.negf %556 : vector<2x32xf32>
    %558 = math.exp %557 : vector<2x32xf32>
    %cst_199 = arith.constant 1.000000e+00 : f32
    %559 = vector.broadcast %cst_199 : f32 to vector<2x32xf32>
    %560 = arith.addf %559, %558 : vector<2x32xf32>
    %561 = arith.divf %559, %560 : vector<2x32xf32>
    %562 = vector.extract_strided_slice %546 {offsets = [0, 32], sizes = [2, 32], strides = [1, 1]} : vector<2x96xf32> to vector<2x32xf32>
    %563 = vector.extract_strided_slice %553 {offsets = [0, 32], sizes = [2, 32], strides = [1, 1]} : vector<2x96xf32> to vector<2x32xf32>
    %564 = arith.addf %562, %563 : vector<2x32xf32>
    %565 = arith.negf %564 : vector<2x32xf32>
    %566 = math.exp %565 : vector<2x32xf32>
    %cst_200 = arith.constant 1.000000e+00 : f32
    %567 = vector.broadcast %cst_200 : f32 to vector<2x32xf32>
    %568 = arith.addf %567, %566 : vector<2x32xf32>
    %569 = arith.divf %567, %568 : vector<2x32xf32>
    %570 = vector.extract_strided_slice %546 {offsets = [0, 64], sizes = [2, 32], strides = [1, 1]} : vector<2x96xf32> to vector<2x32xf32>
    %571 = vector.extract_strided_slice %553 {offsets = [0, 64], sizes = [2, 32], strides = [1, 1]} : vector<2x96xf32> to vector<2x32xf32>
    %572 = arith.mulf %561, %571 : vector<2x32xf32>
    %573 = arith.addf %570, %572 : vector<2x32xf32>
    %574 = math.tanh %573 : vector<2x32xf32>
    %cst_201 = arith.constant 1.000000e+00 : f32
    %575 = vector.broadcast %cst_201 : f32 to vector<2x32xf32>
    %576 = arith.subf %575, %569 : vector<2x32xf32>
    %577 = arith.mulf %576, %574 : vector<2x32xf32>
    %578 = arith.mulf %569, %543 : vector<2x32xf32>
    %579 = arith.addf %577, %578 : vector<2x32xf32>
    %cst_202 = arith.constant 0.000000e+00 : f32
    %580 = vector.broadcast %cst_202 : f32 to vector<2x32xf32>
    %581 = arith.cmpf ogt, %549, %580 : vector<2x32xf32>
    %582 = arith.select %581, %579, %543 : vector<2x32xi1>, vector<2x32xf32>
    %c0_203 = arith.constant 0 : index
    %c0_204 = arith.constant 0 : index
    %583 = vector.load %arg5[%c0_203, %c0_204] : memref<2x32xf32, #tpu.memory_space<vmem>>, vector<2x32xf32>
    tpu.vector_store %arg5[%c0_203, %c0_204], %582 {strides = array<i32>} : memref<2x32xf32, #tpu.memory_space<vmem>>, vector<2x32xf32>,
    %cst_205 = arith.constant 0.000000e+00 : f32
    %584 = vector.broadcast %cst_205 : f32 to vector<2x32xf32>
    %585 = arith.cmpf ogt, %549, %584 : vector<2x32xf32>
    %cst_206 = arith.constant 0.000000e+00 : f32
    %586 = vector.broadcast %cst_206 : f32 to vector<2x32xf32>
    %587 = arith.select %585, %579, %586 : vector<2x32xi1>, vector<2x32xf32>
    %588 = arith.index_cast %c11_i32 : i32 to index
    %c0_207 = arith.constant 0 : index
    %c0_208 = arith.constant 0 : index
    %589 = vector.load %arg4[%588, %c0_207, %c0_208] : memref<16x2x32xf32, #tpu.memory_space<vmem>>, vector<1x2x32xf32>
    %590 = vector.shape_cast %589 : vector<1x2x32xf32> to vector<2x32xf32>
    %591 = vector.shape_cast %587 : vector<2x32xf32> to vector<1x2x32xf32>
    tpu.vector_store %arg4[%588, %c0_207, %c0_208], %591 {strides = array<i32>} : memref<16x2x32xf32, #tpu.memory_space<vmem>>, vector<1x2x32xf32>,
    %c12_i32 = arith.constant 12 : i32
    %c0_209 = arith.constant 0 : index
    %c0_210 = arith.constant 0 : index
    %592 = vector.load %arg5[%c0_209, %c0_210] : memref<2x32xf32, #tpu.memory_space<vmem>>, vector<2x32xf32>
    %593 = arith.index_cast %c12_i32 : i32 to index
    %c0_211 = arith.constant 0 : index
    %c0_212 = arith.constant 0 : index
    %594 = vector.load %arg0[%593, %c0_211, %c0_212] : memref<16x2x96xf32, #tpu.memory_space<vmem>>, vector<1x2x96xf32>
    %595 = vector.shape_cast %594 : vector<1x2x96xf32> to vector<2x96xf32>
    %596 = arith.index_cast %c12_i32 : i32 to index
    %c0_213 = arith.constant 0 : index
    %c0_214 = arith.constant 0 : index
    %597 = vector.load %arg1[%596, %c0_213, %c0_214] : memref<16x2x32xf32, #tpu.memory_space<vmem>>, vector<1x2x32xf32>
    %598 = vector.shape_cast %597 : vector<1x2x32xf32> to vector<2x32xf32>
    %599 = arith.truncf %592 : vector<2x32xf32> to vector<2x32xbf16>
    %cst_215 = arith.constant dense<0.000000e+00> : vector<2x96xf32>
    %600 = tpu.matmul %599, %2, %cst_215 {dimension_numbers = #tpu.dot_dimension_numbers<[1], [0], [0], [1], [0, 0, 1, 1], [], []>} : vector<2x32xbf16>, vector<32x96xbf16>, vector<2x96xf32> -> vector<2x96xf32>
    %601 = vector.broadcast %3 : vector<1x96xf32> to vector<2x96xf32>
    %602 = arith.addf %600, %601 : vector<2x96xf32>
    %603 = vector.extract_strided_slice %595 {offsets = [0, 0], sizes = [2, 32], strides = [1, 1]} : vector<2x96xf32> to vector<2x32xf32>
    %604 = vector.extract_strided_slice %602 {offsets = [0, 0], sizes = [2, 32], strides = [1, 1]} : vector<2x96xf32> to vector<2x32xf32>
    %605 = arith.addf %603, %604 : vector<2x32xf32>
    %606 = arith.negf %605 : vector<2x32xf32>
    %607 = math.exp %606 : vector<2x32xf32>
    %cst_216 = arith.constant 1.000000e+00 : f32
    %608 = vector.broadcast %cst_216 : f32 to vector<2x32xf32>
    %609 = arith.addf %608, %607 : vector<2x32xf32>
    %610 = arith.divf %608, %609 : vector<2x32xf32>
    %611 = vector.extract_strided_slice %595 {offsets = [0, 32], sizes = [2, 32], strides = [1, 1]} : vector<2x96xf32> to vector<2x32xf32>
    %612 = vector.extract_strided_slice %602 {offsets = [0, 32], sizes = [2, 32], strides = [1, 1]} : vector<2x96xf32> to vector<2x32xf32>
    %613 = arith.addf %611, %612 : vector<2x32xf32>
    %614 = arith.negf %613 : vector<2x32xf32>
    %615 = math.exp %614 : vector<2x32xf32>
    %cst_217 = arith.constant 1.000000e+00 : f32
    %616 = vector.broadcast %cst_217 : f32 to vector<2x32xf32>
    %617 = arith.addf %616, %615 : vector<2x32xf32>
    %618 = arith.divf %616, %617 : vector<2x32xf32>
    %619 = vector.extract_strided_slice %595 {offsets = [0, 64], sizes = [2, 32], strides = [1, 1]} : vector<2x96xf32> to vector<2x32xf32>
    %620 = vector.extract_strided_slice %602 {offsets = [0, 64], sizes = [2, 32], strides = [1, 1]} : vector<2x96xf32> to vector<2x32xf32>
    %621 = arith.mulf %610, %620 : vector<2x32xf32>
    %622 = arith.addf %619, %621 : vector<2x32xf32>
    %623 = math.tanh %622 : vector<2x32xf32>
    %cst_218 = arith.constant 1.000000e+00 : f32
    %624 = vector.broadcast %cst_218 : f32 to vector<2x32xf32>
    %625 = arith.subf %624, %618 : vector<2x32xf32>
    %626 = arith.mulf %625, %623 : vector<2x32xf32>
    %627 = arith.mulf %618, %592 : vector<2x32xf32>
    %628 = arith.addf %626, %627 : vector<2x32xf32>
    %cst_219 = arith.constant 0.000000e+00 : f32
    %629 = vector.broadcast %cst_219 : f32 to vector<2x32xf32>
    %630 = arith.cmpf ogt, %598, %629 : vector<2x32xf32>
    %631 = arith.select %630, %628, %592 : vector<2x32xi1>, vector<2x32xf32>
    %c0_220 = arith.constant 0 : index
    %c0_221 = arith.constant 0 : index
    %632 = vector.load %arg5[%c0_220, %c0_221] : memref<2x32xf32, #tpu.memory_space<vmem>>, vector<2x32xf32>
    tpu.vector_store %arg5[%c0_220, %c0_221], %631 {strides = array<i32>} : memref<2x32xf32, #tpu.memory_space<vmem>>, vector<2x32xf32>,
    %cst_222 = arith.constant 0.000000e+00 : f32
    %633 = vector.broadcast %cst_222 : f32 to vector<2x32xf32>
    %634 = arith.cmpf ogt, %598, %633 : vector<2x32xf32>
    %cst_223 = arith.constant 0.000000e+00 : f32
    %635 = vector.broadcast %cst_223 : f32 to vector<2x32xf32>
    %636 = arith.select %634, %628, %635 : vector<2x32xi1>, vector<2x32xf32>
    %637 = arith.index_cast %c12_i32 : i32 to index
    %c0_224 = arith.constant 0 : index
    %c0_225 = arith.constant 0 : index
    %638 = vector.load %arg4[%637, %c0_224, %c0_225] : memref<16x2x32xf32, #tpu.memory_space<vmem>>, vector<1x2x32xf32>
    %639 = vector.shape_cast %638 : vector<1x2x32xf32> to vector<2x32xf32>
    %640 = vector.shape_cast %636 : vector<2x32xf32> to vector<1x2x32xf32>
    tpu.vector_store %arg4[%637, %c0_224, %c0_225], %640 {strides = array<i32>} : memref<16x2x32xf32, #tpu.memory_space<vmem>>, vector<1x2x32xf32>,
    %c13_i32 = arith.constant 13 : i32
    %c0_226 = arith.constant 0 : index
    %c0_227 = arith.constant 0 : index
    %641 = vector.load %arg5[%c0_226, %c0_227] : memref<2x32xf32, #tpu.memory_space<vmem>>, vector<2x32xf32>
    %642 = arith.index_cast %c13_i32 : i32 to index
    %c0_228 = arith.constant 0 : index
    %c0_229 = arith.constant 0 : index
    %643 = vector.load %arg0[%642, %c0_228, %c0_229] : memref<16x2x96xf32, #tpu.memory_space<vmem>>, vector<1x2x96xf32>
    %644 = vector.shape_cast %643 : vector<1x2x96xf32> to vector<2x96xf32>
    %645 = arith.index_cast %c13_i32 : i32 to index
    %c0_230 = arith.constant 0 : index
    %c0_231 = arith.constant 0 : index
    %646 = vector.load %arg1[%645, %c0_230, %c0_231] : memref<16x2x32xf32, #tpu.memory_space<vmem>>, vector<1x2x32xf32>
    %647 = vector.shape_cast %646 : vector<1x2x32xf32> to vector<2x32xf32>
    %648 = arith.truncf %641 : vector<2x32xf32> to vector<2x32xbf16>
    %cst_232 = arith.constant dense<0.000000e+00> : vector<2x96xf32>
    %649 = tpu.matmul %648, %2, %cst_232 {dimension_numbers = #tpu.dot_dimension_numbers<[1], [0], [0], [1], [0, 0, 1, 1], [], []>} : vector<2x32xbf16>, vector<32x96xbf16>, vector<2x96xf32> -> vector<2x96xf32>
    %650 = vector.broadcast %3 : vector<1x96xf32> to vector<2x96xf32>
    %651 = arith.addf %649, %650 : vector<2x96xf32>
    %652 = vector.extract_strided_slice %644 {offsets = [0, 0], sizes = [2, 32], strides = [1, 1]} : vector<2x96xf32> to vector<2x32xf32>
    %653 = vector.extract_strided_slice %651 {offsets = [0, 0], sizes = [2, 32], strides = [1, 1]} : vector<2x96xf32> to vector<2x32xf32>
    %654 = arith.addf %652, %653 : vector<2x32xf32>
    %655 = arith.negf %654 : vector<2x32xf32>
    %656 = math.exp %655 : vector<2x32xf32>
    %cst_233 = arith.constant 1.000000e+00 : f32
    %657 = vector.broadcast %cst_233 : f32 to vector<2x32xf32>
    %658 = arith.addf %657, %656 : vector<2x32xf32>
    %659 = arith.divf %657, %658 : vector<2x32xf32>
    %660 = vector.extract_strided_slice %644 {offsets = [0, 32], sizes = [2, 32], strides = [1, 1]} : vector<2x96xf32> to vector<2x32xf32>
    %661 = vector.extract_strided_slice %651 {offsets = [0, 32], sizes = [2, 32], strides = [1, 1]} : vector<2x96xf32> to vector<2x32xf32>
    %662 = arith.addf %660, %661 : vector<2x32xf32>
    %663 = arith.negf %662 : vector<2x32xf32>
    %664 = math.exp %663 : vector<2x32xf32>
    %cst_234 = arith.constant 1.000000e+00 : f32
    %665 = vector.broadcast %cst_234 : f32 to vector<2x32xf32>
    %666 = arith.addf %665, %664 : vector<2x32xf32>
    %667 = arith.divf %665, %666 : vector<2x32xf32>
    %668 = vector.extract_strided_slice %644 {offsets = [0, 64], sizes = [2, 32], strides = [1, 1]} : vector<2x96xf32> to vector<2x32xf32>
    %669 = vector.extract_strided_slice %651 {offsets = [0, 64], sizes = [2, 32], strides = [1, 1]} : vector<2x96xf32> to vector<2x32xf32>
    %670 = arith.mulf %659, %669 : vector<2x32xf32>
    %671 = arith.addf %668, %670 : vector<2x32xf32>
    %672 = math.tanh %671 : vector<2x32xf32>
    %cst_235 = arith.constant 1.000000e+00 : f32
    %673 = vector.broadcast %cst_235 : f32 to vector<2x32xf32>
    %674 = arith.subf %673, %667 : vector<2x32xf32>
    %675 = arith.mulf %674, %672 : vector<2x32xf32>
    %676 = arith.mulf %667, %641 : vector<2x32xf32>
    %677 = arith.addf %675, %676 : vector<2x32xf32>
    %cst_236 = arith.constant 0.000000e+00 : f32
    %678 = vector.broadcast %cst_236 : f32 to vector<2x32xf32>
    %679 = arith.cmpf ogt, %647, %678 : vector<2x32xf32>
    %680 = arith.select %679, %677, %641 : vector<2x32xi1>, vector<2x32xf32>
    %c0_237 = arith.constant 0 : index
    %c0_238 = arith.constant 0 : index
    %681 = vector.load %arg5[%c0_237, %c0_238] : memref<2x32xf32, #tpu.memory_space<vmem>>, vector<2x32xf32>
    tpu.vector_store %arg5[%c0_237, %c0_238], %680 {strides = array<i32>} : memref<2x32xf32, #tpu.memory_space<vmem>>, vector<2x32xf32>,
    %cst_239 = arith.constant 0.000000e+00 : f32
    %682 = vector.broadcast %cst_239 : f32 to vector<2x32xf32>
    %683 = arith.cmpf ogt, %647, %682 : vector<2x32xf32>
    %cst_240 = arith.constant 0.000000e+00 : f32
    %684 = vector.broadcast %cst_240 : f32 to vector<2x32xf32>
    %685 = arith.select %683, %677, %684 : vector<2x32xi1>, vector<2x32xf32>
    %686 = arith.index_cast %c13_i32 : i32 to index
    %c0_241 = arith.constant 0 : index
    %c0_242 = arith.constant 0 : index
    %687 = vector.load %arg4[%686, %c0_241, %c0_242] : memref<16x2x32xf32, #tpu.memory_space<vmem>>, vector<1x2x32xf32>
    %688 = vector.shape_cast %687 : vector<1x2x32xf32> to vector<2x32xf32>
    %689 = vector.shape_cast %685 : vector<2x32xf32> to vector<1x2x32xf32>
    tpu.vector_store %arg4[%686, %c0_241, %c0_242], %689 {strides = array<i32>} : memref<16x2x32xf32, #tpu.memory_space<vmem>>, vector<1x2x32xf32>,
    %c14_i32 = arith.constant 14 : i32
    %c0_243 = arith.constant 0 : index
    %c0_244 = arith.constant 0 : index
    %690 = vector.load %arg5[%c0_243, %c0_244] : memref<2x32xf32, #tpu.memory_space<vmem>>, vector<2x32xf32>
    %691 = arith.index_cast %c14_i32 : i32 to index
    %c0_245 = arith.constant 0 : index
    %c0_246 = arith.constant 0 : index
    %692 = vector.load %arg0[%691, %c0_245, %c0_246] : memref<16x2x96xf32, #tpu.memory_space<vmem>>, vector<1x2x96xf32>
    %693 = vector.shape_cast %692 : vector<1x2x96xf32> to vector<2x96xf32>
    %694 = arith.index_cast %c14_i32 : i32 to index
    %c0_247 = arith.constant 0 : index
    %c0_248 = arith.constant 0 : index
    %695 = vector.load %arg1[%694, %c0_247, %c0_248] : memref<16x2x32xf32, #tpu.memory_space<vmem>>, vector<1x2x32xf32>
    %696 = vector.shape_cast %695 : vector<1x2x32xf32> to vector<2x32xf32>
    %697 = arith.truncf %690 : vector<2x32xf32> to vector<2x32xbf16>
    %cst_249 = arith.constant dense<0.000000e+00> : vector<2x96xf32>
    %698 = tpu.matmul %697, %2, %cst_249 {dimension_numbers = #tpu.dot_dimension_numbers<[1], [0], [0], [1], [0, 0, 1, 1], [], []>} : vector<2x32xbf16>, vector<32x96xbf16>, vector<2x96xf32> -> vector<2x96xf32>
    %699 = vector.broadcast %3 : vector<1x96xf32> to vector<2x96xf32>
    %700 = arith.addf %698, %699 : vector<2x96xf32>
    %701 = vector.extract_strided_slice %693 {offsets = [0, 0], sizes = [2, 32], strides = [1, 1]} : vector<2x96xf32> to vector<2x32xf32>
    %702 = vector.extract_strided_slice %700 {offsets = [0, 0], sizes = [2, 32], strides = [1, 1]} : vector<2x96xf32> to vector<2x32xf32>
    %703 = arith.addf %701, %702 : vector<2x32xf32>
    %704 = arith.negf %703 : vector<2x32xf32>
    %705 = math.exp %704 : vector<2x32xf32>
    %cst_250 = arith.constant 1.000000e+00 : f32
    %706 = vector.broadcast %cst_250 : f32 to vector<2x32xf32>
    %707 = arith.addf %706, %705 : vector<2x32xf32>
    %708 = arith.divf %706, %707 : vector<2x32xf32>
    %709 = vector.extract_strided_slice %693 {offsets = [0, 32], sizes = [2, 32], strides = [1, 1]} : vector<2x96xf32> to vector<2x32xf32>
    %710 = vector.extract_strided_slice %700 {offsets = [0, 32], sizes = [2, 32], strides = [1, 1]} : vector<2x96xf32> to vector<2x32xf32>
    %711 = arith.addf %709, %710 : vector<2x32xf32>
    %712 = arith.negf %711 : vector<2x32xf32>
    %713 = math.exp %712 : vector<2x32xf32>
    %cst_251 = arith.constant 1.000000e+00 : f32
    %714 = vector.broadcast %cst_251 : f32 to vector<2x32xf32>
    %715 = arith.addf %714, %713 : vector<2x32xf32>
    %716 = arith.divf %714, %715 : vector<2x32xf32>
    %717 = vector.extract_strided_slice %693 {offsets = [0, 64], sizes = [2, 32], strides = [1, 1]} : vector<2x96xf32> to vector<2x32xf32>
    %718 = vector.extract_strided_slice %700 {offsets = [0, 64], sizes = [2, 32], strides = [1, 1]} : vector<2x96xf32> to vector<2x32xf32>
    %719 = arith.mulf %708, %718 : vector<2x32xf32>
    %720 = arith.addf %717, %719 : vector<2x32xf32>
    %721 = math.tanh %720 : vector<2x32xf32>
    %cst_252 = arith.constant 1.000000e+00 : f32
    %722 = vector.broadcast %cst_252 : f32 to vector<2x32xf32>
    %723 = arith.subf %722, %716 : vector<2x32xf32>
    %724 = arith.mulf %723, %721 : vector<2x32xf32>
    %725 = arith.mulf %716, %690 : vector<2x32xf32>
    %726 = arith.addf %724, %725 : vector<2x32xf32>
    %cst_253 = arith.constant 0.000000e+00 : f32
    %727 = vector.broadcast %cst_253 : f32 to vector<2x32xf32>
    %728 = arith.cmpf ogt, %696, %727 : vector<2x32xf32>
    %729 = arith.select %728, %726, %690 : vector<2x32xi1>, vector<2x32xf32>
    %c0_254 = arith.constant 0 : index
    %c0_255 = arith.constant 0 : index
    %730 = vector.load %arg5[%c0_254, %c0_255] : memref<2x32xf32, #tpu.memory_space<vmem>>, vector<2x32xf32>
    tpu.vector_store %arg5[%c0_254, %c0_255], %729 {strides = array<i32>} : memref<2x32xf32, #tpu.memory_space<vmem>>, vector<2x32xf32>,
    %cst_256 = arith.constant 0.000000e+00 : f32
    %731 = vector.broadcast %cst_256 : f32 to vector<2x32xf32>
    %732 = arith.cmpf ogt, %696, %731 : vector<2x32xf32>
    %cst_257 = arith.constant 0.000000e+00 : f32
    %733 = vector.broadcast %cst_257 : f32 to vector<2x32xf32>
    %734 = arith.select %732, %726, %733 : vector<2x32xi1>, vector<2x32xf32>
    %735 = arith.index_cast %c14_i32 : i32 to index
    %c0_258 = arith.constant 0 : index
    %c0_259 = arith.constant 0 : index
    %736 = vector.load %arg4[%735, %c0_258, %c0_259] : memref<16x2x32xf32, #tpu.memory_space<vmem>>, vector<1x2x32xf32>
    %737 = vector.shape_cast %736 : vector<1x2x32xf32> to vector<2x32xf32>
    %738 = vector.shape_cast %734 : vector<2x32xf32> to vector<1x2x32xf32>
    tpu.vector_store %arg4[%735, %c0_258, %c0_259], %738 {strides = array<i32>} : memref<16x2x32xf32, #tpu.memory_space<vmem>>, vector<1x2x32xf32>,
    %c15_i32 = arith.constant 15 : i32
    %c0_260 = arith.constant 0 : index
    %c0_261 = arith.constant 0 : index
    %739 = vector.load %arg5[%c0_260, %c0_261] : memref<2x32xf32, #tpu.memory_space<vmem>>, vector<2x32xf32>
    %740 = arith.index_cast %c15_i32 : i32 to index
    %c0_262 = arith.constant 0 : index
    %c0_263 = arith.constant 0 : index
    %741 = vector.load %arg0[%740, %c0_262, %c0_263] : memref<16x2x96xf32, #tpu.memory_space<vmem>>, vector<1x2x96xf32>
    %742 = vector.shape_cast %741 : vector<1x2x96xf32> to vector<2x96xf32>
    %743 = arith.index_cast %c15_i32 : i32 to index
    %c0_264 = arith.constant 0 : index
    %c0_265 = arith.constant 0 : index
    %744 = vector.load %arg1[%743, %c0_264, %c0_265] : memref<16x2x32xf32, #tpu.memory_space<vmem>>, vector<1x2x32xf32>
    %745 = vector.shape_cast %744 : vector<1x2x32xf32> to vector<2x32xf32>
    %746 = arith.truncf %739 : vector<2x32xf32> to vector<2x32xbf16>
    %cst_266 = arith.constant dense<0.000000e+00> : vector<2x96xf32>
    %747 = tpu.matmul %746, %2, %cst_266 {dimension_numbers = #tpu.dot_dimension_numbers<[1], [0], [0], [1], [0, 0, 1, 1], [], []>} : vector<2x32xbf16>, vector<32x96xbf16>, vector<2x96xf32> -> vector<2x96xf32>
    %748 = vector.broadcast %3 : vector<1x96xf32> to vector<2x96xf32>
    %749 = arith.addf %747, %748 : vector<2x96xf32>
    %750 = vector.extract_strided_slice %742 {offsets = [0, 0], sizes = [2, 32], strides = [1, 1]} : vector<2x96xf32> to vector<2x32xf32>
    %751 = vector.extract_strided_slice %749 {offsets = [0, 0], sizes = [2, 32], strides = [1, 1]} : vector<2x96xf32> to vector<2x32xf32>
    %752 = arith.addf %750, %751 : vector<2x32xf32>
    %753 = arith.negf %752 : vector<2x32xf32>
    %754 = math.exp %753 : vector<2x32xf32>
    %cst_267 = arith.constant 1.000000e+00 : f32
    %755 = vector.broadcast %cst_267 : f32 to vector<2x32xf32>
    %756 = arith.addf %755, %754 : vector<2x32xf32>
    %757 = arith.divf %755, %756 : vector<2x32xf32>
    %758 = vector.extract_strided_slice %742 {offsets = [0, 32], sizes = [2, 32], strides = [1, 1]} : vector<2x96xf32> to vector<2x32xf32>
    %759 = vector.extract_strided_slice %749 {offsets = [0, 32], sizes = [2, 32], strides = [1, 1]} : vector<2x96xf32> to vector<2x32xf32>
    %760 = arith.addf %758, %759 : vector<2x32xf32>
    %761 = arith.negf %760 : vector<2x32xf32>
    %762 = math.exp %761 : vector<2x32xf32>
    %cst_268 = arith.constant 1.000000e+00 : f32
    %763 = vector.broadcast %cst_268 : f32 to vector<2x32xf32>
    %764 = arith.addf %763, %762 : vector<2x32xf32>
    %765 = arith.divf %763, %764 : vector<2x32xf32>
    %766 = vector.extract_strided_slice %742 {offsets = [0, 64], sizes = [2, 32], strides = [1, 1]} : vector<2x96xf32> to vector<2x32xf32>
    %767 = vector.extract_strided_slice %749 {offsets = [0, 64], sizes = [2, 32], strides = [1, 1]} : vector<2x96xf32> to vector<2x32xf32>
    %768 = arith.mulf %757, %767 : vector<2x32xf32>
    %769 = arith.addf %766, %768 : vector<2x32xf32>
    %770 = math.tanh %769 : vector<2x32xf32>
    %cst_269 = arith.constant 1.000000e+00 : f32
    %771 = vector.broadcast %cst_269 : f32 to vector<2x32xf32>
    %772 = arith.subf %771, %765 : vector<2x32xf32>
    %773 = arith.mulf %772, %770 : vector<2x32xf32>
    %774 = arith.mulf %765, %739 : vector<2x32xf32>
    %775 = arith.addf %773, %774 : vector<2x32xf32>
    %cst_270 = arith.constant 0.000000e+00 : f32
    %776 = vector.broadcast %cst_270 : f32 to vector<2x32xf32>
    %777 = arith.cmpf ogt, %745, %776 : vector<2x32xf32>
    %778 = arith.select %777, %775, %739 : vector<2x32xi1>, vector<2x32xf32>
    %c0_271 = arith.constant 0 : index
    %c0_272 = arith.constant 0 : index
    %779 = vector.load %arg5[%c0_271, %c0_272] : memref<2x32xf32, #tpu.memory_space<vmem>>, vector<2x32xf32>
    tpu.vector_store %arg5[%c0_271, %c0_272], %778 {strides = array<i32>} : memref<2x32xf32, #tpu.memory_space<vmem>>, vector<2x32xf32>,
    %cst_273 = arith.constant 0.000000e+00 : f32
    %780 = vector.broadcast %cst_273 : f32 to vector<2x32xf32>
    %781 = arith.cmpf ogt, %745, %780 : vector<2x32xf32>
    %cst_274 = arith.constant 0.000000e+00 : f32
    %782 = vector.broadcast %cst_274 : f32 to vector<2x32xf32>
    %783 = arith.select %781, %775, %782 : vector<2x32xi1>, vector<2x32xf32>
    %784 = arith.index_cast %c15_i32 : i32 to index
    %c0_275 = arith.constant 0 : index
    %c0_276 = arith.constant 0 : index
    %785 = vector.load %arg4[%784, %c0_275, %c0_276] : memref<16x2x32xf32, #tpu.memory_space<vmem>>, vector<1x2x32xf32>
    %786 = vector.shape_cast %785 : vector<1x2x32xf32> to vector<2x32xf32>
    %787 = vector.shape_cast %783 : vector<2x32xf32> to vector<1x2x32xf32>
    tpu.vector_store %arg4[%784, %c0_275, %c0_276], %787 {strides = array<i32>} : memref<16x2x32xf32, #tpu.memory_space<vmem>>, vector<1x2x32xf32>,
    %c16_i32 = arith.constant 16 : i32
    return
  }
}

module attributes {stable_mosaic.version = 11 : i64} {
  func.func @_pointer_kernel(%arg0: memref<2x16x32xf32, #tpu.memory_space<vmem>>, %arg1: memref<2x1x32xf32, #tpu.memory_space<vmem>>, %arg2: memref<2x16x1xf32, #tpu.memory_space<vmem>>, %arg3: memref<96x16xbf16, #tpu.memory_space<vmem>>, %arg4: memref<1x1x16xf32, #tpu.memory_space<vmem>>, %arg5: memref<1x1x16xf32, #tpu.memory_space<vmem>>, %arg6: memref<1x1x1xf32, #tpu.memory_space<vmem>>, %arg7: memref<64x64xbf16, #tpu.memory_space<vmem>>, %arg8: memref<1x1x64xf32, #tpu.memory_space<vmem>>, %arg9: memref<2x16x1xf32, #tpu.memory_space<vmem>>, %arg10: memref<2x1x32xf32, #tpu.memory_space<vmem>>) attributes {dimension_semantics = [], scalar_prefetch = 0 : i64, scratch_operands = 0 : i64, tpu.core_type = #tpu.core_type<tc>} {
    %c0 = arith.constant 0 : index
    %c0_0 = arith.constant 0 : index
    %c0_1 = arith.constant 0 : index
    %0 = vector.load %arg0[%c0, %c0_0, %c0_1] : memref<2x16x32xf32, #tpu.memory_space<vmem>>, vector<2x16x32xf32>
    %c0_2 = arith.constant 0 : index
    %c0_3 = arith.constant 0 : index
    %c0_4 = arith.constant 0 : index
    %1 = vector.load %arg1[%c0_2, %c0_3, %c0_4] : memref<2x1x32xf32, #tpu.memory_space<vmem>>, vector<2x1x32xf32>
    %c0_5 = arith.constant 0 : index
    %c0_6 = arith.constant 0 : index
    %c0_7 = arith.constant 0 : index
    %2 = vector.load %arg2[%c0_5, %c0_6, %c0_7] : memref<2x16x1xf32, #tpu.memory_space<vmem>>, vector<2x16x1xf32>
    %3 = vector.shape_cast %1 : vector<2x1x32xf32> to vector<2x1x32xf32>
    %4 = vector.broadcast %3 : vector<2x1x32xf32> to vector<2x16x32xf32>
    %5 = arith.mulf %0, %4 : vector<2x16x32xf32>
    %6 = tpu.concatenate %0, %4, %5 in 2 : vector<2x16x32xf32>, vector<2x16x32xf32>, vector<2x16x32xf32> -> vector<2x16x96xf32>
    %7 = arith.truncf %6 : vector<2x16x96xf32> to vector<2x16x96xbf16>
    %c0_8 = arith.constant 0 : index
    %c0_9 = arith.constant 0 : index
    %8 = vector.load %arg3[%c0_8, %c0_9] : memref<96x16xbf16, #tpu.memory_space<vmem>>, vector<96x16xbf16>
    %cst = arith.constant dense<0.000000e+00> : vector<2x16x16xf32>
    %9 = tpu.matmul %7, %8, %cst {dimension_numbers = #tpu.dot_dimension_numbers<[2], [0], [0, 1], [1], [0, 0, 0, 1, 1, 1], [], []>} : vector<2x16x96xbf16>, vector<96x16xbf16>, vector<2x16x16xf32> -> vector<2x16x16xf32>
    %c0_10 = arith.constant 0 : index
    %c0_11 = arith.constant 0 : index
    %c0_12 = arith.constant 0 : index
    %10 = vector.load %arg4[%c0_10, %c0_11, %c0_12] : memref<1x1x16xf32, #tpu.memory_space<vmem>>, vector<1x1x16xf32>
    %11 = vector.broadcast %10 : vector<1x1x16xf32> to vector<2x16x16xf32>
    %12 = arith.addf %9, %11 : vector<2x16x16xf32>
    %cst_13 = arith.constant 0.000000e+00 : f32
    %13 = vector.broadcast %cst_13 : f32 to vector<2x16x16xf32>
    %14 = arith.maximumf %12, %13 : vector<2x16x16xf32>
    %c0_14 = arith.constant 0 : index
    %c0_15 = arith.constant 0 : index
    %c0_16 = arith.constant 0 : index
    %15 = vector.load %arg5[%c0_14, %c0_15, %c0_16] : memref<1x1x16xf32, #tpu.memory_space<vmem>>, vector<1x1x16xf32>
    %16 = vector.broadcast %15 : vector<1x1x16xf32> to vector<2x16x16xf32>
    %17 = arith.mulf %14, %16 : vector<2x16x16xf32>
    %cst_17 = arith.constant dense<0.000000e+00> : vector<2x16xf32>
    %18 = vector.multi_reduction <add>, %17, %cst_17 [2] : vector<2x16x16xf32> to vector<2x16xf32>
    %19 = vector.shape_cast %18 : vector<2x16xf32> to vector<2x16x1xf32>
    %c0_18 = arith.constant 0 : index
    %c0_19 = arith.constant 0 : index
    %c0_20 = arith.constant 0 : index
    %20 = vector.load %arg6[%c0_18, %c0_19, %c0_20] : memref<1x1x1xf32, #tpu.memory_space<vmem>>, vector<1x1x1xf32>
    %21 = vector.broadcast %20 : vector<1x1x1xf32> to vector<2x16x1xf32>
    %22 = arith.addf %19, %21 : vector<2x16x1xf32>
    %cst_21 = arith.constant 0.000000e+00 : f32
    %23 = vector.broadcast %cst_21 : f32 to vector<2x16x1xf32>
    %24 = arith.cmpf ogt, %2, %23 : vector<2x16x1xf32>
    %cst_22 = arith.constant -1.000000e+30 : f32
    %25 = vector.broadcast %cst_22 : f32 to vector<2x16x1xf32>
    %26 = arith.select %24, %25, %22 : vector<2x16x1xi1>, vector<2x16x1xf32>
    %cst_23 = arith.constant dense<0xFF800000> : vector<2x1xf32>
    %27 = vector.multi_reduction <maximumf>, %26, %cst_23 [1] : vector<2x16x1xf32> to vector<2x1xf32>
    %28 = vector.shape_cast %27 : vector<2x1xf32> to vector<2x1x1xf32>
    %29 = vector.broadcast %28 : vector<2x1x1xf32> to vector<2x16x1xf32>
    %30 = arith.subf %26, %29 : vector<2x16x1xf32>
    %31 = math.exp %30 : vector<2x16x1xf32>
    %cst_24 = arith.constant dense<0.000000e+00> : vector<2x1xf32>
    %32 = vector.multi_reduction <add>, %31, %cst_24 [1] : vector<2x16x1xf32> to vector<2x1xf32>
    %33 = vector.shape_cast %32 : vector<2x1xf32> to vector<2x1x1xf32>
    %cst_25 = arith.constant 1.000000e-30 : f32
    %34 = vector.broadcast %cst_25 : f32 to vector<2x1x1xf32>
    %35 = arith.maximumf %33, %34 : vector<2x1x1xf32>
    %36 = vector.broadcast %35 : vector<2x1x1xf32> to vector<2x16x1xf32>
    %37 = arith.divf %31, %36 : vector<2x16x1xf32>
    %c0_26 = arith.constant 0 : index
    %c0_27 = arith.constant 0 : index
    %c0_28 = arith.constant 0 : index
    %38 = vector.load %arg9[%c0_26, %c0_27, %c0_28] : memref<2x16x1xf32, #tpu.memory_space<vmem>>, vector<2x16x1xf32>
    tpu.vector_store %arg9[%c0_26, %c0_27, %c0_28], %37 {strides = array<i32>} : memref<2x16x1xf32, #tpu.memory_space<vmem>>, vector<2x16x1xf32>,
    %39 = vector.broadcast %37 : vector<2x16x1xf32> to vector<2x16x32xf32>
    %40 = arith.mulf %39, %0 : vector<2x16x32xf32>
    %cst_29 = arith.constant dense<0.000000e+00> : vector<2x32xf32>
    %41 = vector.multi_reduction <add>, %40, %cst_29 [1] : vector<2x16x32xf32> to vector<2x32xf32>
    %42 = vector.shape_cast %41 : vector<2x32xf32> to vector<2x1x32xf32>
    %43 = tpu.concatenate %1, %42 in 2 : vector<2x1x32xf32>, vector<2x1x32xf32> -> vector<2x1x64xf32>
    %44 = arith.truncf %43 : vector<2x1x64xf32> to vector<2x1x64xbf16>
    %c0_30 = arith.constant 0 : index
    %c0_31 = arith.constant 0 : index
    %45 = vector.load %arg7[%c0_30, %c0_31] : memref<64x64xbf16, #tpu.memory_space<vmem>>, vector<64x64xbf16>
    %cst_32 = arith.constant dense<0.000000e+00> : vector<2x1x64xf32>
    %46 = tpu.matmul %44, %45, %cst_32 {dimension_numbers = #tpu.dot_dimension_numbers<[2], [0], [0, 1], [1], [0, 0, 0, 1, 1, 1], [], []>} : vector<2x1x64xbf16>, vector<64x64xbf16>, vector<2x1x64xf32> -> vector<2x1x64xf32>
    %c0_33 = arith.constant 0 : index
    %c0_34 = arith.constant 0 : index
    %c0_35 = arith.constant 0 : index
    %47 = vector.load %arg8[%c0_33, %c0_34, %c0_35] : memref<1x1x64xf32, #tpu.memory_space<vmem>>, vector<1x1x64xf32>
    %48 = vector.broadcast %47 : vector<1x1x64xf32> to vector<2x1x64xf32>
    %49 = arith.addf %46, %48 : vector<2x1x64xf32>
    %50 = vector.extract_strided_slice %49 {offsets = [0, 0, 0], sizes = [2, 1, 32], strides = [1, 1, 1]} : vector<2x1x64xf32> to vector<2x1x32xf32>
    %51 = math.tanh %50 : vector<2x1x32xf32>
    %52 = vector.extract_strided_slice %49 {offsets = [0, 0, 32], sizes = [2, 1, 32], strides = [1, 1, 1]} : vector<2x1x64xf32> to vector<2x1x32xf32>
    %53 = arith.negf %52 : vector<2x1x32xf32>
    %54 = math.exp %53 : vector<2x1x32xf32>
    %cst_36 = arith.constant 1.000000e+00 : f32
    %55 = vector.broadcast %cst_36 : f32 to vector<2x1x32xf32>
    %56 = arith.addf %55, %54 : vector<2x1x32xf32>
    %57 = arith.divf %55, %56 : vector<2x1x32xf32>
    %58 = arith.mulf %57, %51 : vector<2x1x32xf32>
    %cst_37 = arith.constant 1.000000e+00 : f32
    %59 = vector.broadcast %cst_37 : f32 to vector<2x1x32xf32>
    %60 = arith.subf %59, %57 : vector<2x1x32xf32>
    %61 = arith.mulf %60, %1 : vector<2x1x32xf32>
    %62 = arith.addf %58, %61 : vector<2x1x32xf32>
    %c0_38 = arith.constant 0 : index
    %c0_39 = arith.constant 0 : index
    %c0_40 = arith.constant 0 : index
    %63 = vector.load %arg10[%c0_38, %c0_39, %c0_40] : memref<2x1x32xf32, #tpu.memory_space<vmem>>, vector<2x1x32xf32>
    tpu.vector_store %arg10[%c0_38, %c0_39, %c0_40], %62 {strides = array<i32>} : memref<2x1x32xf32, #tpu.memory_space<vmem>>, vector<2x1x32xf32>,
    return
  }
}

module attributes {stable_mosaic.version = 11 : i64} {
  func.func @_pointer_kernel(%arg0: memref<2x16x32xf32, #tpu.memory_space<vmem>>, %arg1: memref<2x1x32xf32, #tpu.memory_space<vmem>>, %arg2: memref<2x16x1xf32, #tpu.memory_space<vmem>>, %arg3: memref<96x16xbf16, #tpu.memory_space<vmem>>, %arg4: memref<1x1x16xf32, #tpu.memory_space<vmem>>, %arg5: memref<1x1x16xf32, #tpu.memory_space<vmem>>, %arg6: memref<1x1x1xf32, #tpu.memory_space<vmem>>, %arg7: memref<64x64xbf16, #tpu.memory_space<vmem>>, %arg8: memref<1x1x64xf32, #tpu.memory_space<vmem>>, %arg9: memref<2x16x1xf32, #tpu.memory_space<vmem>>, %arg10: memref<2x1x32xf32, #tpu.memory_space<vmem>>) attributes {dimension_semantics = [], scalar_prefetch = 0 : i64, scratch_operands = 0 : i64, tpu.core_type = #tpu.core_type<tc>} {
    %c0 = arith.constant 0 : index
    %c0_0 = arith.constant 0 : index
    %c0_1 = arith.constant 0 : index
    %0 = vector.load %arg0[%c0, %c0_0, %c0_1] : memref<2x16x32xf32, #tpu.memory_space<vmem>>, vector<2x16x32xf32>
    %c0_2 = arith.constant 0 : index
    %c0_3 = arith.constant 0 : index
    %c0_4 = arith.constant 0 : index
    %1 = vector.load %arg1[%c0_2, %c0_3, %c0_4] : memref<2x1x32xf32, #tpu.memory_space<vmem>>, vector<2x1x32xf32>
    %c0_5 = arith.constant 0 : index
    %c0_6 = arith.constant 0 : index
    %c0_7 = arith.constant 0 : index
    %2 = vector.load %arg2[%c0_5, %c0_6, %c0_7] : memref<2x16x1xf32, #tpu.memory_space<vmem>>, vector<2x16x1xf32>
    %3 = vector.shape_cast %1 : vector<2x1x32xf32> to vector<2x1x32xf32>
    %4 = vector.broadcast %3 : vector<2x1x32xf32> to vector<2x16x32xf32>
    %5 = arith.mulf %0, %4 : vector<2x16x32xf32>
    %6 = tpu.concatenate %0, %4, %5 in 2 : vector<2x16x32xf32>, vector<2x16x32xf32>, vector<2x16x32xf32> -> vector<2x16x96xf32>
    %7 = arith.truncf %6 : vector<2x16x96xf32> to vector<2x16x96xbf16>
    %c0_8 = arith.constant 0 : index
    %c0_9 = arith.constant 0 : index
    %8 = vector.load %arg3[%c0_8, %c0_9] : memref<96x16xbf16, #tpu.memory_space<vmem>>, vector<96x16xbf16>
    %cst = arith.constant dense<0.000000e+00> : vector<2x16x16xf32>
    %9 = tpu.matmul %7, %8, %cst {dimension_numbers = #tpu.dot_dimension_numbers<[2], [0], [0, 1], [1], [0, 0, 0, 1, 1, 1], [], []>} : vector<2x16x96xbf16>, vector<96x16xbf16>, vector<2x16x16xf32> -> vector<2x16x16xf32>
    %c0_10 = arith.constant 0 : index
    %c0_11 = arith.constant 0 : index
    %c0_12 = arith.constant 0 : index
    %10 = vector.load %arg4[%c0_10, %c0_11, %c0_12] : memref<1x1x16xf32, #tpu.memory_space<vmem>>, vector<1x1x16xf32>
    %11 = vector.broadcast %10 : vector<1x1x16xf32> to vector<2x16x16xf32>
    %12 = arith.addf %9, %11 : vector<2x16x16xf32>
    %cst_13 = arith.constant 0.000000e+00 : f32
    %13 = vector.broadcast %cst_13 : f32 to vector<2x16x16xf32>
    %14 = arith.maximumf %12, %13 : vector<2x16x16xf32>
    %c0_14 = arith.constant 0 : index
    %c0_15 = arith.constant 0 : index
    %c0_16 = arith.constant 0 : index
    %15 = vector.load %arg5[%c0_14, %c0_15, %c0_16] : memref<1x1x16xf32, #tpu.memory_space<vmem>>, vector<1x1x16xf32>
    %16 = vector.broadcast %15 : vector<1x1x16xf32> to vector<2x16x16xf32>
    %17 = arith.mulf %14, %16 : vector<2x16x16xf32>
    %cst_17 = arith.constant dense<0.000000e+00> : vector<2x16xf32>
    %18 = vector.multi_reduction <add>, %17, %cst_17 [2] : vector<2x16x16xf32> to vector<2x16xf32>
    %19 = vector.shape_cast %18 : vector<2x16xf32> to vector<2x16x1xf32>
    %c0_18 = arith.constant 0 : index
    %c0_19 = arith.constant 0 : index
    %c0_20 = arith.constant 0 : index
    %20 = vector.load %arg6[%c0_18, %c0_19, %c0_20] : memref<1x1x1xf32, #tpu.memory_space<vmem>>, vector<1x1x1xf32>
    %21 = vector.broadcast %20 : vector<1x1x1xf32> to vector<2x16x1xf32>
    %22 = arith.addf %19, %21 : vector<2x16x1xf32>
    %cst_21 = arith.constant 0.000000e+00 : f32
    %23 = vector.broadcast %cst_21 : f32 to vector<2x16x1xf32>
    %24 = arith.cmpf ogt, %2, %23 : vector<2x16x1xf32>
    %cst_22 = arith.constant -1.000000e+30 : f32
    %25 = vector.broadcast %cst_22 : f32 to vector<2x16x1xf32>
    %26 = arith.select %24, %25, %22 : vector<2x16x1xi1>, vector<2x16x1xf32>
    %cst_23 = arith.constant dense<0xFF800000> : vector<2x1xf32>
    %27 = vector.multi_reduction <maximumf>, %26, %cst_23 [1] : vector<2x16x1xf32> to vector<2x1xf32>
    %28 = vector.shape_cast %27 : vector<2x1xf32> to vector<2x1x1xf32>
    %29 = vector.broadcast %28 : vector<2x1x1xf32> to vector<2x16x1xf32>
    %30 = arith.subf %26, %29 : vector<2x16x1xf32>
    %31 = math.exp %30 : vector<2x16x1xf32>
    %cst_24 = arith.constant dense<0.000000e+00> : vector<2x1xf32>
    %32 = vector.multi_reduction <add>, %31, %cst_24 [1] : vector<2x16x1xf32> to vector<2x1xf32>
    %33 = vector.shape_cast %32 : vector<2x1xf32> to vector<2x1x1xf32>
    %cst_25 = arith.constant 1.000000e-30 : f32
    %34 = vector.broadcast %cst_25 : f32 to vector<2x1x1xf32>
    %35 = arith.maximumf %33, %34 : vector<2x1x1xf32>
    %36 = vector.broadcast %35 : vector<2x1x1xf32> to vector<2x16x1xf32>
    %37 = arith.divf %31, %36 : vector<2x16x1xf32>
    %c0_26 = arith.constant 0 : index
    %c0_27 = arith.constant 0 : index
    %c0_28 = arith.constant 0 : index
    %38 = vector.load %arg9[%c0_26, %c0_27, %c0_28] : memref<2x16x1xf32, #tpu.memory_space<vmem>>, vector<2x16x1xf32>
    tpu.vector_store %arg9[%c0_26, %c0_27, %c0_28], %37 {strides = array<i32>} : memref<2x16x1xf32, #tpu.memory_space<vmem>>, vector<2x16x1xf32>,
    %39 = vector.broadcast %37 : vector<2x16x1xf32> to vector<2x16x32xf32>
    %40 = arith.mulf %39, %0 : vector<2x16x32xf32>
    %cst_29 = arith.constant dense<0.000000e+00> : vector<2x32xf32>
    %41 = vector.multi_reduction <add>, %40, %cst_29 [1] : vector<2x16x32xf32> to vector<2x32xf32>
    %42 = vector.shape_cast %41 : vector<2x32xf32> to vector<2x1x32xf32>
    %43 = tpu.concatenate %1, %42 in 2 : vector<2x1x32xf32>, vector<2x1x32xf32> -> vector<2x1x64xf32>
    %44 = arith.truncf %43 : vector<2x1x64xf32> to vector<2x1x64xbf16>
    %c0_30 = arith.constant 0 : index
    %c0_31 = arith.constant 0 : index
    %45 = vector.load %arg7[%c0_30, %c0_31] : memref<64x64xbf16, #tpu.memory_space<vmem>>, vector<64x64xbf16>
    %cst_32 = arith.constant dense<0.000000e+00> : vector<2x1x64xf32>
    %46 = tpu.matmul %44, %45, %cst_32 {dimension_numbers = #tpu.dot_dimension_numbers<[2], [0], [0, 1], [1], [0, 0, 0, 1, 1, 1], [], []>} : vector<2x1x64xbf16>, vector<64x64xbf16>, vector<2x1x64xf32> -> vector<2x1x64xf32>
    %c0_33 = arith.constant 0 : index
    %c0_34 = arith.constant 0 : index
    %c0_35 = arith.constant 0 : index
    %47 = vector.load %arg8[%c0_33, %c0_34, %c0_35] : memref<1x1x64xf32, #tpu.memory_space<vmem>>, vector<1x1x64xf32>
    %48 = vector.broadcast %47 : vector<1x1x64xf32> to vector<2x1x64xf32>
    %49 = arith.addf %46, %48 : vector<2x1x64xf32>
    %50 = vector.extract_strided_slice %49 {offsets = [0, 0, 0], sizes = [2, 1, 32], strides = [1, 1, 1]} : vector<2x1x64xf32> to vector<2x1x32xf32>
    %51 = math.tanh %50 : vector<2x1x32xf32>
    %52 = vector.extract_strided_slice %49 {offsets = [0, 0, 32], sizes = [2, 1, 32], strides = [1, 1, 1]} : vector<2x1x64xf32> to vector<2x1x32xf32>
    %53 = arith.negf %52 : vector<2x1x32xf32>
    %54 = math.exp %53 : vector<2x1x32xf32>
    %cst_36 = arith.constant 1.000000e+00 : f32
    %55 = vector.broadcast %cst_36 : f32 to vector<2x1x32xf32>
    %56 = arith.addf %55, %54 : vector<2x1x32xf32>
    %57 = arith.divf %55, %56 : vector<2x1x32xf32>
    %58 = arith.mulf %57, %51 : vector<2x1x32xf32>
    %cst_37 = arith.constant 1.000000e+00 : f32
    %59 = vector.broadcast %cst_37 : f32 to vector<2x1x32xf32>
    %60 = arith.subf %59, %57 : vector<2x1x32xf32>
    %61 = arith.mulf %60, %1 : vector<2x1x32xf32>
    %62 = arith.addf %58, %61 : vector<2x1x32xf32>
    %c0_38 = arith.constant 0 : index
    %c0_39 = arith.constant 0 : index
    %c0_40 = arith.constant 0 : index
    %63 = vector.load %arg10[%c0_38, %c0_39, %c0_40] : memref<2x1x32xf32, #tpu.memory_space<vmem>>, vector<2x1x32xf32>
    tpu.vector_store %arg10[%c0_38, %c0_39, %c0_40], %62 {strides = array<i32>} : memref<2x1x32xf32, #tpu.memory_space<vmem>>, vector<2x1x32xf32>,
    return
  }
}

module attributes {stable_mosaic.version = 11 : i64} {
  func.func @_pointer_kernel(%arg0: memref<2x16x32xf32, #tpu.memory_space<vmem>>, %arg1: memref<2x1x32xf32, #tpu.memory_space<vmem>>, %arg2: memref<2x16x1xf32, #tpu.memory_space<vmem>>, %arg3: memref<96x16xbf16, #tpu.memory_space<vmem>>, %arg4: memref<1x1x16xf32, #tpu.memory_space<vmem>>, %arg5: memref<1x1x16xf32, #tpu.memory_space<vmem>>, %arg6: memref<1x1x1xf32, #tpu.memory_space<vmem>>, %arg7: memref<64x64xbf16, #tpu.memory_space<vmem>>, %arg8: memref<1x1x64xf32, #tpu.memory_space<vmem>>, %arg9: memref<2x16x1xf32, #tpu.memory_space<vmem>>, %arg10: memref<2x1x32xf32, #tpu.memory_space<vmem>>) attributes {dimension_semantics = [], scalar_prefetch = 0 : i64, scratch_operands = 0 : i64, tpu.core_type = #tpu.core_type<tc>} {
    %c0 = arith.constant 0 : index
    %c0_0 = arith.constant 0 : index
    %c0_1 = arith.constant 0 : index
    %0 = vector.load %arg0[%c0, %c0_0, %c0_1] : memref<2x16x32xf32, #tpu.memory_space<vmem>>, vector<2x16x32xf32>
    %c0_2 = arith.constant 0 : index
    %c0_3 = arith.constant 0 : index
    %c0_4 = arith.constant 0 : index
    %1 = vector.load %arg1[%c0_2, %c0_3, %c0_4] : memref<2x1x32xf32, #tpu.memory_space<vmem>>, vector<2x1x32xf32>
    %c0_5 = arith.constant 0 : index
    %c0_6 = arith.constant 0 : index
    %c0_7 = arith.constant 0 : index
    %2 = vector.load %arg2[%c0_5, %c0_6, %c0_7] : memref<2x16x1xf32, #tpu.memory_space<vmem>>, vector<2x16x1xf32>
    %3 = vector.shape_cast %1 : vector<2x1x32xf32> to vector<2x1x32xf32>
    %4 = vector.broadcast %3 : vector<2x1x32xf32> to vector<2x16x32xf32>
    %5 = arith.mulf %0, %4 : vector<2x16x32xf32>
    %6 = tpu.concatenate %0, %4, %5 in 2 : vector<2x16x32xf32>, vector<2x16x32xf32>, vector<2x16x32xf32> -> vector<2x16x96xf32>
    %7 = arith.truncf %6 : vector<2x16x96xf32> to vector<2x16x96xbf16>
    %c0_8 = arith.constant 0 : index
    %c0_9 = arith.constant 0 : index
    %8 = vector.load %arg3[%c0_8, %c0_9] : memref<96x16xbf16, #tpu.memory_space<vmem>>, vector<96x16xbf16>
    %cst = arith.constant dense<0.000000e+00> : vector<2x16x16xf32>
    %9 = tpu.matmul %7, %8, %cst {dimension_numbers = #tpu.dot_dimension_numbers<[2], [0], [0, 1], [1], [0, 0, 0, 1, 1, 1], [], []>} : vector<2x16x96xbf16>, vector<96x16xbf16>, vector<2x16x16xf32> -> vector<2x16x16xf32>
    %c0_10 = arith.constant 0 : index
    %c0_11 = arith.constant 0 : index
    %c0_12 = arith.constant 0 : index
    %10 = vector.load %arg4[%c0_10, %c0_11, %c0_12] : memref<1x1x16xf32, #tpu.memory_space<vmem>>, vector<1x1x16xf32>
    %11 = vector.broadcast %10 : vector<1x1x16xf32> to vector<2x16x16xf32>
    %12 = arith.addf %9, %11 : vector<2x16x16xf32>
    %cst_13 = arith.constant 0.000000e+00 : f32
    %13 = vector.broadcast %cst_13 : f32 to vector<2x16x16xf32>
    %14 = arith.maximumf %12, %13 : vector<2x16x16xf32>
    %c0_14 = arith.constant 0 : index
    %c0_15 = arith.constant 0 : index
    %c0_16 = arith.constant 0 : index
    %15 = vector.load %arg5[%c0_14, %c0_15, %c0_16] : memref<1x1x16xf32, #tpu.memory_space<vmem>>, vector<1x1x16xf32>
    %16 = vector.broadcast %15 : vector<1x1x16xf32> to vector<2x16x16xf32>
    %17 = arith.mulf %14, %16 : vector<2x16x16xf32>
    %cst_17 = arith.constant dense<0.000000e+00> : vector<2x16xf32>
    %18 = vector.multi_reduction <add>, %17, %cst_17 [2] : vector<2x16x16xf32> to vector<2x16xf32>
    %19 = vector.shape_cast %18 : vector<2x16xf32> to vector<2x16x1xf32>
    %c0_18 = arith.constant 0 : index
    %c0_19 = arith.constant 0 : index
    %c0_20 = arith.constant 0 : index
    %20 = vector.load %arg6[%c0_18, %c0_19, %c0_20] : memref<1x1x1xf32, #tpu.memory_space<vmem>>, vector<1x1x1xf32>
    %21 = vector.broadcast %20 : vector<1x1x1xf32> to vector<2x16x1xf32>
    %22 = arith.addf %19, %21 : vector<2x16x1xf32>
    %cst_21 = arith.constant 0.000000e+00 : f32
    %23 = vector.broadcast %cst_21 : f32 to vector<2x16x1xf32>
    %24 = arith.cmpf ogt, %2, %23 : vector<2x16x1xf32>
    %cst_22 = arith.constant -1.000000e+30 : f32
    %25 = vector.broadcast %cst_22 : f32 to vector<2x16x1xf32>
    %26 = arith.select %24, %25, %22 : vector<2x16x1xi1>, vector<2x16x1xf32>
    %cst_23 = arith.constant dense<0xFF800000> : vector<2x1xf32>
    %27 = vector.multi_reduction <maximumf>, %26, %cst_23 [1] : vector<2x16x1xf32> to vector<2x1xf32>
    %28 = vector.shape_cast %27 : vector<2x1xf32> to vector<2x1x1xf32>
    %29 = vector.broadcast %28 : vector<2x1x1xf32> to vector<2x16x1xf32>
    %30 = arith.subf %26, %29 : vector<2x16x1xf32>
    %31 = math.exp %30 : vector<2x16x1xf32>
    %cst_24 = arith.constant dense<0.000000e+00> : vector<2x1xf32>
    %32 = vector.multi_reduction <add>, %31, %cst_24 [1] : vector<2x16x1xf32> to vector<2x1xf32>
    %33 = vector.shape_cast %32 : vector<2x1xf32> to vector<2x1x1xf32>
    %cst_25 = arith.constant 1.000000e-30 : f32
    %34 = vector.broadcast %cst_25 : f32 to vector<2x1x1xf32>
    %35 = arith.maximumf %33, %34 : vector<2x1x1xf32>
    %36 = vector.broadcast %35 : vector<2x1x1xf32> to vector<2x16x1xf32>
    %37 = arith.divf %31, %36 : vector<2x16x1xf32>
    %c0_26 = arith.constant 0 : index
    %c0_27 = arith.constant 0 : index
    %c0_28 = arith.constant 0 : index
    %38 = vector.load %arg9[%c0_26, %c0_27, %c0_28] : memref<2x16x1xf32, #tpu.memory_space<vmem>>, vector<2x16x1xf32>
    tpu.vector_store %arg9[%c0_26, %c0_27, %c0_28], %37 {strides = array<i32>} : memref<2x16x1xf32, #tpu.memory_space<vmem>>, vector<2x16x1xf32>,
    %39 = vector.broadcast %37 : vector<2x16x1xf32> to vector<2x16x32xf32>
    %40 = arith.mulf %39, %0 : vector<2x16x32xf32>
    %cst_29 = arith.constant dense<0.000000e+00> : vector<2x32xf32>
    %41 = vector.multi_reduction <add>, %40, %cst_29 [1] : vector<2x16x32xf32> to vector<2x32xf32>
    %42 = vector.shape_cast %41 : vector<2x32xf32> to vector<2x1x32xf32>
    %43 = tpu.concatenate %1, %42 in 2 : vector<2x1x32xf32>, vector<2x1x32xf32> -> vector<2x1x64xf32>
    %44 = arith.truncf %43 : vector<2x1x64xf32> to vector<2x1x64xbf16>
    %c0_30 = arith.constant 0 : index
    %c0_31 = arith.constant 0 : index
    %45 = vector.load %arg7[%c0_30, %c0_31] : memref<64x64xbf16, #tpu.memory_space<vmem>>, vector<64x64xbf16>
    %cst_32 = arith.constant dense<0.000000e+00> : vector<2x1x64xf32>
    %46 = tpu.matmul %44, %45, %cst_32 {dimension_numbers = #tpu.dot_dimension_numbers<[2], [0], [0, 1], [1], [0, 0, 0, 1, 1, 1], [], []>} : vector<2x1x64xbf16>, vector<64x64xbf16>, vector<2x1x64xf32> -> vector<2x1x64xf32>
    %c0_33 = arith.constant 0 : index
    %c0_34 = arith.constant 0 : index
    %c0_35 = arith.constant 0 : index
    %47 = vector.load %arg8[%c0_33, %c0_34, %c0_35] : memref<1x1x64xf32, #tpu.memory_space<vmem>>, vector<1x1x64xf32>
    %48 = vector.broadcast %47 : vector<1x1x64xf32> to vector<2x1x64xf32>
    %49 = arith.addf %46, %48 : vector<2x1x64xf32>
    %50 = vector.extract_strided_slice %49 {offsets = [0, 0, 0], sizes = [2, 1, 32], strides = [1, 1, 1]} : vector<2x1x64xf32> to vector<2x1x32xf32>
    %51 = math.tanh %50 : vector<2x1x32xf32>
    %52 = vector.extract_strided_slice %49 {offsets = [0, 0, 32], sizes = [2, 1, 32], strides = [1, 1, 1]} : vector<2x1x64xf32> to vector<2x1x32xf32>
    %53 = arith.negf %52 : vector<2x1x32xf32>
    %54 = math.exp %53 : vector<2x1x32xf32>
    %cst_36 = arith.constant 1.000000e+00 : f32
    %55 = vector.broadcast %cst_36 : f32 to vector<2x1x32xf32>
    %56 = arith.addf %55, %54 : vector<2x1x32xf32>
    %57 = arith.divf %55, %56 : vector<2x1x32xf32>
    %58 = arith.mulf %57, %51 : vector<2x1x32xf32>
    %cst_37 = arith.constant 1.000000e+00 : f32
    %59 = vector.broadcast %cst_37 : f32 to vector<2x1x32xf32>
    %60 = arith.subf %59, %57 : vector<2x1x32xf32>
    %61 = arith.mulf %60, %1 : vector<2x1x32xf32>
    %62 = arith.addf %58, %61 : vector<2x1x32xf32>
    %c0_38 = arith.constant 0 : index
    %c0_39 = arith.constant 0 : index
    %c0_40 = arith.constant 0 : index
    %63 = vector.load %arg10[%c0_38, %c0_39, %c0_40] : memref<2x1x32xf32, #tpu.memory_space<vmem>>, vector<2x1x32xf32>
    tpu.vector_store %arg10[%c0_38, %c0_39, %c0_40], %62 {strides = array<i32>} : memref<2x1x32xf32, #tpu.memory_space<vmem>>, vector<2x1x32xf32>,
    return
  }
}

</mosaic_0001>

<bundles_post_ra>
// kernel: play_reader_forward.14
= control target key start
LH: loop header
LB: loop body
LE: loop exit
PB: predicated region body
PF: predicated region fallthrough
CT: control target
= control target key end

     0   :  { %vm64_vm0 = vcmask 1041408   ;;  %vm51_vm1 = vcmask 293888   ;;  %vm97_vm2 = vcmask 785408   ;;  %s222_s1 = inlined_call_operand.vmem [shape: bf16[36,96], index: 1, kind: input, shape index: {}]   ;;  %s223_s2 = inlined_call_operand.vmem [shape: f32[1,96], index: 2, kind: input, shape index: {}]   ;;  %s224_s0 = inlined_call_operand.vmem [shape: f32[64,36], index: 0, kind: input, shape index: {}]   ;;  %s225_s3 = inlined_call_operand.vmem [shape: f32[64,96], index: 3, kind: output, shape index: {}]  }
   0x1   :  { %v31_v0 = vld [vmem:[%s222_s1 + $0x10] sm:$0x3]  ;;  %v123_v4 = vld [vmem:[%s222_s1 + $0x8] sm:$0xff]  ;;  %v122_v5 = vld [vmem:[%s222_s1] sm:$0xff] }
   0x2   :  { %v45_v1 = vunpack.c.l.b16 %v31_v0  ;;  %v15_v6 = vld [vmem:[%s224_s0] sm:$0xff]  ;;  %v16_v7 = vld [vmem:[%s224_s0 + $0x8] sm:$0xff]  ;;  %v17_v8 = vld [vmem:[%s224_s0 + $0x10] sm:$0xff] }
   0x3   :  { %v18_v9 = vld [vmem:[%s224_s0 + $0x18] sm:$0xff]  ;;  %v19_v10 = vld [vmem:[%s224_s0 + $0x20] sm:$0xff]  ;;  %v20_v11 = vld [vmem:[%s224_s0 + $0x28] sm:$0xff]  ;;  %v23_v14 = vpack.c.bf16 %v16_v7, %v15_v6 }
   0x4   :  { %v48_v2 = vpack.c.b16 %v45_v1, %v45_v1  ;;  %v21_v12 = vld [vmem:[%s224_s0 + $0x30] sm:$0xff]  ;;  %v22_v13 = vld [vmem:[%s224_s0 + $0x38] sm:$0xff]  ;;  %v24_v15 = vpack.c.bf16 %v18_v9, %v17_v8  ;;  %v25_v16 = vpack.c.bf16 %v20_v11, %v19_v10  ;;  %v133_v18 = vld [vmem:[%s223_s2] ss:$0 sm:$0xff] }
   0x5   :  { %v26_v17 = vpack.c.bf16 %v22_v13, %v21_v12 }
   0x6   :  { %v66_v3 = vsel %vm64_vm0, %v48_v2, 0 }
   0x7   :  { %73 = vmatpush.bf16.msra.mxu0 %v66_v3  ;;  %124 = vmatpush.bf16.msra.mxu1 %v66_v3 }
   0x8   :  { %125 = vmatpush.bf16.msra.mxu2 %v66_v3  ;;  %126 = vmatpush.bf16.msra.mxu3 %v66_v3 }
   0xb   :  { %74 = vmatpush.bf16.msra.mxu0 %v123_v4  ;;  %127 = vmatpush.bf16.msra.mxu1 %v123_v4 }
   0xc   :  { %128 = vmatpush.bf16.msra.mxu2 %v123_v4  ;;  %129 = vmatpush.bf16.msra.mxu3 %v123_v4 }
   0xf   :  { %75 = vmatpush.bf16.msra.mxu0 %v122_v5  ;;  %130 = vmatpush.bf16.msra.mxu1 %v122_v5 }
  0x10   :  { %131 = vmatpush.bf16.msra.mxu2 %v122_v5  ;;  %132 = vmatpush.bf16.msra.mxu3 %v122_v5 }
  0x12   :  { %118 = vmatmul.msk.bf16.vlgmr.msra.gmra.mxu0 %vm51_vm1, %v23_v14  ;;  %119 = vmatmul.msk.bf16.vlgmr.msra.gmra.mxu1 %vm51_vm1, %v24_v15 }
  0x13   :  { %120 = vmatmul.msk.bf16.vlgmr.msra.gmra.mxu2 %vm51_vm1, %v25_v16  ;;  %121 = vmatmul.msk.bf16.vlgmr.msra.gmra.mxu3 %vm51_vm1, %v26_v17 }
  0x8f   :  { %v77_v19 = vpop.f32.mrf.mxu0  ;;  %v82_v20 = vpop.f32.mrf.mxu1 }
  0x90   :  { %v78_v21 = vadd.f32 %v133_v18, %v77_v19  ;;  %v83_v22 = vadd.f32 %v133_v18, %v82_v20 }
  0x92   :  { %98 = vst.msk [vmem:[%s225_s3] sm:$0xff] %vm97_vm2, %v78_v21 }
  0x93   :  { %100 = vst.msk [vmem:[%s225_s3 + $0x10] sm:$0xff] %vm97_vm2, %v83_v22 }
  0x96   :  { %v87_v23 = vpop.f32.mrf.mxu2  ;;  %v92_v24 = vpop.f32.mrf.mxu3 }
  0x97   :  { %v88_v25 = vadd.f32 %v133_v18, %v87_v23  ;;  %v93_v26 = vadd.f32 %v133_v18, %v92_v24  ;;  %v79_v27 = vpop.f32.mrf.mxu0  ;;  %v84_v28 = vpop.f32.mrf.mxu1 }
  0x98   :  { %v80_v29 = vadd.f32 %v133_v18, %v79_v27  ;;  %v85_v30 = vadd.f32 %v133_v18, %v84_v28 }
  0x99   :  { %102 = vst.msk [vmem:[%s225_s3 + $0x20] sm:$0xff] %vm97_vm2, %v88_v25 }
  0x9a   :  { %104 = vst.msk [vmem:[%s225_s3 + $0x30] sm:$0xff] %vm97_vm2, %v93_v26 }
  0x9b   :  { %99 = vst.msk [vmem:[%s225_s3 + $0x8] sm:$0xff] %vm97_vm2, %v80_v29 }
  0x9c   :  { %101 = vst.msk [vmem:[%s225_s3 + $0x18] sm:$0xff] %vm97_vm2, %v85_v30 }
  0x9e   :  { %v89_v31 = vpop.f32.mrf.mxu2  ;;  %v94_v32 = vpop.f32.mrf.mxu3 }
  0x9f   :  { %v90_v33 = vadd.f32 %v133_v18, %v89_v31  ;;  %v95_v34 = vadd.f32 %v133_v18, %v94_v32 }
  0xa1   :  { %103 = vst.msk [vmem:[%s225_s3 + $0x28] sm:$0xff] %vm97_vm2, %v90_v33 }
  0xa2   :  { %105 = vst.msk [vmem:[%s225_s3 + $0x38] sm:$0xff] %vm97_vm2, %v95_v34 }

// kernel: play_reader_forward.17
= control target key start
LH: loop header
LB: loop body
LE: loop exit
PB: predicated region body
PF: predicated region fallthrough
CT: control target
= control target key end

     0   :  { %vm33_vm0 = vcmask 261120   ;;  %v73_v18 = vlaneseq  ;;  %v703_v19 = vmov 0   ;;  %vm96_vm6 = vcmask 130048   ;;  %s705_s26 = smov 64   ;;  %s706_s27 = smov 96   ;;  %s931_s0 = inlined_call_operand.vmem [shape: f32[2,16,32], index: 0, kind: input, shape index: {}]   ;;  %s932_s1 = inlined_call_operand.vmem [shape: f32[2,1,16], index: 1, kind: input, shape index: {}]   ;;  %s933_s3 = inlined_call_operand.vmem [shape: f32[1,1,64], index: 3, kind: input, shape index: {}]   ;;  %s934_s2 = inlined_call_operand.vmem [shape: bf16[128,64], index: 2, kind: input, shape index: {}]   ;;  %s935_s4 = inlined_call_operand.vmem [shape: f32[2,16,32], index: 4, kind: output, shape index: {}]  }
   0x1   :  { %v735_v0 = vld [vmem:[%s931_s0] sm:$0xff]  ;;  %v740_v1 = vld [vmem:[%s931_s0 + $0x8] sm:$0xff]  ;;  %v745_v2 = vld [vmem:[%s931_s0 + $0x10] sm:$0xff] }
   0x2   :  { %v24_v3 = vpack.c.bf16 %v735_v0, %v735_v0  ;;  %v25_v4 = vpack.c.bf16 %v740_v1, %v740_v1  ;;  %v754_v5 = vld [vmem:[%s931_s0 + $0x18] sm:$0xff]  ;;  %v26_v6 = vpack.c.bf16 %v745_v2, %v745_v2  ;;  %v22_v16 = vld [vmem:[%s932_s1] sm:$0x1]  ;;  %v23_v17 = vld [vmem:[%s932_s1 + $0x1] sm:$0x1]  ;;  %v74_v22 = vshrl.u32 %v73_v18, 7 }
   0x3   :  { %v27_v7 = vpack.c.bf16 %v754_v5, %v754_v5  ;;  %vm84_vm1 = vcmp.gt.f32.partialorder %v22_v16, 0.0  ;;  %vm85_vm2 = vcmp.gt.f32.partialorder %v23_v17, 0.0  ;;  %v77_v23 = vand.u32 127, %v73_v18  ;;  %s704_s1 = smov 32  }
   0x4   :  { %v30_v8 = vunpack.c.l.b16 %v24_v3  ;;  %v31_v9 = vunpack.c.l.b16 %v25_v4  ;;  %v53_v10 = vunpack.c.l.b16 %v26_v6  ;;  %v86_v20 = vsel %vm84_vm1, 1, %v703_v19 }
   0x5   :  { %v54_v11 = vunpack.c.l.b16 %v27_v7  ;;  %v87_v21 = vsel %vm85_vm2, 1, %v703_v19  ;;  %v88_v24 = vperm.slane %v86_v20, 0  ;;  %vm78_vm3 = vcmp.eq.s32.totalorder %v74_v22, %v77_v23 }
   0x6   :  { %v32_v12 = vpack.c.b16 %v31_v9, %v30_v8  ;;  %v89_v25 = vperm.slane %v87_v21, 0  ;;  %v75_v33 = vadd.s32 8, %v74_v22 }
   0x7   :  { %v55_v13 = vpack.c.b16 %v54_v11, %v53_v10  ;;  %vm770_vm4 = vcmp.eq.s32.totalorder %v88_v24, 1 }
   0x8   :  { %v35_v14 = vsel %vm33_vm0, %v32_v12, 0  ;;  %vm774_vm5 = vcmp.eq.s32.totalorder %v89_v25, 1  ;;  %vm79_vm7 = vcmp.eq.s32.totalorder %v75_v33, %v77_v23 }
   0x9   :  { %44 = vmatpush.bf16.xpose.msra.mxu0 %v35_v14  ;;  %v57_v15 = vsel %vm33_vm0, %v55_v13, 0 }
   0xa   :  { %66 = vmatpush.bf16.xpose.msra.mxu1 %v57_v15 }
  0x10   :  { %572 = vmatmul.msk.bf16.vlgmr.msra.gmra.mxu0 %vm33_vm0, %v32_v12 }
  0x11   :  { %217 = vmatpush.bf16.msrb.mxu0 %v32_v12  ;;  %573 = vmatmul.msk.bf16.vlgmr.msra.gmra.mxu1 %vm33_vm0, %v55_v13 }
  0x12   :  { %240 = vmatpush.bf16.msrb.mxu1 %v55_v13 }
  0x8d   :  { %v46_v27 = vpop.f32.mrf.mxu0 }
  0x8e   :  { %v80_v29 = vsel %vm78_vm3, 0.0, %v46_v27  ;;  %v68_v30 = vpop.f32.mrf.mxu1  ;;  %v619_v27 = vld [vmem:[%s934_s2 + $0x38] sm:$0xff] }
  0x8f   :  { %v82_v31 = vsel %vm78_vm3, 0.0, %v68_v30  ;;  %v92_v32 = vsel %vm770_vm4, -1e+30, %v80_v29  ;;  %620 = vmatpush.bf16.msra.mxu3 %v619_v27  ;;  %401 = vmatpush.bf16.msra.mxu2 %v619_v27  ;;  %v616_v30 = vld [vmem:[%s934_s2 + $0x20] sm:$0xff] }
  0x90   :  { %v94_v34 = vsel %vm774_vm5, -1e+30, %v82_v31  ;;  %v97_v35 = vsel %vm96_vm6, %v92_v32, -inf }
  0x91   :  { %v103_v36 = vsel %vm96_vm6, %v94_v34, -inf  ;;  %98 = vmax.xlane.f32.xlu0 %v97_v35 }
  0x92   :  { %104 = vmax.xlane.f32.xlu1 %v103_v36 }
  0x95   :  { %v48_v37 = vpop.f32.mrf.mxu0 }
  0x96   :  { %v81_v38 = vsel %vm79_vm7, 0.0, %v48_v37  ;;  %v70_v39 = vpop.f32.mrf.mxu1 }
  0x97   :  { %v83_v40 = vsel %vm79_vm7, 0.0, %v70_v39  ;;  %v93_v41 = vsel %vm770_vm4, -1e+30, %v81_v38 }
  0x98   :  { %v95_v42 = vsel %vm774_vm5, -1e+30, %v83_v40  ;;  %v100_v43 = vsel %vm96_vm6, %v93_v41, -inf }
  0x99   :  { %v106_v44 = vsel %vm96_vm6, %v95_v42, -inf  ;;  %101 = vmax.xlane.f32.xlu0 %v100_v43 }
  0x9a   :  { %107 = vmax.xlane.f32.xlu1 %v106_v44 }
 0x104   :  { %v99_v45 = vpop.xlane.xlu0 %98 }
 0x105   :  { %v105_v46 = vpop.xlane.xlu1 %104  ;;  %v109_v47 = vsub.f32 %v92_v32, %v99_v45 }
 0x106   :  { %v111_v48 = vsub.f32 %v94_v34, %v105_v46 }
 0x107   :  { %v113_v49 = vmul.f32 1.442695, %v109_v47 }
 0x108   :  { %v117_v50 = vmul.f32 1.442695, %v111_v48 }
 0x109   :  { %663 = vpow2.f32 %v113_v49 }
 0x10a   :  { %665 = vpow2.f32 %v117_v50 }
 0x10c   :  { %v102_v51 = vpop.xlane.xlu0 %101 }
 0x10d   :  { %v108_v52 = vpop.xlane.xlu1 %107  ;;  %v110_v53 = vsub.f32 %v93_v41, %v102_v51 }
 0x10e   :  { %v112_v54 = vsub.f32 %v95_v42, %v108_v52 }
 0x10f   :  { %v790_v55 = vpop.eup %663  ;;  %v115_v56 = vmul.f32 1.442695, %v110_v53 }
 0x110   :  { %v792_v57 = vpop.eup %665  ;;  %v119_v58 = vmul.f32 1.442695, %v112_v54  ;;  %v121_v59 = vsel %vm96_vm6, %v790_v55, 0.0 }
 0x111   :  { %667 = vpow2.f32 %v115_v56  ;;  %122 = vadd.xlane.f32.xlu2 %v121_v59  ;;  %v127_v60 = vsel %vm96_vm6, %v792_v57, 0.0 }
 0x112   :  { %669 = vpow2.f32 %v119_v58  ;;  %128 = vadd.xlane.f32.xlu0 %v127_v60 }
 0x117   :  { %v798_v61 = vpop.eup %667 }
 0x118   :  { %v800_v62 = vpop.eup %669  ;;  %v124_v63 = vsel %vm96_vm6, %v798_v61, 0.0 }
 0x119   :  { %v130_v3 = vsel %vm96_vm6, %v800_v62, 0.0  ;;  %125 = vadd.xlane.f32.xlu2 %v124_v63 }
 0x11a   :  { %131 = vadd.xlane.f32.xlu1 %v130_v3 }
 0x184   :  { %v123_v4 = vpop.xlane.xlu2 %122 }
 0x185   :  { %v133_v6 = vmax.f32 %v123_v4, 1e-30  ;;  %v129_v7 = vpop.xlane.xlu0 %128 }
 0x186   :  { %v135_v8 = vmax.f32 %v129_v7, 1e-30 }
 0x187   :  { %671 = vrcp.f32 %v133_v6  ;;  %vm142_vm9 = vweird.f32 %v133_v6  ;;  %v148_v20 = vand.u32 2147483648, %v133_v6  ;;  %v146_v23 = vand.u32 2147483647, %v133_v6 }
 0x188   :  { %673 = vrcp.f32 %v135_v8  ;;  %v176_v24 = vand.u32 2147483647, %v135_v8  ;;  %v178_v25 = vand.u32 2147483648, %v135_v8  ;;  %vm172_vm12 = vweird.f32 %v135_v8 }
 0x189   :  { %v149_v33 = vor.u32 1.1754944e-38, %v148_v20  ;;  %vm147_vm14 = vcmp.eq.f32.partialorder %v146_v23, 8.507059e+37 }
 0x18a   :  { %vm177_vm15 = vcmp.eq.f32.partialorder %v176_v24, 8.507059e+37  ;;  %v179_v36 = vor.u32 1.1754944e-38, %v178_v25 }
 0x18c   :  { %v126_v9 = vpop.xlane.xlu2 %125 }
 0x18d   :  { %v672_v10 = vpop.eup %671  ;;  %v132_v11 = vpop.xlane.xlu1 %131  ;;  %v134_v12 = vmax.f32 %v126_v9, 1e-30 }
 0x18e   :  { %v674_v13 = vpop.eup %673  ;;  %v138_v14 = vmul.f32 %v672_v10, %v133_v6  ;;  %v136_v15 = vmax.f32 %v132_v11, 1e-30  ;;  %vm143_vm8 = vweird.f32 %v672_v10 }
 0x18f   :  { %v168_v16 = vmul.f32 %v674_v13, %v135_v8  ;;  %675 = vrcp.f32 %v134_v12  ;;  %vm173_vm10 = vweird.f32 %v674_v13  ;;  %vm806_vm11 = vmor %vm142_vm9, %vm143_vm8  ;;  %v163_v40 = vand.u32 2147483648, %v134_v12 }
 0x190   :  { %v139_v17 = vsub.f32 1.0, %v138_v14  ;;  %677 = vrcp.f32 %v136_v15  ;;  %vm810_vm13 = vmor %vm172_vm12, %vm173_vm10  ;;  %v193_v39 = vand.u32 2147483648, %v136_v15  ;;  %v161_v43 = vand.u32 2147483647, %v134_v12 }
 0x191   :  { %v169_v18 = vsub.f32 1.0, %v168_v16  ;;  %v191_v46 = vand.u32 2147483647, %v136_v15  ;;  %vm157_vm3 = vweird.f32 %v134_v12  ;;  %vm187_vm4 = vweird.f32 %v136_v15 }
 0x192   :  { %v140_v19 = vmul.f32 %v672_v10, %v139_v17  ;;  %v164_v50 = vor.u32 1.1754944e-38, %v163_v40  ;;  %v194_v52 = vor.u32 1.1754944e-38, %v193_v39  ;;  %vm162_vm8 = vcmp.eq.f32.partialorder %v161_v43, 8.507059e+37 }
 0x193   :  { %v170_v21 = vmul.f32 %v674_v13, %v169_v18  ;;  %vm192_vm9 = vcmp.eq.f32.partialorder %v191_v46, 8.507059e+37  ;;  %vm312_vm10 = vcmask 785408  }
 0x194   :  { %v141_v22 = vadd.f32 %v672_v10, %v140_v19 }
 0x195   :  { %v676_v26 = vpop.eup %675  ;;  %v171_v28 = vadd.f32 %v674_v13, %v170_v21 }
 0x196   :  { %v678_v29 = vpop.eup %677  ;;  %v153_v31 = vmul.f32 %v676_v26, %v134_v12  ;;  %v145_v32 = vsel %vm806_vm11, %v672_v10, %v141_v22  ;;  %vm158_vm1 = vweird.f32 %v676_v26 }
 0x197   :  { %v183_v34 = vmul.f32 %v678_v29, %v136_v15  ;;  %v175_v35 = vsel %vm810_vm13, %v674_v13, %v171_v28  ;;  %v150_v41 = vsel %vm147_vm14, %v149_v33, %v145_v32  ;;  %vm188_vm2 = vweird.f32 %v678_v29  ;;  %vm159_vm5 = vmor %vm157_vm3, %vm158_vm1  ;;  %v618_v28 = vld [vmem:[%s934_s2 + $0x30] sm:$0xff]  ;;  %v613_v33 = vld [vmem:[%s934_s2 + $0x8] sm:$0xff] }
 0x198   :  { %v154_v37 = vsub.f32 1.0, %v153_v31  ;;  %v180_v44 = vsel %vm177_vm15, %v179_v36, %v175_v35  ;;  %v151_v48 = vmul.f32 %v790_v55, %v150_v41  ;;  %vm189_vm7 = vmor %vm187_vm4, %vm188_vm2  ;;  %621 = vmatpush.bf16.msra.mxu3 %v618_v28  ;;  %402 = vmatpush.bf16.msra.mxu2 %v618_v28  ;;  %v615_v31 = vld [vmem:[%s934_s2 + $0x18] sm:$0xff]  ;;  %v614_v32 = vld [vmem:[%s934_s2 + $0x10] sm:$0xff] }
 0x199   :  { %v184_v38 = vsub.f32 1.0, %v183_v34  ;;  %v181_v51 = vmul.f32 %v792_v57, %v180_v44  ;;  %v612_v34 = vld [vmem:[%s934_s2] sm:$0xff] }
 0x19a   :  { %v155_v42 = vmul.f32 %v676_v26, %v154_v37  ;;  %v197_v59 = vpack.c.bf16 %v151_v48, %v151_v48 }
 0x19b   :  { %v185_v45 = vmul.f32 %v678_v29, %v184_v38  ;;  %v199_v55 = vpack.c.bf16 %v181_v51, %v181_v51 }
 0x19c   :  { %v156_v47 = vadd.f32 %v676_v26, %v155_v42  ;;  %v203_v6 = vunpack.c.l.b16 %v197_v59 }
 0x19d   :  { %v186_v49 = vadd.f32 %v678_v29, %v185_v45  ;;  %v226_v8 = vunpack.c.l.b16 %v199_v55 }
 0x19e   :  { %v160_v53 = vsel %vm159_vm5, %v676_v26, %v156_v47 }
 0x19f   :  { %v165_v54 = vsel %vm162_vm8, %v164_v50, %v160_v53  ;;  %v190_v56 = vsel %vm189_vm7, %v678_v29, %v186_v49  ;;  %v617_v29 = vld [vmem:[%s934_s2 + $0x28] sm:$0xff] }
 0x1a0   :  { %v166_v58 = vmul.f32 %v798_v61, %v165_v54  ;;  %v195_v60 = vsel %vm192_vm9, %v194_v52, %v190_v56  ;;  %622 = vmatpush.bf16.msra.mxu3 %v617_v29  ;;  %403 = vmatpush.bf16.msra.mxu2 %v617_v29 }
 0x1a1   :  { %v196_v63 = vmul.f32 %v800_v62, %v195_v60 }
 0x1a2   :  { %v198_v3 = vpack.c.bf16 %v166_v58, %v166_v58 }
 0x1a3   :  { %v200_v4 = vpack.c.bf16 %v196_v63, %v196_v63 }
 0x1a4   :  { %v204_v7 = vunpack.c.l.b16 %v198_v3  ;;  %623 = vmatpush.bf16.msra.mxu3 %v616_v30  ;;  %404 = vmatpush.bf16.msra.mxu2 %v616_v30 }
 0x1a5   :  { %v227_v57 = vunpack.c.l.b16 %v200_v4 }
 0x1a6   :  { %v205_v9 = vpack.c.b16 %v204_v7, %v203_v6 }
 0x1a7   :  { %v228_v10 = vpack.c.b16 %v227_v57, %v226_v8 }
 0x1a8   :  { %574 = vmatmul.msk.bf16.vlgmr.msrb.gmra.mxu0 %vm96_vm6, %v205_v9  ;;  %624 = vmatpush.bf16.msra.mxu3 %v615_v31 }
 0x1a9   :  { %575 = vmatmul.msk.bf16.vlgmr.msrb.gmra.mxu1 %vm96_vm6, %v228_v10  ;;  %405 = vmatpush.bf16.msra.mxu2 %v615_v31  ;;  %vm307_vm6 = vcmask 523264  }
 0x1ac   :  { %625 = vmatpush.bf16.msra.mxu3 %v614_v32 }
 0x1ad   :  { %406 = vmatpush.bf16.msra.mxu2 %v614_v32 }
 0x1b0   :  { %626 = vmatpush.bf16.msra.mxu3 %v613_v33 }
 0x1b1   :  { %407 = vmatpush.bf16.msra.mxu2 %v613_v33 }
 0x1b4   :  { %627 = vmatpush.bf16.msra.mxu3 %v612_v34 }
 0x1b5   :  { %408 = vmatpush.bf16.msra.mxu2 %v612_v34 }
 0x225   :  { %v219_v11 = vpop.f32.mrf.mxu0 }
 0x226   :  { %v242_v12 = vpop.f32.mrf.mxu1  ;;  %v247_v13 = vmul.f32 %v219_v11, %v735_v0  ;;  %v251_v21 = vsub.f32 %v735_v0, %v219_v11 }
 0x227   :  { %v249_v20 = vmul.f32 %v242_v12, %v745_v2  ;;  %v253_v25 = vsub.f32 %v745_v2, %v242_v12 }
 0x22d   :  { %v221_v61 = vpop.f32.mrf.mxu0 }
 0x22e   :  { %v632_v14 = vpack.i.bf16 %v221_v61, %v219_v11  ;;  %v248_v62 = vmul.f32 %v221_v61, %v740_v1  ;;  %v244_v15 = vpop.f32.mrf.mxu1  ;;  %v252_v19 = vsub.f32 %v740_v1, %v221_v61 }
 0x22f   :  { %v637_v16 = vpack.i.bf16 %v244_v15, %v242_v12  ;;  %v250_v18 = vmul.f32 %v244_v15, %v754_v5  ;;  %v254_v24 = vsub.f32 %v754_v5, %v244_v15 }
 0x230   :  { %v642_v17 = vpack.i.bf16 %v248_v62, %v247_v13  ;;  %633 = vrot.lane.b32.xlu2 %v632_v14, %s704_s1  ;;  %v652_v23 = vpack.i.bf16 %v252_v19, %v251_v21 }
 0x231   :  { %638 = vrot.lane.b32.xlu0 %v637_v16, %s704_s1  ;;  %v647_v22 = vpack.i.bf16 %v250_v18, %v249_v20  ;;  %v657_v26 = vpack.i.bf16 %v254_v24, %v253_v25 }
 0x232   :  { %643 = vrot.lane.b32.xlu1 %v642_v17, %s705_s26 }
 0x238   :  { %648 = vrot.lane.b32.xlu2 %v647_v22, %s705_s26 }
 0x239   :  { %653 = vrot.lane.b32.xlu0 %v652_v23, %s706_s27 }
 0x240   :  { %658 = vrot.lane.b32.xlu2 %v657_v26, %s706_s27 }
 0x241   :  { %528 = vrot.lane.b32.xlu0 %v735_v0, %s704_s1 }
 0x28a   :  { %v634_v35 = vpop.permute.xlu2 %633 }
 0x28b   :  { %v636_v50 = vunpack.i.h.bf16 %v634_v35  ;;  %v635_v51 = vunpack.i.l.bf16 %v634_v35 }
 0x28d   :  { %v304_v3 = vsel %vm33_vm0, %v740_v1, %v636_v50  ;;  %v303_v4 = vsel %vm33_vm0, %v735_v0, %v635_v51  ;;  %v662_v0 = vld [vmem:[%s933_s3] ss:$0 sm:$0xff] }
 0x292   :  { %v649_v36 = vpop.permute.xlu2 %648 }
 0x293   :  { %v651_v41 = vunpack.i.h.bf16 %v649_v36  ;;  %v650_v42 = vunpack.i.l.bf16 %v649_v36 }
 0x29a   :  { %v659_v37 = vpop.permute.xlu2 %658 }
 0x29b   :  { %v661_v43 = vunpack.i.h.bf16 %v659_v37  ;;  %v660_v44 = vunpack.i.l.bf16 %v659_v37 }
 0x2a3   :  { %v639_v38 = vpop.permute.xlu0 %638 }
 0x2a4   :  { %v641_v39 = vunpack.i.h.bf16 %v639_v38  ;;  %v640_v40 = vunpack.i.l.bf16 %v639_v38  ;;  %v644_v47 = vpop.permute.xlu1 %643 }
 0x2a5   :  { %v646_v54 = vunpack.i.h.bf16 %v644_v47  ;;  %v645_v56 = vunpack.i.l.bf16 %v644_v47 }
 0x2a6   :  { %v306_v45 = vsel %vm33_vm0, %v754_v5, %v641_v39  ;;  %v305_v46 = vsel %vm33_vm0, %v745_v2, %v640_v40 }
 0x2a7   :  { %v310_v48 = vsel %vm307_vm6, %v305_v46, %v650_v42  ;;  %v311_v49 = vsel %vm307_vm6, %v306_v45, %v651_v41  ;;  %v309_v8 = vsel %vm307_vm6, %v304_v3, %v646_v54  ;;  %v308_v57 = vsel %vm307_vm6, %v303_v4, %v645_v56 }
 0x2a8   :  { %v315_v52 = vsel %vm312_vm10, %v310_v48, %v660_v44  ;;  %v316_v53 = vsel %vm312_vm10, %v311_v49, %v661_v43 }
 0x2a9   :  { %v319_v58 = vpack.c.bf16 %v315_v52, %v315_v52  ;;  %v320_v59 = vpack.c.bf16 %v316_v53, %v316_v53 }
 0x2ab   :  { %v654_v60 = vpop.permute.xlu0 %653  ;;  %v347_v63 = vunpack.c.l.b16 %v319_v58  ;;  %v348_v55 = vunpack.c.l.b16 %v320_v59 }
 0x2ac   :  { %v656_v6 = vunpack.i.h.bf16 %v654_v60  ;;  %v655_v7 = vunpack.i.l.bf16 %v654_v60 }
 0x2ad   :  { %v350_v9 = vpack.c.b16 %v348_v55, %v347_v63 }
 0x2ae   :  { %v313_v10 = vsel %vm312_vm10, %v308_v57, %v655_v7  ;;  %v314_v11 = vsel %vm312_vm10, %v309_v8, %v656_v6 }
 0x2af   :  { %414 = vmatmul.bf16.vlgmr.msra.gmra.mxu3 %v350_v9  ;;  %v317_v12 = vpack.c.bf16 %v313_v10, %v313_v10  ;;  %v318_v61 = vpack.c.bf16 %v314_v11, %v314_v11 }
 0x2b1   :  { %v345_v13 = vunpack.c.l.b16 %v317_v12  ;;  %v346_v14 = vunpack.c.l.b16 %v318_v61 }
 0x2b3   :  { %v349_v62 = vpack.c.b16 %v346_v14, %v345_v13  ;;  %v529_v63 = vpop.permute.xlu0 %528 }
 0x2b5   :  { %409 = vmatmul.bf16.vlgmr.msra.gmra.mxu2 %v349_v62 }
 0x332   :  { %v415_v15 = vpop.f32.mrf.mxu3 }
 0x333   :  { %v416_v16 = vadd.f32 %v662_v0, %v415_v15 }
 0x335   :  { %679 = vtanh.f32 %v416_v16  ;;  %v610_v31 = vmul.f32 -1.442695, %v416_v16 }
 0x338   :  { %v410_v17 = vpop.f32.mrf.mxu2 }
 0x339   :  { %v411_v18 = vadd.f32 %v662_v0, %v410_v17 }
 0x33a   :  { %v417_v20 = vpop.f32.mrf.mxu3 }
 0x33b   :  { %v680_v19 = vpop.eup %679  ;;  %681 = vtanh.f32 %v411_v18  ;;  %v418_v21 = vadd.f32 %v662_v0, %v417_v20  ;;  %v608_v27 = vmul.f32 -1.442695, %v411_v18 }
 0x33c   :  { %508 = vrot.lane.b32.xlu2 %v680_v19, %s704_s1 }
 0x33d   :  { %683 = vtanh.f32 %v418_v21 }
 0x340   :  { %v412_v22 = vpop.f32.mrf.mxu2 }
 0x341   :  { %v682_v23 = vpop.eup %681  ;;  %v413_v24 = vadd.f32 %v662_v0, %v412_v22 }
 0x342   :  { %504 = vrot.lane.b32.xlu1 %v682_v23, %s704_s1 }
 0x343   :  { %685 = vtanh.f32 %v413_v24  ;;  %v684_v25 = vpop.eup %683  ;;  %v609_v29 = vmul.f32 -1.442695, %v413_v24 }
 0x344   :  { %530 = vrot.lane.b32.xlu2 %v740_v1, %s704_s1  ;;  %687 = vpow2.f32 %v608_v27  ;;  %v611_v1 = vmul.f32 -1.442695, %v418_v21 }
 0x345   :  { %689 = vpow2.f32 %v609_v29 }
 0x349   :  { %v686_v26 = vpop.eup %685 }
 0x34a   :  { %506 = vrot.lane.b32.xlu0 %v686_v26, %s704_s1  ;;  %510 = vrot.lane.b32.xlu1 %v684_v25, %s704_s1  ;;  %v688_v28 = vpop.eup %687 }
 0x34b   :  { %v436_v30 = vadd.f32 1.0, %v688_v28  ;;  %v690_v32 = vpop.eup %689 }
 0x34c   :  { %v437_v34 = vadd.f32 1.0, %v690_v32 }
 0x34d   :  { %691 = vrcp.f32 %v436_v30  ;;  %v451_v43 = vand.u32 2147483648, %v436_v30  ;;  %vm445_vm12 = vweird.f32 %v436_v30  ;;  %v449_v45 = vand.u32 2147483647, %v436_v30 }
 0x34e   :  { %693 = vpow2.f32 %v610_v31  ;;  %v466_v55 = vand.u32 2147483648, %v437_v34  ;;  %vm460_vm1 = vweird.f32 %v437_v34  ;;  %v464_v3 = vand.u32 2147483647, %v437_v34 }
 0x34f   :  { %695 = vpow2.f32 %v611_v1  ;;  %v452_v49 = vor.u32 1.1754944e-38, %v451_v43  ;;  %vm450_vm14 = vcmp.eq.f32.partialorder %v449_v45, 8.507059e+37 }
 0x350   :  { %697 = vrcp.f32 %v437_v34  ;;  %v467_v10 = vor.u32 1.1754944e-38, %v466_v55  ;;  %vm465_vm3 = vcmp.eq.f32.partialorder %v464_v3, 8.507059e+37 }
 0x352   :  { %534 = vrot.lane.b32.xlu0 %v754_v5, %s704_s1  ;;  %532 = vrot.lane.b32.xlu1 %v745_v2, %s704_s1 }
 0x353   :  { %v692_v33 = vpop.eup %691 }
 0x354   :  { %v441_v35 = vmul.f32 %v692_v33, %v436_v30  ;;  %v694_v36 = vpop.eup %693  ;;  %vm446_vm11 = vweird.f32 %v692_v33 }
 0x355   :  { %v696_v5 = vpop.eup %695  ;;  %v891_v37 = vadd.f32 1.0, %v694_v36  ;;  %vm447_vm13 = vmor %vm445_vm12, %vm446_vm11 }
 0x356   :  { %v442_v2 = vsub.f32 1.0, %v441_v35  ;;  %v893_v38 = vadd.f32 1.0, %v696_v5  ;;  %v698_v39 = vpop.eup %697 }
 0x357   :  { %699 = vrcp.f32 %v891_v37  ;;  %v456_v41 = vmul.f32 %v698_v39, %v437_v34  ;;  %vm461_vm15 = vweird.f32 %v698_v39  ;;  %vm475_vm7 = vweird.f32 %v891_v37 }
 0x358   :  { %v443_v40 = vmul.f32 %v692_v33, %v442_v2  ;;  %701 = vrcp.f32 %v893_v38  ;;  %vm462_vm2 = vmor %vm460_vm1, %vm461_vm15  ;;  %v481_v14 = vand.u32 2147483648, %v891_v37  ;;  %v496_v0 = vand.u32 2147483648, %v893_v38 }
 0x359   :  { %v457_v46 = vsub.f32 1.0, %v456_v41  ;;  %v479_v16 = vand.u32 2147483647, %v891_v37  ;;  %vm490_vm9 = vweird.f32 %v893_v38  ;;  %v494_v18 = vand.u32 2147483647, %v893_v38 }
 0x35a   :  { %v444_v42 = vadd.f32 %v692_v33, %v443_v40  ;;  %v482_v25 = vor.u32 1.1754944e-38, %v481_v14  ;;  %v497_v26 = vor.u32 1.1754944e-38, %v496_v0 }
 0x35b   :  { %v458_v51 = vmul.f32 %v698_v39, %v457_v46  ;;  %vm480_vm10 = vcmp.eq.f32.partialorder %v479_v16, 8.507059e+37  ;;  %vm495_vm11 = vcmp.eq.f32.partialorder %v494_v18, 8.507059e+37 }
 0x35c   :  { %v448_v48 = vsel %vm447_vm13, %v692_v33, %v444_v42 }
 0x35d   :  { %v700_v44 = vpop.eup %699  ;;  %v453_v53 = vsel %vm450_vm14, %v452_v49, %v448_v48  ;;  %v459_v59 = vadd.f32 %v698_v39, %v458_v51 }
 0x35e   :  { %v702_v47 = vpop.eup %701  ;;  %v471_v50 = vmul.f32 %v700_v44, %v891_v37  ;;  %v520_v58 = vsub.f32 1.0, %v453_v53  ;;  %vm476_vm4 = vweird.f32 %v700_v44 }
 0x35f   :  { %v486_v52 = vmul.f32 %v702_v47, %v893_v38  ;;  %v463_v8 = vsel %vm462_vm2, %v698_v39, %v459_v59  ;;  %vm491_vm5 = vweird.f32 %v702_v47  ;;  %vm903_vm8 = vmor %vm475_vm7, %vm476_vm4 }
 0x360   :  { %v472_v54 = vsub.f32 1.0, %v471_v50  ;;  %v540_v7 = vmul.f32 %v529_v63, %v520_v58  ;;  %v468_v12 = vsel %vm465_vm3, %v467_v10, %v463_v8  ;;  %vm492_vm6 = vmor %vm490_vm9, %vm491_vm5 }
 0x361   :  { %v487_v60 = vsub.f32 1.0, %v486_v52  ;;  %v521_v17 = vsub.f32 1.0, %v468_v12 }
 0x362   :  { %v473_v4 = vmul.f32 %v700_v44, %v472_v54 }
 0x363   :  { %v488_v9 = vmul.f32 %v702_v47, %v487_v60 }
 0x364   :  { %v474_v61 = vadd.f32 %v700_v44, %v473_v4 }
 0x365   :  { %v489_v13 = vadd.f32 %v702_v47, %v488_v9 }
 0x366   :  { %v478_v21 = vsel %vm903_vm8, %v700_v44, %v474_v61 }
 0x367   :  { %v493_v24 = vsel %vm492_vm6, %v702_v47, %v489_v13  ;;  %v483_v28 = vsel %vm480_vm10, %v482_v25, %v478_v21 }
 0x368   :  { %v498_v29 = vsel %vm495_vm11, %v497_v26, %v493_v24  ;;  %v522_v31 = vsub.f32 1.0, %v483_v28 }
 0x369   :  { %v523_v30 = vsub.f32 1.0, %v498_v29 }
 0x396   :  { %v509_v56 = vpop.permute.xlu2 %508 }
 0x397   :  { %v518_v33 = vmul.f32 %v509_v56, %v483_v28 }
 0x39e   :  { %v531_v62 = vpop.permute.xlu2 %530 }
 0x39f   :  { %v541_v22 = vmul.f32 %v531_v62, %v521_v17 }
 0x3b4   :  { %v505_v6 = vpop.permute.xlu1 %504 }
 0x3b5   :  { %v516_v57 = vmul.f32 %v505_v6, %v453_v53 }
 0x3b7   :  { %v544_v11 = vadd.f32 %v540_v7, %v516_v57 }
 0x3b9   :  { %552 = vrot.lane.b32.xlu2 %v544_v11, %s706_s27 }
 0x3bc   :  { %v507_v19 = vpop.permute.xlu0 %506  ;;  %v511_v20 = vpop.permute.xlu1 %510 }
 0x3bd   :  { %v517_v23 = vmul.f32 %v507_v19, %v468_v12  ;;  %v519_v34 = vmul.f32 %v511_v20, %v498_v29 }
 0x3bf   :  { %v545_v27 = vadd.f32 %v541_v22, %v517_v23 }
 0x3c1   :  { %554 = vrot.lane.b32.xlu1 %v545_v27, %s706_s27 }
 0x3c4   :  { %v535_v1 = vpop.permute.xlu0 %534  ;;  %v533_v32 = vpop.permute.xlu1 %532 }
 0x3c5   :  { %v543_v35 = vmul.f32 %v535_v1, %v523_v30  ;;  %v542_v36 = vmul.f32 %v533_v32, %v522_v31 }
 0x3c7   :  { %v547_v5 = vadd.f32 %v543_v35, %v519_v34  ;;  %v546_v37 = vadd.f32 %v542_v36, %v518_v33 }
 0x3c9   :  { %558 = vrot.lane.b32.xlu2 %v547_v5, %s706_s27  ;;  %556 = vrot.lane.b32.xlu0 %v546_v37, %s706_s27 }
 0x413   :  { %v553_v2 = vpop.permute.xlu2 %552 }
 0x414   :  { %564 = vst.msk [vmem:[%s935_s4] sm:$0xff] %vm33_vm0, %v553_v2 }
 0x423   :  { %v559_v38 = vpop.permute.xlu2 %558 }
 0x424   :  { %567 = vst.msk [vmem:[%s935_s4 + $0x18] sm:$0xff] %vm33_vm0, %v559_v38 }
 0x433   :  { %v555_v39 = vpop.permute.xlu1 %554 }
 0x434   :  { %565 = vst.msk [vmem:[%s935_s4 + $0x8] sm:$0xff] %vm33_vm0, %v555_v39 }
 0x43b   :  { %v557_v40 = vpop.permute.xlu0 %556 }
 0x43c   :  { %566 = vst.msk [vmem:[%s935_s4 + $0x10] sm:$0xff] %vm33_vm0, %v557_v40 }

// kernel: play_reader_forward.16
= control target key start
LH: loop header
LB: loop body
LE: loop exit
PB: predicated region body
PF: predicated region fallthrough
CT: control target
= control target key end

     0   :  { %vm40_vm0 = vcmask 261120   ;;  %v708_v22 = vmov 0   ;;  %vm98_vm5 = vcmask 64512   ;;  %vm211_vm6 = vcmask 1043456   ;;  %s710_s7 = smov 64   ;;  %s711_s8 = smov 96   ;;  %s939_s1 = inlined_call_operand.vmem [shape: f32[2,8,32], index: 1, kind: input, shape index: {}]   ;;  %s940_s0 = inlined_call_operand.vmem [shape: f32[2,16,32], index: 0, kind: input, shape index: {}]   ;;  %s941_s2 = inlined_call_operand.vmem [shape: f32[2,1,8], index: 2, kind: input, shape index: {}]   ;;  %s942_s4 = inlined_call_operand.vmem [shape: f32[1,1,64], index: 4, kind: input, shape index: {}]   ;;  %s943_s3 = inlined_call_operand.vmem [shape: bf16[128,64], index: 3, kind: input, shape index: {}]   ;;  %s944_s5 = inlined_call_operand.vmem [shape: f32[2,16,32], index: 5, kind: output, shape index: {}]  }
   0x1   :  { %v25_v0 = vld [vmem:[%s939_s1] sm:$0xff]  ;;  %v26_v1 = vld [vmem:[%s939_s1 + $0x8] sm:$0xff]  ;;  %v767_v7 = vld [vmem:[%s940_s0 + $0x10] sm:$0xff] }
   0x2   :  { %v751_v2 = vld [vmem:[%s940_s0] sm:$0xff]  ;;  %v753_v3 = vpack.c.bf16 %v25_v0, %v25_v0  ;;  %v755_v4 = vpack.c.bf16 %v26_v1, %v26_v1  ;;  %v760_v5 = vld [vmem:[%s940_s0 + $0x8] sm:$0xff]  ;;  %v772_v8 = vld [vmem:[%s940_s0 + $0x18] sm:$0xff]  ;;  %v31_v10 = vpack.c.bf16 %v767_v7, %v767_v7 }
   0x3   :  { %v29_v6 = vpack.c.bf16 %v751_v2, %v751_v2  ;;  %v30_v9 = vpack.c.bf16 %v760_v5, %v760_v5  ;;  %v32_v11 = vpack.c.bf16 %v772_v8, %v772_v8  ;;  %v27_v20 = vld [vmem:[%s941_s2] sm:$0x1]  ;;  %v28_v21 = vld [vmem:[%s941_s2 + $0x1] sm:$0x1]  ;;  %s709_s2 = smov 32  }
   0x4   :  { %v45_v12 = vsel %vm40_vm0, %v753_v3, 0  ;;  %v70_v13 = vsel %vm40_vm0, %v755_v4, 0  ;;  %v63_v16 = vunpack.c.l.b16 %v31_v10  ;;  %vm86_vm1 = vcmp.gt.f32.partialorder %v27_v20, 0.0 }
   0x5   :  { %v37_v14 = vunpack.c.l.b16 %v29_v6  ;;  %54 = vmatpush.bf16.xpose.msra.mxu0 %v45_v12  ;;  %79 = vmatpush.bf16.xpose.msra.mxu1 %v70_v13  ;;  %v38_v15 = vunpack.c.l.b16 %v30_v9  ;;  %v64_v17 = vunpack.c.l.b16 %v32_v11  ;;  %vm87_vm2 = vcmp.gt.f32.partialorder %v28_v21, 0.0 }
   0x6   :  { %v88_v23 = vsel %vm86_vm1, 1, %v708_v22  ;;  %v89_v24 = vsel %vm87_vm2, 1, %v708_v22  ;;  %v236_v59 = vsel %vm211_vm6, %v755_v4, 0  ;;  %v212_v60 = vsel %vm211_vm6, %v753_v3, 0 }
   0x7   :  { %v39_v18 = vpack.c.b16 %v38_v15, %v37_v14  ;;  %v65_v19 = vpack.c.b16 %v64_v17, %v63_v16  ;;  %v90_v25 = vperm.slane %v88_v23, 0  ;;  %v91_v26 = vperm.slane %v89_v24, 0  ;;  %v623_v24 = vld [vmem:[%s943_s3 + $0x30] sm:$0xff] }
   0x9   :  { %vm92_vm3 = vcmp.eq.s32.totalorder %v90_v25, 1  ;;  %vm93_vm4 = vcmp.eq.s32.totalorder %v91_v26, 1  ;;  %v621_v26 = vld [vmem:[%s943_s3 + $0x20] sm:$0xff] }
   0xc   :  { %577 = vmatmul.msk.bf16.vlgmr.msra.gmra.mxu0 %vm40_vm0, %v39_v18  ;;  %578 = vmatmul.msk.bf16.vlgmr.msra.gmra.mxu1 %vm40_vm0, %v65_v19 }
   0xd   :  { %245 = vmatpush.bf16.msrb.mxu1 %v236_v59  ;;  %221 = vmatpush.bf16.msrb.mxu0 %v212_v60 }
  0x89   :  { %v56_v27 = vpop.f32.mrf.mxu0  ;;  %v81_v28 = vpop.f32.mrf.mxu1 }
  0x8a   :  { %v94_v29 = vsel %vm92_vm3, -1e+30, %v56_v27  ;;  %v96_v30 = vsel %vm93_vm4, -1e+30, %v81_v28 }
  0x8b   :  { %v105_v31 = vsel %vm98_vm5, %v96_v30, -inf  ;;  %v99_v32 = vsel %vm98_vm5, %v94_v29, -inf }
  0x8c   :  { %106 = vmax.xlane.f32.xlu1 %v105_v31  ;;  %100 = vmax.xlane.f32.xlu0 %v99_v32 }
  0x91   :  { %v58_v33 = vpop.f32.mrf.mxu0  ;;  %v83_v34 = vpop.f32.mrf.mxu1 }
  0x92   :  { %v95_v35 = vsel %vm92_vm3, -1e+30, %v58_v33  ;;  %v97_v36 = vsel %vm93_vm4, -1e+30, %v83_v34 }
  0x93   :  { %v108_v37 = vsel %vm98_vm5, %v97_v36, -inf  ;;  %v102_v38 = vsel %vm98_vm5, %v95_v35, -inf }
  0x94   :  { %109 = vmax.xlane.f32.xlu1 %v108_v37  ;;  %103 = vmax.xlane.f32.xlu0 %v102_v38 }
  0xff   :  { %v107_v39 = vpop.xlane.xlu1 %106  ;;  %v101_v40 = vpop.xlane.xlu0 %100 }
 0x100   :  { %v113_v41 = vsub.f32 %v96_v30, %v107_v39  ;;  %v111_v42 = vsub.f32 %v94_v29, %v101_v40 }
 0x102   :  { %v119_v43 = vmul.f32 1.442695, %v113_v41  ;;  %v115_v44 = vmul.f32 1.442695, %v111_v42 }
 0x104   :  { %668 = vpow2.f32 %v119_v43 }
 0x105   :  { %670 = vpow2.f32 %v115_v44 }
 0x107   :  { %v110_v45 = vpop.xlane.xlu1 %109  ;;  %v104_v46 = vpop.xlane.xlu0 %103 }
 0x108   :  { %v114_v47 = vsub.f32 %v97_v36, %v110_v45  ;;  %v112_v48 = vsub.f32 %v95_v35, %v104_v46 }
 0x10a   :  { %v796_v49 = vpop.eup %668  ;;  %v121_v50 = vmul.f32 1.442695, %v114_v47  ;;  %v117_v51 = vmul.f32 1.442695, %v112_v48 }
 0x10b   :  { %v798_v52 = vpop.eup %670  ;;  %v129_v53 = vsel %vm98_vm5, %v796_v49, 0.0 }
 0x10c   :  { %672 = vpow2.f32 %v121_v50  ;;  %v123_v54 = vsel %vm98_vm5, %v798_v52, 0.0  ;;  %130 = vadd.xlane.f32.xlu0 %v129_v53 }
 0x10d   :  { %674 = vpow2.f32 %v117_v51  ;;  %124 = vadd.xlane.f32.xlu2 %v123_v54 }
 0x112   :  { %v804_v55 = vpop.eup %672 }
 0x113   :  { %v806_v56 = vpop.eup %674  ;;  %v132_v57 = vsel %vm98_vm5, %v804_v55, 0.0 }
 0x114   :  { %133 = vadd.xlane.f32.xlu1 %v132_v57  ;;  %v126_v58 = vsel %vm98_vm5, %v806_v56, 0.0 }
 0x115   :  { %127 = vadd.xlane.f32.xlu2 %v126_v58 }
 0x17f   :  { %v131_v61 = vpop.xlane.xlu0 %130 }
 0x180   :  { %v125_v62 = vpop.xlane.xlu2 %124  ;;  %v137_v63 = vmax.f32 %v131_v61, 1e-30 }
 0x181   :  { %v135_v0 = vmax.f32 %v125_v62, 1e-30 }
 0x182   :  { %676 = vrcp.f32 %v137_v63  ;;  %vm174_vm9 = vweird.f32 %v137_v63  ;;  %v180_v17 = vand.u32 2147483648, %v137_v63  ;;  %v178_v21 = vand.u32 2147483647, %v137_v63 }
 0x183   :  { %678 = vrcp.f32 %v135_v0  ;;  %v148_v18 = vand.u32 2147483647, %v135_v0  ;;  %v150_v19 = vand.u32 2147483648, %v135_v0  ;;  %vm144_vm10 = vweird.f32 %v135_v0 }
 0x184   :  { %v181_v29 = vor.u32 1.1754944e-38, %v180_v17  ;;  %vm179_vm14 = vcmp.eq.f32.partialorder %v178_v21, 8.507059e+37 }
 0x185   :  { %vm149_vm13 = vcmp.eq.f32.partialorder %v148_v18, 8.507059e+37  ;;  %v151_v32 = vor.u32 1.1754944e-38, %v150_v19 }
 0x187   :  { %v134_v1 = vpop.xlane.xlu1 %133 }
 0x188   :  { %v677_v6 = vpop.eup %676  ;;  %v138_v9 = vmax.f32 %v134_v1, 1e-30  ;;  %v128_v10 = vpop.xlane.xlu2 %127 }
 0x189   :  { %v679_v11 = vpop.eup %678  ;;  %v170_v12 = vmul.f32 %v677_v6, %v137_v63  ;;  %v136_v13 = vmax.f32 %v128_v10, 1e-30  ;;  %vm175_vm7 = vweird.f32 %v677_v6 }
 0x18a   :  { %v140_v14 = vmul.f32 %v679_v11, %v135_v0  ;;  %680 = vrcp.f32 %v138_v9  ;;  %vm145_vm8 = vweird.f32 %v679_v11  ;;  %vm814_vm11 = vmor %vm174_vm9, %vm175_vm7  ;;  %v193_v34 = vand.u32 2147483647, %v138_v9 }
 0x18b   :  { %v171_v4 = vsub.f32 1.0, %v170_v12  ;;  %682 = vrcp.f32 %v136_v13  ;;  %vm818_vm12 = vmor %vm144_vm10, %vm145_vm8  ;;  %v195_v35 = vand.u32 2147483648, %v138_v9  ;;  %v165_v39 = vand.u32 2147483648, %v136_v13 }
 0x18c   :  { %v141_v3 = vsub.f32 1.0, %v140_v14  ;;  %v163_v42 = vand.u32 2147483647, %v136_v13  ;;  %vm189_vm2 = vweird.f32 %v138_v9  ;;  %vm159_vm4 = vweird.f32 %v136_v13 }
 0x18d   :  { %v172_v15 = vmul.f32 %v677_v6, %v171_v4  ;;  %v196_v45 = vor.u32 1.1754944e-38, %v195_v35  ;;  %vm194_vm6 = vcmp.eq.f32.partialorder %v193_v34, 8.507059e+37  ;;  %v166_v48 = vor.u32 1.1754944e-38, %v165_v39 }
 0x18e   :  { %v142_v16 = vmul.f32 %v679_v11, %v141_v3  ;;  %vm164_vm8 = vcmp.eq.f32.partialorder %v163_v42, 8.507059e+37  ;;  %vm317_vm9 = vcmask 785408  }
 0x18f   :  { %v173_v20 = vadd.f32 %v677_v6, %v172_v15 }
 0x190   :  { %v681_v22 = vpop.eup %680  ;;  %v143_v23 = vadd.f32 %v679_v11, %v142_v16 }
 0x191   :  { %v683_v25 = vpop.eup %682  ;;  %v185_v27 = vmul.f32 %v681_v22, %v138_v9  ;;  %v177_v28 = vsel %vm814_vm11, %v677_v6, %v173_v20  ;;  %vm190_vm15 = vweird.f32 %v681_v22 }
 0x192   :  { %v155_v30 = vmul.f32 %v683_v25, %v136_v13  ;;  %v147_v31 = vsel %vm818_vm12, %v679_v11, %v143_v23  ;;  %v182_v37 = vsel %vm179_vm14, %v181_v29, %v177_v28  ;;  %vm160_vm1 = vweird.f32 %v683_v25  ;;  %vm191_vm3 = vmor %vm189_vm2, %vm190_vm15  ;;  %v624_v23 = vld [vmem:[%s943_s3 + $0x38] sm:$0xff]  ;;  %v619_v28 = vld [vmem:[%s943_s3 + $0x10] sm:$0xff] }
 0x193   :  { %v186_v33 = vsub.f32 1.0, %v185_v27  ;;  %v152_v40 = vsel %vm149_vm13, %v151_v32, %v147_v31  ;;  %v183_v44 = vmul.f32 %v796_v49, %v182_v37  ;;  %vm161_vm7 = vmor %vm159_vm4, %vm160_vm1  ;;  %625 = vmatpush.bf16.msra.mxu3 %v624_v23  ;;  %406 = vmatpush.bf16.msra.mxu2 %v624_v23  ;;  %v620_v27 = vld [vmem:[%s943_s3 + $0x18] sm:$0xff]  ;;  %v618_v29 = vld [vmem:[%s943_s3 + $0x8] sm:$0xff] }
 0x194   :  { %v156_v36 = vsub.f32 1.0, %v155_v30  ;;  %v153_v47 = vmul.f32 %v798_v52, %v152_v40  ;;  %v617_v30 = vld [vmem:[%s943_s3] sm:$0xff] }
 0x195   :  { %v187_v38 = vmul.f32 %v681_v22, %v186_v33  ;;  %v201_v58 = vpack.c.bf16 %v183_v44, %v183_v44 }
 0x196   :  { %v157_v41 = vmul.f32 %v683_v25, %v156_v36  ;;  %v199_v49 = vpack.c.bf16 %v153_v47, %v153_v47 }
 0x197   :  { %v188_v43 = vadd.f32 %v681_v22, %v187_v38  ;;  %v230_v62 = vunpack.c.l.b16 %v201_v58  ;;  %626 = vmatpush.bf16.msra.mxu3 %v623_v24  ;;  %407 = vmatpush.bf16.msra.mxu2 %v623_v24 }
 0x198   :  { %v158_v46 = vadd.f32 %v683_v25, %v157_v41  ;;  %v205_v0 = vunpack.c.l.b16 %v199_v49 }
 0x199   :  { %v192_v50 = vsel %vm191_vm3, %v681_v22, %v188_v43 }
 0x19a   :  { %v162_v51 = vsel %vm161_vm7, %v683_v25, %v158_v46  ;;  %v197_v53 = vsel %vm194_vm6, %v196_v45, %v192_v50  ;;  %v622_v25 = vld [vmem:[%s943_s3 + $0x28] sm:$0xff] }
 0x19b   :  { %v167_v54 = vsel %vm164_vm8, %v166_v48, %v162_v51  ;;  %v198_v57 = vmul.f32 %v804_v55, %v197_v53  ;;  %627 = vmatpush.bf16.msra.mxu3 %v622_v25  ;;  %408 = vmatpush.bf16.msra.mxu2 %v622_v25 }
 0x19c   :  { %v168_v59 = vmul.f32 %v806_v56, %v167_v54 }
 0x19d   :  { %v202_v60 = vpack.c.bf16 %v198_v57, %v198_v57 }
 0x19e   :  { %v200_v61 = vpack.c.bf16 %v168_v59, %v168_v59 }
 0x19f   :  { %v231_v63 = vunpack.c.l.b16 %v202_v60  ;;  %628 = vmatpush.bf16.msra.mxu3 %v621_v26  ;;  %409 = vmatpush.bf16.msra.mxu2 %v621_v26 }
 0x1a0   :  { %v206_v52 = vunpack.c.l.b16 %v200_v61 }
 0x1a1   :  { %v232_v1 = vpack.c.b16 %v231_v63, %v230_v62 }
 0x1a2   :  { %v207_v6 = vpack.c.b16 %v206_v52, %v205_v0 }
 0x1a3   :  { %580 = vmatmul.msk.bf16.vlgmr.msrb.gmra.mxu1 %vm98_vm5, %v232_v1  ;;  %629 = vmatpush.bf16.msra.mxu3 %v620_v27 }
 0x1a4   :  { %579 = vmatmul.msk.bf16.vlgmr.msrb.gmra.mxu0 %vm98_vm5, %v207_v6  ;;  %410 = vmatpush.bf16.msra.mxu2 %v620_v27  ;;  %vm312_vm5 = vcmask 523264  }
 0x1a7   :  { %630 = vmatpush.bf16.msra.mxu3 %v619_v28 }
 0x1a8   :  { %411 = vmatpush.bf16.msra.mxu2 %v619_v28 }
 0x1ab   :  { %631 = vmatpush.bf16.msra.mxu3 %v618_v29 }
 0x1ac   :  { %412 = vmatpush.bf16.msra.mxu2 %v618_v29 }
 0x1af   :  { %632 = vmatpush.bf16.msra.mxu3 %v617_v30 }
 0x1b0   :  { %413 = vmatpush.bf16.msra.mxu2 %v617_v30 }
 0x220   :  { %v247_v9 = vpop.f32.mrf.mxu1 }
 0x221   :  { %v223_v10 = vpop.f32.mrf.mxu0  ;;  %v254_v17 = vmul.f32 %v247_v9, %v767_v7  ;;  %v258_v21 = vsub.f32 %v767_v7, %v247_v9 }
 0x222   :  { %v252_v56 = vmul.f32 %v223_v10, %v751_v2  ;;  %v256_v16 = vsub.f32 %v751_v2, %v223_v10 }
 0x228   :  { %v249_v11 = vpop.f32.mrf.mxu1 }
 0x229   :  { %v225_v55 = vpop.f32.mrf.mxu0  ;;  %v642_v12 = vpack.i.bf16 %v249_v11, %v247_v9  ;;  %v255_v15 = vmul.f32 %v249_v11, %v772_v8  ;;  %v259_v20 = vsub.f32 %v772_v8, %v249_v11 }
 0x22a   :  { %v637_v13 = vpack.i.bf16 %v225_v55, %v223_v10  ;;  %v253_v14 = vmul.f32 %v225_v55, %v760_v5  ;;  %v257_v3 = vsub.f32 %v760_v5, %v225_v55 }
 0x22b   :  { %643 = vrot.lane.b32.xlu0 %v642_v12, %s709_s2  ;;  %v652_v19 = vpack.i.bf16 %v255_v15, %v254_v17  ;;  %v662_v22 = vpack.i.bf16 %v259_v20, %v258_v21 }
 0x22c   :  { %v647_v4 = vpack.i.bf16 %v253_v14, %v252_v56  ;;  %638 = vrot.lane.b32.xlu2 %v637_v13, %s709_s2  ;;  %v657_v18 = vpack.i.bf16 %v257_v3, %v256_v16 }
 0x22e   :  { %648 = vrot.lane.b32.xlu1 %v647_v4, %s710_s7 }
 0x233   :  { %658 = vrot.lane.b32.xlu0 %v657_v18, %s711_s8 }
 0x234   :  { %653 = vrot.lane.b32.xlu2 %v652_v19, %s710_s7 }
 0x23b   :  { %533 = vrot.lane.b32.xlu0 %v751_v2, %s709_s2 }
 0x23c   :  { %663 = vrot.lane.b32.xlu2 %v662_v22, %s711_s8 }
 0x286   :  { %v639_v31 = vpop.permute.xlu2 %638 }
 0x287   :  { %v641_v46 = vunpack.i.h.bf16 %v639_v31  ;;  %v640_v47 = vunpack.i.l.bf16 %v639_v31 }
 0x289   :  { %v309_v60 = vsel %vm40_vm0, %v760_v5, %v641_v46  ;;  %v308_v61 = vsel %vm40_vm0, %v751_v2, %v640_v47  ;;  %v667_v2 = vld [vmem:[%s942_s4] ss:$0 sm:$0xff] }
 0x28e   :  { %v654_v32 = vpop.permute.xlu2 %653 }
 0x28f   :  { %v656_v37 = vunpack.i.h.bf16 %v654_v32  ;;  %v655_v38 = vunpack.i.l.bf16 %v654_v32 }
 0x296   :  { %v664_v33 = vpop.permute.xlu2 %663 }
 0x297   :  { %v666_v39 = vunpack.i.h.bf16 %v664_v33  ;;  %v665_v40 = vunpack.i.l.bf16 %v664_v33 }
 0x29d   :  { %v644_v34 = vpop.permute.xlu0 %643 }
 0x29e   :  { %v646_v35 = vunpack.i.h.bf16 %v644_v34  ;;  %v645_v36 = vunpack.i.l.bf16 %v644_v34 }
 0x2a0   :  { %v311_v41 = vsel %vm40_vm0, %v772_v8, %v646_v35  ;;  %v310_v42 = vsel %vm40_vm0, %v767_v7, %v645_v36  ;;  %v649_v43 = vpop.permute.xlu1 %648 }
 0x2a1   :  { %v315_v44 = vsel %vm312_vm5, %v310_v42, %v655_v38  ;;  %v316_v45 = vsel %vm312_vm5, %v311_v41, %v656_v37  ;;  %v651_v51 = vunpack.i.h.bf16 %v649_v43  ;;  %v650_v53 = vunpack.i.l.bf16 %v649_v43 }
 0x2a2   :  { %v320_v48 = vsel %vm317_vm9, %v315_v44, %v665_v40  ;;  %v321_v50 = vsel %vm317_vm9, %v316_v45, %v666_v39 }
 0x2a3   :  { %v324_v54 = vpack.c.bf16 %v320_v48, %v320_v48  ;;  %v325_v57 = vpack.c.bf16 %v321_v50, %v321_v50  ;;  %v314_v0 = vsel %vm312_vm5, %v309_v60, %v651_v51  ;;  %v313_v52 = vsel %vm312_vm5, %v308_v61, %v650_v53 }
 0x2a5   :  { %v659_v58 = vpop.permute.xlu0 %658  ;;  %v352_v59 = vunpack.c.l.b16 %v324_v54  ;;  %v353_v49 = vunpack.c.l.b16 %v325_v57 }
 0x2a6   :  { %v661_v62 = vunpack.i.h.bf16 %v659_v58  ;;  %v660_v63 = vunpack.i.l.bf16 %v659_v58 }
 0x2a7   :  { %v355_v1 = vpack.c.b16 %v353_v49, %v352_v59 }
 0x2a8   :  { %v318_v6 = vsel %vm317_vm9, %v313_v52, %v660_v63  ;;  %v319_v9 = vsel %vm317_vm9, %v314_v0, %v661_v62 }
 0x2a9   :  { %419 = vmatmul.bf16.vlgmr.msra.gmra.mxu3 %v355_v1  ;;  %v322_v10 = vpack.c.bf16 %v318_v6, %v318_v6  ;;  %v323_v11 = vpack.c.bf16 %v319_v9, %v319_v9 }
 0x2ab   :  { %v350_v55 = vunpack.c.l.b16 %v322_v10  ;;  %v351_v12 = vunpack.c.l.b16 %v323_v11 }
 0x2ad   :  { %v354_v56 = vpack.c.b16 %v351_v12, %v350_v55  ;;  %v534_v59 = vpop.permute.xlu0 %533 }
 0x2af   :  { %414 = vmatmul.bf16.vlgmr.msra.gmra.mxu2 %v354_v56 }
 0x32c   :  { %v420_v13 = vpop.f32.mrf.mxu3 }
 0x32d   :  { %v421_v14 = vadd.f32 %v667_v2, %v420_v13 }
 0x32f   :  { %684 = vtanh.f32 %v421_v14  ;;  %v615_v27 = vmul.f32 -1.442695, %v421_v14 }
 0x332   :  { %v415_v4 = vpop.f32.mrf.mxu2 }
 0x333   :  { %v416_v3 = vadd.f32 %v667_v2, %v415_v4 }
 0x334   :  { %v422_v16 = vpop.f32.mrf.mxu3 }
 0x335   :  { %v685_v15 = vpop.eup %684  ;;  %686 = vtanh.f32 %v416_v3  ;;  %v423_v17 = vadd.f32 %v667_v2, %v422_v16  ;;  %v613_v23 = vmul.f32 -1.442695, %v416_v3 }
 0x336   :  { %513 = vrot.lane.b32.xlu2 %v685_v15, %s709_s2 }
 0x337   :  { %688 = vtanh.f32 %v423_v17 }
 0x33a   :  { %v417_v18 = vpop.f32.mrf.mxu2 }
 0x33b   :  { %v687_v19 = vpop.eup %686  ;;  %v418_v20 = vadd.f32 %v667_v2, %v417_v18 }
 0x33c   :  { %509 = vrot.lane.b32.xlu1 %v687_v19, %s709_s2 }
 0x33d   :  { %690 = vtanh.f32 %v418_v20  ;;  %v689_v21 = vpop.eup %688  ;;  %v614_v25 = vmul.f32 -1.442695, %v418_v20 }
 0x33e   :  { %535 = vrot.lane.b32.xlu2 %v760_v5, %s709_s2  ;;  %692 = vpow2.f32 %v613_v23  ;;  %v616_v5 = vmul.f32 -1.442695, %v423_v17 }
 0x33f   :  { %694 = vpow2.f32 %v614_v25 }
 0x343   :  { %v691_v22 = vpop.eup %690 }
 0x344   :  { %511 = vrot.lane.b32.xlu0 %v691_v22, %s709_s2  ;;  %515 = vrot.lane.b32.xlu1 %v689_v21, %s709_s2  ;;  %v693_v24 = vpop.eup %692 }
 0x345   :  { %v441_v26 = vadd.f32 1.0, %v693_v24  ;;  %v695_v28 = vpop.eup %694 }
 0x346   :  { %v442_v30 = vadd.f32 1.0, %v695_v28 }
 0x347   :  { %696 = vrcp.f32 %v441_v26  ;;  %v456_v39 = vand.u32 2147483648, %v441_v26  ;;  %vm450_vm11 = vweird.f32 %v441_v26  ;;  %v454_v41 = vand.u32 2147483647, %v441_v26 }
 0x348   :  { %698 = vpow2.f32 %v615_v27  ;;  %v471_v49 = vand.u32 2147483648, %v442_v30  ;;  %vm465_vm15 = vweird.f32 %v442_v30  ;;  %v469_v60 = vand.u32 2147483647, %v442_v30 }
 0x349   :  { %700 = vpow2.f32 %v616_v5  ;;  %v457_v45 = vor.u32 1.1754944e-38, %v456_v39  ;;  %vm455_vm13 = vcmp.eq.f32.partialorder %v454_v41, 8.507059e+37 }
 0x34a   :  { %702 = vrcp.f32 %v442_v30  ;;  %v472_v6 = vor.u32 1.1754944e-38, %v471_v49  ;;  %vm470_vm2 = vcmp.eq.f32.partialorder %v469_v60, 8.507059e+37 }
 0x34c   :  { %539 = vrot.lane.b32.xlu0 %v772_v8, %s709_s2  ;;  %537 = vrot.lane.b32.xlu1 %v767_v7, %s709_s2 }
 0x34d   :  { %v697_v29 = vpop.eup %696 }
 0x34e   :  { %v446_v31 = vmul.f32 %v697_v29, %v441_v26  ;;  %v699_v32 = vpop.eup %698  ;;  %vm451_vm10 = vweird.f32 %v697_v29 }
 0x34f   :  { %v701_v8 = vpop.eup %700  ;;  %v899_v33 = vadd.f32 1.0, %v699_v32  ;;  %vm452_vm12 = vmor %vm450_vm11, %vm451_vm10 }
 0x350   :  { %v447_v7 = vsub.f32 1.0, %v446_v31  ;;  %v901_v34 = vadd.f32 1.0, %v701_v8  ;;  %v703_v35 = vpop.eup %702 }
 0x351   :  { %704 = vrcp.f32 %v899_v33  ;;  %v461_v37 = vmul.f32 %v703_v35, %v442_v30  ;;  %vm466_vm14 = vweird.f32 %v703_v35  ;;  %vm480_vm6 = vweird.f32 %v899_v33 }
 0x352   :  { %v448_v36 = vmul.f32 %v697_v29, %v447_v7  ;;  %706 = vrcp.f32 %v901_v34  ;;  %vm467_vm1 = vmor %vm465_vm15, %vm466_vm14  ;;  %v486_v12 = vand.u32 2147483648, %v899_v33  ;;  %v501_v2 = vand.u32 2147483648, %v901_v34 }
 0x353   :  { %v462_v42 = vsub.f32 1.0, %v461_v37  ;;  %v484_v14 = vand.u32 2147483647, %v899_v33  ;;  %vm495_vm8 = vweird.f32 %v901_v34  ;;  %v499_v3 = vand.u32 2147483647, %v901_v34 }
 0x354   :  { %v449_v38 = vadd.f32 %v697_v29, %v448_v36  ;;  %v487_v21 = vor.u32 1.1754944e-38, %v486_v12  ;;  %v502_v22 = vor.u32 1.1754944e-38, %v501_v2 }
 0x355   :  { %v463_v47 = vmul.f32 %v703_v35, %v462_v42  ;;  %vm485_vm9 = vcmp.eq.f32.partialorder %v484_v14, 8.507059e+37  ;;  %vm500_vm10 = vcmp.eq.f32.partialorder %v499_v3, 8.507059e+37 }
 0x356   :  { %v453_v44 = vsel %vm452_vm12, %v697_v29, %v449_v38 }
 0x357   :  { %v705_v40 = vpop.eup %704  ;;  %v458_v50 = vsel %vm455_vm13, %v457_v45, %v453_v44  ;;  %v464_v57 = vadd.f32 %v703_v35, %v463_v47 }
 0x358   :  { %v707_v43 = vpop.eup %706  ;;  %v476_v46 = vmul.f32 %v705_v40, %v899_v33  ;;  %v525_v54 = vsub.f32 1.0, %v458_v50  ;;  %vm481_vm3 = vweird.f32 %v705_v40 }
 0x359   :  { %v491_v48 = vmul.f32 %v707_v43, %v901_v34  ;;  %v468_v0 = vsel %vm467_vm1, %v703_v35, %v464_v57  ;;  %vm496_vm4 = vweird.f32 %v707_v43  ;;  %vm911_vm7 = vmor %vm480_vm6, %vm481_vm3 }
 0x35a   :  { %v477_v51 = vsub.f32 1.0, %v476_v46  ;;  %v545_v63 = vmul.f32 %v534_v59, %v525_v54  ;;  %v473_v10 = vsel %vm470_vm2, %v472_v6, %v468_v0  ;;  %vm497_vm5 = vmor %vm495_vm8, %vm496_vm4 }
 0x35b   :  { %v492_v58 = vsub.f32 1.0, %v491_v48  ;;  %v526_v4 = vsub.f32 1.0, %v473_v10 }
 0x35c   :  { %v478_v61 = vmul.f32 %v705_v40, %v477_v51 }
 0x35d   :  { %v493_v1 = vmul.f32 %v707_v43, %v492_v58 }
 0x35e   :  { %v479_v11 = vadd.f32 %v705_v40, %v478_v61 }
 0x35f   :  { %v494_v55 = vadd.f32 %v707_v43, %v493_v1 }
 0x360   :  { %v483_v17 = vsel %vm911_vm7, %v705_v40, %v479_v11 }
 0x361   :  { %v498_v20 = vsel %vm497_vm5, %v707_v43, %v494_v55  ;;  %v488_v24 = vsel %vm485_vm9, %v487_v21, %v483_v17 }
 0x362   :  { %v503_v25 = vsel %vm500_vm10, %v502_v22, %v498_v20  ;;  %v527_v27 = vsub.f32 1.0, %v488_v24 }
 0x363   :  { %v528_v26 = vsub.f32 1.0, %v503_v25 }
 0x390   :  { %v514_v53 = vpop.permute.xlu2 %513 }
 0x391   :  { %v523_v29 = vmul.f32 %v514_v53, %v488_v24 }
 0x398   :  { %v536_v56 = vpop.permute.xlu2 %535 }
 0x399   :  { %v546_v18 = vmul.f32 %v536_v56, %v526_v4 }
 0x3ae   :  { %v510_v62 = vpop.permute.xlu1 %509 }
 0x3af   :  { %v521_v52 = vmul.f32 %v510_v62, %v458_v50 }
 0x3b1   :  { %v549_v9 = vadd.f32 %v545_v63, %v521_v52 }
 0x3b3   :  { %557 = vrot.lane.b32.xlu2 %v549_v9, %s711_s8 }
 0x3b6   :  { %v512_v15 = vpop.permute.xlu0 %511  ;;  %v516_v16 = vpop.permute.xlu1 %515 }
 0x3b7   :  { %v522_v19 = vmul.f32 %v512_v15, %v473_v10  ;;  %v524_v30 = vmul.f32 %v516_v16, %v503_v25 }
 0x3b9   :  { %v550_v23 = vadd.f32 %v546_v18, %v522_v19 }
 0x3bb   :  { %559 = vrot.lane.b32.xlu1 %v550_v23, %s711_s8 }
 0x3be   :  { %v540_v5 = vpop.permute.xlu0 %539  ;;  %v538_v28 = vpop.permute.xlu1 %537 }
 0x3bf   :  { %v548_v31 = vmul.f32 %v540_v5, %v528_v26  ;;  %v547_v32 = vmul.f32 %v538_v28, %v527_v27 }
 0x3c1   :  { %v552_v8 = vadd.f32 %v548_v31, %v524_v30  ;;  %v551_v33 = vadd.f32 %v547_v32, %v523_v29 }
 0x3c3   :  { %563 = vrot.lane.b32.xlu2 %v552_v8, %s711_s8  ;;  %561 = vrot.lane.b32.xlu0 %v551_v33, %s711_s8 }
 0x40d   :  { %v558_v7 = vpop.permute.xlu2 %557 }
 0x40e   :  { %569 = vst.msk [vmem:[%s944_s5] sm:$0xff] %vm40_vm0, %v558_v7 }
 0x41d   :  { %v564_v34 = vpop.permute.xlu2 %563 }
 0x41e   :  { %572 = vst.msk [vmem:[%s944_s5 + $0x18] sm:$0xff] %vm40_vm0, %v564_v34 }
 0x42d   :  { %v560_v35 = vpop.permute.xlu1 %559 }
 0x42e   :  { %570 = vst.msk [vmem:[%s944_s5 + $0x8] sm:$0xff] %vm40_vm0, %v560_v35 }
 0x435   :  { %v562_v36 = vpop.permute.xlu0 %561 }
 0x436   :  { %571 = vst.msk [vmem:[%s944_s5 + $0x10] sm:$0xff] %vm40_vm0, %v562_v36 }

// kernel: play_reader_forward.15
= control target key start
LH: loop header
LB: loop body
LE: loop exit
PB: predicated region body
PF: predicated region fallthrough
CT: control target
= control target key end

     0   :  { %vm18_vm0 = vcmask 257024   ;;  %v1431_v1 = vmov 0.0   ;;  %vm44_vm1 = vcmask 261120   ;;  %s1432_s20 = smov 64   ;;  %s1433_s23 = smov 96   ;;  %s1807_s2 = inlined_call_operand.vmem [shape: bf16[32,96], index: 2, kind: input, shape index: {}]   ;;  %s1808_s3 = inlined_call_operand.vmem [shape: f32[1,96], index: 3, kind: input, shape index: {}]   ;;  %s1809_s0 = inlined_call_operand.vmem [shape: f32[16,4,96], index: 0, kind: input, shape index: {}]   ;;  %s1810_s1 = inlined_call_operand.vmem [shape: f32[16,4,32], index: 1, kind: input, shape index: {}]   ;;  %s1811_s4 = inlined_call_operand.vmem [shape: f32[16,4,32], index: 4, kind: output, shape index: {}]  }
   0x1   :  { %v1463_v0 = vld [vmem:[%s1807_s2 + $0x8] sm:$0xff]  ;;  %19 = vst.msk [vmem:[#allocation2] sm:$0xf] %vm18_vm0, %v1431_v1  ;;  %v1470_v2 = vld [vmem:[%s1807_s2] sm:$0xff]  ;;  %s1434_s24 = smov 32  }
   0x2   :  { %54 = vmatpush.bf16.msra.mxu0 %v1463_v0  ;;  %128 = vmatpush.bf16.msra.mxu1 %v1463_v0  ;;  %v1497_v5 = vld [vmem:[%s1808_s3] ss:$0 sm:$0xff]  ;;  %v1252_v44 = vld [vmem:[%s1809_s0 + $0x4] sm:$0xf] }
   0x3   :  { %203 = vmatpush.bf16.msra.mxu2 %v1463_v0  ;;  %278 = vmatpush.bf16.msra.mxu3 %v1463_v0  ;;  %v26_v9 = vld [vmem:[%s1809_s0] sm:$0xf] }
   0x4   :  { %v27_v35 = vld [vmem:[%s1810_s1] sm:$0xf] }
   0x5   :  { %vm104_vm6 = vcmp.gt.f32.partialorder %v27_v35, 0.0 }
   0x6   :  { %55 = vmatpush.bf16.msra.mxu0 %v1470_v2  ;;  %129 = vmatpush.bf16.msra.mxu1 %v1470_v2 }
   0x7   :  { %204 = vmatpush.bf16.msra.mxu2 %v1470_v2  ;;  %279 = vmatpush.bf16.msra.mxu3 %v1470_v2 }
   0x8   :  { %v1477_v3 = vld [vmem:[#allocation2] sm:$0xf] }
   0x9   :  { %v28_v4 = vpack.c.bf16 %v1477_v3, %v1477_v3 }
   0xa   :  { %353 = vmatpush.bf16.msrb.mxu0 %v1463_v0  ;;  %428 = vmatpush.bf16.msrb.mxu1 %v1463_v0 }
   0xb   :  { %503 = vmatpush.bf16.msrb.mxu2 %v1463_v0  ;;  %578 = vmatpush.bf16.msrb.mxu3 %v1463_v0 }
   0xc   :  { %1250 = vmatmul.msk.bf16.vlgmr.msra.gmra.mxu0 %vm44_vm1, %v28_v4 }
   0xe   :  { %354 = vmatpush.bf16.msrb.mxu0 %v1470_v2  ;;  %429 = vmatpush.bf16.msrb.mxu1 %v1470_v2 }
   0xf   :  { %504 = vmatpush.bf16.msrb.mxu2 %v1470_v2  ;;  %579 = vmatpush.bf16.msrb.mxu3 %v1470_v2 }
  0x12   :  { %653 = vmatpush.bf16.msra.mxu0 %v1463_v0 }
  0x16   :  { %654 = vmatpush.bf16.msra.mxu0 %v1470_v2 }
  0x89   :  { %v57_v6 = vpop.f32.mrf.mxu0 }
  0x8a   :  { %v58_v7 = vadd.f32 %v1497_v5, %v57_v6 }
  0x8c   :  { %82 = vrot.lane.b32.xlu0 %v58_v7, %s1432_s20  ;;  %v61_v10 = vadd.f32 %v58_v7, %v26_v9 }
  0x8e   :  { %v1251_v11 = vmul.f32 -1.442695, %v61_v10 }
  0x90   :  { %1334 = vpow2.f32 %v1251_v11 }
  0x91   :  { %v59_v8 = vpop.f32.mrf.mxu0 }
  0x96   :  { %v1335_v12 = vpop.eup %1334 }
  0x97   :  { %v65_v13 = vadd.f32 1.0, %v1335_v12 }
  0x99   :  { %1336 = vrcp.f32 %v65_v13  ;;  %v77_v19 = vand.u32 2147483648, %v65_v13  ;;  %vm71_vm3 = vweird.f32 %v65_v13  ;;  %v75_v20 = vand.u32 2147483647, %v65_v13 }
  0x9b   :  { %v78_v22 = vor.u32 1.1754944e-38, %v77_v19  ;;  %vm76_vm5 = vcmp.eq.f32.partialorder %v75_v20, 8.507059e+37 }
  0x9f   :  { %v1337_v14 = vpop.eup %1336 }
  0xa0   :  { %v67_v15 = vmul.f32 %v1337_v14, %v65_v13  ;;  %vm72_vm2 = vweird.f32 %v1337_v14 }
  0xa1   :  { %vm73_vm4 = vmor %vm71_vm3, %vm72_vm2 }
  0xa2   :  { %v68_v16 = vsub.f32 1.0, %v67_v15 }
  0xa4   :  { %v69_v17 = vmul.f32 %v1337_v14, %v68_v16 }
  0xa6   :  { %v70_v18 = vadd.f32 %v1337_v14, %v69_v17 }
  0xa8   :  { %v74_v21 = vsel %vm73_vm4, %v1337_v14, %v70_v18  ;;  %v1257_v18 = vld [vmem:[%s1809_s0 + $0x8] sm:$0xf] }
  0xa9   :  { %v79_v24 = vsel %vm76_vm5, %v78_v22, %v74_v21 }
  0xaa   :  { %v92_v30 = vsub.f32 1.0, %v79_v24 }
  0xfe   :  { %v83_v23 = vpop.permute.xlu0 %82 }
  0xff   :  { %v85_v25 = vmul.f32 %v83_v23, %v79_v24 }
 0x101   :  { %87 = vrot.lane.b32.xlu0 %v85_v25, %s1432_s20 }
 0x173   :  { %v88_v26 = vpop.permute.xlu0 %87 }
 0x174   :  { %v90_v27 = vadd.f32 %v88_v26, %v26_v9  ;;  %v1253_v9 = vld [vmem:[%s1810_s1 + $0x4] sm:$0xf] }
 0x175   :  { %vm178_vm11 = vcmp.gt.f32.partialorder %v1253_v9, 0.0 }
 0x176   :  { %1338 = vtanh.f32 %v90_v27 }
 0x17c   :  { %v1339_v28 = vpop.eup %1338 }
 0x17d   :  { %94 = vrot.lane.b32.xlu1 %v1339_v28, %s1433_s23 }
 0x185   :  { %99 = vrot.lane.b32.xlu1 %v1477_v3, %s1434_s24 }
 0x1ef   :  { %v95_v29 = vpop.permute.xlu1 %94 }
 0x1f0   :  { %v97_v32 = vmul.f32 %v95_v29, %v92_v30 }
 0x1f7   :  { %v100_v31 = vpop.permute.xlu1 %99 }
 0x1f8   :  { %v102_v33 = vmul.f32 %v100_v31, %v79_v24 }
 0x1fa   :  { %v103_v34 = vadd.f32 %v102_v33, %v97_v32 }
 0x1fc   :  { %106 = vrot.lane.b32.xlu2 %v103_v34, %s1433_s23 }
 0x256   :  { %v107_v36 = vpop.permute.xlu2 %106 }
 0x257   :  { %v109_v37 = vsel %vm104_vm6, %v107_v36, %v1477_v3  ;;  %v111_v38 = vsel %vm104_vm6, %v107_v36, 0.0 }
 0x258   :  { %110 = vst.msk [vmem:[#allocation2] sm:$0xf] %vm18_vm0, %v109_v37 }
 0x259   :  { %112 = vst.msk [vmem:[%s1811_s4] sm:$0xf] %vm18_vm0, %v111_v38 }
 0x25f   :  { %v113_v39 = vld [vmem:[#allocation2] sm:$0xf] }
 0x260   :  { %v118_v40 = vpack.c.bf16 %v113_v39, %v113_v39 }
 0x262   :  { %1254 = vmatmul.msk.bf16.vlgmr.msra.gmra.mxu1 %vm44_vm1, %v118_v40 }
 0x263   :  { %728 = vmatpush.bf16.msra.mxu1 %v1463_v0 }
 0x267   :  { %729 = vmatpush.bf16.msra.mxu1 %v1470_v2 }
 0x2df   :  { %v131_v41 = vpop.f32.mrf.mxu1 }
 0x2e0   :  { %v132_v42 = vadd.f32 %v1497_v5, %v131_v41 }
 0x2e2   :  { %156 = vrot.lane.b32.xlu2 %v132_v42, %s1432_s20  ;;  %v135_v45 = vadd.f32 %v1252_v44, %v132_v42 }
 0x2e4   :  { %v1255_v46 = vmul.f32 -1.442695, %v135_v45 }
 0x2e6   :  { %1340 = vpow2.f32 %v1255_v46 }
 0x2e7   :  { %v133_v43 = vpop.f32.mrf.mxu1 }
 0x2ea   :  { %173 = vrot.lane.b32.xlu2 %v113_v39, %s1434_s24 }
 0x2ec   :  { %v1341_v47 = vpop.eup %1340 }
 0x2ed   :  { %v139_v48 = vadd.f32 1.0, %v1341_v47 }
 0x2ef   :  { %1342 = vrcp.f32 %v139_v48  ;;  %v151_v54 = vand.u32 2147483648, %v139_v48  ;;  %vm145_vm8 = vweird.f32 %v139_v48  ;;  %v149_v55 = vand.u32 2147483647, %v139_v48 }
 0x2f1   :  { %v152_v57 = vor.u32 1.1754944e-38, %v151_v54  ;;  %vm150_vm10 = vcmp.eq.f32.partialorder %v149_v55, 8.507059e+37 }
 0x2f5   :  { %v1343_v49 = vpop.eup %1342 }
 0x2f6   :  { %v141_v50 = vmul.f32 %v1343_v49, %v139_v48  ;;  %vm146_vm7 = vweird.f32 %v1343_v49 }
 0x2f7   :  { %vm147_vm9 = vmor %vm145_vm8, %vm146_vm7 }
 0x2f8   :  { %v142_v51 = vsub.f32 1.0, %v141_v50 }
 0x2fa   :  { %v143_v52 = vmul.f32 %v1343_v49, %v142_v51 }
 0x2fc   :  { %v144_v53 = vadd.f32 %v1343_v49, %v143_v52 }
 0x2fe   :  { %v148_v56 = vsel %vm147_vm9, %v1343_v49, %v144_v53  ;;  %v1262_v53 = vld [vmem:[%s1809_s0 + $0xc] sm:$0xf] }
 0x2ff   :  { %v153_v59 = vsel %vm150_vm10, %v152_v57, %v148_v56 }
 0x300   :  { %v166_v3 = vsub.f32 1.0, %v153_v59 }
 0x33c   :  { %v157_v58 = vpop.permute.xlu2 %156 }
 0x33d   :  { %v159_v60 = vmul.f32 %v157_v58, %v153_v59 }
 0x33f   :  { %161 = vrot.lane.b32.xlu0 %v159_v60, %s1432_s20 }
 0x344   :  { %v174_v1 = vpop.permute.xlu2 %173 }
 0x345   :  { %v176_v6 = vmul.f32 %v174_v1, %v153_v59 }
 0x3b1   :  { %v162_v61 = vpop.permute.xlu0 %161 }
 0x3b2   :  { %v164_v62 = vadd.f32 %v1252_v44, %v162_v61  ;;  %v1258_v44 = vld [vmem:[%s1810_s1 + $0x8] sm:$0xf] }
 0x3b3   :  { %vm253_vm2 = vcmp.gt.f32.partialorder %v1258_v44, 0.0 }
 0x3b4   :  { %1344 = vtanh.f32 %v164_v62 }
 0x3ba   :  { %v1345_v63 = vpop.eup %1344 }
 0x3bb   :  { %168 = vrot.lane.b32.xlu1 %v1345_v63, %s1433_s23 }
 0x42d   :  { %v169_v4 = vpop.permute.xlu1 %168 }
 0x42e   :  { %v171_v7 = vmul.f32 %v169_v4, %v166_v3 }
 0x430   :  { %v177_v8 = vadd.f32 %v176_v6, %v171_v7 }
 0x432   :  { %180 = vrot.lane.b32.xlu0 %v177_v8, %s1433_s23 }
 0x4a4   :  { %v181_v10 = vpop.permute.xlu0 %180 }
 0x4a5   :  { %v183_v11 = vsel %vm178_vm11, %v181_v10, %v113_v39  ;;  %v185_v12 = vsel %vm178_vm11, %v181_v10, 0.0 }
 0x4a6   :  { %184 = vst.msk [vmem:[#allocation2] sm:$0xf] %vm18_vm0, %v183_v11 }
 0x4a7   :  { %1256 = vst.msk [vmem:[%s1811_s4 + $0x4] sm:$0xf] %vm18_vm0, %v185_v12 }
 0x4ad   :  { %v188_v13 = vld [vmem:[#allocation2] sm:$0xf] }
 0x4ae   :  { %v193_v14 = vpack.c.bf16 %v188_v13, %v188_v13 }
 0x4b0   :  { %1259 = vmatmul.msk.bf16.vlgmr.msra.gmra.mxu2 %vm44_vm1, %v193_v14 }
 0x4b1   :  { %803 = vmatpush.bf16.msra.mxu2 %v1463_v0 }
 0x4b5   :  { %804 = vmatpush.bf16.msra.mxu2 %v1470_v2 }
 0x533   :  { %v206_v15 = vpop.f32.mrf.mxu2 }
 0x534   :  { %v207_v16 = vadd.f32 %v1497_v5, %v206_v15 }
 0x536   :  { %231 = vrot.lane.b32.xlu1 %v207_v16, %s1432_s20  ;;  %v210_v19 = vadd.f32 %v1257_v18, %v207_v16 }
 0x538   :  { %v1260_v20 = vmul.f32 -1.442695, %v210_v19 }
 0x53a   :  { %1346 = vpow2.f32 %v1260_v20 }
 0x53b   :  { %v208_v17 = vpop.f32.mrf.mxu2 }
 0x53e   :  { %248 = vrot.lane.b32.xlu1 %v188_v13, %s1434_s24 }
 0x540   :  { %v1347_v21 = vpop.eup %1346 }
 0x541   :  { %v214_v22 = vadd.f32 1.0, %v1347_v21 }
 0x543   :  { %1348 = vrcp.f32 %v214_v22  ;;  %v226_v28 = vand.u32 2147483648, %v214_v22  ;;  %vm220_vm13 = vweird.f32 %v214_v22  ;;  %v224_v29 = vand.u32 2147483647, %v214_v22 }
 0x545   :  { %v227_v31 = vor.u32 1.1754944e-38, %v226_v28  ;;  %vm225_vm15 = vcmp.eq.f32.partialorder %v224_v29, 8.507059e+37 }
 0x549   :  { %v1349_v23 = vpop.eup %1348 }
 0x54a   :  { %v216_v24 = vmul.f32 %v1349_v23, %v214_v22  ;;  %vm221_vm12 = vweird.f32 %v1349_v23 }
 0x54b   :  { %vm222_vm14 = vmor %vm220_vm13, %vm221_vm12 }
 0x54c   :  { %v217_v25 = vsub.f32 1.0, %v216_v24 }
 0x54e   :  { %v218_v26 = vmul.f32 %v1349_v23, %v217_v25 }
 0x550   :  { %v219_v27 = vadd.f32 %v1349_v23, %v218_v26 }
 0x552   :  { %v223_v30 = vsel %vm222_vm14, %v1349_v23, %v219_v27  ;;  %v1267_v27 = vld [vmem:[%s1809_s0 + $0x10] sm:$0xf] }
 0x553   :  { %v228_v33 = vsel %vm225_vm15, %v227_v31, %v223_v30 }
 0x554   :  { %v241_v39 = vsub.f32 1.0, %v228_v33 }
 0x5a8   :  { %v232_v32 = vpop.permute.xlu1 %231 }
 0x5a9   :  { %v234_v34 = vmul.f32 %v232_v32, %v228_v33 }
 0x5ab   :  { %236 = vrot.lane.b32.xlu2 %v234_v34, %s1432_s20 }
 0x5b0   :  { %v249_v38 = vpop.permute.xlu1 %248 }
 0x5b1   :  { %v251_v41 = vmul.f32 %v249_v38, %v228_v33 }
 0x605   :  { %v237_v35 = vpop.permute.xlu2 %236 }
 0x606   :  { %v239_v36 = vadd.f32 %v1257_v18, %v237_v35  ;;  %v1263_v18 = vld [vmem:[%s1810_s1 + $0xc] sm:$0xf] }
 0x607   :  { %vm328_vm7 = vcmp.gt.f32.partialorder %v1263_v18, 0.0 }
 0x608   :  { %1350 = vtanh.f32 %v239_v36 }
 0x60e   :  { %v1351_v37 = vpop.eup %1350 }
 0x60f   :  { %243 = vrot.lane.b32.xlu0 %v1351_v37, %s1433_s23 }
 0x681   :  { %v244_v40 = vpop.permute.xlu0 %243 }
 0x682   :  { %v246_v42 = vmul.f32 %v244_v40, %v241_v39 }
 0x684   :  { %v252_v43 = vadd.f32 %v251_v41, %v246_v42 }
 0x686   :  { %255 = vrot.lane.b32.xlu2 %v252_v43, %s1433_s23 }
 0x6e0   :  { %v256_v45 = vpop.permute.xlu2 %255 }
 0x6e1   :  { %v258_v46 = vsel %vm253_vm2, %v256_v45, %v188_v13  ;;  %v260_v47 = vsel %vm253_vm2, %v256_v45, 0.0 }
 0x6e2   :  { %259 = vst.msk [vmem:[#allocation2] sm:$0xf] %vm18_vm0, %v258_v46 }
 0x6e3   :  { %1261 = vst.msk [vmem:[%s1811_s4 + $0x8] sm:$0xf] %vm18_vm0, %v260_v47 }
 0x6e9   :  { %v263_v48 = vld [vmem:[#allocation2] sm:$0xf] }
 0x6ea   :  { %v268_v49 = vpack.c.bf16 %v263_v48, %v263_v48 }
 0x6ec   :  { %1264 = vmatmul.msk.bf16.vlgmr.msra.gmra.mxu3 %vm44_vm1, %v268_v49 }
 0x6ed   :  { %878 = vmatpush.bf16.msra.mxu3 %v1463_v0 }
 0x6f1   :  { %879 = vmatpush.bf16.msra.mxu3 %v1470_v2 }
 0x76f   :  { %v281_v50 = vpop.f32.mrf.mxu3 }
 0x770   :  { %v282_v51 = vadd.f32 %v1497_v5, %v281_v50 }
 0x772   :  { %306 = vrot.lane.b32.xlu0 %v282_v51, %s1432_s20  ;;  %v285_v54 = vadd.f32 %v1262_v53, %v282_v51 }
 0x774   :  { %v1265_v55 = vmul.f32 -1.442695, %v285_v54 }
 0x776   :  { %1352 = vpow2.f32 %v1265_v55 }
 0x777   :  { %v283_v52 = vpop.f32.mrf.mxu3 }
 0x77a   :  { %323 = vrot.lane.b32.xlu0 %v263_v48, %s1434_s24 }
 0x77c   :  { %v1353_v56 = vpop.eup %1352 }
 0x77d   :  { %v289_v57 = vadd.f32 1.0, %v1353_v56 }
 0x77f   :  { %1354 = vrcp.f32 %v289_v57  ;;  %v301_v63 = vand.u32 2147483648, %v289_v57  ;;  %vm295_vm4 = vweird.f32 %v289_v57  ;;  %v299_v1 = vand.u32 2147483647, %v289_v57 }
 0x781   :  { %v302_v4 = vor.u32 1.1754944e-38, %v301_v63  ;;  %vm300_vm6 = vcmp.eq.f32.partialorder %v299_v1, 8.507059e+37 }
 0x785   :  { %v1355_v58 = vpop.eup %1354 }
 0x786   :  { %v291_v59 = vmul.f32 %v1355_v58, %v289_v57  ;;  %vm296_vm3 = vweird.f32 %v1355_v58 }
 0x787   :  { %vm297_vm5 = vmor %vm295_vm4, %vm296_vm3 }
 0x788   :  { %v292_v60 = vsub.f32 1.0, %v291_v59 }
 0x78a   :  { %v293_v61 = vmul.f32 %v1355_v58, %v292_v60 }
 0x78c   :  { %v294_v62 = vadd.f32 %v1355_v58, %v293_v61 }
 0x78e   :  { %v298_v3 = vsel %vm297_vm5, %v1355_v58, %v294_v62  ;;  %v1272_v62 = vld [vmem:[%s1809_s0 + $0x14] sm:$0xf] }
 0x78f   :  { %v303_v7 = vsel %vm300_vm6, %v302_v4, %v298_v3 }
 0x790   :  { %v316_v13 = vsub.f32 1.0, %v303_v7 }
 0x7e4   :  { %v307_v6 = vpop.permute.xlu0 %306 }
 0x7e5   :  { %v309_v8 = vmul.f32 %v307_v6, %v303_v7 }
 0x7e7   :  { %311 = vrot.lane.b32.xlu1 %v309_v8, %s1432_s20 }
 0x7ec   :  { %v324_v12 = vpop.permute.xlu0 %323 }
 0x7ed   :  { %v326_v15 = vmul.f32 %v324_v12, %v303_v7 }
 0x859   :  { %v312_v9 = vpop.permute.xlu1 %311 }
 0x85a   :  { %v314_v10 = vadd.f32 %v1262_v53, %v312_v9  ;;  %v1268_v53 = vld [vmem:[%s1810_s1 + $0x10] sm:$0xf] }
 0x85b   :  { %vm403_vm12 = vcmp.gt.f32.partialorder %v1268_v53, 0.0 }
 0x85c   :  { %1356 = vtanh.f32 %v314_v10 }
 0x862   :  { %v1357_v11 = vpop.eup %1356 }
 0x863   :  { %318 = vrot.lane.b32.xlu2 %v1357_v11, %s1433_s23 }
 0x8bd   :  { %v319_v14 = vpop.permute.xlu2 %318 }
 0x8be   :  { %v321_v16 = vmul.f32 %v319_v14, %v316_v13 }
 0x8c0   :  { %v327_v17 = vadd.f32 %v326_v15, %v321_v16 }
 0x8c2   :  { %330 = vrot.lane.b32.xlu1 %v327_v17, %s1433_s23 }
 0x934   :  { %v331_v19 = vpop.permute.xlu1 %330 }
 0x935   :  { %v333_v20 = vsel %vm328_vm7, %v331_v19, %v263_v48  ;;  %v335_v21 = vsel %vm328_vm7, %v331_v19, 0.0 }
 0x936   :  { %334 = vst.msk [vmem:[#allocation2] sm:$0xf] %vm18_vm0, %v333_v20 }
 0x937   :  { %1266 = vst.msk [vmem:[%s1811_s4 + $0xc] sm:$0xf] %vm18_vm0, %v335_v21 }
 0x93d   :  { %v338_v22 = vld [vmem:[#allocation2] sm:$0xf] }
 0x93e   :  { %v343_v23 = vpack.c.bf16 %v338_v22, %v338_v22 }
 0x940   :  { %1269 = vmatmul.msk.bf16.vlgmr.msrb.gmra.mxu0 %vm44_vm1, %v343_v23 }
 0x941   :  { %953 = vmatpush.bf16.msrb.mxu0 %v1463_v0 }
 0x945   :  { %954 = vmatpush.bf16.msrb.mxu0 %v1470_v2 }
 0x9bd   :  { %v356_v24 = vpop.f32.mrf.mxu0 }
 0x9be   :  { %v357_v25 = vadd.f32 %v1497_v5, %v356_v24 }
 0x9c0   :  { %381 = vrot.lane.b32.xlu2 %v357_v25, %s1432_s20  ;;  %v360_v28 = vadd.f32 %v1267_v27, %v357_v25 }
 0x9c2   :  { %v1270_v29 = vmul.f32 -1.442695, %v360_v28 }
 0x9c4   :  { %1358 = vpow2.f32 %v1270_v29 }
 0x9c5   :  { %v358_v26 = vpop.f32.mrf.mxu0 }
 0x9c8   :  { %398 = vrot.lane.b32.xlu2 %v338_v22, %s1434_s24 }
 0x9ca   :  { %v1359_v30 = vpop.eup %1358 }
 0x9cb   :  { %v364_v31 = vadd.f32 1.0, %v1359_v30 }
 0x9cd   :  { %1360 = vrcp.f32 %v364_v31  ;;  %v376_v37 = vand.u32 2147483648, %v364_v31  ;;  %vm370_vm9 = vweird.f32 %v364_v31  ;;  %v374_v38 = vand.u32 2147483647, %v364_v31 }
 0x9cf   :  { %v377_v40 = vor.u32 1.1754944e-38, %v376_v37  ;;  %vm375_vm11 = vcmp.eq.f32.partialorder %v374_v38, 8.507059e+37 }
 0x9d3   :  { %v1361_v32 = vpop.eup %1360 }
 0x9d4   :  { %v366_v33 = vmul.f32 %v1361_v32, %v364_v31  ;;  %vm371_vm8 = vweird.f32 %v1361_v32 }
 0x9d5   :  { %vm372_vm10 = vmor %vm370_vm9, %vm371_vm8 }
 0x9d6   :  { %v367_v34 = vsub.f32 1.0, %v366_v33 }
 0x9d8   :  { %v368_v35 = vmul.f32 %v1361_v32, %v367_v34 }
 0x9da   :  { %v369_v36 = vadd.f32 %v1361_v32, %v368_v35 }
 0x9dc   :  { %v373_v39 = vsel %vm372_vm10, %v1361_v32, %v369_v36  ;;  %v1277_v36 = vld [vmem:[%s1809_s0 + $0x18] sm:$0xf] }
 0x9dd   :  { %v378_v42 = vsel %vm375_vm11, %v377_v40, %v373_v39 }
 0x9de   :  { %v391_v48 = vsub.f32 1.0, %v378_v42 }
 0xa1a   :  { %v382_v41 = vpop.permute.xlu2 %381 }
 0xa1b   :  { %v384_v43 = vmul.f32 %v382_v41, %v378_v42 }
 0xa1d   :  { %386 = vrot.lane.b32.xlu0 %v384_v43, %s1432_s20 }
 0xa22   :  { %v399_v47 = vpop.permute.xlu2 %398 }
 0xa23   :  { %v401_v50 = vmul.f32 %v399_v47, %v378_v42 }
 0xa8f   :  { %v387_v44 = vpop.permute.xlu0 %386 }
 0xa90   :  { %v389_v45 = vadd.f32 %v1267_v27, %v387_v44  ;;  %v1273_v27 = vld [vmem:[%s1810_s1 + $0x14] sm:$0xf] }
 0xa91   :  { %vm478_vm3 = vcmp.gt.f32.partialorder %v1273_v27, 0.0 }
 0xa92   :  { %1362 = vtanh.f32 %v389_v45 }
 0xa98   :  { %v1363_v46 = vpop.eup %1362 }
 0xa99   :  { %393 = vrot.lane.b32.xlu1 %v1363_v46, %s1433_s23 }
 0xb0b   :  { %v394_v49 = vpop.permute.xlu1 %393 }
 0xb0c   :  { %v396_v51 = vmul.f32 %v394_v49, %v391_v48 }
 0xb0e   :  { %v402_v52 = vadd.f32 %v401_v50, %v396_v51 }
 0xb10   :  { %405 = vrot.lane.b32.xlu0 %v402_v52, %s1433_s23 }
 0xb82   :  { %v406_v54 = vpop.permute.xlu0 %405 }
 0xb83   :  { %v408_v55 = vsel %vm403_vm12, %v406_v54, %v338_v22  ;;  %v410_v56 = vsel %vm403_vm12, %v406_v54, 0.0 }
 0xb84   :  { %409 = vst.msk [vmem:[#allocation2] sm:$0xf] %vm18_vm0, %v408_v55 }
 0xb85   :  { %1271 = vst.msk [vmem:[%s1811_s4 + $0x10] sm:$0xf] %vm18_vm0, %v410_v56 }
 0xb8b   :  { %v413_v57 = vld [vmem:[#allocation2] sm:$0xf] }
 0xb8c   :  { %v418_v58 = vpack.c.bf16 %v413_v57, %v413_v57 }
 0xb8e   :  { %1274 = vmatmul.msk.bf16.vlgmr.msrb.gmra.mxu1 %vm44_vm1, %v418_v58 }
 0xb8f   :  { %1028 = vmatpush.bf16.msrb.mxu1 %v1463_v0 }
 0xb93   :  { %1029 = vmatpush.bf16.msrb.mxu1 %v1470_v2 }
 0xc0b   :  { %v431_v59 = vpop.f32.mrf.mxu1 }
 0xc0c   :  { %v432_v60 = vadd.f32 %v1497_v5, %v431_v59 }
 0xc0e   :  { %456 = vrot.lane.b32.xlu1 %v432_v60, %s1432_s20  ;;  %v435_v63 = vadd.f32 %v1272_v62, %v432_v60 }
 0xc10   :  { %v1275_v1 = vmul.f32 -1.442695, %v435_v63 }
 0xc12   :  { %1364 = vpow2.f32 %v1275_v1 }
 0xc13   :  { %v433_v61 = vpop.f32.mrf.mxu1 }
 0xc16   :  { %473 = vrot.lane.b32.xlu1 %v413_v57, %s1434_s24 }
 0xc18   :  { %v1365_v3 = vpop.eup %1364 }
 0xc19   :  { %v439_v4 = vadd.f32 1.0, %v1365_v3 }
 0xc1b   :  { %1366 = vrcp.f32 %v439_v4  ;;  %v451_v11 = vand.u32 2147483648, %v439_v4  ;;  %vm445_vm14 = vweird.f32 %v439_v4  ;;  %v449_v12 = vand.u32 2147483647, %v439_v4 }
 0xc1d   :  { %v452_v14 = vor.u32 1.1754944e-38, %v451_v11  ;;  %vm450_vm2 = vcmp.eq.f32.partialorder %v449_v12, 8.507059e+37 }
 0xc21   :  { %v1367_v6 = vpop.eup %1366 }
 0xc22   :  { %v441_v7 = vmul.f32 %v1367_v6, %v439_v4  ;;  %vm446_vm13 = vweird.f32 %v1367_v6 }
 0xc23   :  { %vm447_vm15 = vmor %vm445_vm14, %vm446_vm13 }
 0xc24   :  { %v442_v8 = vsub.f32 1.0, %v441_v7 }
 0xc26   :  { %v443_v9 = vmul.f32 %v1367_v6, %v442_v8 }
 0xc28   :  { %v444_v10 = vadd.f32 %v1367_v6, %v443_v9 }
 0xc2a   :  { %v448_v13 = vsel %vm447_vm15, %v1367_v6, %v444_v10  ;;  %v1282_v10 = vld [vmem:[%s1809_s0 + $0x1c] sm:$0xf] }
 0xc2b   :  { %v453_v16 = vsel %vm450_vm2, %v452_v14, %v448_v13 }
 0xc2c   :  { %v466_v22 = vsub.f32 1.0, %v453_v16 }
 0xc80   :  { %v457_v15 = vpop.permute.xlu1 %456 }
 0xc81   :  { %v459_v17 = vmul.f32 %v457_v15, %v453_v16 }
 0xc83   :  { %461 = vrot.lane.b32.xlu2 %v459_v17, %s1432_s20 }
 0xc88   :  { %v474_v21 = vpop.permute.xlu1 %473 }
 0xc89   :  { %v476_v24 = vmul.f32 %v474_v21, %v453_v16 }
 0xcdd   :  { %v462_v18 = vpop.permute.xlu2 %461 }
 0xcde   :  { %v464_v19 = vadd.f32 %v1272_v62, %v462_v18  ;;  %v1278_v62 = vld [vmem:[%s1810_s1 + $0x18] sm:$0xf] }
 0xcdf   :  { %vm553_vm8 = vcmp.gt.f32.partialorder %v1278_v62, 0.0 }
 0xce0   :  { %1368 = vtanh.f32 %v464_v19 }
 0xce6   :  { %v1369_v20 = vpop.eup %1368 }
 0xce7   :  { %468 = vrot.lane.b32.xlu0 %v1369_v20, %s1433_s23 }
 0xd59   :  { %v469_v23 = vpop.permute.xlu0 %468 }
 0xd5a   :  { %v471_v25 = vmul.f32 %v469_v23, %v466_v22 }
 0xd5c   :  { %v477_v26 = vadd.f32 %v476_v24, %v471_v25 }
 0xd5e   :  { %480 = vrot.lane.b32.xlu2 %v477_v26, %s1433_s23 }
 0xdb8   :  { %v481_v28 = vpop.permute.xlu2 %480 }
 0xdb9   :  { %v483_v29 = vsel %vm478_vm3, %v481_v28, %v413_v57  ;;  %v485_v30 = vsel %vm478_vm3, %v481_v28, 0.0 }
 0xdba   :  { %484 = vst.msk [vmem:[#allocation2] sm:$0xf] %vm18_vm0, %v483_v29 }
 0xdbb   :  { %1276 = vst.msk [vmem:[%s1811_s4 + $0x14] sm:$0xf] %vm18_vm0, %v485_v30 }
 0xdc1   :  { %v488_v31 = vld [vmem:[#allocation2] sm:$0xf] }
 0xdc2   :  { %v493_v32 = vpack.c.bf16 %v488_v31, %v488_v31 }
 0xdc4   :  { %1279 = vmatmul.msk.bf16.vlgmr.msrb.gmra.mxu2 %vm44_vm1, %v493_v32 }
 0xdc5   :  { %1103 = vmatpush.bf16.msrb.mxu2 %v1463_v0 }
 0xdc9   :  { %1104 = vmatpush.bf16.msrb.mxu2 %v1470_v2 }
 0xe47   :  { %v506_v33 = vpop.f32.mrf.mxu2 }
 0xe48   :  { %v507_v34 = vadd.f32 %v1497_v5, %v506_v33 }
 0xe4a   :  { %531 = vrot.lane.b32.xlu0 %v507_v34, %s1432_s20  ;;  %v510_v37 = vadd.f32 %v1277_v36, %v507_v34  ;;  %v1283_v34 = vld [vmem:[%s1810_s1 + $0x1c] sm:$0xf] }
 0xe4b   :  { %vm628_vm13 = vcmp.gt.f32.partialorder %v1283_v34, 0.0 }
 0xe4c   :  { %v1280_v38 = vmul.f32 -1.442695, %v510_v37 }
 0xe4e   :  { %1370 = vpow2.f32 %v1280_v38 }
 0xe4f   :  { %v508_v35 = vpop.f32.mrf.mxu2 }
 0xe52   :  { %548 = vrot.lane.b32.xlu0 %v488_v31, %s1434_s24 }
 0xe54   :  { %v1371_v39 = vpop.eup %1370 }
 0xe55   :  { %v514_v40 = vadd.f32 1.0, %v1371_v39 }
 0xe57   :  { %1372 = vrcp.f32 %v514_v40  ;;  %v526_v46 = vand.u32 2147483648, %v514_v40  ;;  %vm520_vm5 = vweird.f32 %v514_v40  ;;  %v524_v47 = vand.u32 2147483647, %v514_v40 }
 0xe59   :  { %v527_v49 = vor.u32 1.1754944e-38, %v526_v46  ;;  %vm525_vm7 = vcmp.eq.f32.partialorder %v524_v47, 8.507059e+37 }
 0xe5d   :  { %v1373_v41 = vpop.eup %1372 }
 0xe5e   :  { %v516_v42 = vmul.f32 %v1373_v41, %v514_v40  ;;  %vm521_vm4 = vweird.f32 %v1373_v41 }
 0xe5f   :  { %vm522_vm6 = vmor %vm520_vm5, %vm521_vm4 }
 0xe60   :  { %v517_v43 = vsub.f32 1.0, %v516_v42 }
 0xe62   :  { %v518_v44 = vmul.f32 %v1373_v41, %v517_v43  ;;  %v1287_v43 = vld [vmem:[%s1809_s0 + $0x20] sm:$0xf] }
 0xe64   :  { %v519_v45 = vadd.f32 %v1373_v41, %v518_v44 }
 0xe66   :  { %v523_v48 = vsel %vm522_vm6, %v1373_v41, %v519_v45 }
 0xe67   :  { %v528_v51 = vsel %vm525_vm7, %v527_v49, %v523_v48 }
 0xe68   :  { %v541_v57 = vsub.f32 1.0, %v528_v51 }
 0xebc   :  { %v532_v50 = vpop.permute.xlu0 %531 }
 0xebd   :  { %v534_v52 = vmul.f32 %v532_v50, %v528_v51 }
 0xebf   :  { %536 = vrot.lane.b32.xlu1 %v534_v52, %s1432_s20 }
 0xec4   :  { %v549_v56 = vpop.permute.xlu0 %548 }
 0xec5   :  { %v551_v59 = vmul.f32 %v549_v56, %v528_v51 }
 0xf31   :  { %v537_v53 = vpop.permute.xlu1 %536 }
 0xf32   :  { %v539_v54 = vadd.f32 %v1277_v36, %v537_v53 }
 0xf34   :  { %1374 = vtanh.f32 %v539_v54 }
 0xf3a   :  { %v1375_v55 = vpop.eup %1374 }
 0xf3b   :  { %543 = vrot.lane.b32.xlu2 %v1375_v55, %s1433_s23 }
 0xf95   :  { %v544_v58 = vpop.permute.xlu2 %543 }
 0xf96   :  { %v546_v60 = vmul.f32 %v544_v58, %v541_v57 }
 0xf98   :  { %v552_v61 = vadd.f32 %v551_v59, %v546_v60 }
 0xf9a   :  { %555 = vrot.lane.b32.xlu1 %v552_v61, %s1433_s23 }
0x100c   :  { %v556_v63 = vpop.permute.xlu1 %555 }
0x100d   :  { %v558_v1 = vsel %vm553_vm8, %v556_v63, %v488_v31  ;;  %v560_v3 = vsel %vm553_vm8, %v556_v63, 0.0 }
0x100e   :  { %559 = vst.msk [vmem:[#allocation2] sm:$0xf] %vm18_vm0, %v558_v1 }
0x100f   :  { %1281 = vst.msk [vmem:[%s1811_s4 + $0x18] sm:$0xf] %vm18_vm0, %v560_v3 }
0x1015   :  { %v563_v4 = vld [vmem:[#allocation2] sm:$0xf] }
0x1016   :  { %v568_v6 = vpack.c.bf16 %v563_v4, %v563_v4 }
0x1018   :  { %1284 = vmatmul.msk.bf16.vlgmr.msrb.gmra.mxu3 %vm44_vm1, %v568_v6 }
0x1019   :  { %1178 = vmatpush.bf16.msrb.mxu3 %v1463_v0 }
0x101d   :  { %1179 = vmatpush.bf16.msrb.mxu3 %v1470_v2 }
0x109b   :  { %v581_v7 = vpop.f32.mrf.mxu3 }
0x109c   :  { %v582_v8 = vadd.f32 %v1497_v5, %v581_v7 }
0x109e   :  { %606 = vrot.lane.b32.xlu2 %v582_v8, %s1432_s20  ;;  %v585_v11 = vadd.f32 %v1282_v10, %v582_v8  ;;  %v1288_v8 = vld [vmem:[%s1810_s1 + $0x20] sm:$0xf] }
0x109f   :  { %vm703_vm4 = vcmp.gt.f32.partialorder %v1288_v8, 0.0 }
0x10a0   :  { %v1285_v12 = vmul.f32 -1.442695, %v585_v11 }
0x10a2   :  { %1376 = vpow2.f32 %v1285_v12 }
0x10a3   :  { %v583_v9 = vpop.f32.mrf.mxu3 }
0x10a6   :  { %623 = vrot.lane.b32.xlu2 %v563_v4, %s1434_s24 }
0x10a8   :  { %v1377_v13 = vpop.eup %1376 }
0x10a9   :  { %v589_v14 = vadd.f32 1.0, %v1377_v13 }
0x10ab   :  { %1378 = vrcp.f32 %v589_v14  ;;  %v601_v18 = vand.u32 2147483648, %v589_v14  ;;  %vm595_vm10 = vweird.f32 %v589_v14  ;;  %v599_v19 = vand.u32 2147483647, %v589_v14 }
0x10ad   :  { %v602_v21 = vor.u32 1.1754944e-38, %v601_v18  ;;  %vm600_vm12 = vcmp.eq.f32.partialorder %v599_v19, 8.507059e+37 }
0x10b1   :  { %v1379_v0 = vpop.eup %1378 }
0x10b2   :  { %v591_v2 = vmul.f32 %v1379_v0, %v589_v14  ;;  %vm596_vm9 = vweird.f32 %v1379_v0 }
0x10b3   :  { %vm597_vm11 = vmor %vm595_vm10, %vm596_vm9 }
0x10b4   :  { %v592_v15 = vsub.f32 1.0, %v591_v2 }
0x10b6   :  { %v593_v16 = vmul.f32 %v1379_v0, %v592_v15  ;;  %v1292_v15 = vld [vmem:[%s1809_s0 + $0x24] sm:$0xf] }
0x10b8   :  { %v594_v17 = vadd.f32 %v1379_v0, %v593_v16 }
0x10ba   :  { %v598_v20 = vsel %vm597_vm11, %v1379_v0, %v594_v17 }
0x10bb   :  { %v603_v23 = vsel %vm600_vm12, %v602_v21, %v598_v20 }
0x10bc   :  { %v616_v29 = vsub.f32 1.0, %v603_v23 }
0x10f8   :  { %v607_v22 = vpop.permute.xlu2 %606 }
0x10f9   :  { %v609_v24 = vmul.f32 %v607_v22, %v603_v23 }
0x10fb   :  { %611 = vrot.lane.b32.xlu0 %v609_v24, %s1432_s20 }
0x1100   :  { %v624_v28 = vpop.permute.xlu2 %623 }
0x1101   :  { %v626_v31 = vmul.f32 %v624_v28, %v603_v23 }
0x116d   :  { %v612_v25 = vpop.permute.xlu0 %611 }
0x116e   :  { %v614_v26 = vadd.f32 %v1282_v10, %v612_v25 }
0x1170   :  { %1380 = vtanh.f32 %v614_v26 }
0x1176   :  { %v1381_v27 = vpop.eup %1380 }
0x1177   :  { %618 = vrot.lane.b32.xlu1 %v1381_v27, %s1433_s23 }
0x11e9   :  { %v619_v30 = vpop.permute.xlu1 %618 }
0x11ea   :  { %v621_v32 = vmul.f32 %v619_v30, %v616_v29 }
0x11ec   :  { %v627_v33 = vadd.f32 %v626_v31, %v621_v32 }
0x11ee   :  { %630 = vrot.lane.b32.xlu0 %v627_v33, %s1433_s23 }
0x1260   :  { %v631_v35 = vpop.permute.xlu0 %630 }
0x1261   :  { %v633_v36 = vsel %vm628_vm13, %v631_v35, %v563_v4  ;;  %v635_v37 = vsel %vm628_vm13, %v631_v35, 0.0 }
0x1262   :  { %634 = vst.msk [vmem:[#allocation2] sm:$0xf] %vm18_vm0, %v633_v36 }
0x1263   :  { %1286 = vst.msk [vmem:[%s1811_s4 + $0x1c] sm:$0xf] %vm18_vm0, %v635_v37 }
0x1269   :  { %v638_v38 = vld [vmem:[#allocation2] sm:$0xf] }
0x126a   :  { %v643_v39 = vpack.c.bf16 %v638_v38, %v638_v38 }
0x126c   :  { %1289 = vmatmul.msk.bf16.vlgmr.msra.gmra.mxu0 %vm44_vm1, %v643_v39 }
0x12e9   :  { %v656_v40 = vpop.f32.mrf.mxu0 }
0x12ea   :  { %v657_v41 = vadd.f32 %v1497_v5, %v656_v40  ;;  %v1293_v40 = vld [vmem:[%s1810_s1 + $0x24] sm:$0xf] }
0x12eb   :  { %vm778_vm9 = vcmp.gt.f32.partialorder %v1293_v40, 0.0 }
0x12ec   :  { %681 = vrot.lane.b32.xlu1 %v657_v41, %s1432_s20  ;;  %v660_v44 = vadd.f32 %v1287_v43, %v657_v41 }
0x12ee   :  { %v1290_v45 = vmul.f32 -1.442695, %v660_v44 }
0x12f0   :  { %1382 = vpow2.f32 %v1290_v45 }
0x12f1   :  { %v658_v42 = vpop.f32.mrf.mxu0 }
0x12f4   :  { %698 = vrot.lane.b32.xlu1 %v638_v38, %s1434_s24 }
0x12f6   :  { %v1383_v46 = vpop.eup %1382 }
0x12f7   :  { %v664_v47 = vadd.f32 1.0, %v1383_v46 }
0x12f9   :  { %1384 = vrcp.f32 %v664_v47  ;;  %v676_v53 = vand.u32 2147483648, %v664_v47  ;;  %vm670_vm15 = vweird.f32 %v664_v47  ;;  %v674_v54 = vand.u32 2147483647, %v664_v47 }
0x12fb   :  { %v677_v56 = vor.u32 1.1754944e-38, %v676_v53  ;;  %vm675_vm3 = vcmp.eq.f32.partialorder %v674_v54, 8.507059e+37 }
0x12ff   :  { %v1385_v48 = vpop.eup %1384 }
0x1300   :  { %v666_v49 = vmul.f32 %v1385_v48, %v664_v47  ;;  %vm671_vm14 = vweird.f32 %v1385_v48  ;;  %v1698_v47 = vld [vmem:[%s1808_s3] ss:$0 sm:$0xff] }
0x1301   :  { %vm672_vm2 = vmor %vm670_vm15, %vm671_vm14 }
0x1302   :  { %v667_v50 = vsub.f32 1.0, %v666_v49 }
0x1304   :  { %v668_v51 = vmul.f32 %v1385_v48, %v667_v50  ;;  %v1297_v50 = vld [vmem:[%s1809_s0 + $0x28] sm:$0xf] }
0x1306   :  { %v669_v52 = vadd.f32 %v1385_v48, %v668_v51 }
0x1308   :  { %v673_v55 = vsel %vm672_vm2, %v1385_v48, %v669_v52 }
0x1309   :  { %v678_v58 = vsel %vm675_vm3, %v677_v56, %v673_v55 }
0x130a   :  { %v691_v1 = vsub.f32 1.0, %v678_v58 }
0x135e   :  { %v682_v57 = vpop.permute.xlu1 %681 }
0x135f   :  { %v684_v59 = vmul.f32 %v682_v57, %v678_v58 }
0x1361   :  { %686 = vrot.lane.b32.xlu2 %v684_v59, %s1432_s20 }
0x1366   :  { %v699_v63 = vpop.permute.xlu1 %698 }
0x1367   :  { %v701_v4 = vmul.f32 %v699_v63, %v678_v58 }
0x13bb   :  { %v687_v60 = vpop.permute.xlu2 %686 }
0x13bc   :  { %v689_v61 = vadd.f32 %v1287_v43, %v687_v60 }
0x13be   :  { %1386 = vtanh.f32 %v689_v61 }
0x13c4   :  { %v1387_v62 = vpop.eup %1386 }
0x13c5   :  { %693 = vrot.lane.b32.xlu0 %v1387_v62, %s1433_s23 }
0x1437   :  { %v694_v3 = vpop.permute.xlu0 %693 }
0x1438   :  { %v696_v6 = vmul.f32 %v694_v3, %v691_v1 }
0x143a   :  { %v702_v7 = vadd.f32 %v701_v4, %v696_v6 }
0x143c   :  { %705 = vrot.lane.b32.xlu2 %v702_v7, %s1433_s23 }
0x1496   :  { %v706_v9 = vpop.permute.xlu2 %705 }
0x1497   :  { %v708_v10 = vsel %vm703_vm4, %v706_v9, %v638_v38  ;;  %v710_v11 = vsel %vm703_vm4, %v706_v9, 0.0 }
0x1498   :  { %709 = vst.msk [vmem:[#allocation2] sm:$0xf] %vm18_vm0, %v708_v10 }
0x1499   :  { %1291 = vst.msk [vmem:[%s1811_s4 + $0x20] sm:$0xf] %vm18_vm0, %v710_v11 }
0x149f   :  { %v713_v12 = vld [vmem:[#allocation2] sm:$0xf] }
0x14a0   :  { %v718_v13 = vpack.c.bf16 %v713_v12, %v713_v12 }
0x14a2   :  { %1294 = vmatmul.msk.bf16.vlgmr.msra.gmra.mxu1 %vm44_vm1, %v718_v13 }
0x151f   :  { %v731_v14 = vpop.f32.mrf.mxu1 }
0x1520   :  { %v732_v0 = vadd.f32 %v1497_v5, %v731_v14 }
0x1522   :  { %756 = vrot.lane.b32.xlu0 %v732_v0, %s1432_s20  ;;  %v735_v16 = vadd.f32 %v1292_v15, %v732_v0  ;;  %v1298_v0 = vld [vmem:[%s1810_s1 + $0x28] sm:$0xf] }
0x1523   :  { %vm853_vm14 = vcmp.gt.f32.partialorder %v1298_v0, 0.0 }
0x1524   :  { %v1295_v17 = vmul.f32 -1.442695, %v735_v16 }
0x1526   :  { %1388 = vpow2.f32 %v1295_v17 }
0x1527   :  { %v733_v2 = vpop.f32.mrf.mxu1 }
0x152a   :  { %773 = vrot.lane.b32.xlu0 %v713_v12, %s1434_s24 }
0x152c   :  { %v1389_v18 = vpop.eup %1388 }
0x152d   :  { %v739_v19 = vadd.f32 1.0, %v1389_v18 }
0x152f   :  { %1390 = vrcp.f32 %v739_v19  ;;  %v751_v24 = vand.u32 2147483648, %v739_v19  ;;  %vm745_vm6 = vweird.f32 %v739_v19  ;;  %v749_v25 = vand.u32 2147483647, %v739_v19 }
0x1531   :  { %v752_v27 = vor.u32 1.1754944e-38, %v751_v24  ;;  %vm750_vm8 = vcmp.eq.f32.partialorder %v749_v25, 8.507059e+37 }
0x1535   :  { %v1391_v20 = vpop.eup %1390 }
0x1536   :  { %v741_v21 = vmul.f32 %v1391_v20, %v739_v19  ;;  %vm746_vm5 = vweird.f32 %v1391_v20 }
0x1537   :  { %vm747_vm7 = vmor %vm745_vm6, %vm746_vm5 }
0x1538   :  { %v742_v22 = vsub.f32 1.0, %v741_v21 }
0x153a   :  { %v743_v23 = vmul.f32 %v1391_v20, %v742_v22  ;;  %v1302_v22 = vld [vmem:[%s1809_s0 + $0x2c] sm:$0xf] }
0x153c   :  { %v744_v5 = vadd.f32 %v1391_v20, %v743_v23 }
0x153e   :  { %v748_v26 = vsel %vm747_vm7, %v1391_v20, %v744_v5 }
0x153f   :  { %v753_v29 = vsel %vm750_vm8, %v752_v27, %v748_v26 }
0x1540   :  { %v766_v35 = vsub.f32 1.0, %v753_v29 }
0x1594   :  { %v757_v28 = vpop.permute.xlu0 %756 }
0x1595   :  { %v759_v30 = vmul.f32 %v757_v28, %v753_v29 }
0x1597   :  { %761 = vrot.lane.b32.xlu1 %v759_v30, %s1432_s20 }
0x159c   :  { %v774_v34 = vpop.permute.xlu0 %773 }
0x159d   :  { %v776_v37 = vmul.f32 %v774_v34, %v753_v29 }
0x1609   :  { %v762_v31 = vpop.permute.xlu1 %761 }
0x160a   :  { %v764_v32 = vadd.f32 %v1292_v15, %v762_v31 }
0x160c   :  { %1392 = vtanh.f32 %v764_v32 }
0x1612   :  { %v1393_v33 = vpop.eup %1392 }
0x1613   :  { %768 = vrot.lane.b32.xlu2 %v1393_v33, %s1433_s23 }
0x166d   :  { %v769_v36 = vpop.permute.xlu2 %768 }
0x166e   :  { %v771_v38 = vmul.f32 %v769_v36, %v766_v35 }
0x1670   :  { %v777_v39 = vadd.f32 %v776_v37, %v771_v38 }
0x1672   :  { %780 = vrot.lane.b32.xlu1 %v777_v39, %s1433_s23 }
0x16e4   :  { %v781_v41 = vpop.permute.xlu1 %780 }
0x16e5   :  { %v783_v42 = vsel %vm778_vm9, %v781_v41, %v713_v12  ;;  %v785_v43 = vsel %vm778_vm9, %v781_v41, 0.0 }
0x16e6   :  { %784 = vst.msk [vmem:[#allocation2] sm:$0xf] %vm18_vm0, %v783_v42 }
0x16e7   :  { %1296 = vst.msk [vmem:[%s1811_s4 + $0x24] sm:$0xf] %vm18_vm0, %v785_v43 }
0x16ed   :  { %v788_v44 = vld [vmem:[#allocation2] sm:$0xf] }
0x16ee   :  { %v793_v45 = vpack.c.bf16 %v788_v44, %v788_v44 }
0x16f0   :  { %1299 = vmatmul.msk.bf16.vlgmr.msra.gmra.mxu2 %vm44_vm1, %v793_v45 }
0x1773   :  { %v806_v46 = vpop.f32.mrf.mxu2 }
0x1774   :  { %v807_v48 = vadd.f32 %v1698_v47, %v806_v46 }
0x1776   :  { %831 = vrot.lane.b32.xlu2 %v807_v48, %s1432_s20  ;;  %v810_v51 = vadd.f32 %v1297_v50, %v807_v48  ;;  %v1303_v48 = vld [vmem:[%s1810_s1 + $0x2c] sm:$0xf] }
0x1777   :  { %vm928_vm5 = vcmp.gt.f32.partialorder %v1303_v48, 0.0 }
0x1778   :  { %v1300_v52 = vmul.f32 -1.442695, %v810_v51 }
0x177a   :  { %1394 = vpow2.f32 %v1300_v52 }
0x177b   :  { %v808_v49 = vpop.f32.mrf.mxu2 }
0x177e   :  { %848 = vrot.lane.b32.xlu2 %v788_v44, %s1434_s24 }
0x1780   :  { %v1395_v53 = vpop.eup %1394 }
0x1781   :  { %v814_v54 = vadd.f32 1.0, %v1395_v53 }
0x1783   :  { %1396 = vrcp.f32 %v814_v54  ;;  %v826_v60 = vand.u32 2147483648, %v814_v54  ;;  %vm820_vm11 = vweird.f32 %v814_v54  ;;  %v824_v61 = vand.u32 2147483647, %v814_v54 }
0x1785   :  { %v827_v63 = vor.u32 1.1754944e-38, %v826_v60  ;;  %vm825_vm13 = vcmp.eq.f32.partialorder %v824_v61, 8.507059e+37 }
0x1789   :  { %v1397_v55 = vpop.eup %1396 }
0x178a   :  { %v816_v56 = vmul.f32 %v1397_v55, %v814_v54  ;;  %vm821_vm10 = vweird.f32 %v1397_v55 }
0x178b   :  { %vm822_vm12 = vmor %vm820_vm11, %vm821_vm10 }
0x178c   :  { %v817_v57 = vsub.f32 1.0, %v816_v56 }
0x178e   :  { %v818_v58 = vmul.f32 %v1397_v55, %v817_v57  ;;  %v1307_v57 = vld [vmem:[%s1809_s0 + $0x30] sm:$0xf] }
0x1790   :  { %v819_v59 = vadd.f32 %v1397_v55, %v818_v58 }
0x1792   :  { %v823_v62 = vsel %vm822_vm12, %v1397_v55, %v819_v59 }
0x1793   :  { %v828_v3 = vsel %vm825_vm13, %v827_v63, %v823_v62 }
0x1794   :  { %v841_v10 = vsub.f32 1.0, %v828_v3 }
0x17d0   :  { %v832_v1 = vpop.permute.xlu2 %831 }
0x17d1   :  { %v834_v4 = vmul.f32 %v832_v1, %v828_v3 }
0x17d3   :  { %836 = vrot.lane.b32.xlu0 %v834_v4, %s1432_s20 }
0x17d8   :  { %v849_v9 = vpop.permute.xlu2 %848 }
0x17d9   :  { %v851_v12 = vmul.f32 %v849_v9, %v828_v3 }
0x1845   :  { %v837_v6 = vpop.permute.xlu0 %836 }
0x1846   :  { %v839_v7 = vadd.f32 %v1297_v50, %v837_v6 }
0x1848   :  { %1398 = vtanh.f32 %v839_v7 }
0x184e   :  { %v1399_v8 = vpop.eup %1398 }
0x184f   :  { %843 = vrot.lane.b32.xlu1 %v1399_v8, %s1433_s23 }
0x18c1   :  { %v844_v11 = vpop.permute.xlu1 %843 }
0x18c2   :  { %v846_v13 = vmul.f32 %v844_v11, %v841_v10 }
0x18c4   :  { %v852_v14 = vadd.f32 %v851_v12, %v846_v13 }
0x18c6   :  { %855 = vrot.lane.b32.xlu0 %v852_v14, %s1433_s23 }
0x1938   :  { %v856_v2 = vpop.permute.xlu0 %855 }
0x1939   :  { %v858_v15 = vsel %vm853_vm14, %v856_v2, %v788_v44  ;;  %v860_v16 = vsel %vm853_vm14, %v856_v2, 0.0 }
0x193a   :  { %859 = vst.msk [vmem:[#allocation2] sm:$0xf] %vm18_vm0, %v858_v15 }
0x193b   :  { %1301 = vst.msk [vmem:[%s1811_s4 + $0x28] sm:$0xf] %vm18_vm0, %v860_v16 }
0x1941   :  { %v863_v17 = vld [vmem:[#allocation2] sm:$0xf] }
0x1942   :  { %v868_v18 = vpack.c.bf16 %v863_v17, %v863_v17 }
0x1944   :  { %1304 = vmatmul.msk.bf16.vlgmr.msra.gmra.mxu3 %vm44_vm1, %v868_v18 }
0x19c7   :  { %v881_v19 = vpop.f32.mrf.mxu3 }
0x19c8   :  { %v882_v20 = vadd.f32 %v1698_v47, %v881_v19 }
0x19ca   :  { %906 = vrot.lane.b32.xlu1 %v882_v20, %s1432_s20  ;;  %v885_v23 = vadd.f32 %v1302_v22, %v882_v20  ;;  %v1308_v20 = vld [vmem:[%s1810_s1 + $0x30] sm:$0xf] }
0x19cb   :  { %vm1003_vm10 = vcmp.gt.f32.partialorder %v1308_v20, 0.0 }
0x19cc   :  { %v1305_v5 = vmul.f32 -1.442695, %v885_v23 }
0x19ce   :  { %1400 = vpow2.f32 %v1305_v5 }
0x19cf   :  { %v883_v21 = vpop.f32.mrf.mxu3 }
0x19d2   :  { %923 = vrot.lane.b32.xlu1 %v863_v17, %s1434_s24 }
0x19d4   :  { %v1401_v24 = vpop.eup %1400 }
0x19d5   :  { %v889_v25 = vadd.f32 1.0, %v1401_v24 }
0x19d7   :  { %1402 = vrcp.f32 %v889_v25  ;;  %v901_v31 = vand.u32 2147483648, %v889_v25  ;;  %vm895_vm2 = vweird.f32 %v889_v25  ;;  %v899_v32 = vand.u32 2147483647, %v889_v25 }
0x19d9   :  { %v902_v34 = vor.u32 1.1754944e-38, %v901_v31  ;;  %vm900_vm4 = vcmp.eq.f32.partialorder %v899_v32, 8.507059e+37 }
0x19dd   :  { %v1403_v26 = vpop.eup %1402 }
0x19de   :  { %v891_v27 = vmul.f32 %v1403_v26, %v889_v25  ;;  %vm896_vm15 = vweird.f32 %v1403_v26 }
0x19df   :  { %vm897_vm3 = vmor %vm895_vm2, %vm896_vm15 }
0x19e0   :  { %v892_v28 = vsub.f32 1.0, %v891_v27 }
0x19e2   :  { %v893_v29 = vmul.f32 %v1403_v26, %v892_v28  ;;  %v1312_v28 = vld [vmem:[%s1809_s0 + $0x34] sm:$0xf] }
0x19e4   :  { %v894_v30 = vadd.f32 %v1403_v26, %v893_v29 }
0x19e6   :  { %v898_v33 = vsel %vm897_vm3, %v1403_v26, %v894_v30 }
0x19e7   :  { %v903_v36 = vsel %vm900_vm4, %v902_v34, %v898_v33 }
0x19e8   :  { %v916_v42 = vsub.f32 1.0, %v903_v36 }
0x1a3c   :  { %v907_v35 = vpop.permute.xlu1 %906 }
0x1a3d   :  { %v909_v37 = vmul.f32 %v907_v35, %v903_v36 }
0x1a3f   :  { %911 = vrot.lane.b32.xlu2 %v909_v37, %s1432_s20 }
0x1a44   :  { %v924_v41 = vpop.permute.xlu1 %923 }
0x1a45   :  { %v926_v44 = vmul.f32 %v924_v41, %v903_v36 }
0x1a99   :  { %v912_v38 = vpop.permute.xlu2 %911 }
0x1a9a   :  { %v914_v39 = vadd.f32 %v1302_v22, %v912_v38 }
0x1a9c   :  { %1404 = vtanh.f32 %v914_v39 }
0x1aa2   :  { %v1405_v40 = vpop.eup %1404 }
0x1aa3   :  { %918 = vrot.lane.b32.xlu0 %v1405_v40, %s1433_s23 }
0x1b15   :  { %v919_v43 = vpop.permute.xlu0 %918 }
0x1b16   :  { %v921_v45 = vmul.f32 %v919_v43, %v916_v42 }
0x1b18   :  { %v927_v46 = vadd.f32 %v926_v44, %v921_v45 }
0x1b1a   :  { %930 = vrot.lane.b32.xlu2 %v927_v46, %s1433_s23 }
0x1b74   :  { %v931_v49 = vpop.permute.xlu2 %930 }
0x1b75   :  { %v933_v50 = vsel %vm928_vm5, %v931_v49, %v863_v17  ;;  %v935_v51 = vsel %vm928_vm5, %v931_v49, 0.0 }
0x1b76   :  { %1306 = vst.msk [vmem:[%s1811_s4 + $0x2c] sm:$0xf] %vm18_vm0, %v935_v51 }
0x1b77   :  { %934 = vst.msk [vmem:[#allocation2] sm:$0xf] %vm18_vm0, %v933_v50 }
0x1b7e   :  { %v938_v52 = vld [vmem:[#allocation2] sm:$0xf] }
0x1b7f   :  { %v943_v53 = vpack.c.bf16 %v938_v52, %v938_v52 }
0x1b81   :  { %1309 = vmatmul.msk.bf16.vlgmr.msrb.gmra.mxu0 %vm44_vm1, %v943_v53 }
0x1bfe   :  { %v956_v54 = vpop.f32.mrf.mxu0 }
0x1bff   :  { %v957_v55 = vadd.f32 %v1698_v47, %v956_v54 }
0x1c01   :  { %981 = vrot.lane.b32.xlu0 %v957_v55, %s1432_s20  ;;  %v960_v58 = vadd.f32 %v1307_v57, %v957_v55  ;;  %v1313_v55 = vld [vmem:[%s1810_s1 + $0x34] sm:$0xf] }
0x1c02   :  { %vm1078_vm15 = vcmp.gt.f32.partialorder %v1313_v55, 0.0 }
0x1c03   :  { %v1310_v59 = vmul.f32 -1.442695, %v960_v58 }
0x1c05   :  { %1406 = vpow2.f32 %v1310_v59 }
0x1c06   :  { %v958_v56 = vpop.f32.mrf.mxu0 }
0x1c09   :  { %998 = vrot.lane.b32.xlu0 %v938_v52, %s1434_s24 }
0x1c0b   :  { %v1407_v60 = vpop.eup %1406 }
0x1c0c   :  { %v964_v61 = vadd.f32 1.0, %v1407_v60 }
0x1c0e   :  { %1408 = vrcp.f32 %v964_v61  ;;  %v976_v6 = vand.u32 2147483648, %v964_v61  ;;  %vm970_vm7 = vweird.f32 %v964_v61  ;;  %v974_v7 = vand.u32 2147483647, %v964_v61 }
0x1c10   :  { %v977_v9 = vor.u32 1.1754944e-38, %v976_v6  ;;  %vm975_vm9 = vcmp.eq.f32.partialorder %v974_v7, 8.507059e+37 }
0x1c14   :  { %v1409_v62 = vpop.eup %1408 }
0x1c15   :  { %v966_v63 = vmul.f32 %v1409_v62, %v964_v61  ;;  %vm971_vm6 = vweird.f32 %v1409_v62 }
0x1c16   :  { %vm972_vm8 = vmor %vm970_vm7, %vm971_vm6 }
0x1c17   :  { %v967_v1 = vsub.f32 1.0, %v966_v63 }
0x1c19   :  { %v968_v3 = vmul.f32 %v1409_v62, %v967_v1  ;;  %v1317_v1 = vld [vmem:[%s1809_s0 + $0x38] sm:$0xf] }
0x1c1b   :  { %v969_v4 = vadd.f32 %v1409_v62, %v968_v3 }
0x1c1d   :  { %v973_v8 = vsel %vm972_vm8, %v1409_v62, %v969_v4 }
0x1c1e   :  { %v978_v11 = vsel %vm975_vm9, %v977_v9, %v973_v8 }
0x1c1f   :  { %v991_v15 = vsub.f32 1.0, %v978_v11 }
0x1c73   :  { %v982_v10 = vpop.permute.xlu0 %981 }
0x1c74   :  { %v984_v12 = vmul.f32 %v982_v10, %v978_v11 }
0x1c76   :  { %986 = vrot.lane.b32.xlu1 %v984_v12, %s1432_s20 }
0x1c7b   :  { %v999_v2 = vpop.permute.xlu0 %998 }
0x1c7c   :  { %v1001_v17 = vmul.f32 %v999_v2, %v978_v11 }
0x1ce8   :  { %v987_v13 = vpop.permute.xlu1 %986 }
0x1ce9   :  { %v989_v14 = vadd.f32 %v1307_v57, %v987_v13 }
0x1ceb   :  { %1410 = vtanh.f32 %v989_v14 }
0x1cf1   :  { %v1411_v0 = vpop.eup %1410 }
0x1cf2   :  { %993 = vrot.lane.b32.xlu2 %v1411_v0, %s1433_s23 }
0x1d4c   :  { %v994_v16 = vpop.permute.xlu2 %993 }
0x1d4d   :  { %v996_v18 = vmul.f32 %v994_v16, %v991_v15 }
0x1d4f   :  { %v1002_v19 = vadd.f32 %v1001_v17, %v996_v18 }
0x1d51   :  { %1005 = vrot.lane.b32.xlu1 %v1002_v19, %s1433_s23 }
0x1dc3   :  { %v1006_v21 = vpop.permute.xlu1 %1005 }
0x1dc4   :  { %v1008_v22 = vsel %vm1003_vm10, %v1006_v21, %v938_v52  ;;  %v1010_v23 = vsel %vm1003_vm10, %v1006_v21, 0.0 }
0x1dc5   :  { %1311 = vst.msk [vmem:[%s1811_s4 + $0x30] sm:$0xf] %vm18_vm0, %v1010_v23 }
0x1dc6   :  { %1009 = vst.msk [vmem:[#allocation2] sm:$0xf] %vm18_vm0, %v1008_v22 }
0x1dcd   :  { %v1013_v5 = vld [vmem:[#allocation2] sm:$0xf] }
0x1dce   :  { %v1018_v24 = vpack.c.bf16 %v1013_v5, %v1013_v5 }
0x1dd0   :  { %1314 = vmatmul.msk.bf16.vlgmr.msrb.gmra.mxu1 %vm44_vm1, %v1018_v24 }
0x1e4d   :  { %v1031_v25 = vpop.f32.mrf.mxu1 }
0x1e4e   :  { %v1032_v26 = vadd.f32 %v1698_v47, %v1031_v25 }
0x1e50   :  { %1056 = vrot.lane.b32.xlu2 %v1032_v26, %s1432_s20  ;;  %v1035_v29 = vadd.f32 %v1312_v28, %v1032_v26  ;;  %v1318_v26 = vld [vmem:[%s1810_s1 + $0x38] sm:$0xf] }
0x1e51   :  { %vm1153_vm6 = vcmp.gt.f32.partialorder %v1318_v26, 0.0 }
0x1e52   :  { %v1315_v30 = vmul.f32 -1.442695, %v1035_v29 }
0x1e54   :  { %1412 = vpow2.f32 %v1315_v30 }
0x1e55   :  { %v1033_v27 = vpop.f32.mrf.mxu1 }
0x1e58   :  { %1073 = vrot.lane.b32.xlu2 %v1013_v5, %s1434_s24 }
0x1e5a   :  { %v1413_v31 = vpop.eup %1412 }
0x1e5b   :  { %v1039_v32 = vadd.f32 1.0, %v1413_v31 }
0x1e5d   :  { %1414 = vrcp.f32 %v1039_v32  ;;  %v1051_v38 = vand.u32 2147483648, %v1039_v32  ;;  %vm1045_vm12 = vweird.f32 %v1039_v32  ;;  %v1049_v39 = vand.u32 2147483647, %v1039_v32 }
0x1e5f   :  { %v1052_v41 = vor.u32 1.1754944e-38, %v1051_v38  ;;  %vm1050_vm14 = vcmp.eq.f32.partialorder %v1049_v39, 8.507059e+37 }
0x1e63   :  { %v1415_v33 = vpop.eup %1414 }
0x1e64   :  { %v1041_v34 = vmul.f32 %v1415_v33, %v1039_v32  ;;  %vm1046_vm11 = vweird.f32 %v1415_v33 }
0x1e65   :  { %vm1047_vm13 = vmor %vm1045_vm12, %vm1046_vm11 }
0x1e66   :  { %v1042_v35 = vsub.f32 1.0, %v1041_v34 }
0x1e68   :  { %v1043_v36 = vmul.f32 %v1415_v33, %v1042_v35  ;;  %v1322_v35 = vld [vmem:[%s1809_s0 + $0x3c] sm:$0xf] }
0x1e6a   :  { %v1044_v37 = vadd.f32 %v1415_v33, %v1043_v36 }
0x1e6c   :  { %v1048_v40 = vsel %vm1047_vm13, %v1415_v33, %v1044_v37 }
0x1e6d   :  { %v1053_v43 = vsel %vm1050_vm14, %v1052_v41, %v1048_v40 }
0x1e6e   :  { %v1066_v50 = vsub.f32 1.0, %v1053_v43 }
0x1eaa   :  { %v1057_v42 = vpop.permute.xlu2 %1056 }
0x1eab   :  { %v1059_v44 = vmul.f32 %v1057_v42, %v1053_v43 }
0x1ead   :  { %1061 = vrot.lane.b32.xlu0 %v1059_v44, %s1432_s20 }
0x1eb2   :  { %v1074_v49 = vpop.permute.xlu2 %1073 }
0x1eb3   :  { %v1076_v52 = vmul.f32 %v1074_v49, %v1053_v43 }
0x1f1f   :  { %v1062_v45 = vpop.permute.xlu0 %1061 }
0x1f20   :  { %v1064_v46 = vadd.f32 %v1312_v28, %v1062_v45 }
0x1f22   :  { %1416 = vtanh.f32 %v1064_v46 }
0x1f28   :  { %v1417_v48 = vpop.eup %1416 }
0x1f29   :  { %1068 = vrot.lane.b32.xlu1 %v1417_v48, %s1433_s23 }
0x1f9b   :  { %v1069_v51 = vpop.permute.xlu1 %1068 }
0x1f9c   :  { %v1071_v53 = vmul.f32 %v1069_v51, %v1066_v50 }
0x1f9e   :  { %v1077_v54 = vadd.f32 %v1076_v52, %v1071_v53 }
0x1fa0   :  { %1080 = vrot.lane.b32.xlu0 %v1077_v54, %s1433_s23 }
0x2012   :  { %v1081_v56 = vpop.permute.xlu0 %1080 }
0x2013   :  { %v1083_v57 = vsel %vm1078_vm15, %v1081_v56, %v1013_v5  ;;  %v1085_v58 = vsel %vm1078_vm15, %v1081_v56, 0.0 }
0x2014   :  { %1316 = vst.msk [vmem:[%s1811_s4 + $0x34] sm:$0xf] %vm18_vm0, %v1085_v58 }
0x2015   :  { %1084 = vst.msk [vmem:[#allocation2] sm:$0xf] %vm18_vm0, %v1083_v57 }
0x201c   :  { %v1088_v59 = vld [vmem:[#allocation2] sm:$0xf] }
0x201d   :  { %v1093_v60 = vpack.c.bf16 %v1088_v59, %v1088_v59 }
0x201f   :  { %1319 = vmatmul.msk.bf16.vlgmr.msrb.gmra.mxu2 %vm44_vm1, %v1093_v60 }
0x20a2   :  { %v1106_v61 = vpop.f32.mrf.mxu2 }
0x20a3   :  { %v1107_v62 = vadd.f32 %v1698_v47, %v1106_v61  ;;  %v1323_v61 = vld [vmem:[%s1810_s1 + $0x3c] sm:$0xf] }
0x20a4   :  { %vm1228_vm10 = vcmp.gt.f32.partialorder %v1323_v61, 0.0 }
0x20a5   :  { %1131 = vrot.lane.b32.xlu1 %v1107_v62, %s1432_s20  ;;  %v1110_v3 = vadd.f32 %v1317_v1, %v1107_v62 }
0x20a7   :  { %v1320_v4 = vmul.f32 -1.442695, %v1110_v3 }
0x20a9   :  { %1418 = vpow2.f32 %v1320_v4 }
0x20aa   :  { %v1108_v63 = vpop.f32.mrf.mxu2 }
0x20ad   :  { %1148 = vrot.lane.b32.xlu1 %v1088_v59, %s1434_s24 }
0x20af   :  { %v1419_v6 = vpop.eup %1418 }
0x20b0   :  { %v1114_v7 = vadd.f32 1.0, %v1419_v6 }
0x20b2   :  { %1420 = vrcp.f32 %v1114_v7  ;;  %v1126_v13 = vand.u32 2147483648, %v1114_v7  ;;  %vm1120_vm3 = vweird.f32 %v1114_v7  ;;  %v1124_v14 = vand.u32 2147483647, %v1114_v7 }
0x20b4   :  { %v1127_v2 = vor.u32 1.1754944e-38, %v1126_v13  ;;  %vm1125_vm5 = vcmp.eq.f32.partialorder %v1124_v14, 8.507059e+37 }
0x20b8   :  { %v1421_v8 = vpop.eup %1420 }
0x20b9   :  { %v1116_v9 = vmul.f32 %v1421_v8, %v1114_v7  ;;  %vm1121_vm2 = vweird.f32 %v1421_v8 }
0x20ba   :  { %vm1122_vm4 = vmor %vm1120_vm3, %vm1121_vm2 }
0x20bb   :  { %v1117_v10 = vsub.f32 1.0, %v1116_v9 }
0x20bd   :  { %v1118_v11 = vmul.f32 %v1421_v8, %v1117_v10 }
0x20bf   :  { %v1119_v12 = vadd.f32 %v1421_v8, %v1118_v11 }
0x20c1   :  { %v1123_v0 = vsel %vm1122_vm4, %v1421_v8, %v1119_v12 }
0x20c2   :  { %v1128_v16 = vsel %vm1125_vm5, %v1127_v2, %v1123_v0 }
0x20c3   :  { %v1141_v22 = vsub.f32 1.0, %v1128_v16 }
0x2117   :  { %v1132_v15 = vpop.permute.xlu1 %1131 }
0x2118   :  { %v1134_v17 = vmul.f32 %v1132_v15, %v1128_v16 }
0x211a   :  { %1136 = vrot.lane.b32.xlu2 %v1134_v17, %s1432_s20 }
0x211f   :  { %v1149_v21 = vpop.permute.xlu1 %1148 }
0x2120   :  { %v1151_v5 = vmul.f32 %v1149_v21, %v1128_v16 }
0x2174   :  { %v1137_v18 = vpop.permute.xlu2 %1136 }
0x2175   :  { %v1139_v19 = vadd.f32 %v1317_v1, %v1137_v18 }
0x2177   :  { %1422 = vtanh.f32 %v1139_v19 }
0x217d   :  { %v1423_v20 = vpop.eup %1422 }
0x217e   :  { %1143 = vrot.lane.b32.xlu0 %v1423_v20, %s1433_s23 }
0x21f0   :  { %v1144_v23 = vpop.permute.xlu0 %1143 }
0x21f1   :  { %v1146_v24 = vmul.f32 %v1144_v23, %v1141_v22 }
0x21f3   :  { %v1152_v25 = vadd.f32 %v1151_v5, %v1146_v24 }
0x21f5   :  { %1155 = vrot.lane.b32.xlu2 %v1152_v25, %s1433_s23 }
0x224f   :  { %v1156_v27 = vpop.permute.xlu2 %1155 }
0x2250   :  { %v1158_v28 = vsel %vm1153_vm6, %v1156_v27, %v1088_v59  ;;  %v1160_v29 = vsel %vm1153_vm6, %v1156_v27, 0.0 }
0x2251   :  { %1321 = vst.msk [vmem:[%s1811_s4 + $0x38] sm:$0xf] %vm18_vm0, %v1160_v29 }
0x2252   :  { %1159 = vst.msk [vmem:[#allocation2] sm:$0xf] %vm18_vm0, %v1158_v28 }
0x2259   :  { %v1163_v30 = vld [vmem:[#allocation2] sm:$0xf] }
0x225a   :  { %v1168_v31 = vpack.c.bf16 %v1163_v30, %v1163_v30 }
0x225c   :  { %1324 = vmatmul.msk.bf16.vlgmr.msrb.gmra.mxu3 %vm44_vm1, %v1168_v31 }
0x22df   :  { %v1181_v32 = vpop.f32.mrf.mxu3 }
0x22e0   :  { %v1182_v33 = vadd.f32 %v1698_v47, %v1181_v32 }
0x22e2   :  { %1206 = vrot.lane.b32.xlu0 %v1182_v33, %s1432_s20  ;;  %v1185_v36 = vadd.f32 %v1322_v35, %v1182_v33 }
0x22e4   :  { %v1325_v37 = vmul.f32 -1.442695, %v1185_v36 }
0x22e6   :  { %1424 = vpow2.f32 %v1325_v37 }
0x22e7   :  { %v1183_v34 = vpop.f32.mrf.mxu3 }
0x22ea   :  { %1223 = vrot.lane.b32.xlu0 %v1163_v30, %s1434_s24 }
0x22ec   :  { %v1425_v38 = vpop.eup %1424 }
0x22ed   :  { %v1189_v39 = vadd.f32 1.0, %v1425_v38 }
0x22ef   :  { %1426 = vrcp.f32 %v1189_v39  ;;  %v1201_v44 = vand.u32 2147483648, %v1189_v39  ;;  %vm1195_vm7 = vweird.f32 %v1189_v39  ;;  %v1199_v45 = vand.u32 2147483647, %v1189_v39 }
0x22f1   :  { %v1202_v48 = vor.u32 1.1754944e-38, %v1201_v44  ;;  %vm1200_vm9 = vcmp.eq.f32.partialorder %v1199_v45, 8.507059e+37 }
0x22f5   :  { %v1427_v40 = vpop.eup %1426 }
0x22f6   :  { %v1191_v41 = vmul.f32 %v1427_v40, %v1189_v39  ;;  %vm1196_vm1 = vweird.f32 %v1427_v40 }
0x22f7   :  { %vm1197_vm8 = vmor %vm1195_vm7, %vm1196_vm1 }
0x22f8   :  { %v1192_v42 = vsub.f32 1.0, %v1191_v41 }
0x22fa   :  { %v1193_v43 = vmul.f32 %v1427_v40, %v1192_v42 }
0x22fc   :  { %v1194_v47 = vadd.f32 %v1427_v40, %v1193_v43 }
0x22fe   :  { %v1198_v46 = vsel %vm1197_vm8, %v1427_v40, %v1194_v47 }
0x22ff   :  { %v1203_v50 = vsel %vm1200_vm9, %v1202_v48, %v1198_v46 }
0x2300   :  { %v1216_v56 = vsub.f32 1.0, %v1203_v50 }
0x2354   :  { %v1207_v49 = vpop.permute.xlu0 %1206 }
0x2355   :  { %v1209_v51 = vmul.f32 %v1207_v49, %v1203_v50 }
0x2357   :  { %1211 = vrot.lane.b32.xlu1 %v1209_v51, %s1432_s20 }
0x235c   :  { %v1224_v55 = vpop.permute.xlu0 %1223 }
0x235d   :  { %v1226_v58 = vmul.f32 %v1224_v55, %v1203_v50 }
0x23c9   :  { %v1212_v52 = vpop.permute.xlu1 %1211 }
0x23ca   :  { %v1214_v53 = vadd.f32 %v1322_v35, %v1212_v52 }
0x23cc   :  { %1428 = vtanh.f32 %v1214_v53 }
0x23d2   :  { %v1429_v54 = vpop.eup %1428 }
0x23d3   :  { %1218 = vrot.lane.b32.xlu2 %v1429_v54, %s1433_s23 }
0x242d   :  { %v1219_v57 = vpop.permute.xlu2 %1218 }
0x242e   :  { %v1221_v59 = vmul.f32 %v1219_v57, %v1216_v56 }
0x2430   :  { %v1227_v60 = vadd.f32 %v1226_v58, %v1221_v59 }
0x2432   :  { %1230 = vrot.lane.b32.xlu1 %v1227_v60, %s1433_s23 }
0x24a4   :  { %v1231_v62 = vpop.permute.xlu1 %1230 }
0x24a5   :  { %v1233_v63 = vsel %vm1228_vm10, %v1231_v62, %v1163_v30  ;;  %v1235_v1 = vsel %vm1228_vm10, %v1231_v62, 0.0 }
0x24a6   :  { %1234 = vst.msk [vmem:[#allocation2] sm:$0xf] %vm18_vm0, %v1233_v63 }
0x24a7   :  { %1326 = vst.msk [vmem:[%s1811_s4 + $0x3c] sm:$0xf] %vm18_vm0, %v1235_v1 }

// kernel: play_reader_forward.18
= control target key start
LH: loop header
LB: loop body
LE: loop exit
PB: predicated region body
PF: predicated region fallthrough
CT: control target
= control target key end

     0   :  { %vm41_vm0 = vcmask 261120   ;;  %vm67_vm1 = vcmask 785408   ;;  %s144_s1 = inlined_call_operand.vmem [shape: bf16[32,96], index: 1, kind: input, shape index: {}]   ;;  %s145_s0 = inlined_call_operand.vmem [shape: f32[32,32], index: 0, kind: input, shape index: {}]   ;;  %s146_s2 = inlined_call_operand.vmem [shape: f32[1,96], index: 2, kind: input, shape index: {}]   ;;  %s147_s3 = inlined_call_operand.vmem [shape: f32[32,96], index: 3, kind: output, shape index: {}]  }
   0x1   :  { %v87_v0 = vld [vmem:[%s144_s1 + $0x8] sm:$0xff]  ;;  %v86_v1 = vld [vmem:[%s144_s1] sm:$0xff]  ;;  %v17_v4 = vld [vmem:[%s145_s0 + $0x10] sm:$0xff] }
   0x2   :  { %v15_v2 = vld [vmem:[%s145_s0] sm:$0xff]  ;;  %v16_v3 = vld [vmem:[%s145_s0 + $0x8] sm:$0xff]  ;;  %54 = vmatpush.bf16.msra.mxu0 %v87_v0  ;;  %88 = vmatpush.bf16.msra.mxu1 %v87_v0  ;;  %v18_v5 = vld [vmem:[%s145_s0 + $0x18] sm:$0xff] }
   0x3   :  { %v19_v6 = vpack.c.bf16 %v16_v3, %v15_v2  ;;  %v20_v7 = vpack.c.bf16 %v18_v5, %v17_v4  ;;  %v90_v8 = vld [vmem:[%s146_s2] ss:$0 sm:$0xff] }
   0x6   :  { %55 = vmatpush.bf16.msra.mxu0 %v86_v1  ;;  %89 = vmatpush.bf16.msra.mxu1 %v86_v1 }
   0x9   :  { %84 = vmatmul.msk.bf16.vlgmr.msra.gmra.mxu0 %vm41_vm0, %v19_v6  ;;  %85 = vmatmul.msk.bf16.vlgmr.msra.gmra.mxu1 %vm41_vm0, %v20_v7 }
  0x86   :  { %v57_v9 = vpop.f32.mrf.mxu0  ;;  %v62_v10 = vpop.f32.mrf.mxu1 }
  0x87   :  { %v58_v11 = vadd.f32 %v90_v8, %v57_v9  ;;  %v63_v12 = vadd.f32 %v90_v8, %v62_v10 }
  0x89   :  { %68 = vst.msk [vmem:[%s147_s3] sm:$0xff] %vm67_vm1, %v58_v11 }
  0x8a   :  { %70 = vst.msk [vmem:[%s147_s3 + $0x10] sm:$0xff] %vm67_vm1, %v63_v12 }
  0x8e   :  { %v59_v13 = vpop.f32.mrf.mxu0  ;;  %v64_v14 = vpop.f32.mrf.mxu1 }
  0x8f   :  { %v60_v15 = vadd.f32 %v90_v8, %v59_v13  ;;  %v65_v16 = vadd.f32 %v90_v8, %v64_v14 }
  0x91   :  { %69 = vst.msk [vmem:[%s147_s3 + $0x8] sm:$0xff] %vm67_vm1, %v60_v15 }
  0x92   :  { %71 = vst.msk [vmem:[%s147_s3 + $0x18] sm:$0xff] %vm67_vm1, %v65_v16 }

// kernel: play_reader_forward.26
= control target key start
LH: loop header
LB: loop body
LE: loop exit
PB: predicated region body
PF: predicated region fallthrough
CT: control target
= control target key end

     0   :  { %s629_s21 = smov 32   ;;  %vm79_vm0 = vcmask 261120   ;;  %vm84_vm1 = vcmask 523264   ;;  %vm155_vm2 = vcmask 785408   ;;  %vm193_vm3 = vcmask 130048   ;;  %s842_s1 = inlined_call_operand.vmem [shape: f32[2,1,32], index: 1, kind: input, shape index: {}]   ;;  %s843_s0 = inlined_call_operand.vmem [shape: f32[2,16,32], index: 0, kind: input, shape index: {}]   ;;  %s844_s3 = inlined_call_operand.vmem [shape: bf16[96,16], index: 3, kind: input, shape index: {}]   ;;  %s845_s4 = inlined_call_operand.vmem [shape: f32[1,1,16], index: 4, kind: input, shape index: {}]   ;;  %s846_s5 = inlined_call_operand.vmem [shape: f32[1,1,16], index: 5, kind: input, shape index: {}]   ;;  %s847_s6 = inlined_call_operand.<no memory space> [shape: f32[1,1,1], index: 6, kind: input, shape index: {}]   ;;  %s848_s2 = inlined_call_operand.vmem [shape: f32[2,16,1], index: 2, kind: input, shape index: {}]   ;;  %s849_s9 = inlined_call_operand.vmem [shape: f32[2,16,1], index: 9, kind: output, shape index: {0}]   ;;  %s850_s7 = inlined_call_operand.vmem [shape: bf16[64,64], index: 7, kind: input, shape index: {}]   ;;  %s851_s8 = inlined_call_operand.vmem [shape: f32[1,1,64], index: 8, kind: input, shape index: {}]   ;;  %s852_s10 = inlined_call_operand.vmem [shape: f32[2,1,32], index: 10, kind: output, shape index: {1}]  }
   0x1   :  { %v600_v0 = vld [vmem:[%s842_s1 + $0x1] ss:$0 sm:$0xff]  ;;  %v601_v1 = vld [vmem:[%s842_s1] ss:$0 sm:$0xff]  ;;  %v697_v2 = vld [vmem:[%s843_s0 + $0x10] sm:$0xff]  ;;  %v16_v44 = vstv %s847_s6  ;;  %vm222_vm6 = vcmask 7168  }
   0x2   :  { %v702_v3 = vld [vmem:[%s843_s0 + $0x18] sm:$0xff]  ;;  %59 = vrot.lane.b32.xlu0 %v600_v0, %s629_s21  ;;  %v55_v4 = vmul.f32 %v600_v0, %v697_v2  ;;  %v710_v6 = vld [vmem:[%s843_s0] sm:$0xff]  ;;  %v715_v7 = vld [vmem:[%s843_s0 + $0x8] sm:$0xff]  ;;  %s630_s0 = smov 64   ;;  %17 = vst [vmem:[#allocation2] sm:$0x1] %v16_v44 }
   0x3   :  { %v56_v5 = vmul.f32 %v600_v0, %v702_v3  ;;  %v568_v8 = vld [vmem:[%s844_s3 + $0x28] sm:$0xff]  ;;  %57 = vrot.lane.b32.xlu1 %v601_v1, %s629_s21  ;;  %v53_v9 = vmul.f32 %v601_v1, %v710_v6  ;;  %v54_v10 = vmul.f32 %v601_v1, %v715_v7  ;;  %v567_v11 = vld [vmem:[%s844_s3 + $0x20] sm:$0xff]  ;;  %v566_v14 = vld [vmem:[%s844_s3 + $0x18] sm:$0xff] }
   0x4   :  { %164 = vmatpush.bf16.msra.mxu0 %v568_v8  ;;  %573 = vmatpush.bf16.msra.mxu2 %v568_v8  ;;  %v565_v15 = vld [vmem:[%s844_s3 + $0x10] sm:$0xff]  ;;  %v564_v16 = vld [vmem:[%s844_s3 + $0x8] sm:$0xff]  ;;  %v563_v17 = vld [vmem:[%s844_s3] sm:$0xff] }
   0x5   :  { %v583_v12 = vpack.i.bf16 %v56_v5, %v55_v4  ;;  %v588_v13 = vpack.i.bf16 %v54_v10, %v53_v9  ;;  %v602_v45 = vld [vmem:[%s845_s4] ss:$0 sm:$0xff] }
   0x6   :  { %v603_v48 = vld [vmem:[%s846_s5] ss:$0 sm:$0xff] }
   0x7   :  { %v43_v9 = vld [vmem:[%s848_s2] sm:$0xff] }
   0x8   :  { %165 = vmatpush.bf16.msra.mxu0 %v567_v11  ;;  %574 = vmatpush.bf16.msra.mxu2 %v567_v11  ;;  %vm214_vm4 = vcmp.gt.f32.partialorder %v43_v9, 0.0 }
   0x9   :  { %v604_v5 = vld [vmem:[#allocation2] ss:$0 sm:$0xff] }
   0xa   :  { %584 = vrot.lane.b32.xlu0 %v583_v12, %s630_s0  ;;  %v44_v12 = vld [vmem:[%s848_s2 + $0x8] sm:$0xff] }
   0xb   :  { %589 = vrot.lane.b32.xlu1 %v588_v13, %s630_s0  ;;  %v45_v13 = vld [vmem:[%s848_s2 + $0x10] sm:$0xff]  ;;  %vm215_vm5 = vcmp.gt.f32.partialorder %v44_v12, 0.0 }
   0xc   :  { %166 = vmatpush.bf16.msra.mxu0 %v566_v14  ;;  %575 = vmatpush.bf16.msra.mxu2 %v566_v14  ;;  %vm216_vm7 = vcmp.gt.f32.partialorder %v45_v13, 0.0 }
  0x10   :  { %167 = vmatpush.bf16.msra.mxu0 %v565_v15  ;;  %576 = vmatpush.bf16.msra.mxu2 %v565_v15 }
  0x14   :  { %168 = vmatpush.bf16.msra.mxu0 %v564_v16  ;;  %577 = vmatpush.bf16.msra.mxu2 %v564_v16 }
  0x18   :  { %169 = vmatpush.bf16.msra.mxu0 %v563_v17  ;;  %578 = vmatpush.bf16.msra.mxu2 %v563_v17 }
  0x74   :  { %v60_v18 = vpop.permute.xlu0 %59 }
  0x75   :  { %v58_v19 = vpop.permute.xlu1 %57  ;;  %v82_v24 = vsel %vm79_vm0, %v697_v2, %v60_v18  ;;  %v83_v25 = vsel %vm79_vm0, %v702_v3, %v60_v18  ;;  %v46_v18 = vld [vmem:[%s848_s2 + $0x18] sm:$0xff] }
  0x76   :  { %v80_v28 = vsel %vm79_vm0, %v710_v6, %v58_v19  ;;  %v81_v29 = vsel %vm79_vm0, %v715_v7, %v58_v19  ;;  %vm217_vm8 = vcmp.gt.f32.partialorder %v46_v18, 0.0 }
  0x7c   :  { %v585_v20 = vpop.permute.xlu0 %584 }
  0x7d   :  { %v587_v21 = vunpack.i.h.bf16 %v585_v20  ;;  %v586_v22 = vunpack.i.l.bf16 %v585_v20  ;;  %v590_v23 = vpop.permute.xlu1 %589 }
  0x7e   :  { %v592_v26 = vunpack.i.h.bf16 %v590_v23  ;;  %v591_v27 = vunpack.i.l.bf16 %v590_v23 }
  0x7f   :  { %v88_v30 = vsel %vm84_vm1, %v83_v25, %v587_v21  ;;  %v87_v31 = vsel %vm84_vm1, %v82_v24, %v586_v22 }
  0x80   :  { %v86_v32 = vsel %vm84_vm1, %v81_v29, %v592_v26  ;;  %v85_v33 = vsel %vm84_vm1, %v80_v28, %v591_v27  ;;  %v91_v34 = vpack.c.bf16 %v87_v31, %v87_v31  ;;  %v92_v35 = vpack.c.bf16 %v88_v30, %v88_v30 }
  0x81   :  { %v89_v36 = vpack.c.bf16 %v85_v33, %v85_v33  ;;  %v90_v37 = vpack.c.bf16 %v86_v32, %v86_v32 }
  0x82   :  { %v115_v38 = vunpack.c.l.b16 %v91_v34  ;;  %v116_v39 = vunpack.c.l.b16 %v92_v35 }
  0x83   :  { %v113_v40 = vunpack.c.l.b16 %v89_v36  ;;  %v114_v41 = vunpack.c.l.b16 %v90_v37 }
  0x84   :  { %v118_v42 = vpack.c.b16 %v116_v39, %v115_v38 }
  0x85   :  { %v117_v43 = vpack.c.b16 %v114_v41, %v113_v40 }
  0x86   :  { %541 = vmatmul.msk.bf16.vlgmr.msra.gmra.mxu2 %vm155_vm2, %v118_v42 }
  0x87   :  { %540 = vmatmul.msk.bf16.vlgmr.msra.gmra.mxu0 %vm155_vm2, %v117_v43 }
 0x104   :  { %v171_v46 = vpop.f32.mrf.mxu0 }
 0x105   :  { %v172_v47 = vadd.f32 %v602_v45, %v171_v46  ;;  %v631_v46 = vmov 0  }
 0x106   :  { %593 = vset.pattern.permute.xlu2 %v631_v46  ;;  %599 = vset.pattern.permute.xlu0 %v631_v46 }
 0x107   :  { %v181_v49 = vmax.f32 %v172_v47, 0.0 }
 0x109   :  { %v176_v50 = vpop.f32.mrf.mxu2  ;;  %v189_v51 = vmul.f32 %v603_v48, %v181_v49 }
 0x10a   :  { %v177_v52 = vadd.f32 %v602_v45, %v176_v50 }
 0x10b   :  { %v194_v53 = vsel %vm193_vm3, %v189_v51, 0.0 }
 0x10c   :  { %v183_v54 = vmax.f32 %v177_v52, 0.0  ;;  %v173_v55 = vpop.f32.mrf.mxu0  ;;  %195 = vadd.xlane.f32.xlu0 %v194_v53 }
 0x10d   :  { %v174_v56 = vadd.f32 %v602_v45, %v173_v55 }
 0x10e   :  { %v191_v57 = vmul.f32 %v603_v48, %v183_v54 }
 0x10f   :  { %v182_v58 = vmax.f32 %v174_v56, 0.0 }
 0x110   :  { %v200_v59 = vsel %vm193_vm3, %v191_v57, 0.0 }
 0x111   :  { %v178_v60 = vpop.f32.mrf.mxu2  ;;  %201 = vadd.xlane.f32.xlu2 %v200_v59  ;;  %v190_v61 = vmul.f32 %v603_v48, %v182_v58 }
 0x112   :  { %v179_v62 = vadd.f32 %v602_v45, %v178_v60 }
 0x113   :  { %v197_v63 = vsel %vm193_vm3, %v190_v61, 0.0 }
 0x114   :  { %v184_v0 = vmax.f32 %v179_v62, 0.0  ;;  %198 = vadd.xlane.f32.xlu1 %v197_v63 }
 0x116   :  { %v192_v1 = vmul.f32 %v603_v48, %v184_v0 }
 0x118   :  { %v203_v4 = vsel %vm193_vm3, %v192_v1, 0.0  ;;  %vm381_vm3 = vcmask 1041409  }
 0x119   :  { %204 = vadd.xlane.f32.xlu2 %v203_v4 }
 0x17f   :  { %v196_v8 = vpop.xlane.xlu0 %195 }
 0x180   :  { %v210_v10 = vadd.f32 %v604_v5, %v196_v8 }
 0x182   :  { %v218_v15 = vsel %vm214_vm4, -1e+30, %v210_v10 }
 0x183   :  { %v223_v20 = vsel %vm222_vm6, %v218_v15, -inf }
 0x184   :  { %v202_v11 = vpop.xlane.xlu2 %201 }
 0x185   :  { %v212_v17 = vadd.f32 %v604_v5, %v202_v11 }
 0x187   :  { %v199_v14 = vpop.xlane.xlu1 %198  ;;  %v220_v24 = vsel %vm216_vm7, -1e+30, %v212_v17 }
 0x188   :  { %v211_v16 = vadd.f32 %v604_v5, %v199_v14  ;;  %v232_v28 = vsel %vm222_vm6, %v220_v24, -inf }
 0x18a   :  { %v219_v19 = vsel %vm215_vm5, -1e+30, %v211_v16 }
 0x18b   :  { %v224_v21 = vsel %vm222_vm6, %v219_v19, -inf }
 0x18c   :  { %v225_v22 = vmax.f32 %v223_v20, %v224_v21  ;;  %v205_v23 = vpop.xlane.xlu2 %204 }
 0x18d   :  { %v213_v25 = vadd.f32 %v604_v5, %v205_v23 }
 0x18e   :  { %v226_v26 = vrot.slane %v225_v22, 4 }
 0x18f   :  { %v221_v27 = vsel %vm217_vm8, -1e+30, %v213_v25 }
 0x190   :  { %v227_v29 = vmax.f32 %v225_v22, %v226_v26  ;;  %v233_v30 = vsel %vm222_vm6, %v221_v27, -inf }
 0x191   :  { %v234_v31 = vmax.f32 %v232_v28, %v233_v30 }
 0x192   :  { %v228_v32 = vrot.slane %v227_v29, 2 }
 0x193   :  { %v235_v33 = vrot.slane %v234_v31, 4 }
 0x194   :  { %v229_v34 = vmax.f32 %v227_v29, %v228_v32 }
 0x195   :  { %v236_v35 = vmax.f32 %v234_v31, %v235_v33 }
 0x196   :  { %v230_v36 = vrot.slane %v229_v34, 1 }
 0x197   :  { %v237_v37 = vrot.slane %v236_v35, 2 }
 0x198   :  { %v231_v38 = vmax.f32 %v229_v34, %v230_v36 }
 0x199   :  { %v238_v39 = vmax.f32 %v236_v35, %v237_v37 }
 0x19a   :  { %v241_v40 = vsub.f32 %v218_v15, %v231_v38  ;;  %v242_v41 = vsub.f32 %v219_v19, %v231_v38 }
 0x19b   :  { %v239_v42 = vrot.slane %v238_v39, 1 }
 0x19c   :  { %v245_v43 = vmul.f32 1.442695, %v241_v40  ;;  %v247_v44 = vmul.f32 1.442695, %v242_v41  ;;  %v572_v41 = vld [vmem:[%s850_s7 + $0x18] sm:$0xff] }
 0x19d   :  { %v240_v45 = vmax.f32 %v238_v39, %v239_v42  ;;  %421 = vmatpush.bf16.msra.mxu1 %v572_v41 }
 0x19e   :  { %605 = vpow2.f32 %v245_v43 }
 0x19f   :  { %607 = vpow2.f32 %v247_v44  ;;  %v243_v47 = vsub.f32 %v220_v24, %v240_v45  ;;  %v244_v48 = vsub.f32 %v221_v27, %v240_v45 }
 0x1a1   :  { %v249_v49 = vmul.f32 1.442695, %v243_v47  ;;  %v251_v50 = vmul.f32 1.442695, %v244_v48 }
 0x1a3   :  { %609 = vpow2.f32 %v249_v49 }
 0x1a4   :  { %v606_v51 = vpop.eup %605  ;;  %611 = vpow2.f32 %v251_v50 }
 0x1a5   :  { %v608_v52 = vpop.eup %607  ;;  %v253_v53 = vsel %vm222_vm6, %v606_v51, 0.0 }
 0x1a6   :  { %v254_v54 = vsel %vm222_vm6, %v608_v52, 0.0 }
 0x1a7   :  { %v255_v55 = vadd.f32 %v254_v54, %v253_v53 }
 0x1a9   :  { %v610_v56 = vpop.eup %609  ;;  %v256_v57 = vrot.slane %v255_v55, 4 }
 0x1aa   :  { %v612_v58 = vpop.eup %611  ;;  %v262_v59 = vsel %vm222_vm6, %v610_v56, 0.0 }
 0x1ab   :  { %v257_v60 = vadd.f32 %v256_v57, %v255_v55  ;;  %v263_v61 = vsel %vm222_vm6, %v612_v58, 0.0 }
 0x1ac   :  { %v264_v62 = vadd.f32 %v263_v61, %v262_v59 }
 0x1ad   :  { %v258_v63 = vrot.slane %v257_v60, 2 }
 0x1ae   :  { %v265_v0 = vrot.slane %v264_v62, 4 }
 0x1af   :  { %v259_v1 = vadd.f32 %v258_v63, %v257_v60 }
 0x1b0   :  { %v266_v4 = vadd.f32 %v265_v0, %v264_v62  ;;  %v571_v0 = vld [vmem:[%s850_s7 + $0x10] sm:$0xff] }
 0x1b1   :  { %v260_v5 = vrot.slane %v259_v1, 1  ;;  %422 = vmatpush.bf16.msra.mxu1 %v571_v0 }
 0x1b2   :  { %v267_v8 = vrot.slane %v266_v4, 2 }
 0x1b3   :  { %v261_v9 = vadd.f32 %v260_v5, %v259_v1  ;;  %v570_v1 = vld [vmem:[%s850_s7 + $0x8] sm:$0xff]  ;;  %v371_v5 = vld [vmem:[%s851_s8] sm:$0x1] }
 0x1b4   :  { %v268_v10 = vadd.f32 %v267_v8, %v266_v4  ;;  %v569_v4 = vld [vmem:[%s850_s7] sm:$0xff]  ;;  %409 = vst [vmem:[#allocation1] ss:$9 sm:$0xff] %v371_v5 }
 0x1b5   :  { %v271_v11 = vmax.f32 %v261_v9, 1e-30  ;;  %423 = vmatpush.bf16.msra.mxu1 %v570_v1  ;;  %411 = vst [vmem:[#allocation1 + $0x1] ss:$9 sm:$0xff] %v371_v5  ;;  %v41_v8 = vld [vmem:[%s842_s1] sm:$0x1] }
 0x1b6   :  { %v269_v12 = vrot.slane %v268_v10, 1 }
 0x1b7   :  { %613 = vrcp.f32 %v271_v11  ;;  %v284_v18 = vand.u32 2147483648, %v271_v11  ;;  %v282_v21 = vand.u32 2147483647, %v271_v11  ;;  %vm278_vm10 = vweird.f32 %v271_v11 }
 0x1b8   :  { %v270_v13 = vadd.f32 %v269_v12, %v268_v10 }
 0x1b9   :  { %v285_v24 = vor.u32 1.1754944e-38, %v284_v18  ;;  %vm283_vm12 = vcmp.eq.f32.partialorder %v282_v21, 8.507059e+37  ;;  %424 = vmatpush.bf16.msra.mxu1 %v569_v4 }
 0x1ba   :  { %v272_v14 = vmax.f32 %v270_v13, 1e-30 }
 0x1bc   :  { %615 = vrcp.f32 %v272_v14  ;;  %v300_v27 = vand.u32 2147483648, %v272_v14  ;;  %v298_v30 = vand.u32 2147483647, %v272_v14  ;;  %vm294_vm14 = vweird.f32 %v272_v14 }
 0x1bd   :  { %v614_v15 = vpop.eup %613 }
 0x1be   :  { %v274_v16 = vmul.f32 %v614_v15, %v271_v11  ;;  %vm279_vm9 = vweird.f32 %v614_v15  ;;  %v301_v34 = vor.u32 1.1754944e-38, %v300_v27  ;;  %vm299_vm2 = vcmp.eq.f32.partialorder %v298_v30, 8.507059e+37 }
 0x1bf   :  { %vm280_vm11 = vmor %vm278_vm10, %vm279_vm9  ;;  %vm505_vm10 = vcmask 253952  }
 0x1c0   :  { %v275_v17 = vsub.f32 1.0, %v274_v16 }
 0x1c2   :  { %v616_v19 = vpop.eup %615  ;;  %v276_v20 = vmul.f32 %v614_v15, %v275_v17 }
 0x1c3   :  { %v290_v22 = vmul.f32 %v616_v19, %v272_v14  ;;  %vm295_vm13 = vweird.f32 %v616_v19 }
 0x1c4   :  { %v277_v23 = vadd.f32 %v614_v15, %v276_v20  ;;  %vm296_vm15 = vmor %vm294_vm14, %vm295_vm13 }
 0x1c5   :  { %v291_v25 = vsub.f32 1.0, %v290_v22 }
 0x1c6   :  { %v281_v26 = vsel %vm280_vm11, %v614_v15, %v277_v23  ;;  %v412_v23 = vld [vmem:[#allocation1] sm:$0xff] }
 0x1c7   :  { %v286_v28 = vsel %vm283_vm12, %v285_v24, %v281_v26  ;;  %v292_v29 = vmul.f32 %v616_v19, %v291_v25 }
 0x1c8   :  { %v287_v31 = vmul.f32 %v606_v51, %v286_v28  ;;  %v288_v32 = vmul.f32 %v608_v52, %v286_v28 }
 0x1c9   :  { %v293_v33 = vadd.f32 %v616_v19, %v292_v29 }
 0x1ca   :  { %311 = vperm.xlu2 %593, %v287_v31   ;;  %305 = vst.msk [vmem:[%s849_s9] sm:$0xff] %vm222_vm6, %v287_v31 }
 0x1cb   :  { %v297_v35 = vsel %vm296_vm15, %v616_v19, %v293_v33  ;;  %306 = vst.msk [vmem:[%s849_s9 + $0x8] sm:$0xff] %vm222_vm6, %v288_v32 }
 0x1cc   :  { %v302_v36 = vsel %vm299_vm2, %v301_v34, %v297_v35 }
 0x1cd   :  { %v303_v37 = vmul.f32 %v610_v56, %v302_v36  ;;  %v304_v38 = vmul.f32 %v612_v58, %v302_v36 }
 0x1cf   :  { %307 = vst.msk [vmem:[%s849_s9 + $0x10] sm:$0xff] %vm222_vm6, %v303_v37 }
 0x1d0   :  { %308 = vst.msk [vmem:[%s849_s9 + $0x18] sm:$0xff] %vm222_vm6, %v304_v38 }
 0x1d2   :  { %321 = vperm.xlu2 %593, %v303_v37  }
 0x1da   :  { %326 = vperm.xlu2 %593, %v304_v38  }
 0x1e2   :  { %316 = vperm.xlu2 %593, %v288_v32  }
 0x224   :  { %v312_v39 = vpop.permute.xlu2 %311 }
 0x225   :  { %v329_v49 = vmul.f32 %v312_v39, %v710_v6 }
 0x227   :  { %v333_v53 = vsel %vm79_vm0, %v329_v49, 0.0 }
 0x22c   :  { %v322_v40 = vpop.permute.xlu2 %321 }
 0x22d   :  { %v331_v42 = vmul.f32 %v322_v40, %v697_v2 }
 0x22f   :  { %v342_v45 = vsel %vm79_vm0, %v331_v42, 0.0 }
 0x234   :  { %v327_v43 = vpop.permute.xlu2 %326 }
 0x235   :  { %v332_v44 = vmul.f32 %v327_v43, %v702_v3 }
 0x237   :  { %v343_v46 = vsel %vm79_vm0, %v332_v44, 0.0 }
 0x238   :  { %v344_v47 = vadd.f32 %v343_v46, %v342_v45 }
 0x23a   :  { %v345_v48 = vrot.slane %v344_v47, 4 }
 0x23c   :  { %v346_v50 = vadd.f32 %v345_v48, %v344_v47  ;;  %v317_v51 = vpop.permute.xlu2 %316 }
 0x23d   :  { %v330_v52 = vmul.f32 %v317_v51, %v715_v7  ;;  %v42_v7 = vld [vmem:[%s842_s1 + $0x1] sm:$0x1]  ;;  %s632_s1 = smov 96  }
 0x23e   :  { %v347_v2 = vrot.slane %v346_v50, 2 }
 0x23f   :  { %v334_v54 = vsel %vm79_vm0, %v330_v52, 0.0 }
 0x240   :  { %v335_v55 = vadd.f32 %v334_v54, %v333_v53  ;;  %v348_v3 = vadd.f32 %v347_v2, %v346_v50 }
 0x242   :  { %v336_v56 = vrot.slane %v335_v55, 4  ;;  %v349_v60 = vrot.slane %v348_v3, 1 }
 0x244   :  { %v337_v57 = vadd.f32 %v336_v56, %v335_v55  ;;  %v350_v63 = vadd.f32 %v349_v60, %v348_v3 }
 0x246   :  { %v338_v58 = vrot.slane %v337_v57, 2 }
 0x248   :  { %v339_v59 = vadd.f32 %v338_v58, %v337_v57 }
 0x24a   :  { %v340_v61 = vrot.slane %v339_v59, 1 }
 0x24c   :  { %v341_v62 = vadd.f32 %v340_v61, %v339_v59 }
 0x24e   :  { %v594_v6 = vpack.i.bf16 %v341_v62, %v350_v63 }
 0x250   :  { %595 = vrot.lane.b32.xlu0 %v594_v6, %s629_s21 }
 0x258   :  { %487 = vrot.lane.b32.xlu0 %v42_v7, %s629_s21 }
 0x2c2   :  { %v596_v9 = vpop.permute.xlu0 %595 }
 0x2c3   :  { %v598_v10 = vunpack.i.h.bf16 %v596_v9  ;;  %v597_v11 = vunpack.i.l.bf16 %v596_v9 }
 0x2c5   :  { %v359_v12 = vsel %vm79_vm0, %v41_v8, %v598_v10  ;;  %v360_v13 = vsel %vm79_vm0, %v42_v7, %v597_v11 }
 0x2c6   :  { %v361_v14 = vpack.c.bf16 %v359_v12, %v359_v12  ;;  %v362_v15 = vpack.c.bf16 %v360_v13, %v360_v13 }
 0x2c8   :  { %v374_v16 = vunpack.c.l.b16 %v361_v14  ;;  %v375_v17 = vunpack.c.l.b16 %v362_v15 }
 0x2ca   :  { %v543_v18 = vunpack.i.l.s16 %v375_v17  ;;  %v542_v19 = vunpack.i.l.s16 %v374_v16  ;;  %v488_v48 = vpop.permute.xlu0 %487 }
 0x2cc   :  { %v380_v20 = vrot.slane %v543_v18, 7 }
 0x2ce   :  { %v382_v21 = vsel %vm381_vm3, %v380_v20, %v542_v19 }
 0x2cf   :  { %v383_v22 = vpack.c.b16 %v382_v21, %v382_v21 }
 0x2d1   :  { %560 = vmatmul.msk.bf16.vlgmr.msra.gmra.mxu1 %vm84_vm1, %v383_v22 }
 0x34e   :  { %v426_v24 = vpop.f32.mrf.mxu1 }
 0x34f   :  { %v427_v25 = vadd.f32 %v426_v24, %v412_v23 }
 0x351   :  { %v431_v26 = vrot.slane %v427_v25, 1  ;;  %617 = vtanh.f32 %v427_v25  ;;  %v561_v34 = vmul.f32 -1.442695, %v427_v25 }
 0x353   :  { %619 = vtanh.f32 %v431_v26  ;;  %v562_v30 = vmul.f32 -1.442695, %v431_v26 }
 0x355   :  { %621 = vpow2.f32 %v562_v30 }
 0x356   :  { %v428_v27 = vpop.f32.mrf.mxu1 }
 0x357   :  { %v618_v28 = vpop.eup %617 }
 0x358   :  { %475 = vrot.lane.b32.xlu1 %v618_v28, %s629_s21 }
 0x359   :  { %v620_v29 = vpop.eup %619 }
 0x35a   :  { %477 = vrot.lane.b32.xlu2 %v620_v29, %s629_s21 }
 0x35b   :  { %v622_v31 = vpop.eup %621 }
 0x35c   :  { %v442_v32 = vadd.f32 1.0, %v622_v31 }
 0x35e   :  { %623 = vrcp.f32 %v442_v32  ;;  %v469_v41 = vand.u32 2147483648, %v442_v32  ;;  %vm463_vm1 = vweird.f32 %v442_v32  ;;  %v467_v42 = vand.u32 2147483647, %v442_v32 }
 0x35f   :  { %625 = vpow2.f32 %v561_v34 }
 0x360   :  { %v470_v44 = vor.u32 1.1754944e-38, %v469_v41  ;;  %vm468_vm5 = vcmp.eq.f32.partialorder %v467_v42, 8.507059e+37 }
 0x362   :  { %485 = vrot.lane.b32.xlu2 %v41_v8, %s629_s21 }
 0x364   :  { %v624_v33 = vpop.eup %623 }
 0x365   :  { %v459_v35 = vmul.f32 %v624_v33, %v442_v32  ;;  %v626_v37 = vpop.eup %625  ;;  %vm464_vm0 = vweird.f32 %v624_v33 }
 0x366   :  { %v441_v39 = vadd.f32 1.0, %v626_v37  ;;  %vm465_vm4 = vmor %vm463_vm1, %vm464_vm0 }
 0x367   :  { %v460_v36 = vsub.f32 1.0, %v459_v35 }
 0x368   :  { %627 = vrcp.f32 %v441_v39  ;;  %v454_v3 = vand.u32 2147483648, %v441_v39  ;;  %vm448_vm7 = vweird.f32 %v441_v39  ;;  %v452_v57 = vand.u32 2147483647, %v441_v39 }
 0x369   :  { %v461_v38 = vmul.f32 %v624_v33, %v460_v36 }
 0x36a   :  { %v455_v59 = vor.u32 1.1754944e-38, %v454_v3  ;;  %vm453_vm9 = vcmp.eq.f32.partialorder %v452_v57, 8.507059e+37 }
 0x36b   :  { %v462_v40 = vadd.f32 %v624_v33, %v461_v38 }
 0x36d   :  { %v466_v43 = vsel %vm465_vm4, %v624_v33, %v462_v40 }
 0x36e   :  { %v471_v45 = vsel %vm468_vm5, %v470_v44, %v466_v43  ;;  %v628_v46 = vpop.eup %627 }
 0x36f   :  { %v484_v47 = vsub.f32 1.0, %v471_v45  ;;  %v444_v49 = vmul.f32 %v628_v46, %v441_v39  ;;  %vm449_vm6 = vweird.f32 %v628_v46 }
 0x370   :  { %vm450_vm8 = vmor %vm448_vm7, %vm449_vm6 }
 0x371   :  { %v492_v51 = vmul.f32 %v488_v48, %v484_v47  ;;  %v445_v54 = vsub.f32 1.0, %v444_v49 }
 0x373   :  { %v446_v55 = vmul.f32 %v628_v46, %v445_v54 }
 0x375   :  { %v447_v56 = vadd.f32 %v628_v46, %v446_v55 }
 0x377   :  { %v451_v58 = vsel %vm450_vm8, %v628_v46, %v447_v56 }
 0x378   :  { %v456_v60 = vsel %vm453_vm9, %v455_v59, %v451_v58 }
 0x379   :  { %v483_v62 = vsub.f32 1.0, %v456_v60 }
 0x3b4   :  { %v478_v50 = vpop.permute.xlu2 %477 }
 0x3b5   :  { %v482_v52 = vmul.f32 %v478_v50, %v471_v45 }
 0x3b7   :  { %v494_v53 = vadd.f32 %v492_v51, %v482_v52 }
 0x3b9   :  { %v498_v2 = vperm.slane %v494_v53, 0 }
 0x3bb   :  { %501 = vrot.lane.b32.xlu1 %v498_v2, %s632_s1 }
 0x3bc   :  { %v486_v61 = vpop.permute.xlu2 %485 }
 0x3bd   :  { %v491_v6 = vmul.f32 %v486_v61, %v483_v62 }
 0x3ca   :  { %v476_v63 = vpop.permute.xlu1 %475 }
 0x3cb   :  { %v481_v7 = vmul.f32 %v476_v63, %v456_v60 }
 0x3cd   :  { %v493_v0 = vadd.f32 %v491_v6, %v481_v7 }
 0x3cf   :  { %v497_v1 = vperm.slane %v493_v0, 0 }
 0x3d1   :  { %499 = vrot.lane.b32.xlu2 %v497_v1, %s632_s1 }
 0x42b   :  { %v500_v4 = vpop.permute.xlu2 %499 }
 0x42c   :  { %506 = vst.msk [vmem:[%s852_s10] sm:$0x1] %vm505_vm10, %v500_v4 }
 0x42d   :  { %v502_v5 = vpop.permute.xlu1 %501 }
 0x42e   :  { %507 = vst.msk [vmem:[%s852_s10 + $0x1] sm:$0x1] %vm505_vm10, %v502_v5 }

// kernel: play_reader_forward.24
= control target key start
LH: loop header
LB: loop body
LE: loop exit
PB: predicated region body
PF: predicated region fallthrough
CT: control target
= control target key end

     0   :  { %s880_s0 = inlined_call_operand.vmem [shape: f32[2,16,32], index: 0, kind: input, shape index: {}]   ;;  %s881_s1 = inlined_call_operand.vmem [shape: f32[2,1,32], index: 1, kind: input, shape index: {}]   ;;  %s882_s2 = inlined_call_operand.vmem [shape: f32[2,16,1], index: 2, kind: input, shape index: {}]   ;;  %s883_s3 = inlined_call_operand.vmem [shape: bf16[96,16], index: 3, kind: input, shape index: {}]   ;;  %s884_s4 = inlined_call_operand.vmem [shape: f32[1,1,16], index: 4, kind: input, shape index: {}]   ;;  %s885_s5 = inlined_call_operand.vmem [shape: f32[1,1,16], index: 5, kind: input, shape index: {}]   ;;  %s886_s6 = inlined_call_operand.<no memory space> [shape: f32[1,1,1], index: 6, kind: input, shape index: {}]   ;;  %s887_s7 = inlined_call_operand.vmem [shape: bf16[64,64], index: 7, kind: input, shape index: {}]   ;;  %s888_s8 = inlined_call_operand.vmem [shape: f32[1,1,64], index: 8, kind: input, shape index: {}]   ;;  %s889_s9 = inlined_call_operand.hbm [shape: f32[2,16,1], index: 9, kind: output, shape index: {0}]   ;;  %s890_s10 = inlined_call_operand.vmem [shape: f32[2,1,32], index: 10, kind: output, shape index: {1}]  }
   0x1   :  { %v16_v0 = vstv %s886_s6 }
   0x2   :  { %17 = vst [vmem:[#allocation2] sm:$0x1] %v16_v0 }
   0x3   :  { %v618_v1 = vld [vmem:[%s881_s1 + $0x1] ss:$0 sm:$0xff]  ;;  %v744_v2 = vld [vmem:[%s880_s0 + $0x10] sm:$0xff]  ;;  %v619_v3 = vld [vmem:[%s881_s1] ss:$0 sm:$0xff]  ;;  %s673_s6 = smov 32  }
   0x4   :  { %v752_v4 = vld [vmem:[%s880_s0 + $0x18] sm:$0xff]  ;;  %60 = vrot.lane.b32.xlu0 %v618_v1, %s673_s6  ;;  %v56_v5 = vmul.f32 %v618_v1, %v744_v2  ;;  %v760_v7 = vld [vmem:[%s880_s0] sm:$0xff]  ;;  %v765_v8 = vld [vmem:[%s880_s0 + $0x8] sm:$0xff] }
   0x5   :  { %v57_v6 = vmul.f32 %v618_v1, %v752_v4  ;;  %v583_v9 = vld [vmem:[%s883_s3 + $0x28] sm:$0xff]  ;;  %58 = vrot.lane.b32.xlu1 %v619_v3, %s673_s6  ;;  %v54_v10 = vmul.f32 %v619_v3, %v760_v7  ;;  %v55_v11 = vmul.f32 %v619_v3, %v765_v8  ;;  %v582_v12 = vld [vmem:[%s883_s3 + $0x20] sm:$0xff] }
   0x6   :  { %165 = vmatpush.bf16.msra.mxu0 %v583_v9  ;;  %588 = vmatpush.bf16.msra.mxu2 %v583_v9 }
   0x7   :  { %18 = vsyncpa [#allocation4], 0  ;;  %v601_v13 = vpack.i.bf16 %v57_v6, %v56_v5  ;;  %v606_v14 = vpack.i.bf16 %v55_v11, %v54_v10  ;;  %s674_s0 = smov 64   ;;  %v581_v15 = vld [vmem:[%s883_s3 + $0x18] sm:$0xff]  ;;  %v580_v16 = vld [vmem:[%s883_s3 + $0x10] sm:$0xff]  ;;  %vm80_vm0 = vcmask 261120  }
   0x8   :  { %v579_v17 = vld [vmem:[%s883_s3 + $0x8] sm:$0xff]  ;;  %v578_v18 = vld [vmem:[%s883_s3] sm:$0xff]  ;;  %vm85_vm1 = vcmask 523264   ;;  %vm156_vm2 = vcmask 785408   ;;  %vm194_vm3 = vcmask 130048   ;;  %vm223_vm6 = vcmask 7168  }
   0x9   :  { %v620_v45 = vld [vmem:[%s884_s4] ss:$0 sm:$0xff]  ;;  %v622_v5 = vld [vmem:[#allocation2] ss:$0 sm:$0xff]  ;;  %s515_s19 = sshll.u32 %s889_s9, 4  ;;  %s677_s20 = smov 128   ;;  %s516_s19 = int_to_ptr.hbm [resolvable:$true] %s515_s19 }
   0xa   :  { %166 = vmatpush.bf16.msra.mxu0 %v582_v12  ;;  %589 = vmatpush.bf16.msra.mxu2 %v582_v12  ;;  %v621_v48 = vld [vmem:[%s885_s5] ss:$0 sm:$0xff]  ;;  %v45_v12 = vld [vmem:[%s882_s2 + $0x8] sm:$0xff]  ;;  %s678_s21 = smov 8   ;;  %s679_s4 = smov 96  }
   0xb   :  { %v44_v9 = vld [vmem:[%s882_s2] sm:$0xff]  ;;  %vm216_vm5 = vcmp.gt.f32.partialorder %v45_v12, 0.0 }
   0xc   :  { %602 = vrot.lane.b32.xlu0 %v601_v13, %s674_s0  ;;  %vm215_vm4 = vcmp.gt.f32.partialorder %v44_v9, 0.0  ;;  %v46_v13 = vld [vmem:[%s882_s2 + $0x10] sm:$0xff] }
   0xd   :  { %607 = vrot.lane.b32.xlu1 %v606_v14, %s674_s0  ;;  %vm217_vm7 = vcmp.gt.f32.partialorder %v46_v13, 0.0 }
   0xe   :  { %167 = vmatpush.bf16.msra.mxu0 %v581_v15  ;;  %590 = vmatpush.bf16.msra.mxu2 %v581_v15 }
  0x12   :  { %168 = vmatpush.bf16.msra.mxu0 %v580_v16  ;;  %591 = vmatpush.bf16.msra.mxu2 %v580_v16 }
  0x16   :  { %169 = vmatpush.bf16.msra.mxu0 %v579_v17  ;;  %592 = vmatpush.bf16.msra.mxu2 %v579_v17 }
  0x1a   :  { %170 = vmatpush.bf16.msra.mxu0 %v578_v18  ;;  %593 = vmatpush.bf16.msra.mxu2 %v578_v18  ;;  %v47_v18 = vld [vmem:[%s882_s2 + $0x18] sm:$0xff] }
  0x1b   :  { %vm218_vm8 = vcmp.gt.f32.partialorder %v47_v18, 0.0 }
  0x76   :  { %v61_v19 = vpop.permute.xlu0 %60 }
  0x77   :  { %v59_v20 = vpop.permute.xlu1 %58  ;;  %v83_v25 = vsel %vm80_vm0, %v744_v2, %v61_v19  ;;  %v84_v26 = vsel %vm80_vm0, %v752_v4, %v61_v19 }
  0x78   :  { %v81_v29 = vsel %vm80_vm0, %v760_v7, %v59_v20  ;;  %v82_v30 = vsel %vm80_vm0, %v765_v8, %v59_v20 }
  0x7e   :  { %v603_v21 = vpop.permute.xlu0 %602 }
  0x7f   :  { %v605_v22 = vunpack.i.h.bf16 %v603_v21  ;;  %v604_v23 = vunpack.i.l.bf16 %v603_v21  ;;  %v608_v24 = vpop.permute.xlu1 %607 }
  0x80   :  { %v610_v27 = vunpack.i.h.bf16 %v608_v24  ;;  %v609_v28 = vunpack.i.l.bf16 %v608_v24 }
  0x81   :  { %v89_v31 = vsel %vm85_vm1, %v84_v26, %v605_v22  ;;  %v88_v32 = vsel %vm85_vm1, %v83_v25, %v604_v23 }
  0x82   :  { %v87_v33 = vsel %vm85_vm1, %v82_v30, %v610_v27  ;;  %v86_v34 = vsel %vm85_vm1, %v81_v29, %v609_v28  ;;  %v92_v35 = vpack.c.bf16 %v88_v32, %v88_v32  ;;  %v93_v36 = vpack.c.bf16 %v89_v31, %v89_v31 }
  0x83   :  { %v90_v37 = vpack.c.bf16 %v86_v34, %v86_v34  ;;  %v91_v38 = vpack.c.bf16 %v87_v33, %v87_v33 }
  0x84   :  { %v116_v39 = vunpack.c.l.b16 %v92_v35  ;;  %v117_v40 = vunpack.c.l.b16 %v93_v36 }
  0x85   :  { %v114_v41 = vunpack.c.l.b16 %v90_v37  ;;  %v115_v42 = vunpack.c.l.b16 %v91_v38 }
  0x86   :  { %v119_v43 = vpack.c.b16 %v117_v40, %v116_v39 }
  0x87   :  { %v118_v44 = vpack.c.b16 %v115_v42, %v114_v41 }
  0x88   :  { %556 = vmatmul.msk.bf16.vlgmr.msra.gmra.mxu2 %vm156_vm2, %v119_v43 }
  0x89   :  { %555 = vmatmul.msk.bf16.vlgmr.msra.gmra.mxu0 %vm156_vm2, %v118_v44 }
 0x106   :  { %v172_v46 = vpop.f32.mrf.mxu0 }
 0x107   :  { %v173_v47 = vadd.f32 %v620_v45, %v172_v46  ;;  %v675_v46 = vmov 0  }
 0x108   :  { %611 = vset.pattern.permute.xlu2 %v675_v46  ;;  %617 = vset.pattern.permute.xlu0 %v675_v46 }
 0x109   :  { %v182_v49 = vmax.f32 %v173_v47, 0.0 }
 0x10b   :  { %v177_v50 = vpop.f32.mrf.mxu2  ;;  %v190_v51 = vmul.f32 %v621_v48, %v182_v49 }
 0x10c   :  { %v178_v52 = vadd.f32 %v620_v45, %v177_v50 }
 0x10d   :  { %v195_v53 = vsel %vm194_vm3, %v190_v51, 0.0 }
 0x10e   :  { %v184_v54 = vmax.f32 %v178_v52, 0.0  ;;  %v174_v55 = vpop.f32.mrf.mxu0  ;;  %196 = vadd.xlane.f32.xlu0 %v195_v53 }
 0x10f   :  { %v175_v56 = vadd.f32 %v620_v45, %v174_v55 }
 0x110   :  { %v192_v57 = vmul.f32 %v621_v48, %v184_v54 }
 0x111   :  { %v183_v58 = vmax.f32 %v175_v56, 0.0 }
 0x112   :  { %v201_v59 = vsel %vm194_vm3, %v192_v57, 0.0 }
 0x113   :  { %v179_v60 = vpop.f32.mrf.mxu2  ;;  %202 = vadd.xlane.f32.xlu2 %v201_v59  ;;  %v191_v61 = vmul.f32 %v621_v48, %v183_v58 }
 0x114   :  { %v180_v62 = vadd.f32 %v620_v45, %v179_v60 }
 0x115   :  { %v198_v63 = vsel %vm194_vm3, %v191_v61, 0.0 }
 0x116   :  { %v185_v0 = vmax.f32 %v180_v62, 0.0  ;;  %199 = vadd.xlane.f32.xlu1 %v198_v63 }
 0x118   :  { %v193_v1 = vmul.f32 %v621_v48, %v185_v0 }
 0x11a   :  { %v204_v3 = vsel %vm194_vm3, %v193_v1, 0.0  ;;  %vm382_vm3 = vcmask 1041409  }
 0x11b   :  { %205 = vadd.xlane.f32.xlu2 %v204_v3 }
 0x181   :  { %v197_v6 = vpop.xlane.xlu0 %196 }
 0x182   :  { %v211_v10 = vadd.f32 %v622_v5, %v197_v6 }
 0x184   :  { %v219_v15 = vsel %vm215_vm4, -1e+30, %v211_v10 }
 0x185   :  { %v224_v20 = vsel %vm223_vm6, %v219_v15, -inf }
 0x186   :  { %v203_v11 = vpop.xlane.xlu2 %202 }
 0x187   :  { %v213_v17 = vadd.f32 %v622_v5, %v203_v11 }
 0x189   :  { %v200_v14 = vpop.xlane.xlu1 %199  ;;  %v221_v24 = vsel %vm217_vm7, -1e+30, %v213_v17 }
 0x18a   :  { %v212_v16 = vadd.f32 %v622_v5, %v200_v14  ;;  %v233_v28 = vsel %vm223_vm6, %v221_v24, -inf }
 0x18c   :  { %v220_v19 = vsel %vm216_vm5, -1e+30, %v212_v16 }
 0x18d   :  { %v225_v21 = vsel %vm223_vm6, %v220_v19, -inf }
 0x18e   :  { %v226_v22 = vmax.f32 %v224_v20, %v225_v21  ;;  %v206_v23 = vpop.xlane.xlu2 %205 }
 0x18f   :  { %v214_v25 = vadd.f32 %v622_v5, %v206_v23 }
 0x190   :  { %v227_v26 = vrot.slane %v226_v22, 4 }
 0x191   :  { %v222_v27 = vsel %vm218_vm8, -1e+30, %v214_v25 }
 0x192   :  { %v228_v29 = vmax.f32 %v226_v22, %v227_v26  ;;  %v234_v30 = vsel %vm223_vm6, %v222_v27, -inf }
 0x193   :  { %v235_v31 = vmax.f32 %v233_v28, %v234_v30 }
 0x194   :  { %v229_v32 = vrot.slane %v228_v29, 2 }
 0x195   :  { %v236_v33 = vrot.slane %v235_v31, 4 }
 0x196   :  { %v230_v34 = vmax.f32 %v228_v29, %v229_v32 }
 0x197   :  { %v237_v35 = vmax.f32 %v235_v31, %v236_v33 }
 0x198   :  { %v231_v36 = vrot.slane %v230_v34, 1 }
 0x199   :  { %v238_v37 = vrot.slane %v237_v35, 2 }
 0x19a   :  { %v232_v38 = vmax.f32 %v230_v34, %v231_v36 }
 0x19b   :  { %v239_v39 = vmax.f32 %v237_v35, %v238_v37 }
 0x19c   :  { %v242_v40 = vsub.f32 %v219_v15, %v232_v38  ;;  %v243_v41 = vsub.f32 %v220_v19, %v232_v38 }
 0x19d   :  { %v240_v42 = vrot.slane %v239_v39, 1 }
 0x19e   :  { %v246_v43 = vmul.f32 1.442695, %v242_v40  ;;  %v248_v44 = vmul.f32 1.442695, %v243_v41  ;;  %v587_v41 = vld [vmem:[%s887_s7 + $0x18] sm:$0xff] }
 0x19f   :  { %v241_v45 = vmax.f32 %v239_v39, %v240_v42  ;;  %422 = vmatpush.bf16.msra.mxu1 %v587_v41 }
 0x1a0   :  { %623 = vpow2.f32 %v246_v43 }
 0x1a1   :  { %625 = vpow2.f32 %v248_v44  ;;  %v244_v47 = vsub.f32 %v221_v24, %v241_v45  ;;  %v245_v48 = vsub.f32 %v222_v27, %v241_v45 }
 0x1a3   :  { %v250_v49 = vmul.f32 1.442695, %v244_v47  ;;  %v252_v50 = vmul.f32 1.442695, %v245_v48 }
 0x1a5   :  { %627 = vpow2.f32 %v250_v49 }
 0x1a6   :  { %v624_v51 = vpop.eup %623  ;;  %629 = vpow2.f32 %v252_v50 }
 0x1a7   :  { %v626_v52 = vpop.eup %625  ;;  %v254_v53 = vsel %vm223_vm6, %v624_v51, 0.0 }
 0x1a8   :  { %v255_v54 = vsel %vm223_vm6, %v626_v52, 0.0 }
 0x1a9   :  { %v256_v55 = vadd.f32 %v255_v54, %v254_v53 }
 0x1ab   :  { %v628_v56 = vpop.eup %627  ;;  %v257_v57 = vrot.slane %v256_v55, 4 }
 0x1ac   :  { %v630_v58 = vpop.eup %629  ;;  %v263_v59 = vsel %vm223_vm6, %v628_v56, 0.0 }
 0x1ad   :  { %v258_v60 = vadd.f32 %v257_v57, %v256_v55  ;;  %v264_v61 = vsel %vm223_vm6, %v630_v58, 0.0 }
 0x1ae   :  { %v265_v62 = vadd.f32 %v264_v61, %v263_v59 }
 0x1af   :  { %v259_v63 = vrot.slane %v258_v60, 2 }
 0x1b0   :  { %v266_v0 = vrot.slane %v265_v62, 4 }
 0x1b1   :  { %v260_v1 = vadd.f32 %v259_v63, %v258_v60 }
 0x1b2   :  { %v267_v3 = vadd.f32 %v266_v0, %v265_v62  ;;  %v586_v0 = vld [vmem:[%s887_s7 + $0x10] sm:$0xff] }
 0x1b3   :  { %v261_v5 = vrot.slane %v260_v1, 1  ;;  %423 = vmatpush.bf16.msra.mxu1 %v586_v0 }
 0x1b4   :  { %v268_v6 = vrot.slane %v267_v3, 2 }
 0x1b5   :  { %v262_v9 = vadd.f32 %v261_v5, %v260_v1  ;;  %v585_v1 = vld [vmem:[%s887_s7 + $0x8] sm:$0xff]  ;;  %v372_v5 = vld [vmem:[%s888_s8] sm:$0x1] }
 0x1b6   :  { %v269_v10 = vadd.f32 %v268_v6, %v267_v3  ;;  %v584_v3 = vld [vmem:[%s887_s7] sm:$0xff]  ;;  %410 = vst [vmem:[#allocation1] ss:$9 sm:$0xff] %v372_v5 }
 0x1b7   :  { %v272_v11 = vmax.f32 %v262_v9, 1e-30  ;;  %424 = vmatpush.bf16.msra.mxu1 %v585_v1  ;;  %412 = vst [vmem:[#allocation1 + $0x1] ss:$9 sm:$0xff] %v372_v5  ;;  %v42_v6 = vld [vmem:[%s881_s1] sm:$0x1] }
 0x1b8   :  { %v270_v12 = vrot.slane %v269_v10, 1 }
 0x1b9   :  { %631 = vrcp.f32 %v272_v11  ;;  %v285_v18 = vand.u32 2147483648, %v272_v11  ;;  %v283_v21 = vand.u32 2147483647, %v272_v11  ;;  %vm279_vm10 = vweird.f32 %v272_v11 }
 0x1ba   :  { %v271_v13 = vadd.f32 %v270_v12, %v269_v10 }
 0x1bb   :  { %v286_v24 = vor.u32 1.1754944e-38, %v285_v18  ;;  %vm284_vm12 = vcmp.eq.f32.partialorder %v283_v21, 8.507059e+37  ;;  %425 = vmatpush.bf16.msra.mxu1 %v584_v3 }
 0x1bc   :  { %v273_v14 = vmax.f32 %v271_v13, 1e-30 }
 0x1be   :  { %633 = vrcp.f32 %v273_v14  ;;  %v301_v27 = vand.u32 2147483648, %v273_v14  ;;  %v299_v30 = vand.u32 2147483647, %v273_v14  ;;  %vm295_vm14 = vweird.f32 %v273_v14 }
 0x1bf   :  { %v632_v15 = vpop.eup %631 }
 0x1c0   :  { %v275_v16 = vmul.f32 %v632_v15, %v272_v11  ;;  %vm280_vm9 = vweird.f32 %v632_v15  ;;  %v302_v34 = vor.u32 1.1754944e-38, %v301_v27  ;;  %vm300_vm2 = vcmp.eq.f32.partialorder %v299_v30, 8.507059e+37 }
 0x1c1   :  { %vm281_vm11 = vmor %vm279_vm10, %vm280_vm9  ;;  %vm506_vm10 = vcmask 253952  }
 0x1c2   :  { %v276_v17 = vsub.f32 1.0, %v275_v16 }
 0x1c4   :  { %v634_v19 = vpop.eup %633  ;;  %v277_v20 = vmul.f32 %v632_v15, %v276_v17 }
 0x1c5   :  { %v291_v22 = vmul.f32 %v634_v19, %v273_v14  ;;  %vm296_vm13 = vweird.f32 %v634_v19 }
 0x1c6   :  { %v278_v23 = vadd.f32 %v632_v15, %v277_v20  ;;  %vm297_vm15 = vmor %vm295_vm14, %vm296_vm13 }
 0x1c7   :  { %v292_v25 = vsub.f32 1.0, %v291_v22 }
 0x1c8   :  { %v282_v26 = vsel %vm281_vm11, %v632_v15, %v278_v23  ;;  %v413_v23 = vld [vmem:[#allocation1] sm:$0xff] }
 0x1c9   :  { %v287_v28 = vsel %vm284_vm12, %v286_v24, %v282_v26  ;;  %v293_v29 = vmul.f32 %v634_v19, %v292_v25 }
 0x1ca   :  { %v288_v31 = vmul.f32 %v624_v51, %v287_v28  ;;  %v289_v32 = vmul.f32 %v626_v52, %v287_v28 }
 0x1cb   :  { %v294_v33 = vadd.f32 %v634_v19, %v293_v29 }
 0x1cc   :  { %312 = vperm.xlu2 %611, %v288_v31   ;;  %306 = vst.msk [vmem:[#allocation3] sm:$0xff] %vm223_vm6, %v288_v31 }
 0x1cd   :  { %v298_v35 = vsel %vm297_vm15, %v634_v19, %v294_v33  ;;  %307 = vst.msk [vmem:[#allocation3 + $0x8] sm:$0xff] %vm223_vm6, %v289_v32 }
 0x1ce   :  { %v303_v36 = vsel %vm300_vm2, %v302_v34, %v298_v35 }
 0x1cf   :  { %v304_v37 = vmul.f32 %v628_v56, %v303_v36  ;;  %v305_v38 = vmul.f32 %v630_v58, %v303_v36 }
 0x1d1   :  { %308 = vst.msk [vmem:[#allocation3 + $0x10] sm:$0xff] %vm223_vm6, %v304_v37 }
 0x1d2   :  { %309 = vst.msk [vmem:[#allocation3 + $0x18] sm:$0xff] %vm223_vm6, %v305_v38 }
 0x1d4   :  { %322 = vperm.xlu2 %611, %v304_v37  }
 0x1dc   :  { %327 = vperm.xlu2 %611, %v305_v38  }
 0x1e4   :  { %317 = vperm.xlu2 %611, %v289_v32  }
 0x226   :  { %v313_v39 = vpop.permute.xlu2 %312 }
 0x227   :  { %v330_v49 = vmul.f32 %v313_v39, %v760_v7 }
 0x229   :  { %v334_v53 = vsel %vm80_vm0, %v330_v49, 0.0 }
 0x22e   :  { %v323_v40 = vpop.permute.xlu2 %322 }
 0x22f   :  { %v332_v42 = vmul.f32 %v323_v40, %v744_v2 }
 0x231   :  { %v343_v45 = vsel %vm80_vm0, %v332_v42, 0.0 }
 0x236   :  { %v328_v43 = vpop.permute.xlu2 %327 }
 0x237   :  { %v333_v44 = vmul.f32 %v328_v43, %v752_v4 }
 0x239   :  { %v344_v46 = vsel %vm80_vm0, %v333_v44, 0.0 }
 0x23a   :  { %v345_v47 = vadd.f32 %v344_v46, %v343_v45 }
 0x23c   :  { %v346_v48 = vrot.slane %v345_v47, 4 }
 0x23e   :  { %v347_v50 = vadd.f32 %v346_v48, %v345_v47  ;;  %v318_v51 = vpop.permute.xlu2 %317 }
 0x23f   :  { %v331_v52 = vmul.f32 %v318_v51, %v765_v8  ;;  %v43_v8 = vld [vmem:[%s881_s1 + $0x1] sm:$0x1]  ;;  %s676_s1 = smov [#allocation3]  }
 0x240   :  { %v348_v2 = vrot.slane %v347_v50, 2  ;;  %s513_s7 = sshll.u32 %s676_s1, 4  ;;  %s514_s7 = int_to_ptr.vmem [resolvable:$true] %s513_s7 }
 0x241   :  { %v335_v54 = vsel %vm80_vm0, %v331_v52, 0.0  ;;  %521 = dma.vmem_to_hbm [thread:$0]  %s514_s7, 512, %s516_s19, [#allocation4], %s677_s20, %s677_s20, %s678_s21  }
 0x242   :  { %v336_v55 = vadd.f32 %v335_v54, %v334_v53  ;;  %v349_v4 = vadd.f32 %v348_v2, %v347_v50 }
 0x244   :  { %v337_v56 = vrot.slane %v336_v55, 4  ;;  %v350_v60 = vrot.slane %v349_v4, 1 }
 0x246   :  { %v338_v57 = vadd.f32 %v337_v56, %v336_v55  ;;  %v351_v63 = vadd.f32 %v350_v60, %v349_v4 }
 0x248   :  { %v339_v58 = vrot.slane %v338_v57, 2 }
 0x24a   :  { %v340_v59 = vadd.f32 %v339_v58, %v338_v57 }
 0x24c   :  { %v341_v61 = vrot.slane %v340_v59, 1 }
 0x24e   :  { %v342_v62 = vadd.f32 %v341_v61, %v340_v59 }
 0x250   :  { %v612_v7 = vpack.i.bf16 %v342_v62, %v351_v63 }
 0x252   :  { %613 = vrot.lane.b32.xlu0 %v612_v7, %s673_s6 }
 0x25a   :  { %488 = vrot.lane.b32.xlu0 %v43_v8, %s673_s6 }
 0x2c4   :  { %v614_v9 = vpop.permute.xlu0 %613 }
 0x2c5   :  { %v616_v10 = vunpack.i.h.bf16 %v614_v9  ;;  %v615_v11 = vunpack.i.l.bf16 %v614_v9 }
 0x2c7   :  { %v360_v12 = vsel %vm80_vm0, %v42_v6, %v616_v10  ;;  %v361_v13 = vsel %vm80_vm0, %v43_v8, %v615_v11 }
 0x2c8   :  { %v362_v14 = vpack.c.bf16 %v360_v12, %v360_v12  ;;  %v363_v15 = vpack.c.bf16 %v361_v13, %v361_v13 }
 0x2ca   :  { %v375_v16 = vunpack.c.l.b16 %v362_v14  ;;  %v376_v17 = vunpack.c.l.b16 %v363_v15 }
 0x2cc   :  { %v558_v18 = vunpack.i.l.s16 %v376_v17  ;;  %v557_v19 = vunpack.i.l.s16 %v375_v16  ;;  %v489_v48 = vpop.permute.xlu0 %488 }
 0x2ce   :  { %v381_v20 = vrot.slane %v558_v18, 7 }
 0x2d0   :  { %v383_v21 = vsel %vm382_vm3, %v381_v20, %v557_v19 }
 0x2d1   :  { %v384_v22 = vpack.c.b16 %v383_v21, %v383_v21 }
 0x2d3   :  { %575 = vmatmul.msk.bf16.vlgmr.msra.gmra.mxu1 %vm85_vm1, %v384_v22 }
 0x350   :  { %v427_v24 = vpop.f32.mrf.mxu1 }
 0x351   :  { %v428_v25 = vadd.f32 %v427_v24, %v413_v23 }
 0x353   :  { %v432_v26 = vrot.slane %v428_v25, 1  ;;  %635 = vtanh.f32 %v428_v25  ;;  %v576_v34 = vmul.f32 -1.442695, %v428_v25 }
 0x355   :  { %637 = vtanh.f32 %v432_v26  ;;  %v577_v30 = vmul.f32 -1.442695, %v432_v26 }
 0x357   :  { %639 = vpow2.f32 %v577_v30 }
 0x358   :  { %v429_v27 = vpop.f32.mrf.mxu1 }
 0x359   :  { %v636_v28 = vpop.eup %635 }
 0x35a   :  { %476 = vrot.lane.b32.xlu1 %v636_v28, %s673_s6 }
 0x35b   :  { %v638_v29 = vpop.eup %637 }
 0x35c   :  { %478 = vrot.lane.b32.xlu2 %v638_v29, %s673_s6 }
 0x35d   :  { %v640_v31 = vpop.eup %639 }
 0x35e   :  { %v443_v32 = vadd.f32 1.0, %v640_v31 }
 0x360   :  { %641 = vrcp.f32 %v443_v32  ;;  %v470_v41 = vand.u32 2147483648, %v443_v32  ;;  %vm464_vm1 = vweird.f32 %v443_v32  ;;  %v468_v42 = vand.u32 2147483647, %v443_v32 }
 0x361   :  { %643 = vpow2.f32 %v576_v34 }
 0x362   :  { %v471_v44 = vor.u32 1.1754944e-38, %v470_v41  ;;  %vm469_vm5 = vcmp.eq.f32.partialorder %v468_v42, 8.507059e+37 }
 0x364   :  { %486 = vrot.lane.b32.xlu2 %v42_v6, %s673_s6 }
 0x366   :  { %v642_v33 = vpop.eup %641 }
 0x367   :  { %v460_v35 = vmul.f32 %v642_v33, %v443_v32  ;;  %v644_v37 = vpop.eup %643  ;;  %vm465_vm0 = vweird.f32 %v642_v33 }
 0x368   :  { %v442_v39 = vadd.f32 1.0, %v644_v37  ;;  %vm466_vm4 = vmor %vm464_vm1, %vm465_vm0 }
 0x369   :  { %v461_v36 = vsub.f32 1.0, %v460_v35 }
 0x36a   :  { %645 = vrcp.f32 %v442_v39  ;;  %v455_v4 = vand.u32 2147483648, %v442_v39  ;;  %vm449_vm7 = vweird.f32 %v442_v39  ;;  %v453_v57 = vand.u32 2147483647, %v442_v39 }
 0x36b   :  { %v462_v38 = vmul.f32 %v642_v33, %v461_v36 }
 0x36c   :  { %v456_v59 = vor.u32 1.1754944e-38, %v455_v4  ;;  %vm454_vm9 = vcmp.eq.f32.partialorder %v453_v57, 8.507059e+37 }
 0x36d   :  { %v463_v40 = vadd.f32 %v642_v33, %v462_v38 }
 0x36f   :  { %v467_v43 = vsel %vm466_vm4, %v642_v33, %v463_v40 }
 0x370   :  { %v472_v45 = vsel %vm469_vm5, %v471_v44, %v467_v43  ;;  %v646_v46 = vpop.eup %645 }
 0x371   :  { %v485_v47 = vsub.f32 1.0, %v472_v45  ;;  %v445_v49 = vmul.f32 %v646_v46, %v442_v39  ;;  %vm450_vm6 = vweird.f32 %v646_v46 }
 0x372   :  { %vm451_vm8 = vmor %vm449_vm7, %vm450_vm6 }
 0x373   :  { %v493_v51 = vmul.f32 %v489_v48, %v485_v47  ;;  %v446_v54 = vsub.f32 1.0, %v445_v49 }
 0x375   :  { %v447_v55 = vmul.f32 %v646_v46, %v446_v54 }
 0x377   :  { %v448_v56 = vadd.f32 %v646_v46, %v447_v55 }
 0x379   :  { %v452_v58 = vsel %vm451_vm8, %v646_v46, %v448_v56 }
 0x37a   :  { %v457_v60 = vsel %vm454_vm9, %v456_v59, %v452_v58 }
 0x37b   :  { %v484_v62 = vsub.f32 1.0, %v457_v60 }
 0x3b6   :  { %v479_v50 = vpop.permute.xlu2 %478 }
 0x3b7   :  { %v483_v52 = vmul.f32 %v479_v50, %v472_v45 }
 0x3b9   :  { %v495_v53 = vadd.f32 %v493_v51, %v483_v52 }
 0x3bb   :  { %v499_v2 = vperm.slane %v495_v53, 0 }
 0x3bd   :  { %502 = vrot.lane.b32.xlu1 %v499_v2, %s679_s4 }
 0x3be   :  { %v487_v61 = vpop.permute.xlu2 %486 }
 0x3bf   :  { %v492_v7 = vmul.f32 %v487_v61, %v484_v62 }
 0x3cc   :  { %v477_v63 = vpop.permute.xlu1 %476 }
 0x3cd   :  { %v482_v8 = vmul.f32 %v477_v63, %v457_v60 }
 0x3cf   :  { %v494_v0 = vadd.f32 %v492_v7, %v482_v8 }
 0x3d1   :  { %v498_v1 = vperm.slane %v494_v0, 0 }
 0x3d3   :  { %500 = vrot.lane.b32.xlu2 %v498_v1, %s679_s4 }
 0x42d   :  { %v501_v3 = vpop.permute.xlu2 %500 }
 0x42e   :  { %507 = vst.msk [vmem:[%s890_s10] sm:$0x1] %vm506_vm10, %v501_v3 }
 0x42f   :  { %v503_v5 = vpop.permute.xlu1 %502 }
 0x430   :  { %508 = vst.msk [vmem:[%s890_s10 + $0x1] sm:$0x1] %vm506_vm10, %v503_v5 }
 0x431   :  { %671 = dma.done.wait [#allocation4], 512  }
 0x432   :  { %672 = vsyncadd [#allocation4], 4294966784 }
 0x433   :  { %530 = vsyncpa [#allocation4], 1 }

// kernel: play_reader_forward.27
= control target key start
LH: loop header
LB: loop body
LE: loop exit
PB: predicated region body
PF: predicated region fallthrough
CT: control target
= control target key end

     0   :  { %s886_s0 = inlined_call_operand.vmem [shape: f32[2,16,32], index: 0, kind: input, shape index: {}]   ;;  %s887_s1 = inlined_call_operand.vmem [shape: f32[2,1,32], index: 1, kind: input, shape index: {}]   ;;  %s888_s2 = inlined_call_operand.vmem [shape: f32[2,16,1], index: 2, kind: input, shape index: {}]   ;;  %s889_s3 = inlined_call_operand.vmem [shape: bf16[96,16], index: 3, kind: input, shape index: {}]   ;;  %s890_s4 = inlined_call_operand.vmem [shape: f32[1,1,16], index: 4, kind: input, shape index: {}]   ;;  %s891_s5 = inlined_call_operand.vmem [shape: f32[1,1,16], index: 5, kind: input, shape index: {}]   ;;  %s892_s6 = inlined_call_operand.<no memory space> [shape: f32[1,1,1], index: 6, kind: input, shape index: {}]   ;;  %s893_s7 = inlined_call_operand.vmem [shape: bf16[64,64], index: 7, kind: input, shape index: {}]   ;;  %s894_s8 = inlined_call_operand.vmem [shape: f32[1,1,64], index: 8, kind: input, shape index: {}]   ;;  %s895_s9 = inlined_call_operand.vmem [shape: f32[2,16,1], index: 9, kind: output, shape index: {0}]   ;;  %s896_s10 = inlined_call_operand.hbm [shape: f32[2,1,32], index: 10, kind: output, shape index: {1}]  }
   0x1   :  { %v16_v0 = vstv %s892_s6 }
   0x2   :  { %17 = vst [vmem:[#allocation2] sm:$0x1] %v16_v0 }
   0x3   :  { %v618_v1 = vld [vmem:[%s887_s1 + $0x1] ss:$0 sm:$0xff]  ;;  %v744_v2 = vld [vmem:[%s886_s0 + $0x10] sm:$0xff]  ;;  %v619_v3 = vld [vmem:[%s887_s1] ss:$0 sm:$0xff]  ;;  %s673_s6 = smov 32  }
   0x4   :  { %v752_v4 = vld [vmem:[%s886_s0 + $0x18] sm:$0xff]  ;;  %60 = vrot.lane.b32.xlu0 %v618_v1, %s673_s6  ;;  %v56_v5 = vmul.f32 %v618_v1, %v744_v2  ;;  %v760_v7 = vld [vmem:[%s886_s0] sm:$0xff]  ;;  %v765_v8 = vld [vmem:[%s886_s0 + $0x8] sm:$0xff] }
   0x5   :  { %v57_v6 = vmul.f32 %v618_v1, %v752_v4  ;;  %v583_v9 = vld [vmem:[%s889_s3 + $0x28] sm:$0xff]  ;;  %58 = vrot.lane.b32.xlu1 %v619_v3, %s673_s6  ;;  %v54_v10 = vmul.f32 %v619_v3, %v760_v7  ;;  %v55_v11 = vmul.f32 %v619_v3, %v765_v8  ;;  %v582_v12 = vld [vmem:[%s889_s3 + $0x20] sm:$0xff] }
   0x6   :  { %165 = vmatpush.bf16.msra.mxu0 %v583_v9  ;;  %588 = vmatpush.bf16.msra.mxu2 %v583_v9 }
   0x7   :  { %18 = vsyncpa [#allocation4], 0  ;;  %v601_v13 = vpack.i.bf16 %v57_v6, %v56_v5  ;;  %v606_v14 = vpack.i.bf16 %v55_v11, %v54_v10  ;;  %s674_s0 = smov 64   ;;  %v581_v15 = vld [vmem:[%s889_s3 + $0x18] sm:$0xff]  ;;  %v580_v16 = vld [vmem:[%s889_s3 + $0x10] sm:$0xff]  ;;  %vm80_vm0 = vcmask 261120  }
   0x8   :  { %v579_v17 = vld [vmem:[%s889_s3 + $0x8] sm:$0xff]  ;;  %v578_v18 = vld [vmem:[%s889_s3] sm:$0xff]  ;;  %vm85_vm1 = vcmask 523264   ;;  %vm156_vm2 = vcmask 785408   ;;  %vm194_vm3 = vcmask 130048   ;;  %vm223_vm6 = vcmask 7168  }
   0x9   :  { %v620_v45 = vld [vmem:[%s890_s4] ss:$0 sm:$0xff]  ;;  %v622_v5 = vld [vmem:[#allocation2] ss:$0 sm:$0xff]  ;;  %s517_s25 = sshll.u32 %s896_s10, 4  ;;  %s678_s26 = smov 16   ;;  %s518_s25 = int_to_ptr.hbm [resolvable:$true] %s517_s25 }
   0xa   :  { %166 = vmatpush.bf16.msra.mxu0 %v582_v12  ;;  %589 = vmatpush.bf16.msra.mxu2 %v582_v12  ;;  %v621_v48 = vld [vmem:[%s891_s5] ss:$0 sm:$0xff]  ;;  %v45_v12 = vld [vmem:[%s888_s2 + $0x8] sm:$0xff]  ;;  %s679_s27 = smov 1  }
   0xb   :  { %v44_v9 = vld [vmem:[%s888_s2] sm:$0xff]  ;;  %vm216_vm5 = vcmp.gt.f32.partialorder %v45_v12, 0.0 }
   0xc   :  { %602 = vrot.lane.b32.xlu0 %v601_v13, %s674_s0  ;;  %vm215_vm4 = vcmp.gt.f32.partialorder %v44_v9, 0.0  ;;  %v46_v13 = vld [vmem:[%s888_s2 + $0x10] sm:$0xff] }
   0xd   :  { %607 = vrot.lane.b32.xlu1 %v606_v14, %s674_s0  ;;  %vm217_vm7 = vcmp.gt.f32.partialorder %v46_v13, 0.0 }
   0xe   :  { %167 = vmatpush.bf16.msra.mxu0 %v581_v15  ;;  %590 = vmatpush.bf16.msra.mxu2 %v581_v15 }
  0x12   :  { %168 = vmatpush.bf16.msra.mxu0 %v580_v16  ;;  %591 = vmatpush.bf16.msra.mxu2 %v580_v16 }
  0x16   :  { %169 = vmatpush.bf16.msra.mxu0 %v579_v17  ;;  %592 = vmatpush.bf16.msra.mxu2 %v579_v17 }
  0x1a   :  { %170 = vmatpush.bf16.msra.mxu0 %v578_v18  ;;  %593 = vmatpush.bf16.msra.mxu2 %v578_v18  ;;  %v47_v18 = vld [vmem:[%s888_s2 + $0x18] sm:$0xff] }
  0x1b   :  { %vm218_vm8 = vcmp.gt.f32.partialorder %v47_v18, 0.0 }
  0x76   :  { %v61_v19 = vpop.permute.xlu0 %60 }
  0x77   :  { %v59_v20 = vpop.permute.xlu1 %58  ;;  %v83_v25 = vsel %vm80_vm0, %v744_v2, %v61_v19  ;;  %v84_v26 = vsel %vm80_vm0, %v752_v4, %v61_v19 }
  0x78   :  { %v81_v29 = vsel %vm80_vm0, %v760_v7, %v59_v20  ;;  %v82_v30 = vsel %vm80_vm0, %v765_v8, %v59_v20 }
  0x7e   :  { %v603_v21 = vpop.permute.xlu0 %602 }
  0x7f   :  { %v605_v22 = vunpack.i.h.bf16 %v603_v21  ;;  %v604_v23 = vunpack.i.l.bf16 %v603_v21  ;;  %v608_v24 = vpop.permute.xlu1 %607 }
  0x80   :  { %v610_v27 = vunpack.i.h.bf16 %v608_v24  ;;  %v609_v28 = vunpack.i.l.bf16 %v608_v24 }
  0x81   :  { %v89_v31 = vsel %vm85_vm1, %v84_v26, %v605_v22  ;;  %v88_v32 = vsel %vm85_vm1, %v83_v25, %v604_v23 }
  0x82   :  { %v87_v33 = vsel %vm85_vm1, %v82_v30, %v610_v27  ;;  %v86_v34 = vsel %vm85_vm1, %v81_v29, %v609_v28  ;;  %v92_v35 = vpack.c.bf16 %v88_v32, %v88_v32  ;;  %v93_v36 = vpack.c.bf16 %v89_v31, %v89_v31 }
  0x83   :  { %v90_v37 = vpack.c.bf16 %v86_v34, %v86_v34  ;;  %v91_v38 = vpack.c.bf16 %v87_v33, %v87_v33 }
  0x84   :  { %v116_v39 = vunpack.c.l.b16 %v92_v35  ;;  %v117_v40 = vunpack.c.l.b16 %v93_v36 }
  0x85   :  { %v114_v41 = vunpack.c.l.b16 %v90_v37  ;;  %v115_v42 = vunpack.c.l.b16 %v91_v38 }
  0x86   :  { %v119_v43 = vpack.c.b16 %v117_v40, %v116_v39 }
  0x87   :  { %v118_v44 = vpack.c.b16 %v115_v42, %v114_v41 }
  0x88   :  { %556 = vmatmul.msk.bf16.vlgmr.msra.gmra.mxu2 %vm156_vm2, %v119_v43 }
  0x89   :  { %555 = vmatmul.msk.bf16.vlgmr.msra.gmra.mxu0 %vm156_vm2, %v118_v44 }
 0x106   :  { %v172_v46 = vpop.f32.mrf.mxu0 }
 0x107   :  { %v173_v47 = vadd.f32 %v620_v45, %v172_v46  ;;  %v675_v46 = vmov 0  }
 0x108   :  { %611 = vset.pattern.permute.xlu2 %v675_v46  ;;  %617 = vset.pattern.permute.xlu0 %v675_v46 }
 0x109   :  { %v182_v49 = vmax.f32 %v173_v47, 0.0 }
 0x10b   :  { %v177_v50 = vpop.f32.mrf.mxu2  ;;  %v190_v51 = vmul.f32 %v621_v48, %v182_v49 }
 0x10c   :  { %v178_v52 = vadd.f32 %v620_v45, %v177_v50 }
 0x10d   :  { %v195_v53 = vsel %vm194_vm3, %v190_v51, 0.0 }
 0x10e   :  { %v184_v54 = vmax.f32 %v178_v52, 0.0  ;;  %v174_v55 = vpop.f32.mrf.mxu0  ;;  %196 = vadd.xlane.f32.xlu0 %v195_v53 }
 0x10f   :  { %v175_v56 = vadd.f32 %v620_v45, %v174_v55 }
 0x110   :  { %v192_v57 = vmul.f32 %v621_v48, %v184_v54 }
 0x111   :  { %v183_v58 = vmax.f32 %v175_v56, 0.0 }
 0x112   :  { %v201_v59 = vsel %vm194_vm3, %v192_v57, 0.0 }
 0x113   :  { %v179_v60 = vpop.f32.mrf.mxu2  ;;  %202 = vadd.xlane.f32.xlu2 %v201_v59  ;;  %v191_v61 = vmul.f32 %v621_v48, %v183_v58 }
 0x114   :  { %v180_v62 = vadd.f32 %v620_v45, %v179_v60 }
 0x115   :  { %v198_v63 = vsel %vm194_vm3, %v191_v61, 0.0 }
 0x116   :  { %v185_v0 = vmax.f32 %v180_v62, 0.0  ;;  %199 = vadd.xlane.f32.xlu1 %v198_v63 }
 0x118   :  { %v193_v1 = vmul.f32 %v621_v48, %v185_v0 }
 0x11a   :  { %v204_v3 = vsel %vm194_vm3, %v193_v1, 0.0  ;;  %vm382_vm3 = vcmask 1041409  }
 0x11b   :  { %205 = vadd.xlane.f32.xlu2 %v204_v3 }
 0x181   :  { %v197_v6 = vpop.xlane.xlu0 %196 }
 0x182   :  { %v211_v10 = vadd.f32 %v622_v5, %v197_v6 }
 0x184   :  { %v219_v15 = vsel %vm215_vm4, -1e+30, %v211_v10 }
 0x185   :  { %v224_v20 = vsel %vm223_vm6, %v219_v15, -inf }
 0x186   :  { %v203_v11 = vpop.xlane.xlu2 %202 }
 0x187   :  { %v213_v17 = vadd.f32 %v622_v5, %v203_v11 }
 0x189   :  { %v200_v14 = vpop.xlane.xlu1 %199  ;;  %v221_v24 = vsel %vm217_vm7, -1e+30, %v213_v17 }
 0x18a   :  { %v212_v16 = vadd.f32 %v622_v5, %v200_v14  ;;  %v233_v28 = vsel %vm223_vm6, %v221_v24, -inf }
 0x18c   :  { %v220_v19 = vsel %vm216_vm5, -1e+30, %v212_v16 }
 0x18d   :  { %v225_v21 = vsel %vm223_vm6, %v220_v19, -inf }
 0x18e   :  { %v226_v22 = vmax.f32 %v224_v20, %v225_v21  ;;  %v206_v23 = vpop.xlane.xlu2 %205 }
 0x18f   :  { %v214_v25 = vadd.f32 %v622_v5, %v206_v23 }
 0x190   :  { %v227_v26 = vrot.slane %v226_v22, 4 }
 0x191   :  { %v222_v27 = vsel %vm218_vm8, -1e+30, %v214_v25 }
 0x192   :  { %v228_v29 = vmax.f32 %v226_v22, %v227_v26  ;;  %v234_v30 = vsel %vm223_vm6, %v222_v27, -inf }
 0x193   :  { %v235_v31 = vmax.f32 %v233_v28, %v234_v30 }
 0x194   :  { %v229_v32 = vrot.slane %v228_v29, 2 }
 0x195   :  { %v236_v33 = vrot.slane %v235_v31, 4 }
 0x196   :  { %v230_v34 = vmax.f32 %v228_v29, %v229_v32 }
 0x197   :  { %v237_v35 = vmax.f32 %v235_v31, %v236_v33 }
 0x198   :  { %v231_v36 = vrot.slane %v230_v34, 1 }
 0x199   :  { %v238_v37 = vrot.slane %v237_v35, 2 }
 0x19a   :  { %v232_v38 = vmax.f32 %v230_v34, %v231_v36 }
 0x19b   :  { %v239_v39 = vmax.f32 %v237_v35, %v238_v37 }
 0x19c   :  { %v242_v40 = vsub.f32 %v219_v15, %v232_v38  ;;  %v243_v41 = vsub.f32 %v220_v19, %v232_v38 }
 0x19d   :  { %v240_v42 = vrot.slane %v239_v39, 1 }
 0x19e   :  { %v246_v43 = vmul.f32 1.442695, %v242_v40  ;;  %v248_v44 = vmul.f32 1.442695, %v243_v41  ;;  %v587_v41 = vld [vmem:[%s893_s7 + $0x18] sm:$0xff] }
 0x19f   :  { %v241_v45 = vmax.f32 %v239_v39, %v240_v42  ;;  %422 = vmatpush.bf16.msra.mxu1 %v587_v41 }
 0x1a0   :  { %623 = vpow2.f32 %v246_v43 }
 0x1a1   :  { %625 = vpow2.f32 %v248_v44  ;;  %v244_v47 = vsub.f32 %v221_v24, %v241_v45  ;;  %v245_v48 = vsub.f32 %v222_v27, %v241_v45 }
 0x1a3   :  { %v250_v49 = vmul.f32 1.442695, %v244_v47  ;;  %v252_v50 = vmul.f32 1.442695, %v245_v48 }
 0x1a5   :  { %627 = vpow2.f32 %v250_v49 }
 0x1a6   :  { %v624_v51 = vpop.eup %623  ;;  %629 = vpow2.f32 %v252_v50 }
 0x1a7   :  { %v626_v52 = vpop.eup %625  ;;  %v254_v53 = vsel %vm223_vm6, %v624_v51, 0.0 }
 0x1a8   :  { %v255_v54 = vsel %vm223_vm6, %v626_v52, 0.0 }
 0x1a9   :  { %v256_v55 = vadd.f32 %v255_v54, %v254_v53 }
 0x1ab   :  { %v628_v56 = vpop.eup %627  ;;  %v257_v57 = vrot.slane %v256_v55, 4 }
 0x1ac   :  { %v630_v58 = vpop.eup %629  ;;  %v263_v59 = vsel %vm223_vm6, %v628_v56, 0.0 }
 0x1ad   :  { %v258_v60 = vadd.f32 %v257_v57, %v256_v55  ;;  %v264_v61 = vsel %vm223_vm6, %v630_v58, 0.0 }
 0x1ae   :  { %v265_v62 = vadd.f32 %v264_v61, %v263_v59 }
 0x1af   :  { %v259_v63 = vrot.slane %v258_v60, 2 }
 0x1b0   :  { %v266_v0 = vrot.slane %v265_v62, 4 }
 0x1b1   :  { %v260_v1 = vadd.f32 %v259_v63, %v258_v60 }
 0x1b2   :  { %v267_v3 = vadd.f32 %v266_v0, %v265_v62  ;;  %v586_v0 = vld [vmem:[%s893_s7 + $0x10] sm:$0xff] }
 0x1b3   :  { %v261_v5 = vrot.slane %v260_v1, 1  ;;  %423 = vmatpush.bf16.msra.mxu1 %v586_v0 }
 0x1b4   :  { %v268_v6 = vrot.slane %v267_v3, 2 }
 0x1b5   :  { %v262_v9 = vadd.f32 %v261_v5, %v260_v1  ;;  %v585_v1 = vld [vmem:[%s893_s7 + $0x8] sm:$0xff]  ;;  %v372_v5 = vld [vmem:[%s894_s8] sm:$0x1] }
 0x1b6   :  { %v269_v10 = vadd.f32 %v268_v6, %v267_v3  ;;  %v584_v3 = vld [vmem:[%s893_s7] sm:$0xff]  ;;  %410 = vst [vmem:[#allocation1] ss:$9 sm:$0xff] %v372_v5  ;;  %s677_s7 = smov [#allocation3]  }
 0x1b7   :  { %v272_v11 = vmax.f32 %v262_v9, 1e-30  ;;  %424 = vmatpush.bf16.msra.mxu1 %v585_v1  ;;  %412 = vst [vmem:[#allocation1 + $0x1] ss:$9 sm:$0xff] %v372_v5  ;;  %v42_v6 = vld [vmem:[%s887_s1] sm:$0x1] }
 0x1b8   :  { %v270_v12 = vrot.slane %v269_v10, 1  ;;  %s515_s8 = sshll.u32 %s677_s7, 4  ;;  %s516_s8 = int_to_ptr.vmem [resolvable:$true] %s515_s8 }
 0x1b9   :  { %631 = vrcp.f32 %v272_v11  ;;  %v285_v18 = vand.u32 2147483648, %v272_v11  ;;  %v283_v21 = vand.u32 2147483647, %v272_v11  ;;  %vm279_vm10 = vweird.f32 %v272_v11 }
 0x1ba   :  { %v271_v13 = vadd.f32 %v270_v12, %v269_v10 }
 0x1bb   :  { %v286_v24 = vor.u32 1.1754944e-38, %v285_v18  ;;  %vm284_vm12 = vcmp.eq.f32.partialorder %v283_v21, 8.507059e+37  ;;  %425 = vmatpush.bf16.msra.mxu1 %v584_v3 }
 0x1bc   :  { %v273_v14 = vmax.f32 %v271_v13, 1e-30 }
 0x1be   :  { %633 = vrcp.f32 %v273_v14  ;;  %v301_v27 = vand.u32 2147483648, %v273_v14  ;;  %v299_v30 = vand.u32 2147483647, %v273_v14  ;;  %vm295_vm14 = vweird.f32 %v273_v14 }
 0x1bf   :  { %v632_v15 = vpop.eup %631 }
 0x1c0   :  { %v275_v16 = vmul.f32 %v632_v15, %v272_v11  ;;  %vm280_vm9 = vweird.f32 %v632_v15  ;;  %v302_v34 = vor.u32 1.1754944e-38, %v301_v27  ;;  %vm300_vm2 = vcmp.eq.f32.partialorder %v299_v30, 8.507059e+37 }
 0x1c1   :  { %vm281_vm11 = vmor %vm279_vm10, %vm280_vm9  ;;  %vm506_vm10 = vcmask 253952  }
 0x1c2   :  { %v276_v17 = vsub.f32 1.0, %v275_v16 }
 0x1c4   :  { %v634_v19 = vpop.eup %633  ;;  %v277_v20 = vmul.f32 %v632_v15, %v276_v17 }
 0x1c5   :  { %v291_v22 = vmul.f32 %v634_v19, %v273_v14  ;;  %vm296_vm13 = vweird.f32 %v634_v19 }
 0x1c6   :  { %v278_v23 = vadd.f32 %v632_v15, %v277_v20  ;;  %vm297_vm15 = vmor %vm295_vm14, %vm296_vm13 }
 0x1c7   :  { %v292_v25 = vsub.f32 1.0, %v291_v22 }
 0x1c8   :  { %v282_v26 = vsel %vm281_vm11, %v632_v15, %v278_v23  ;;  %v413_v23 = vld [vmem:[#allocation1] sm:$0xff] }
 0x1c9   :  { %v287_v28 = vsel %vm284_vm12, %v286_v24, %v282_v26  ;;  %v293_v29 = vmul.f32 %v634_v19, %v292_v25 }
 0x1ca   :  { %v288_v31 = vmul.f32 %v624_v51, %v287_v28  ;;  %v289_v32 = vmul.f32 %v626_v52, %v287_v28 }
 0x1cb   :  { %v294_v33 = vadd.f32 %v634_v19, %v293_v29 }
 0x1cc   :  { %312 = vperm.xlu2 %611, %v288_v31   ;;  %306 = vst.msk [vmem:[%s895_s9] sm:$0xff] %vm223_vm6, %v288_v31 }
 0x1cd   :  { %v298_v35 = vsel %vm297_vm15, %v634_v19, %v294_v33  ;;  %307 = vst.msk [vmem:[%s895_s9 + $0x8] sm:$0xff] %vm223_vm6, %v289_v32 }
 0x1ce   :  { %v303_v36 = vsel %vm300_vm2, %v302_v34, %v298_v35 }
 0x1cf   :  { %v304_v37 = vmul.f32 %v628_v56, %v303_v36  ;;  %v305_v38 = vmul.f32 %v630_v58, %v303_v36 }
 0x1d1   :  { %308 = vst.msk [vmem:[%s895_s9 + $0x10] sm:$0xff] %vm223_vm6, %v304_v37 }
 0x1d2   :  { %309 = vst.msk [vmem:[%s895_s9 + $0x18] sm:$0xff] %vm223_vm6, %v305_v38 }
 0x1d4   :  { %322 = vperm.xlu2 %611, %v304_v37  }
 0x1dc   :  { %327 = vperm.xlu2 %611, %v305_v38  }
 0x1e4   :  { %317 = vperm.xlu2 %611, %v289_v32  }
 0x226   :  { %v313_v39 = vpop.permute.xlu2 %312 }
 0x227   :  { %v330_v49 = vmul.f32 %v313_v39, %v760_v7 }
 0x229   :  { %v334_v53 = vsel %vm80_vm0, %v330_v49, 0.0 }
 0x22e   :  { %v323_v40 = vpop.permute.xlu2 %322 }
 0x22f   :  { %v332_v42 = vmul.f32 %v323_v40, %v744_v2 }
 0x231   :  { %v343_v45 = vsel %vm80_vm0, %v332_v42, 0.0 }
 0x236   :  { %v328_v43 = vpop.permute.xlu2 %327 }
 0x237   :  { %v333_v44 = vmul.f32 %v328_v43, %v752_v4 }
 0x239   :  { %v344_v46 = vsel %vm80_vm0, %v333_v44, 0.0 }
 0x23a   :  { %v345_v47 = vadd.f32 %v344_v46, %v343_v45 }
 0x23c   :  { %v346_v48 = vrot.slane %v345_v47, 4 }
 0x23e   :  { %v347_v50 = vadd.f32 %v346_v48, %v345_v47  ;;  %v318_v51 = vpop.permute.xlu2 %317 }
 0x23f   :  { %v331_v52 = vmul.f32 %v318_v51, %v765_v8  ;;  %v43_v8 = vld [vmem:[%s887_s1 + $0x1] sm:$0x1]  ;;  %s676_s1 = smov 96  }
 0x240   :  { %v348_v2 = vrot.slane %v347_v50, 2 }
 0x241   :  { %v335_v54 = vsel %vm80_vm0, %v331_v52, 0.0 }
 0x242   :  { %v336_v55 = vadd.f32 %v335_v54, %v334_v53  ;;  %v349_v4 = vadd.f32 %v348_v2, %v347_v50 }
 0x244   :  { %v337_v56 = vrot.slane %v336_v55, 4  ;;  %v350_v60 = vrot.slane %v349_v4, 1 }
 0x246   :  { %v338_v57 = vadd.f32 %v337_v56, %v336_v55  ;;  %v351_v63 = vadd.f32 %v350_v60, %v349_v4 }
 0x248   :  { %v339_v58 = vrot.slane %v338_v57, 2 }
 0x24a   :  { %v340_v59 = vadd.f32 %v339_v58, %v338_v57 }
 0x24c   :  { %v341_v61 = vrot.slane %v340_v59, 1 }
 0x24e   :  { %v342_v62 = vadd.f32 %v341_v61, %v340_v59 }
 0x250   :  { %v612_v7 = vpack.i.bf16 %v342_v62, %v351_v63 }
 0x252   :  { %613 = vrot.lane.b32.xlu0 %v612_v7, %s673_s6 }
 0x25a   :  { %488 = vrot.lane.b32.xlu0 %v43_v8, %s673_s6 }
 0x2c4   :  { %v614_v9 = vpop.permute.xlu0 %613 }
 0x2c5   :  { %v616_v10 = vunpack.i.h.bf16 %v614_v9  ;;  %v615_v11 = vunpack.i.l.bf16 %v614_v9 }
 0x2c7   :  { %v360_v12 = vsel %vm80_vm0, %v42_v6, %v616_v10  ;;  %v361_v13 = vsel %vm80_vm0, %v43_v8, %v615_v11 }
 0x2c8   :  { %v362_v14 = vpack.c.bf16 %v360_v12, %v360_v12  ;;  %v363_v15 = vpack.c.bf16 %v361_v13, %v361_v13 }
 0x2ca   :  { %v375_v16 = vunpack.c.l.b16 %v362_v14  ;;  %v376_v17 = vunpack.c.l.b16 %v363_v15 }
 0x2cc   :  { %v558_v18 = vunpack.i.l.s16 %v376_v17  ;;  %v557_v19 = vunpack.i.l.s16 %v375_v16  ;;  %v489_v48 = vpop.permute.xlu0 %488 }
 0x2ce   :  { %v381_v20 = vrot.slane %v558_v18, 7 }
 0x2d0   :  { %v383_v21 = vsel %vm382_vm3, %v381_v20, %v557_v19 }
 0x2d1   :  { %v384_v22 = vpack.c.b16 %v383_v21, %v383_v21 }
 0x2d3   :  { %575 = vmatmul.msk.bf16.vlgmr.msra.gmra.mxu1 %vm85_vm1, %v384_v22 }
 0x350   :  { %v427_v24 = vpop.f32.mrf.mxu1 }
 0x351   :  { %v428_v25 = vadd.f32 %v427_v24, %v413_v23 }
 0x353   :  { %v432_v26 = vrot.slane %v428_v25, 1  ;;  %635 = vtanh.f32 %v428_v25  ;;  %v576_v34 = vmul.f32 -1.442695, %v428_v25 }
 0x355   :  { %637 = vtanh.f32 %v432_v26  ;;  %v577_v30 = vmul.f32 -1.442695, %v432_v26 }
 0x357   :  { %639 = vpow2.f32 %v577_v30 }
 0x358   :  { %v429_v27 = vpop.f32.mrf.mxu1 }
 0x359   :  { %v636_v28 = vpop.eup %635 }
 0x35a   :  { %476 = vrot.lane.b32.xlu1 %v636_v28, %s673_s6 }
 0x35b   :  { %v638_v29 = vpop.eup %637 }
 0x35c   :  { %478 = vrot.lane.b32.xlu2 %v638_v29, %s673_s6 }
 0x35d   :  { %v640_v31 = vpop.eup %639 }
 0x35e   :  { %v443_v32 = vadd.f32 1.0, %v640_v31 }
 0x360   :  { %641 = vrcp.f32 %v443_v32  ;;  %v470_v41 = vand.u32 2147483648, %v443_v32  ;;  %vm464_vm1 = vweird.f32 %v443_v32  ;;  %v468_v42 = vand.u32 2147483647, %v443_v32 }
 0x361   :  { %643 = vpow2.f32 %v576_v34 }
 0x362   :  { %v471_v44 = vor.u32 1.1754944e-38, %v470_v41  ;;  %vm469_vm5 = vcmp.eq.f32.partialorder %v468_v42, 8.507059e+37 }
 0x364   :  { %486 = vrot.lane.b32.xlu2 %v42_v6, %s673_s6 }
 0x366   :  { %v642_v33 = vpop.eup %641 }
 0x367   :  { %v460_v35 = vmul.f32 %v642_v33, %v443_v32  ;;  %v644_v37 = vpop.eup %643  ;;  %vm465_vm0 = vweird.f32 %v642_v33 }
 0x368   :  { %v442_v39 = vadd.f32 1.0, %v644_v37  ;;  %vm466_vm4 = vmor %vm464_vm1, %vm465_vm0 }
 0x369   :  { %v461_v36 = vsub.f32 1.0, %v460_v35 }
 0x36a   :  { %645 = vrcp.f32 %v442_v39  ;;  %v455_v4 = vand.u32 2147483648, %v442_v39  ;;  %vm449_vm7 = vweird.f32 %v442_v39  ;;  %v453_v57 = vand.u32 2147483647, %v442_v39 }
 0x36b   :  { %v462_v38 = vmul.f32 %v642_v33, %v461_v36 }
 0x36c   :  { %v456_v59 = vor.u32 1.1754944e-38, %v455_v4  ;;  %vm454_vm9 = vcmp.eq.f32.partialorder %v453_v57, 8.507059e+37 }
 0x36d   :  { %v463_v40 = vadd.f32 %v642_v33, %v462_v38 }
 0x36f   :  { %v467_v43 = vsel %vm466_vm4, %v642_v33, %v463_v40 }
 0x370   :  { %v472_v45 = vsel %vm469_vm5, %v471_v44, %v467_v43  ;;  %v646_v46 = vpop.eup %645 }
 0x371   :  { %v485_v47 = vsub.f32 1.0, %v472_v45  ;;  %v445_v49 = vmul.f32 %v646_v46, %v442_v39  ;;  %vm450_vm6 = vweird.f32 %v646_v46 }
 0x372   :  { %vm451_vm8 = vmor %vm449_vm7, %vm450_vm6 }
 0x373   :  { %v493_v51 = vmul.f32 %v489_v48, %v485_v47  ;;  %v446_v54 = vsub.f32 1.0, %v445_v49 }
 0x375   :  { %v447_v55 = vmul.f32 %v646_v46, %v446_v54 }
 0x377   :  { %v448_v56 = vadd.f32 %v646_v46, %v447_v55 }
 0x379   :  { %v452_v58 = vsel %vm451_vm8, %v646_v46, %v448_v56 }
 0x37a   :  { %v457_v60 = vsel %vm454_vm9, %v456_v59, %v452_v58 }
 0x37b   :  { %v484_v62 = vsub.f32 1.0, %v457_v60 }
 0x3b6   :  { %v479_v50 = vpop.permute.xlu2 %478 }
 0x3b7   :  { %v483_v52 = vmul.f32 %v479_v50, %v472_v45 }
 0x3b9   :  { %v495_v53 = vadd.f32 %v493_v51, %v483_v52 }
 0x3bb   :  { %v499_v2 = vperm.slane %v495_v53, 0 }
 0x3bd   :  { %502 = vrot.lane.b32.xlu1 %v499_v2, %s676_s1 }
 0x3be   :  { %v487_v61 = vpop.permute.xlu2 %486 }
 0x3bf   :  { %v492_v7 = vmul.f32 %v487_v61, %v484_v62 }
 0x3cc   :  { %v477_v63 = vpop.permute.xlu1 %476 }
 0x3cd   :  { %v482_v8 = vmul.f32 %v477_v63, %v457_v60 }
 0x3cf   :  { %v494_v0 = vadd.f32 %v492_v7, %v482_v8 }
 0x3d1   :  { %v498_v1 = vperm.slane %v494_v0, 0 }
 0x3d3   :  { %500 = vrot.lane.b32.xlu2 %v498_v1, %s676_s1 }
 0x42d   :  { %v501_v3 = vpop.permute.xlu2 %500 }
 0x42e   :  { %507 = vst.msk [vmem:[#allocation3] sm:$0x1] %vm506_vm10, %v501_v3 }
 0x42f   :  { %v503_v5 = vpop.permute.xlu1 %502 }
 0x430   :  { %508 = vst.msk [vmem:[#allocation3 + $0x1] sm:$0x1] %vm506_vm10, %v503_v5 }
 0x431   :  { %523 = dma.vmem_to_hbm [thread:$0]  %s516_s8, 32, %s518_s25, [#allocation4], %s678_s26, %s678_s26, %s679_s27  }
 0x432   :  { %671 = dma.done.wait [#allocation4], 32  }
 0x433   :  { %672 = vsyncadd [#allocation4], 4294967264 }
 0x434   :  { %530 = vsyncpa [#allocation4], 1 }

// kernel: play_reader_forward.19
= control target key start
LH: loop header
LB: loop body
LE: loop exit
PB: predicated region body
PF: predicated region fallthrough
CT: control target
= control target key end

     0   :  { %vm18_vm0 = vcmask 254976   ;;  %v1431_v1 = vmov 0.0   ;;  %vm44_vm1 = vcmask 261120   ;;  %s1432_s20 = smov 64   ;;  %s1433_s23 = smov 96   ;;  %s1807_s2 = inlined_call_operand.vmem [shape: bf16[32,96], index: 2, kind: input, shape index: {}]   ;;  %s1808_s3 = inlined_call_operand.vmem [shape: f32[1,96], index: 3, kind: input, shape index: {}]   ;;  %s1809_s0 = inlined_call_operand.vmem [shape: f32[16,2,96], index: 0, kind: input, shape index: {}]   ;;  %s1810_s1 = inlined_call_operand.vmem [shape: f32[16,2,32], index: 1, kind: input, shape index: {}]   ;;  %s1811_s4 = inlined_call_operand.vmem [shape: f32[16,2,32], index: 4, kind: output, shape index: {}]  }
   0x1   :  { %v1463_v0 = vld [vmem:[%s1807_s2 + $0x8] sm:$0xff]  ;;  %19 = vst.msk [vmem:[#allocation2] sm:$0x3] %vm18_vm0, %v1431_v1  ;;  %v1470_v2 = vld [vmem:[%s1807_s2] sm:$0xff]  ;;  %s1434_s24 = smov 32  }
   0x2   :  { %54 = vmatpush.bf16.msra.mxu0 %v1463_v0  ;;  %128 = vmatpush.bf16.msra.mxu1 %v1463_v0  ;;  %v1497_v5 = vld [vmem:[%s1808_s3] ss:$0 sm:$0xff]  ;;  %v1252_v44 = vld [vmem:[%s1809_s0 + $0x2] sm:$0x3] }
   0x3   :  { %203 = vmatpush.bf16.msra.mxu2 %v1463_v0  ;;  %278 = vmatpush.bf16.msra.mxu3 %v1463_v0  ;;  %v26_v9 = vld [vmem:[%s1809_s0] sm:$0x3] }
   0x4   :  { %v27_v35 = vld [vmem:[%s1810_s1] sm:$0x3] }
   0x5   :  { %vm104_vm6 = vcmp.gt.f32.partialorder %v27_v35, 0.0 }
   0x6   :  { %55 = vmatpush.bf16.msra.mxu0 %v1470_v2  ;;  %129 = vmatpush.bf16.msra.mxu1 %v1470_v2 }
   0x7   :  { %204 = vmatpush.bf16.msra.mxu2 %v1470_v2  ;;  %279 = vmatpush.bf16.msra.mxu3 %v1470_v2 }
   0x8   :  { %v1477_v3 = vld [vmem:[#allocation2] sm:$0x3] }
   0x9   :  { %v28_v4 = vpack.c.bf16 %v1477_v3, %v1477_v3 }
   0xa   :  { %353 = vmatpush.bf16.msrb.mxu0 %v1463_v0  ;;  %428 = vmatpush.bf16.msrb.mxu1 %v1463_v0 }
   0xb   :  { %503 = vmatpush.bf16.msrb.mxu2 %v1463_v0  ;;  %578 = vmatpush.bf16.msrb.mxu3 %v1463_v0 }
   0xc   :  { %1250 = vmatmul.msk.bf16.vlgmr.msra.gmra.mxu0 %vm44_vm1, %v28_v4 }
   0xe   :  { %354 = vmatpush.bf16.msrb.mxu0 %v1470_v2  ;;  %429 = vmatpush.bf16.msrb.mxu1 %v1470_v2 }
   0xf   :  { %504 = vmatpush.bf16.msrb.mxu2 %v1470_v2  ;;  %579 = vmatpush.bf16.msrb.mxu3 %v1470_v2 }
  0x12   :  { %653 = vmatpush.bf16.msra.mxu0 %v1463_v0 }
  0x16   :  { %654 = vmatpush.bf16.msra.mxu0 %v1470_v2 }
  0x89   :  { %v57_v6 = vpop.f32.mrf.mxu0 }
  0x8a   :  { %v58_v7 = vadd.f32 %v1497_v5, %v57_v6 }
  0x8c   :  { %82 = vrot.lane.b32.xlu0 %v58_v7, %s1432_s20  ;;  %v61_v10 = vadd.f32 %v58_v7, %v26_v9 }
  0x8e   :  { %v1251_v11 = vmul.f32 -1.442695, %v61_v10 }
  0x90   :  { %1334 = vpow2.f32 %v1251_v11 }
  0x91   :  { %v59_v8 = vpop.f32.mrf.mxu0 }
  0x96   :  { %v1335_v12 = vpop.eup %1334 }
  0x97   :  { %v65_v13 = vadd.f32 1.0, %v1335_v12 }
  0x99   :  { %1336 = vrcp.f32 %v65_v13  ;;  %v77_v19 = vand.u32 2147483648, %v65_v13  ;;  %vm71_vm3 = vweird.f32 %v65_v13  ;;  %v75_v20 = vand.u32 2147483647, %v65_v13 }
  0x9b   :  { %v78_v22 = vor.u32 1.1754944e-38, %v77_v19  ;;  %vm76_vm5 = vcmp.eq.f32.partialorder %v75_v20, 8.507059e+37 }
  0x9f   :  { %v1337_v14 = vpop.eup %1336 }
  0xa0   :  { %v67_v15 = vmul.f32 %v1337_v14, %v65_v13  ;;  %vm72_vm2 = vweird.f32 %v1337_v14 }
  0xa1   :  { %vm73_vm4 = vmor %vm71_vm3, %vm72_vm2 }
  0xa2   :  { %v68_v16 = vsub.f32 1.0, %v67_v15 }
  0xa4   :  { %v69_v17 = vmul.f32 %v1337_v14, %v68_v16 }
  0xa6   :  { %v70_v18 = vadd.f32 %v1337_v14, %v69_v17 }
  0xa8   :  { %v74_v21 = vsel %vm73_vm4, %v1337_v14, %v70_v18  ;;  %v1257_v18 = vld [vmem:[%s1809_s0 + $0x4] sm:$0x3] }
  0xa9   :  { %v79_v24 = vsel %vm76_vm5, %v78_v22, %v74_v21 }
  0xaa   :  { %v92_v30 = vsub.f32 1.0, %v79_v24 }
  0xfe   :  { %v83_v23 = vpop.permute.xlu0 %82 }
  0xff   :  { %v85_v25 = vmul.f32 %v83_v23, %v79_v24 }
 0x101   :  { %87 = vrot.lane.b32.xlu0 %v85_v25, %s1432_s20 }
 0x173   :  { %v88_v26 = vpop.permute.xlu0 %87 }
 0x174   :  { %v90_v27 = vadd.f32 %v88_v26, %v26_v9  ;;  %v1253_v9 = vld [vmem:[%s1810_s1 + $0x2] sm:$0x3] }
 0x175   :  { %vm178_vm11 = vcmp.gt.f32.partialorder %v1253_v9, 0.0 }
 0x176   :  { %1338 = vtanh.f32 %v90_v27 }
 0x17c   :  { %v1339_v28 = vpop.eup %1338 }
 0x17d   :  { %94 = vrot.lane.b32.xlu1 %v1339_v28, %s1433_s23 }
 0x185   :  { %99 = vrot.lane.b32.xlu1 %v1477_v3, %s1434_s24 }
 0x1ef   :  { %v95_v29 = vpop.permute.xlu1 %94 }
 0x1f0   :  { %v97_v32 = vmul.f32 %v95_v29, %v92_v30 }
 0x1f7   :  { %v100_v31 = vpop.permute.xlu1 %99 }
 0x1f8   :  { %v102_v33 = vmul.f32 %v100_v31, %v79_v24 }
 0x1fa   :  { %v103_v34 = vadd.f32 %v102_v33, %v97_v32 }
 0x1fc   :  { %106 = vrot.lane.b32.xlu2 %v103_v34, %s1433_s23 }
 0x256   :  { %v107_v36 = vpop.permute.xlu2 %106 }
 0x257   :  { %v109_v37 = vsel %vm104_vm6, %v107_v36, %v1477_v3  ;;  %v111_v38 = vsel %vm104_vm6, %v107_v36, 0.0 }
 0x258   :  { %110 = vst.msk [vmem:[#allocation2] sm:$0x3] %vm18_vm0, %v109_v37 }
 0x259   :  { %112 = vst.msk [vmem:[%s1811_s4] sm:$0x3] %vm18_vm0, %v111_v38 }
 0x25f   :  { %v113_v39 = vld [vmem:[#allocation2] sm:$0x3] }
 0x260   :  { %v118_v40 = vpack.c.bf16 %v113_v39, %v113_v39 }
 0x262   :  { %1254 = vmatmul.msk.bf16.vlgmr.msra.gmra.mxu1 %vm44_vm1, %v118_v40 }
 0x263   :  { %728 = vmatpush.bf16.msra.mxu1 %v1463_v0 }
 0x267   :  { %729 = vmatpush.bf16.msra.mxu1 %v1470_v2 }
 0x2df   :  { %v131_v41 = vpop.f32.mrf.mxu1 }
 0x2e0   :  { %v132_v42 = vadd.f32 %v1497_v5, %v131_v41 }
 0x2e2   :  { %156 = vrot.lane.b32.xlu2 %v132_v42, %s1432_s20  ;;  %v135_v45 = vadd.f32 %v1252_v44, %v132_v42 }
 0x2e4   :  { %v1255_v46 = vmul.f32 -1.442695, %v135_v45 }
 0x2e6   :  { %1340 = vpow2.f32 %v1255_v46 }
 0x2e7   :  { %v133_v43 = vpop.f32.mrf.mxu1 }
 0x2ea   :  { %173 = vrot.lane.b32.xlu2 %v113_v39, %s1434_s24 }
 0x2ec   :  { %v1341_v47 = vpop.eup %1340 }
 0x2ed   :  { %v139_v48 = vadd.f32 1.0, %v1341_v47 }
 0x2ef   :  { %1342 = vrcp.f32 %v139_v48  ;;  %v151_v54 = vand.u32 2147483648, %v139_v48  ;;  %vm145_vm8 = vweird.f32 %v139_v48  ;;  %v149_v55 = vand.u32 2147483647, %v139_v48 }
 0x2f1   :  { %v152_v57 = vor.u32 1.1754944e-38, %v151_v54  ;;  %vm150_vm10 = vcmp.eq.f32.partialorder %v149_v55, 8.507059e+37 }
 0x2f5   :  { %v1343_v49 = vpop.eup %1342 }
 0x2f6   :  { %v141_v50 = vmul.f32 %v1343_v49, %v139_v48  ;;  %vm146_vm7 = vweird.f32 %v1343_v49 }
 0x2f7   :  { %vm147_vm9 = vmor %vm145_vm8, %vm146_vm7 }
 0x2f8   :  { %v142_v51 = vsub.f32 1.0, %v141_v50 }
 0x2fa   :  { %v143_v52 = vmul.f32 %v1343_v49, %v142_v51 }
 0x2fc   :  { %v144_v53 = vadd.f32 %v1343_v49, %v143_v52 }
 0x2fe   :  { %v148_v56 = vsel %vm147_vm9, %v1343_v49, %v144_v53  ;;  %v1262_v53 = vld [vmem:[%s1809_s0 + $0x6] sm:$0x3] }
 0x2ff   :  { %v153_v59 = vsel %vm150_vm10, %v152_v57, %v148_v56 }
 0x300   :  { %v166_v3 = vsub.f32 1.0, %v153_v59 }
 0x33c   :  { %v157_v58 = vpop.permute.xlu2 %156 }
 0x33d   :  { %v159_v60 = vmul.f32 %v157_v58, %v153_v59 }
 0x33f   :  { %161 = vrot.lane.b32.xlu0 %v159_v60, %s1432_s20 }
 0x344   :  { %v174_v1 = vpop.permute.xlu2 %173 }
 0x345   :  { %v176_v6 = vmul.f32 %v174_v1, %v153_v59 }
 0x3b1   :  { %v162_v61 = vpop.permute.xlu0 %161 }
 0x3b2   :  { %v164_v62 = vadd.f32 %v1252_v44, %v162_v61  ;;  %v1258_v44 = vld [vmem:[%s1810_s1 + $0x4] sm:$0x3] }
 0x3b3   :  { %vm253_vm2 = vcmp.gt.f32.partialorder %v1258_v44, 0.0 }
 0x3b4   :  { %1344 = vtanh.f32 %v164_v62 }
 0x3ba   :  { %v1345_v63 = vpop.eup %1344 }
 0x3bb   :  { %168 = vrot.lane.b32.xlu1 %v1345_v63, %s1433_s23 }
 0x42d   :  { %v169_v4 = vpop.permute.xlu1 %168 }
 0x42e   :  { %v171_v7 = vmul.f32 %v169_v4, %v166_v3 }
 0x430   :  { %v177_v8 = vadd.f32 %v176_v6, %v171_v7 }
 0x432   :  { %180 = vrot.lane.b32.xlu0 %v177_v8, %s1433_s23 }
 0x4a4   :  { %v181_v10 = vpop.permute.xlu0 %180 }
 0x4a5   :  { %v183_v11 = vsel %vm178_vm11, %v181_v10, %v113_v39  ;;  %v185_v12 = vsel %vm178_vm11, %v181_v10, 0.0 }
 0x4a6   :  { %184 = vst.msk [vmem:[#allocation2] sm:$0x3] %vm18_vm0, %v183_v11 }
 0x4a7   :  { %1256 = vst.msk [vmem:[%s1811_s4 + $0x2] sm:$0x3] %vm18_vm0, %v185_v12 }
 0x4ad   :  { %v188_v13 = vld [vmem:[#allocation2] sm:$0x3] }
 0x4ae   :  { %v193_v14 = vpack.c.bf16 %v188_v13, %v188_v13 }
 0x4b0   :  { %1259 = vmatmul.msk.bf16.vlgmr.msra.gmra.mxu2 %vm44_vm1, %v193_v14 }
 0x4b1   :  { %803 = vmatpush.bf16.msra.mxu2 %v1463_v0 }
 0x4b5   :  { %804 = vmatpush.bf16.msra.mxu2 %v1470_v2 }
 0x533   :  { %v206_v15 = vpop.f32.mrf.mxu2 }
 0x534   :  { %v207_v16 = vadd.f32 %v1497_v5, %v206_v15 }
 0x536   :  { %231 = vrot.lane.b32.xlu1 %v207_v16, %s1432_s20  ;;  %v210_v19 = vadd.f32 %v1257_v18, %v207_v16 }
 0x538   :  { %v1260_v20 = vmul.f32 -1.442695, %v210_v19 }
 0x53a   :  { %1346 = vpow2.f32 %v1260_v20 }
 0x53b   :  { %v208_v17 = vpop.f32.mrf.mxu2 }
 0x53e   :  { %248 = vrot.lane.b32.xlu1 %v188_v13, %s1434_s24 }
 0x540   :  { %v1347_v21 = vpop.eup %1346 }
 0x541   :  { %v214_v22 = vadd.f32 1.0, %v1347_v21 }
 0x543   :  { %1348 = vrcp.f32 %v214_v22  ;;  %v226_v28 = vand.u32 2147483648, %v214_v22  ;;  %vm220_vm13 = vweird.f32 %v214_v22  ;;  %v224_v29 = vand.u32 2147483647, %v214_v22 }
 0x545   :  { %v227_v31 = vor.u32 1.1754944e-38, %v226_v28  ;;  %vm225_vm15 = vcmp.eq.f32.partialorder %v224_v29, 8.507059e+37 }
 0x549   :  { %v1349_v23 = vpop.eup %1348 }
 0x54a   :  { %v216_v24 = vmul.f32 %v1349_v23, %v214_v22  ;;  %vm221_vm12 = vweird.f32 %v1349_v23 }
 0x54b   :  { %vm222_vm14 = vmor %vm220_vm13, %vm221_vm12 }
 0x54c   :  { %v217_v25 = vsub.f32 1.0, %v216_v24 }
 0x54e   :  { %v218_v26 = vmul.f32 %v1349_v23, %v217_v25 }
 0x550   :  { %v219_v27 = vadd.f32 %v1349_v23, %v218_v26 }
 0x552   :  { %v223_v30 = vsel %vm222_vm14, %v1349_v23, %v219_v27  ;;  %v1267_v27 = vld [vmem:[%s1809_s0 + $0x8] sm:$0x3] }
 0x553   :  { %v228_v33 = vsel %vm225_vm15, %v227_v31, %v223_v30 }
 0x554   :  { %v241_v39 = vsub.f32 1.0, %v228_v33 }
 0x5a8   :  { %v232_v32 = vpop.permute.xlu1 %231 }
 0x5a9   :  { %v234_v34 = vmul.f32 %v232_v32, %v228_v33 }
 0x5ab   :  { %236 = vrot.lane.b32.xlu2 %v234_v34, %s1432_s20 }
 0x5b0   :  { %v249_v38 = vpop.permute.xlu1 %248 }
 0x5b1   :  { %v251_v41 = vmul.f32 %v249_v38, %v228_v33 }
 0x605   :  { %v237_v35 = vpop.permute.xlu2 %236 }
 0x606   :  { %v239_v36 = vadd.f32 %v1257_v18, %v237_v35  ;;  %v1263_v18 = vld [vmem:[%s1810_s1 + $0x6] sm:$0x3] }
 0x607   :  { %vm328_vm7 = vcmp.gt.f32.partialorder %v1263_v18, 0.0 }
 0x608   :  { %1350 = vtanh.f32 %v239_v36 }
 0x60e   :  { %v1351_v37 = vpop.eup %1350 }
 0x60f   :  { %243 = vrot.lane.b32.xlu0 %v1351_v37, %s1433_s23 }
 0x681   :  { %v244_v40 = vpop.permute.xlu0 %243 }
 0x682   :  { %v246_v42 = vmul.f32 %v244_v40, %v241_v39 }
 0x684   :  { %v252_v43 = vadd.f32 %v251_v41, %v246_v42 }
 0x686   :  { %255 = vrot.lane.b32.xlu2 %v252_v43, %s1433_s23 }
 0x6e0   :  { %v256_v45 = vpop.permute.xlu2 %255 }
 0x6e1   :  { %v258_v46 = vsel %vm253_vm2, %v256_v45, %v188_v13  ;;  %v260_v47 = vsel %vm253_vm2, %v256_v45, 0.0 }
 0x6e2   :  { %259 = vst.msk [vmem:[#allocation2] sm:$0x3] %vm18_vm0, %v258_v46 }
 0x6e3   :  { %1261 = vst.msk [vmem:[%s1811_s4 + $0x4] sm:$0x3] %vm18_vm0, %v260_v47 }
 0x6e9   :  { %v263_v48 = vld [vmem:[#allocation2] sm:$0x3] }
 0x6ea   :  { %v268_v49 = vpack.c.bf16 %v263_v48, %v263_v48 }
 0x6ec   :  { %1264 = vmatmul.msk.bf16.vlgmr.msra.gmra.mxu3 %vm44_vm1, %v268_v49 }
 0x6ed   :  { %878 = vmatpush.bf16.msra.mxu3 %v1463_v0 }
 0x6f1   :  { %879 = vmatpush.bf16.msra.mxu3 %v1470_v2 }
 0x76f   :  { %v281_v50 = vpop.f32.mrf.mxu3 }
 0x770   :  { %v282_v51 = vadd.f32 %v1497_v5, %v281_v50 }
 0x772   :  { %306 = vrot.lane.b32.xlu0 %v282_v51, %s1432_s20  ;;  %v285_v54 = vadd.f32 %v1262_v53, %v282_v51 }
 0x774   :  { %v1265_v55 = vmul.f32 -1.442695, %v285_v54 }
 0x776   :  { %1352 = vpow2.f32 %v1265_v55 }
 0x777   :  { %v283_v52 = vpop.f32.mrf.mxu3 }
 0x77a   :  { %323 = vrot.lane.b32.xlu0 %v263_v48, %s1434_s24 }
 0x77c   :  { %v1353_v56 = vpop.eup %1352 }
 0x77d   :  { %v289_v57 = vadd.f32 1.0, %v1353_v56 }
 0x77f   :  { %1354 = vrcp.f32 %v289_v57  ;;  %v301_v63 = vand.u32 2147483648, %v289_v57  ;;  %vm295_vm4 = vweird.f32 %v289_v57  ;;  %v299_v1 = vand.u32 2147483647, %v289_v57 }
 0x781   :  { %v302_v4 = vor.u32 1.1754944e-38, %v301_v63  ;;  %vm300_vm6 = vcmp.eq.f32.partialorder %v299_v1, 8.507059e+37 }
 0x785   :  { %v1355_v58 = vpop.eup %1354 }
 0x786   :  { %v291_v59 = vmul.f32 %v1355_v58, %v289_v57  ;;  %vm296_vm3 = vweird.f32 %v1355_v58 }
 0x787   :  { %vm297_vm5 = vmor %vm295_vm4, %vm296_vm3 }
 0x788   :  { %v292_v60 = vsub.f32 1.0, %v291_v59 }
 0x78a   :  { %v293_v61 = vmul.f32 %v1355_v58, %v292_v60 }
 0x78c   :  { %v294_v62 = vadd.f32 %v1355_v58, %v293_v61 }
 0x78e   :  { %v298_v3 = vsel %vm297_vm5, %v1355_v58, %v294_v62  ;;  %v1272_v62 = vld [vmem:[%s1809_s0 + $0xa] sm:$0x3] }
 0x78f   :  { %v303_v7 = vsel %vm300_vm6, %v302_v4, %v298_v3 }
 0x790   :  { %v316_v13 = vsub.f32 1.0, %v303_v7 }
 0x7e4   :  { %v307_v6 = vpop.permute.xlu0 %306 }
 0x7e5   :  { %v309_v8 = vmul.f32 %v307_v6, %v303_v7 }
 0x7e7   :  { %311 = vrot.lane.b32.xlu1 %v309_v8, %s1432_s20 }
 0x7ec   :  { %v324_v12 = vpop.permute.xlu0 %323 }
 0x7ed   :  { %v326_v15 = vmul.f32 %v324_v12, %v303_v7 }
 0x859   :  { %v312_v9 = vpop.permute.xlu1 %311 }
 0x85a   :  { %v314_v10 = vadd.f32 %v1262_v53, %v312_v9  ;;  %v1268_v53 = vld [vmem:[%s1810_s1 + $0x8] sm:$0x3] }
 0x85b   :  { %vm403_vm12 = vcmp.gt.f32.partialorder %v1268_v53, 0.0 }
 0x85c   :  { %1356 = vtanh.f32 %v314_v10 }
 0x862   :  { %v1357_v11 = vpop.eup %1356 }
 0x863   :  { %318 = vrot.lane.b32.xlu2 %v1357_v11, %s1433_s23 }
 0x8bd   :  { %v319_v14 = vpop.permute.xlu2 %318 }
 0x8be   :  { %v321_v16 = vmul.f32 %v319_v14, %v316_v13 }
 0x8c0   :  { %v327_v17 = vadd.f32 %v326_v15, %v321_v16 }
 0x8c2   :  { %330 = vrot.lane.b32.xlu1 %v327_v17, %s1433_s23 }
 0x934   :  { %v331_v19 = vpop.permute.xlu1 %330 }
 0x935   :  { %v333_v20 = vsel %vm328_vm7, %v331_v19, %v263_v48  ;;  %v335_v21 = vsel %vm328_vm7, %v331_v19, 0.0 }
 0x936   :  { %334 = vst.msk [vmem:[#allocation2] sm:$0x3] %vm18_vm0, %v333_v20 }
 0x937   :  { %1266 = vst.msk [vmem:[%s1811_s4 + $0x6] sm:$0x3] %vm18_vm0, %v335_v21 }
 0x93d   :  { %v338_v22 = vld [vmem:[#allocation2] sm:$0x3] }
 0x93e   :  { %v343_v23 = vpack.c.bf16 %v338_v22, %v338_v22 }
 0x940   :  { %1269 = vmatmul.msk.bf16.vlgmr.msrb.gmra.mxu0 %vm44_vm1, %v343_v23 }
 0x941   :  { %953 = vmatpush.bf16.msrb.mxu0 %v1463_v0 }
 0x945   :  { %954 = vmatpush.bf16.msrb.mxu0 %v1470_v2 }
 0x9bd   :  { %v356_v24 = vpop.f32.mrf.mxu0 }
 0x9be   :  { %v357_v25 = vadd.f32 %v1497_v5, %v356_v24 }
 0x9c0   :  { %381 = vrot.lane.b32.xlu2 %v357_v25, %s1432_s20  ;;  %v360_v28 = vadd.f32 %v1267_v27, %v357_v25 }
 0x9c2   :  { %v1270_v29 = vmul.f32 -1.442695, %v360_v28 }
 0x9c4   :  { %1358 = vpow2.f32 %v1270_v29 }
 0x9c5   :  { %v358_v26 = vpop.f32.mrf.mxu0 }
 0x9c8   :  { %398 = vrot.lane.b32.xlu2 %v338_v22, %s1434_s24 }
 0x9ca   :  { %v1359_v30 = vpop.eup %1358 }
 0x9cb   :  { %v364_v31 = vadd.f32 1.0, %v1359_v30 }
 0x9cd   :  { %1360 = vrcp.f32 %v364_v31  ;;  %v376_v37 = vand.u32 2147483648, %v364_v31  ;;  %vm370_vm9 = vweird.f32 %v364_v31  ;;  %v374_v38 = vand.u32 2147483647, %v364_v31 }
 0x9cf   :  { %v377_v40 = vor.u32 1.1754944e-38, %v376_v37  ;;  %vm375_vm11 = vcmp.eq.f32.partialorder %v374_v38, 8.507059e+37 }
 0x9d3   :  { %v1361_v32 = vpop.eup %1360 }
 0x9d4   :  { %v366_v33 = vmul.f32 %v1361_v32, %v364_v31  ;;  %vm371_vm8 = vweird.f32 %v1361_v32 }
 0x9d5   :  { %vm372_vm10 = vmor %vm370_vm9, %vm371_vm8 }
 0x9d6   :  { %v367_v34 = vsub.f32 1.0, %v366_v33 }
 0x9d8   :  { %v368_v35 = vmul.f32 %v1361_v32, %v367_v34 }
 0x9da   :  { %v369_v36 = vadd.f32 %v1361_v32, %v368_v35 }
 0x9dc   :  { %v373_v39 = vsel %vm372_vm10, %v1361_v32, %v369_v36  ;;  %v1277_v36 = vld [vmem:[%s1809_s0 + $0xc] sm:$0x3] }
 0x9dd   :  { %v378_v42 = vsel %vm375_vm11, %v377_v40, %v373_v39 }
 0x9de   :  { %v391_v48 = vsub.f32 1.0, %v378_v42 }
 0xa1a   :  { %v382_v41 = vpop.permute.xlu2 %381 }
 0xa1b   :  { %v384_v43 = vmul.f32 %v382_v41, %v378_v42 }
 0xa1d   :  { %386 = vrot.lane.b32.xlu0 %v384_v43, %s1432_s20 }
 0xa22   :  { %v399_v47 = vpop.permute.xlu2 %398 }
 0xa23   :  { %v401_v50 = vmul.f32 %v399_v47, %v378_v42 }
 0xa8f   :  { %v387_v44 = vpop.permute.xlu0 %386 }
 0xa90   :  { %v389_v45 = vadd.f32 %v1267_v27, %v387_v44  ;;  %v1273_v27 = vld [vmem:[%s1810_s1 + $0xa] sm:$0x3] }
 0xa91   :  { %vm478_vm3 = vcmp.gt.f32.partialorder %v1273_v27, 0.0 }
 0xa92   :  { %1362 = vtanh.f32 %v389_v45 }
 0xa98   :  { %v1363_v46 = vpop.eup %1362 }
 0xa99   :  { %393 = vrot.lane.b32.xlu1 %v1363_v46, %s1433_s23 }
 0xb0b   :  { %v394_v49 = vpop.permute.xlu1 %393 }
 0xb0c   :  { %v396_v51 = vmul.f32 %v394_v49, %v391_v48 }
 0xb0e   :  { %v402_v52 = vadd.f32 %v401_v50, %v396_v51 }
 0xb10   :  { %405 = vrot.lane.b32.xlu0 %v402_v52, %s1433_s23 }
 0xb82   :  { %v406_v54 = vpop.permute.xlu0 %405 }
 0xb83   :  { %v408_v55 = vsel %vm403_vm12, %v406_v54, %v338_v22  ;;  %v410_v56 = vsel %vm403_vm12, %v406_v54, 0.0 }
 0xb84   :  { %409 = vst.msk [vmem:[#allocation2] sm:$0x3] %vm18_vm0, %v408_v55 }
 0xb85   :  { %1271 = vst.msk [vmem:[%s1811_s4 + $0x8] sm:$0x3] %vm18_vm0, %v410_v56 }
 0xb8b   :  { %v413_v57 = vld [vmem:[#allocation2] sm:$0x3] }
 0xb8c   :  { %v418_v58 = vpack.c.bf16 %v413_v57, %v413_v57 }
 0xb8e   :  { %1274 = vmatmul.msk.bf16.vlgmr.msrb.gmra.mxu1 %vm44_vm1, %v418_v58 }
 0xb8f   :  { %1028 = vmatpush.bf16.msrb.mxu1 %v1463_v0 }
 0xb93   :  { %1029 = vmatpush.bf16.msrb.mxu1 %v1470_v2 }
 0xc0b   :  { %v431_v59 = vpop.f32.mrf.mxu1 }
 0xc0c   :  { %v432_v60 = vadd.f32 %v1497_v5, %v431_v59 }
 0xc0e   :  { %456 = vrot.lane.b32.xlu1 %v432_v60, %s1432_s20  ;;  %v435_v63 = vadd.f32 %v1272_v62, %v432_v60 }
 0xc10   :  { %v1275_v1 = vmul.f32 -1.442695, %v435_v63 }
 0xc12   :  { %1364 = vpow2.f32 %v1275_v1 }
 0xc13   :  { %v433_v61 = vpop.f32.mrf.mxu1 }
 0xc16   :  { %473 = vrot.lane.b32.xlu1 %v413_v57, %s1434_s24 }
 0xc18   :  { %v1365_v3 = vpop.eup %1364 }
 0xc19   :  { %v439_v4 = vadd.f32 1.0, %v1365_v3 }
 0xc1b   :  { %1366 = vrcp.f32 %v439_v4  ;;  %v451_v11 = vand.u32 2147483648, %v439_v4  ;;  %vm445_vm14 = vweird.f32 %v439_v4  ;;  %v449_v12 = vand.u32 2147483647, %v439_v4 }
 0xc1d   :  { %v452_v14 = vor.u32 1.1754944e-38, %v451_v11  ;;  %vm450_vm2 = vcmp.eq.f32.partialorder %v449_v12, 8.507059e+37 }
 0xc21   :  { %v1367_v6 = vpop.eup %1366 }
 0xc22   :  { %v441_v7 = vmul.f32 %v1367_v6, %v439_v4  ;;  %vm446_vm13 = vweird.f32 %v1367_v6 }
 0xc23   :  { %vm447_vm15 = vmor %vm445_vm14, %vm446_vm13 }
 0xc24   :  { %v442_v8 = vsub.f32 1.0, %v441_v7 }
 0xc26   :  { %v443_v9 = vmul.f32 %v1367_v6, %v442_v8 }
 0xc28   :  { %v444_v10 = vadd.f32 %v1367_v6, %v443_v9 }
 0xc2a   :  { %v448_v13 = vsel %vm447_vm15, %v1367_v6, %v444_v10  ;;  %v1282_v10 = vld [vmem:[%s1809_s0 + $0xe] sm:$0x3] }
 0xc2b   :  { %v453_v16 = vsel %vm450_vm2, %v452_v14, %v448_v13 }
 0xc2c   :  { %v466_v22 = vsub.f32 1.0, %v453_v16 }
 0xc80   :  { %v457_v15 = vpop.permute.xlu1 %456 }
 0xc81   :  { %v459_v17 = vmul.f32 %v457_v15, %v453_v16 }
 0xc83   :  { %461 = vrot.lane.b32.xlu2 %v459_v17, %s1432_s20 }
 0xc88   :  { %v474_v21 = vpop.permute.xlu1 %473 }
 0xc89   :  { %v476_v24 = vmul.f32 %v474_v21, %v453_v16 }
 0xcdd   :  { %v462_v18 = vpop.permute.xlu2 %461 }
 0xcde   :  { %v464_v19 = vadd.f32 %v1272_v62, %v462_v18  ;;  %v1278_v62 = vld [vmem:[%s1810_s1 + $0xc] sm:$0x3] }
 0xcdf   :  { %vm553_vm8 = vcmp.gt.f32.partialorder %v1278_v62, 0.0 }
 0xce0   :  { %1368 = vtanh.f32 %v464_v19 }
 0xce6   :  { %v1369_v20 = vpop.eup %1368 }
 0xce7   :  { %468 = vrot.lane.b32.xlu0 %v1369_v20, %s1433_s23 }
 0xd59   :  { %v469_v23 = vpop.permute.xlu0 %468 }
 0xd5a   :  { %v471_v25 = vmul.f32 %v469_v23, %v466_v22 }
 0xd5c   :  { %v477_v26 = vadd.f32 %v476_v24, %v471_v25 }
 0xd5e   :  { %480 = vrot.lane.b32.xlu2 %v477_v26, %s1433_s23 }
 0xdb8   :  { %v481_v28 = vpop.permute.xlu2 %480 }
 0xdb9   :  { %v483_v29 = vsel %vm478_vm3, %v481_v28, %v413_v57  ;;  %v485_v30 = vsel %vm478_vm3, %v481_v28, 0.0 }
 0xdba   :  { %484 = vst.msk [vmem:[#allocation2] sm:$0x3] %vm18_vm0, %v483_v29 }
 0xdbb   :  { %1276 = vst.msk [vmem:[%s1811_s4 + $0xa] sm:$0x3] %vm18_vm0, %v485_v30 }
 0xdc1   :  { %v488_v31 = vld [vmem:[#allocation2] sm:$0x3] }
 0xdc2   :  { %v493_v32 = vpack.c.bf16 %v488_v31, %v488_v31 }
 0xdc4   :  { %1279 = vmatmul.msk.bf16.vlgmr.msrb.gmra.mxu2 %vm44_vm1, %v493_v32 }
 0xdc5   :  { %1103 = vmatpush.bf16.msrb.mxu2 %v1463_v0 }
 0xdc9   :  { %1104 = vmatpush.bf16.msrb.mxu2 %v1470_v2 }
 0xe47   :  { %v506_v33 = vpop.f32.mrf.mxu2 }
 0xe48   :  { %v507_v34 = vadd.f32 %v1497_v5, %v506_v33 }
 0xe4a   :  { %531 = vrot.lane.b32.xlu0 %v507_v34, %s1432_s20  ;;  %v510_v37 = vadd.f32 %v1277_v36, %v507_v34  ;;  %v1283_v34 = vld [vmem:[%s1810_s1 + $0xe] sm:$0x3] }
 0xe4b   :  { %vm628_vm13 = vcmp.gt.f32.partialorder %v1283_v34, 0.0 }
 0xe4c   :  { %v1280_v38 = vmul.f32 -1.442695, %v510_v37 }
 0xe4e   :  { %1370 = vpow2.f32 %v1280_v38 }
 0xe4f   :  { %v508_v35 = vpop.f32.mrf.mxu2 }
 0xe52   :  { %548 = vrot.lane.b32.xlu0 %v488_v31, %s1434_s24 }
 0xe54   :  { %v1371_v39 = vpop.eup %1370 }
 0xe55   :  { %v514_v40 = vadd.f32 1.0, %v1371_v39 }
 0xe57   :  { %1372 = vrcp.f32 %v514_v40  ;;  %v526_v46 = vand.u32 2147483648, %v514_v40  ;;  %vm520_vm5 = vweird.f32 %v514_v40  ;;  %v524_v47 = vand.u32 2147483647, %v514_v40 }
 0xe59   :  { %v527_v49 = vor.u32 1.1754944e-38, %v526_v46  ;;  %vm525_vm7 = vcmp.eq.f32.partialorder %v524_v47, 8.507059e+37 }
 0xe5d   :  { %v1373_v41 = vpop.eup %1372 }
 0xe5e   :  { %v516_v42 = vmul.f32 %v1373_v41, %v514_v40  ;;  %vm521_vm4 = vweird.f32 %v1373_v41 }
 0xe5f   :  { %vm522_vm6 = vmor %vm520_vm5, %vm521_vm4 }
 0xe60   :  { %v517_v43 = vsub.f32 1.0, %v516_v42 }
 0xe62   :  { %v518_v44 = vmul.f32 %v1373_v41, %v517_v43  ;;  %v1287_v43 = vld [vmem:[%s1809_s0 + $0x10] sm:$0x3] }
 0xe64   :  { %v519_v45 = vadd.f32 %v1373_v41, %v518_v44 }
 0xe66   :  { %v523_v48 = vsel %vm522_vm6, %v1373_v41, %v519_v45 }
 0xe67   :  { %v528_v51 = vsel %vm525_vm7, %v527_v49, %v523_v48 }
 0xe68   :  { %v541_v57 = vsub.f32 1.0, %v528_v51 }
 0xebc   :  { %v532_v50 = vpop.permute.xlu0 %531 }
 0xebd   :  { %v534_v52 = vmul.f32 %v532_v50, %v528_v51 }
 0xebf   :  { %536 = vrot.lane.b32.xlu1 %v534_v52, %s1432_s20 }
 0xec4   :  { %v549_v56 = vpop.permute.xlu0 %548 }
 0xec5   :  { %v551_v59 = vmul.f32 %v549_v56, %v528_v51 }
 0xf31   :  { %v537_v53 = vpop.permute.xlu1 %536 }
 0xf32   :  { %v539_v54 = vadd.f32 %v1277_v36, %v537_v53 }
 0xf34   :  { %1374 = vtanh.f32 %v539_v54 }
 0xf3a   :  { %v1375_v55 = vpop.eup %1374 }
 0xf3b   :  { %543 = vrot.lane.b32.xlu2 %v1375_v55, %s1433_s23 }
 0xf95   :  { %v544_v58 = vpop.permute.xlu2 %543 }
 0xf96   :  { %v546_v60 = vmul.f32 %v544_v58, %v541_v57 }
 0xf98   :  { %v552_v61 = vadd.f32 %v551_v59, %v546_v60 }
 0xf9a   :  { %555 = vrot.lane.b32.xlu1 %v552_v61, %s1433_s23 }
0x100c   :  { %v556_v63 = vpop.permute.xlu1 %555 }
0x100d   :  { %v558_v1 = vsel %vm553_vm8, %v556_v63, %v488_v31  ;;  %v560_v3 = vsel %vm553_vm8, %v556_v63, 0.0 }
0x100e   :  { %559 = vst.msk [vmem:[#allocation2] sm:$0x3] %vm18_vm0, %v558_v1 }
0x100f   :  { %1281 = vst.msk [vmem:[%s1811_s4 + $0xc] sm:$0x3] %vm18_vm0, %v560_v3 }
0x1015   :  { %v563_v4 = vld [vmem:[#allocation2] sm:$0x3] }
0x1016   :  { %v568_v6 = vpack.c.bf16 %v563_v4, %v563_v4 }
0x1018   :  { %1284 = vmatmul.msk.bf16.vlgmr.msrb.gmra.mxu3 %vm44_vm1, %v568_v6 }
0x1019   :  { %1178 = vmatpush.bf16.msrb.mxu3 %v1463_v0 }
0x101d   :  { %1179 = vmatpush.bf16.msrb.mxu3 %v1470_v2 }
0x109b   :  { %v581_v7 = vpop.f32.mrf.mxu3 }
0x109c   :  { %v582_v8 = vadd.f32 %v1497_v5, %v581_v7 }
0x109e   :  { %606 = vrot.lane.b32.xlu2 %v582_v8, %s1432_s20  ;;  %v585_v11 = vadd.f32 %v1282_v10, %v582_v8  ;;  %v1288_v8 = vld [vmem:[%s1810_s1 + $0x10] sm:$0x3] }
0x109f   :  { %vm703_vm4 = vcmp.gt.f32.partialorder %v1288_v8, 0.0 }
0x10a0   :  { %v1285_v12 = vmul.f32 -1.442695, %v585_v11 }
0x10a2   :  { %1376 = vpow2.f32 %v1285_v12 }
0x10a3   :  { %v583_v9 = vpop.f32.mrf.mxu3 }
0x10a6   :  { %623 = vrot.lane.b32.xlu2 %v563_v4, %s1434_s24 }
0x10a8   :  { %v1377_v13 = vpop.eup %1376 }
0x10a9   :  { %v589_v14 = vadd.f32 1.0, %v1377_v13 }
0x10ab   :  { %1378 = vrcp.f32 %v589_v14  ;;  %v601_v18 = vand.u32 2147483648, %v589_v14  ;;  %vm595_vm10 = vweird.f32 %v589_v14  ;;  %v599_v19 = vand.u32 2147483647, %v589_v14 }
0x10ad   :  { %v602_v21 = vor.u32 1.1754944e-38, %v601_v18  ;;  %vm600_vm12 = vcmp.eq.f32.partialorder %v599_v19, 8.507059e+37 }
0x10b1   :  { %v1379_v0 = vpop.eup %1378 }
0x10b2   :  { %v591_v2 = vmul.f32 %v1379_v0, %v589_v14  ;;  %vm596_vm9 = vweird.f32 %v1379_v0 }
0x10b3   :  { %vm597_vm11 = vmor %vm595_vm10, %vm596_vm9 }
0x10b4   :  { %v592_v15 = vsub.f32 1.0, %v591_v2 }
0x10b6   :  { %v593_v16 = vmul.f32 %v1379_v0, %v592_v15  ;;  %v1292_v15 = vld [vmem:[%s1809_s0 + $0x12] sm:$0x3] }
0x10b8   :  { %v594_v17 = vadd.f32 %v1379_v0, %v593_v16 }
0x10ba   :  { %v598_v20 = vsel %vm597_vm11, %v1379_v0, %v594_v17 }
0x10bb   :  { %v603_v23 = vsel %vm600_vm12, %v602_v21, %v598_v20 }
0x10bc   :  { %v616_v29 = vsub.f32 1.0, %v603_v23 }
0x10f8   :  { %v607_v22 = vpop.permute.xlu2 %606 }
0x10f9   :  { %v609_v24 = vmul.f32 %v607_v22, %v603_v23 }
0x10fb   :  { %611 = vrot.lane.b32.xlu0 %v609_v24, %s1432_s20 }
0x1100   :  { %v624_v28 = vpop.permute.xlu2 %623 }
0x1101   :  { %v626_v31 = vmul.f32 %v624_v28, %v603_v23 }
0x116d   :  { %v612_v25 = vpop.permute.xlu0 %611 }
0x116e   :  { %v614_v26 = vadd.f32 %v1282_v10, %v612_v25 }
0x1170   :  { %1380 = vtanh.f32 %v614_v26 }
0x1176   :  { %v1381_v27 = vpop.eup %1380 }
0x1177   :  { %618 = vrot.lane.b32.xlu1 %v1381_v27, %s1433_s23 }
0x11e9   :  { %v619_v30 = vpop.permute.xlu1 %618 }
0x11ea   :  { %v621_v32 = vmul.f32 %v619_v30, %v616_v29 }
0x11ec   :  { %v627_v33 = vadd.f32 %v626_v31, %v621_v32 }
0x11ee   :  { %630 = vrot.lane.b32.xlu0 %v627_v33, %s1433_s23 }
0x1260   :  { %v631_v35 = vpop.permute.xlu0 %630 }
0x1261   :  { %v633_v36 = vsel %vm628_vm13, %v631_v35, %v563_v4  ;;  %v635_v37 = vsel %vm628_vm13, %v631_v35, 0.0 }
0x1262   :  { %634 = vst.msk [vmem:[#allocation2] sm:$0x3] %vm18_vm0, %v633_v36 }
0x1263   :  { %1286 = vst.msk [vmem:[%s1811_s4 + $0xe] sm:$0x3] %vm18_vm0, %v635_v37 }
0x1269   :  { %v638_v38 = vld [vmem:[#allocation2] sm:$0x3] }
0x126a   :  { %v643_v39 = vpack.c.bf16 %v638_v38, %v638_v38 }
0x126c   :  { %1289 = vmatmul.msk.bf16.vlgmr.msra.gmra.mxu0 %vm44_vm1, %v643_v39 }
0x12e9   :  { %v656_v40 = vpop.f32.mrf.mxu0 }
0x12ea   :  { %v657_v41 = vadd.f32 %v1497_v5, %v656_v40  ;;  %v1293_v40 = vld [vmem:[%s1810_s1 + $0x12] sm:$0x3] }
0x12eb   :  { %vm778_vm9 = vcmp.gt.f32.partialorder %v1293_v40, 0.0 }
0x12ec   :  { %681 = vrot.lane.b32.xlu1 %v657_v41, %s1432_s20  ;;  %v660_v44 = vadd.f32 %v1287_v43, %v657_v41 }
0x12ee   :  { %v1290_v45 = vmul.f32 -1.442695, %v660_v44 }
0x12f0   :  { %1382 = vpow2.f32 %v1290_v45 }
0x12f1   :  { %v658_v42 = vpop.f32.mrf.mxu0 }
0x12f4   :  { %698 = vrot.lane.b32.xlu1 %v638_v38, %s1434_s24 }
0x12f6   :  { %v1383_v46 = vpop.eup %1382 }
0x12f7   :  { %v664_v47 = vadd.f32 1.0, %v1383_v46 }
0x12f9   :  { %1384 = vrcp.f32 %v664_v47  ;;  %v676_v53 = vand.u32 2147483648, %v664_v47  ;;  %vm670_vm15 = vweird.f32 %v664_v47  ;;  %v674_v54 = vand.u32 2147483647, %v664_v47 }
0x12fb   :  { %v677_v56 = vor.u32 1.1754944e-38, %v676_v53  ;;  %vm675_vm3 = vcmp.eq.f32.partialorder %v674_v54, 8.507059e+37 }
0x12ff   :  { %v1385_v48 = vpop.eup %1384 }
0x1300   :  { %v666_v49 = vmul.f32 %v1385_v48, %v664_v47  ;;  %vm671_vm14 = vweird.f32 %v1385_v48  ;;  %v1698_v47 = vld [vmem:[%s1808_s3] ss:$0 sm:$0xff] }
0x1301   :  { %vm672_vm2 = vmor %vm670_vm15, %vm671_vm14 }
0x1302   :  { %v667_v50 = vsub.f32 1.0, %v666_v49 }
0x1304   :  { %v668_v51 = vmul.f32 %v1385_v48, %v667_v50  ;;  %v1297_v50 = vld [vmem:[%s1809_s0 + $0x14] sm:$0x3] }
0x1306   :  { %v669_v52 = vadd.f32 %v1385_v48, %v668_v51 }
0x1308   :  { %v673_v55 = vsel %vm672_vm2, %v1385_v48, %v669_v52 }
0x1309   :  { %v678_v58 = vsel %vm675_vm3, %v677_v56, %v673_v55 }
0x130a   :  { %v691_v1 = vsub.f32 1.0, %v678_v58 }
0x135e   :  { %v682_v57 = vpop.permute.xlu1 %681 }
0x135f   :  { %v684_v59 = vmul.f32 %v682_v57, %v678_v58 }
0x1361   :  { %686 = vrot.lane.b32.xlu2 %v684_v59, %s1432_s20 }
0x1366   :  { %v699_v63 = vpop.permute.xlu1 %698 }
0x1367   :  { %v701_v4 = vmul.f32 %v699_v63, %v678_v58 }
0x13bb   :  { %v687_v60 = vpop.permute.xlu2 %686 }
0x13bc   :  { %v689_v61 = vadd.f32 %v1287_v43, %v687_v60 }
0x13be   :  { %1386 = vtanh.f32 %v689_v61 }
0x13c4   :  { %v1387_v62 = vpop.eup %1386 }
0x13c5   :  { %693 = vrot.lane.b32.xlu0 %v1387_v62, %s1433_s23 }
0x1437   :  { %v694_v3 = vpop.permute.xlu0 %693 }
0x1438   :  { %v696_v6 = vmul.f32 %v694_v3, %v691_v1 }
0x143a   :  { %v702_v7 = vadd.f32 %v701_v4, %v696_v6 }
0x143c   :  { %705 = vrot.lane.b32.xlu2 %v702_v7, %s1433_s23 }
0x1496   :  { %v706_v9 = vpop.permute.xlu2 %705 }
0x1497   :  { %v708_v10 = vsel %vm703_vm4, %v706_v9, %v638_v38  ;;  %v710_v11 = vsel %vm703_vm4, %v706_v9, 0.0 }
0x1498   :  { %709 = vst.msk [vmem:[#allocation2] sm:$0x3] %vm18_vm0, %v708_v10 }
0x1499   :  { %1291 = vst.msk [vmem:[%s1811_s4 + $0x10] sm:$0x3] %vm18_vm0, %v710_v11 }
0x149f   :  { %v713_v12 = vld [vmem:[#allocation2] sm:$0x3] }
0x14a0   :  { %v718_v13 = vpack.c.bf16 %v713_v12, %v713_v12 }
0x14a2   :  { %1294 = vmatmul.msk.bf16.vlgmr.msra.gmra.mxu1 %vm44_vm1, %v718_v13 }
0x151f   :  { %v731_v14 = vpop.f32.mrf.mxu1 }
0x1520   :  { %v732_v0 = vadd.f32 %v1497_v5, %v731_v14 }
0x1522   :  { %756 = vrot.lane.b32.xlu0 %v732_v0, %s1432_s20  ;;  %v735_v16 = vadd.f32 %v1292_v15, %v732_v0  ;;  %v1298_v0 = vld [vmem:[%s1810_s1 + $0x14] sm:$0x3] }
0x1523   :  { %vm853_vm14 = vcmp.gt.f32.partialorder %v1298_v0, 0.0 }
0x1524   :  { %v1295_v17 = vmul.f32 -1.442695, %v735_v16 }
0x1526   :  { %1388 = vpow2.f32 %v1295_v17 }
0x1527   :  { %v733_v2 = vpop.f32.mrf.mxu1 }
0x152a   :  { %773 = vrot.lane.b32.xlu0 %v713_v12, %s1434_s24 }
0x152c   :  { %v1389_v18 = vpop.eup %1388 }
0x152d   :  { %v739_v19 = vadd.f32 1.0, %v1389_v18 }
0x152f   :  { %1390 = vrcp.f32 %v739_v19  ;;  %v751_v24 = vand.u32 2147483648, %v739_v19  ;;  %vm745_vm6 = vweird.f32 %v739_v19  ;;  %v749_v25 = vand.u32 2147483647, %v739_v19 }
0x1531   :  { %v752_v27 = vor.u32 1.1754944e-38, %v751_v24  ;;  %vm750_vm8 = vcmp.eq.f32.partialorder %v749_v25, 8.507059e+37 }
0x1535   :  { %v1391_v20 = vpop.eup %1390 }
0x1536   :  { %v741_v21 = vmul.f32 %v1391_v20, %v739_v19  ;;  %vm746_vm5 = vweird.f32 %v1391_v20 }
0x1537   :  { %vm747_vm7 = vmor %vm745_vm6, %vm746_vm5 }
0x1538   :  { %v742_v22 = vsub.f32 1.0, %v741_v21 }
0x153a   :  { %v743_v23 = vmul.f32 %v1391_v20, %v742_v22  ;;  %v1302_v22 = vld [vmem:[%s1809_s0 + $0x16] sm:$0x3] }
0x153c   :  { %v744_v5 = vadd.f32 %v1391_v20, %v743_v23 }
0x153e   :  { %v748_v26 = vsel %vm747_vm7, %v1391_v20, %v744_v5 }
0x153f   :  { %v753_v29 = vsel %vm750_vm8, %v752_v27, %v748_v26 }
0x1540   :  { %v766_v35 = vsub.f32 1.0, %v753_v29 }
0x1594   :  { %v757_v28 = vpop.permute.xlu0 %756 }
0x1595   :  { %v759_v30 = vmul.f32 %v757_v28, %v753_v29 }
0x1597   :  { %761 = vrot.lane.b32.xlu1 %v759_v30, %s1432_s20 }
0x159c   :  { %v774_v34 = vpop.permute.xlu0 %773 }
0x159d   :  { %v776_v37 = vmul.f32 %v774_v34, %v753_v29 }
0x1609   :  { %v762_v31 = vpop.permute.xlu1 %761 }
0x160a   :  { %v764_v32 = vadd.f32 %v1292_v15, %v762_v31 }
0x160c   :  { %1392 = vtanh.f32 %v764_v32 }
0x1612   :  { %v1393_v33 = vpop.eup %1392 }
0x1613   :  { %768 = vrot.lane.b32.xlu2 %v1393_v33, %s1433_s23 }
0x166d   :  { %v769_v36 = vpop.permute.xlu2 %768 }
0x166e   :  { %v771_v38 = vmul.f32 %v769_v36, %v766_v35 }
0x1670   :  { %v777_v39 = vadd.f32 %v776_v37, %v771_v38 }
0x1672   :  { %780 = vrot.lane.b32.xlu1 %v777_v39, %s1433_s23 }
0x16e4   :  { %v781_v41 = vpop.permute.xlu1 %780 }
0x16e5   :  { %v783_v42 = vsel %vm778_vm9, %v781_v41, %v713_v12  ;;  %v785_v43 = vsel %vm778_vm9, %v781_v41, 0.0 }
0x16e6   :  { %784 = vst.msk [vmem:[#allocation2] sm:$0x3] %vm18_vm0, %v783_v42 }
0x16e7   :  { %1296 = vst.msk [vmem:[%s1811_s4 + $0x12] sm:$0x3] %vm18_vm0, %v785_v43 }
0x16ed   :  { %v788_v44 = vld [vmem:[#allocation2] sm:$0x3] }
0x16ee   :  { %v793_v45 = vpack.c.bf16 %v788_v44, %v788_v44 }
0x16f0   :  { %1299 = vmatmul.msk.bf16.vlgmr.msra.gmra.mxu2 %vm44_vm1, %v793_v45 }
0x1773   :  { %v806_v46 = vpop.f32.mrf.mxu2 }
0x1774   :  { %v807_v48 = vadd.f32 %v1698_v47, %v806_v46 }
0x1776   :  { %831 = vrot.lane.b32.xlu2 %v807_v48, %s1432_s20  ;;  %v810_v51 = vadd.f32 %v1297_v50, %v807_v48  ;;  %v1303_v48 = vld [vmem:[%s1810_s1 + $0x16] sm:$0x3] }
0x1777   :  { %vm928_vm5 = vcmp.gt.f32.partialorder %v1303_v48, 0.0 }
0x1778   :  { %v1300_v52 = vmul.f32 -1.442695, %v810_v51 }
0x177a   :  { %1394 = vpow2.f32 %v1300_v52 }
0x177b   :  { %v808_v49 = vpop.f32.mrf.mxu2 }
0x177e   :  { %848 = vrot.lane.b32.xlu2 %v788_v44, %s1434_s24 }
0x1780   :  { %v1395_v53 = vpop.eup %1394 }
0x1781   :  { %v814_v54 = vadd.f32 1.0, %v1395_v53 }
0x1783   :  { %1396 = vrcp.f32 %v814_v54  ;;  %v826_v60 = vand.u32 2147483648, %v814_v54  ;;  %vm820_vm11 = vweird.f32 %v814_v54  ;;  %v824_v61 = vand.u32 2147483647, %v814_v54 }
0x1785   :  { %v827_v63 = vor.u32 1.1754944e-38, %v826_v60  ;;  %vm825_vm13 = vcmp.eq.f32.partialorder %v824_v61, 8.507059e+37 }
0x1789   :  { %v1397_v55 = vpop.eup %1396 }
0x178a   :  { %v816_v56 = vmul.f32 %v1397_v55, %v814_v54  ;;  %vm821_vm10 = vweird.f32 %v1397_v55 }
0x178b   :  { %vm822_vm12 = vmor %vm820_vm11, %vm821_vm10 }
0x178c   :  { %v817_v57 = vsub.f32 1.0, %v816_v56 }
0x178e   :  { %v818_v58 = vmul.f32 %v1397_v55, %v817_v57  ;;  %v1307_v57 = vld [vmem:[%s1809_s0 + $0x18] sm:$0x3] }
0x1790   :  { %v819_v59 = vadd.f32 %v1397_v55, %v818_v58 }
0x1792   :  { %v823_v62 = vsel %vm822_vm12, %v1397_v55, %v819_v59 }
0x1793   :  { %v828_v3 = vsel %vm825_vm13, %v827_v63, %v823_v62 }
0x1794   :  { %v841_v10 = vsub.f32 1.0, %v828_v3 }
0x17d0   :  { %v832_v1 = vpop.permute.xlu2 %831 }
0x17d1   :  { %v834_v4 = vmul.f32 %v832_v1, %v828_v3 }
0x17d3   :  { %836 = vrot.lane.b32.xlu0 %v834_v4, %s1432_s20 }
0x17d8   :  { %v849_v9 = vpop.permute.xlu2 %848 }
0x17d9   :  { %v851_v12 = vmul.f32 %v849_v9, %v828_v3 }
0x1845   :  { %v837_v6 = vpop.permute.xlu0 %836 }
0x1846   :  { %v839_v7 = vadd.f32 %v1297_v50, %v837_v6 }
0x1848   :  { %1398 = vtanh.f32 %v839_v7 }
0x184e   :  { %v1399_v8 = vpop.eup %1398 }
0x184f   :  { %843 = vrot.lane.b32.xlu1 %v1399_v8, %s1433_s23 }
0x18c1   :  { %v844_v11 = vpop.permute.xlu1 %843 }
0x18c2   :  { %v846_v13 = vmul.f32 %v844_v11, %v841_v10 }
0x18c4   :  { %v852_v14 = vadd.f32 %v851_v12, %v846_v13 }
0x18c6   :  { %855 = vrot.lane.b32.xlu0 %v852_v14, %s1433_s23 }
0x1938   :  { %v856_v2 = vpop.permute.xlu0 %855 }
0x1939   :  { %v858_v15 = vsel %vm853_vm14, %v856_v2, %v788_v44  ;;  %v860_v16 = vsel %vm853_vm14, %v856_v2, 0.0 }
0x193a   :  { %859 = vst.msk [vmem:[#allocation2] sm:$0x3] %vm18_vm0, %v858_v15 }
0x193b   :  { %1301 = vst.msk [vmem:[%s1811_s4 + $0x14] sm:$0x3] %vm18_vm0, %v860_v16 }
0x1941   :  { %v863_v17 = vld [vmem:[#allocation2] sm:$0x3] }
0x1942   :  { %v868_v18 = vpack.c.bf16 %v863_v17, %v863_v17 }
0x1944   :  { %1304 = vmatmul.msk.bf16.vlgmr.msra.gmra.mxu3 %vm44_vm1, %v868_v18 }
0x19c7   :  { %v881_v19 = vpop.f32.mrf.mxu3 }
0x19c8   :  { %v882_v20 = vadd.f32 %v1698_v47, %v881_v19 }
0x19ca   :  { %906 = vrot.lane.b32.xlu1 %v882_v20, %s1432_s20  ;;  %v885_v23 = vadd.f32 %v1302_v22, %v882_v20  ;;  %v1308_v20 = vld [vmem:[%s1810_s1 + $0x18] sm:$0x3] }
0x19cb   :  { %vm1003_vm10 = vcmp.gt.f32.partialorder %v1308_v20, 0.0 }
0x19cc   :  { %v1305_v5 = vmul.f32 -1.442695, %v885_v23 }
0x19ce   :  { %1400 = vpow2.f32 %v1305_v5 }
0x19cf   :  { %v883_v21 = vpop.f32.mrf.mxu3 }
0x19d2   :  { %923 = vrot.lane.b32.xlu1 %v863_v17, %s1434_s24 }
0x19d4   :  { %v1401_v24 = vpop.eup %1400 }
0x19d5   :  { %v889_v25 = vadd.f32 1.0, %v1401_v24 }
0x19d7   :  { %1402 = vrcp.f32 %v889_v25  ;;  %v901_v31 = vand.u32 2147483648, %v889_v25  ;;  %vm895_vm2 = vweird.f32 %v889_v25  ;;  %v899_v32 = vand.u32 2147483647, %v889_v25 }
0x19d9   :  { %v902_v34 = vor.u32 1.1754944e-38, %v901_v31  ;;  %vm900_vm4 = vcmp.eq.f32.partialorder %v899_v32, 8.507059e+37 }
0x19dd   :  { %v1403_v26 = vpop.eup %1402 }
0x19de   :  { %v891_v27 = vmul.f32 %v1403_v26, %v889_v25  ;;  %vm896_vm15 = vweird.f32 %v1403_v26 }
0x19df   :  { %vm897_vm3 = vmor %vm895_vm2, %vm896_vm15 }
0x19e0   :  { %v892_v28 = vsub.f32 1.0, %v891_v27 }
0x19e2   :  { %v893_v29 = vmul.f32 %v1403_v26, %v892_v28  ;;  %v1312_v28 = vld [vmem:[%s1809_s0 + $0x1a] sm:$0x3] }
0x19e4   :  { %v894_v30 = vadd.f32 %v1403_v26, %v893_v29 }
0x19e6   :  { %v898_v33 = vsel %vm897_vm3, %v1403_v26, %v894_v30 }
0x19e7   :  { %v903_v36 = vsel %vm900_vm4, %v902_v34, %v898_v33 }
0x19e8   :  { %v916_v42 = vsub.f32 1.0, %v903_v36 }
0x1a3c   :  { %v907_v35 = vpop.permute.xlu1 %906 }
0x1a3d   :  { %v909_v37 = vmul.f32 %v907_v35, %v903_v36 }
0x1a3f   :  { %911 = vrot.lane.b32.xlu2 %v909_v37, %s1432_s20 }
0x1a44   :  { %v924_v41 = vpop.permute.xlu1 %923 }
0x1a45   :  { %v926_v44 = vmul.f32 %v924_v41, %v903_v36 }
0x1a99   :  { %v912_v38 = vpop.permute.xlu2 %911 }
0x1a9a   :  { %v914_v39 = vadd.f32 %v1302_v22, %v912_v38 }
0x1a9c   :  { %1404 = vtanh.f32 %v914_v39 }
0x1aa2   :  { %v1405_v40 = vpop.eup %1404 }
0x1aa3   :  { %918 = vrot.lane.b32.xlu0 %v1405_v40, %s1433_s23 }
0x1b15   :  { %v919_v43 = vpop.permute.xlu0 %918 }
0x1b16   :  { %v921_v45 = vmul.f32 %v919_v43, %v916_v42 }
0x1b18   :  { %v927_v46 = vadd.f32 %v926_v44, %v921_v45 }
0x1b1a   :  { %930 = vrot.lane.b32.xlu2 %v927_v46, %s1433_s23 }
0x1b74   :  { %v931_v49 = vpop.permute.xlu2 %930 }
0x1b75   :  { %v933_v50 = vsel %vm928_vm5, %v931_v49, %v863_v17  ;;  %v935_v51 = vsel %vm928_vm5, %v931_v49, 0.0 }
0x1b76   :  { %1306 = vst.msk [vmem:[%s1811_s4 + $0x16] sm:$0x3] %vm18_vm0, %v935_v51 }
0x1b77   :  { %934 = vst.msk [vmem:[#allocation2] sm:$0x3] %vm18_vm0, %v933_v50 }
0x1b7e   :  { %v938_v52 = vld [vmem:[#allocation2] sm:$0x3] }
0x1b7f   :  { %v943_v53 = vpack.c.bf16 %v938_v52, %v938_v52 }
0x1b81   :  { %1309 = vmatmul.msk.bf16.vlgmr.msrb.gmra.mxu0 %vm44_vm1, %v943_v53 }
0x1bfe   :  { %v956_v54 = vpop.f32.mrf.mxu0 }
0x1bff   :  { %v957_v55 = vadd.f32 %v1698_v47, %v956_v54 }
0x1c01   :  { %981 = vrot.lane.b32.xlu0 %v957_v55, %s1432_s20  ;;  %v960_v58 = vadd.f32 %v1307_v57, %v957_v55  ;;  %v1313_v55 = vld [vmem:[%s1810_s1 + $0x1a] sm:$0x3] }
0x1c02   :  { %vm1078_vm15 = vcmp.gt.f32.partialorder %v1313_v55, 0.0 }
0x1c03   :  { %v1310_v59 = vmul.f32 -1.442695, %v960_v58 }
0x1c05   :  { %1406 = vpow2.f32 %v1310_v59 }
0x1c06   :  { %v958_v56 = vpop.f32.mrf.mxu0 }
0x1c09   :  { %998 = vrot.lane.b32.xlu0 %v938_v52, %s1434_s24 }
0x1c0b   :  { %v1407_v60 = vpop.eup %1406 }
0x1c0c   :  { %v964_v61 = vadd.f32 1.0, %v1407_v60 }
0x1c0e   :  { %1408 = vrcp.f32 %v964_v61  ;;  %v976_v6 = vand.u32 2147483648, %v964_v61  ;;  %vm970_vm7 = vweird.f32 %v964_v61  ;;  %v974_v7 = vand.u32 2147483647, %v964_v61 }
0x1c10   :  { %v977_v9 = vor.u32 1.1754944e-38, %v976_v6  ;;  %vm975_vm9 = vcmp.eq.f32.partialorder %v974_v7, 8.507059e+37 }
0x1c14   :  { %v1409_v62 = vpop.eup %1408 }
0x1c15   :  { %v966_v63 = vmul.f32 %v1409_v62, %v964_v61  ;;  %vm971_vm6 = vweird.f32 %v1409_v62 }
0x1c16   :  { %vm972_vm8 = vmor %vm970_vm7, %vm971_vm6 }
0x1c17   :  { %v967_v1 = vsub.f32 1.0, %v966_v63 }
0x1c19   :  { %v968_v3 = vmul.f32 %v1409_v62, %v967_v1  ;;  %v1317_v1 = vld [vmem:[%s1809_s0 + $0x1c] sm:$0x3] }
0x1c1b   :  { %v969_v4 = vadd.f32 %v1409_v62, %v968_v3 }
0x1c1d   :  { %v973_v8 = vsel %vm972_vm8, %v1409_v62, %v969_v4 }
0x1c1e   :  { %v978_v11 = vsel %vm975_vm9, %v977_v9, %v973_v8 }
0x1c1f   :  { %v991_v15 = vsub.f32 1.0, %v978_v11 }
0x1c73   :  { %v982_v10 = vpop.permute.xlu0 %981 }
0x1c74   :  { %v984_v12 = vmul.f32 %v982_v10, %v978_v11 }
0x1c76   :  { %986 = vrot.lane.b32.xlu1 %v984_v12, %s1432_s20 }
0x1c7b   :  { %v999_v2 = vpop.permute.xlu0 %998 }
0x1c7c   :  { %v1001_v17 = vmul.f32 %v999_v2, %v978_v11 }
0x1ce8   :  { %v987_v13 = vpop.permute.xlu1 %986 }
0x1ce9   :  { %v989_v14 = vadd.f32 %v1307_v57, %v987_v13 }
0x1ceb   :  { %1410 = vtanh.f32 %v989_v14 }
0x1cf1   :  { %v1411_v0 = vpop.eup %1410 }
0x1cf2   :  { %993 = vrot.lane.b32.xlu2 %v1411_v0, %s1433_s23 }
0x1d4c   :  { %v994_v16 = vpop.permute.xlu2 %993 }
0x1d4d   :  { %v996_v18 = vmul.f32 %v994_v16, %v991_v15 }
0x1d4f   :  { %v1002_v19 = vadd.f32 %v1001_v17, %v996_v18 }
0x1d51   :  { %1005 = vrot.lane.b32.xlu1 %v1002_v19, %s1433_s23 }
0x1dc3   :  { %v1006_v21 = vpop.permute.xlu1 %1005 }
0x1dc4   :  { %v1008_v22 = vsel %vm1003_vm10, %v1006_v21, %v938_v52  ;;  %v1010_v23 = vsel %vm1003_vm10, %v1006_v21, 0.0 }
0x1dc5   :  { %1311 = vst.msk [vmem:[%s1811_s4 + $0x18] sm:$0x3] %vm18_vm0, %v1010_v23 }
0x1dc6   :  { %1009 = vst.msk [vmem:[#allocation2] sm:$0x3] %vm18_vm0, %v1008_v22 }
0x1dcd   :  { %v1013_v5 = vld [vmem:[#allocation2] sm:$0x3] }
0x1dce   :  { %v1018_v24 = vpack.c.bf16 %v1013_v5, %v1013_v5 }
0x1dd0   :  { %1314 = vmatmul.msk.bf16.vlgmr.msrb.gmra.mxu1 %vm44_vm1, %v1018_v24 }
0x1e4d   :  { %v1031_v25 = vpop.f32.mrf.mxu1 }
0x1e4e   :  { %v1032_v26 = vadd.f32 %v1698_v47, %v1031_v25 }
0x1e50   :  { %1056 = vrot.lane.b32.xlu2 %v1032_v26, %s1432_s20  ;;  %v1035_v29 = vadd.f32 %v1312_v28, %v1032_v26  ;;  %v1318_v26 = vld [vmem:[%s1810_s1 + $0x1c] sm:$0x3] }
0x1e51   :  { %vm1153_vm6 = vcmp.gt.f32.partialorder %v1318_v26, 0.0 }
0x1e52   :  { %v1315_v30 = vmul.f32 -1.442695, %v1035_v29 }
0x1e54   :  { %1412 = vpow2.f32 %v1315_v30 }
0x1e55   :  { %v1033_v27 = vpop.f32.mrf.mxu1 }
0x1e58   :  { %1073 = vrot.lane.b32.xlu2 %v1013_v5, %s1434_s24 }
0x1e5a   :  { %v1413_v31 = vpop.eup %1412 }
0x1e5b   :  { %v1039_v32 = vadd.f32 1.0, %v1413_v31 }
0x1e5d   :  { %1414 = vrcp.f32 %v1039_v32  ;;  %v1051_v38 = vand.u32 2147483648, %v1039_v32  ;;  %vm1045_vm12 = vweird.f32 %v1039_v32  ;;  %v1049_v39 = vand.u32 2147483647, %v1039_v32 }
0x1e5f   :  { %v1052_v41 = vor.u32 1.1754944e-38, %v1051_v38  ;;  %vm1050_vm14 = vcmp.eq.f32.partialorder %v1049_v39, 8.507059e+37 }
0x1e63   :  { %v1415_v33 = vpop.eup %1414 }
0x1e64   :  { %v1041_v34 = vmul.f32 %v1415_v33, %v1039_v32  ;;  %vm1046_vm11 = vweird.f32 %v1415_v33 }
0x1e65   :  { %vm1047_vm13 = vmor %vm1045_vm12, %vm1046_vm11 }
0x1e66   :  { %v1042_v35 = vsub.f32 1.0, %v1041_v34 }
0x1e68   :  { %v1043_v36 = vmul.f32 %v1415_v33, %v1042_v35  ;;  %v1322_v35 = vld [vmem:[%s1809_s0 + $0x1e] sm:$0x3] }
0x1e6a   :  { %v1044_v37 = vadd.f32 %v1415_v33, %v1043_v36 }
0x1e6c   :  { %v1048_v40 = vsel %vm1047_vm13, %v1415_v33, %v1044_v37 }
0x1e6d   :  { %v1053_v43 = vsel %vm1050_vm14, %v1052_v41, %v1048_v40 }
0x1e6e   :  { %v1066_v50 = vsub.f32 1.0, %v1053_v43 }
0x1eaa   :  { %v1057_v42 = vpop.permute.xlu2 %1056 }
0x1eab   :  { %v1059_v44 = vmul.f32 %v1057_v42, %v1053_v43 }
0x1ead   :  { %1061 = vrot.lane.b32.xlu0 %v1059_v44, %s1432_s20 }
0x1eb2   :  { %v1074_v49 = vpop.permute.xlu2 %1073 }
0x1eb3   :  { %v1076_v52 = vmul.f32 %v1074_v49, %v1053_v43 }
0x1f1f   :  { %v1062_v45 = vpop.permute.xlu0 %1061 }
0x1f20   :  { %v1064_v46 = vadd.f32 %v1312_v28, %v1062_v45 }
0x1f22   :  { %1416 = vtanh.f32 %v1064_v46 }
0x1f28   :  { %v1417_v48 = vpop.eup %1416 }
0x1f29   :  { %1068 = vrot.lane.b32.xlu1 %v1417_v48, %s1433_s23 }
0x1f9b   :  { %v1069_v51 = vpop.permute.xlu1 %1068 }
0x1f9c   :  { %v1071_v53 = vmul.f32 %v1069_v51, %v1066_v50 }
0x1f9e   :  { %v1077_v54 = vadd.f32 %v1076_v52, %v1071_v53 }
0x1fa0   :  { %1080 = vrot.lane.b32.xlu0 %v1077_v54, %s1433_s23 }
0x2012   :  { %v1081_v56 = vpop.permute.xlu0 %1080 }
0x2013   :  { %v1083_v57 = vsel %vm1078_vm15, %v1081_v56, %v1013_v5  ;;  %v1085_v58 = vsel %vm1078_vm15, %v1081_v56, 0.0 }
0x2014   :  { %1316 = vst.msk [vmem:[%s1811_s4 + $0x1a] sm:$0x3] %vm18_vm0, %v1085_v58 }
0x2015   :  { %1084 = vst.msk [vmem:[#allocation2] sm:$0x3] %vm18_vm0, %v1083_v57 }
0x201c   :  { %v1088_v59 = vld [vmem:[#allocation2] sm:$0x3] }
0x201d   :  { %v1093_v60 = vpack.c.bf16 %v1088_v59, %v1088_v59 }
0x201f   :  { %1319 = vmatmul.msk.bf16.vlgmr.msrb.gmra.mxu2 %vm44_vm1, %v1093_v60 }
0x20a2   :  { %v1106_v61 = vpop.f32.mrf.mxu2 }
0x20a3   :  { %v1107_v62 = vadd.f32 %v1698_v47, %v1106_v61  ;;  %v1323_v61 = vld [vmem:[%s1810_s1 + $0x1e] sm:$0x3] }
0x20a4   :  { %vm1228_vm10 = vcmp.gt.f32.partialorder %v1323_v61, 0.0 }
0x20a5   :  { %1131 = vrot.lane.b32.xlu1 %v1107_v62, %s1432_s20  ;;  %v1110_v3 = vadd.f32 %v1317_v1, %v1107_v62 }
0x20a7   :  { %v1320_v4 = vmul.f32 -1.442695, %v1110_v3 }
0x20a9   :  { %1418 = vpow2.f32 %v1320_v4 }
0x20aa   :  { %v1108_v63 = vpop.f32.mrf.mxu2 }
0x20ad   :  { %1148 = vrot.lane.b32.xlu1 %v1088_v59, %s1434_s24 }
0x20af   :  { %v1419_v6 = vpop.eup %1418 }
0x20b0   :  { %v1114_v7 = vadd.f32 1.0, %v1419_v6 }
0x20b2   :  { %1420 = vrcp.f32 %v1114_v7  ;;  %v1126_v13 = vand.u32 2147483648, %v1114_v7  ;;  %vm1120_vm3 = vweird.f32 %v1114_v7  ;;  %v1124_v14 = vand.u32 2147483647, %v1114_v7 }
0x20b4   :  { %v1127_v2 = vor.u32 1.1754944e-38, %v1126_v13  ;;  %vm1125_vm5 = vcmp.eq.f32.partialorder %v1124_v14, 8.507059e+37 }
0x20b8   :  { %v1421_v8 = vpop.eup %1420 }
0x20b9   :  { %v1116_v9 = vmul.f32 %v1421_v8, %v1114_v7  ;;  %vm1121_vm2 = vweird.f32 %v1421_v8 }
0x20ba   :  { %vm1122_vm4 = vmor %vm1120_vm3, %vm1121_vm2 }
0x20bb   :  { %v1117_v10 = vsub.f32 1.0, %v1116_v9 }
0x20bd   :  { %v1118_v11 = vmul.f32 %v1421_v8, %v1117_v10 }
0x20bf   :  { %v1119_v12 = vadd.f32 %v1421_v8, %v1118_v11 }
0x20c1   :  { %v1123_v0 = vsel %vm1122_vm4, %v1421_v8, %v1119_v12 }
0x20c2   :  { %v1128_v16 = vsel %vm1125_vm5, %v1127_v2, %v1123_v0 }
0x20c3   :  { %v1141_v22 = vsub.f32 1.0, %v1128_v16 }
0x2117   :  { %v1132_v15 = vpop.permute.xlu1 %1131 }
0x2118   :  { %v1134_v17 = vmul.f32 %v1132_v15, %v1128_v16 }
0x211a   :  { %1136 = vrot.lane.b32.xlu2 %v1134_v17, %s1432_s20 }
0x211f   :  { %v1149_v21 = vpop.permute.xlu1 %1148 }
0x2120   :  { %v1151_v5 = vmul.f32 %v1149_v21, %v1128_v16 }
0x2174   :  { %v1137_v18 = vpop.permute.xlu2 %1136 }
0x2175   :  { %v1139_v19 = vadd.f32 %v1317_v1, %v1137_v18 }
0x2177   :  { %1422 = vtanh.f32 %v1139_v19 }
0x217d   :  { %v1423_v20 = vpop.eup %1422 }
0x217e   :  { %1143 = vrot.lane.b32.xlu0 %v1423_v20, %s1433_s23 }
0x21f0   :  { %v1144_v23 = vpop.permute.xlu0 %1143 }
0x21f1   :  { %v1146_v24 = vmul.f32 %v1144_v23, %v1141_v22 }
0x21f3   :  { %v1152_v25 = vadd.f32 %v1151_v5, %v1146_v24 }
0x21f5   :  { %1155 = vrot.lane.b32.xlu2 %v1152_v25, %s1433_s23 }
0x224f   :  { %v1156_v27 = vpop.permute.xlu2 %1155 }
0x2250   :  { %v1158_v28 = vsel %vm1153_vm6, %v1156_v27, %v1088_v59  ;;  %v1160_v29 = vsel %vm1153_vm6, %v1156_v27, 0.0 }
0x2251   :  { %1321 = vst.msk [vmem:[%s1811_s4 + $0x1c] sm:$0x3] %vm18_vm0, %v1160_v29 }
0x2252   :  { %1159 = vst.msk [vmem:[#allocation2] sm:$0x3] %vm18_vm0, %v1158_v28 }
0x2259   :  { %v1163_v30 = vld [vmem:[#allocation2] sm:$0x3] }
0x225a   :  { %v1168_v31 = vpack.c.bf16 %v1163_v30, %v1163_v30 }
0x225c   :  { %1324 = vmatmul.msk.bf16.vlgmr.msrb.gmra.mxu3 %vm44_vm1, %v1168_v31 }
0x22df   :  { %v1181_v32 = vpop.f32.mrf.mxu3 }
0x22e0   :  { %v1182_v33 = vadd.f32 %v1698_v47, %v1181_v32 }
0x22e2   :  { %1206 = vrot.lane.b32.xlu0 %v1182_v33, %s1432_s20  ;;  %v1185_v36 = vadd.f32 %v1322_v35, %v1182_v33 }
0x22e4   :  { %v1325_v37 = vmul.f32 -1.442695, %v1185_v36 }
0x22e6   :  { %1424 = vpow2.f32 %v1325_v37 }
0x22e7   :  { %v1183_v34 = vpop.f32.mrf.mxu3 }
0x22ea   :  { %1223 = vrot.lane.b32.xlu0 %v1163_v30, %s1434_s24 }
0x22ec   :  { %v1425_v38 = vpop.eup %1424 }
0x22ed   :  { %v1189_v39 = vadd.f32 1.0, %v1425_v38 }
0x22ef   :  { %1426 = vrcp.f32 %v1189_v39  ;;  %v1201_v44 = vand.u32 2147483648, %v1189_v39  ;;  %vm1195_vm7 = vweird.f32 %v1189_v39  ;;  %v1199_v45 = vand.u32 2147483647, %v1189_v39 }
0x22f1   :  { %v1202_v48 = vor.u32 1.1754944e-38, %v1201_v44  ;;  %vm1200_vm9 = vcmp.eq.f32.partialorder %v1199_v45, 8.507059e+37 }
0x22f5   :  { %v1427_v40 = vpop.eup %1426 }
0x22f6   :  { %v1191_v41 = vmul.f32 %v1427_v40, %v1189_v39  ;;  %vm1196_vm1 = vweird.f32 %v1427_v40 }
0x22f7   :  { %vm1197_vm8 = vmor %vm1195_vm7, %vm1196_vm1 }
0x22f8   :  { %v1192_v42 = vsub.f32 1.0, %v1191_v41 }
0x22fa   :  { %v1193_v43 = vmul.f32 %v1427_v40, %v1192_v42 }
0x22fc   :  { %v1194_v47 = vadd.f32 %v1427_v40, %v1193_v43 }
0x22fe   :  { %v1198_v46 = vsel %vm1197_vm8, %v1427_v40, %v1194_v47 }
0x22ff   :  { %v1203_v50 = vsel %vm1200_vm9, %v1202_v48, %v1198_v46 }
0x2300   :  { %v1216_v56 = vsub.f32 1.0, %v1203_v50 }
0x2354   :  { %v1207_v49 = vpop.permute.xlu0 %1206 }
0x2355   :  { %v1209_v51 = vmul.f32 %v1207_v49, %v1203_v50 }
0x2357   :  { %1211 = vrot.lane.b32.xlu1 %v1209_v51, %s1432_s20 }
0x235c   :  { %v1224_v55 = vpop.permute.xlu0 %1223 }
0x235d   :  { %v1226_v58 = vmul.f32 %v1224_v55, %v1203_v50 }
0x23c9   :  { %v1212_v52 = vpop.permute.xlu1 %1211 }
0x23ca   :  { %v1214_v53 = vadd.f32 %v1322_v35, %v1212_v52 }
0x23cc   :  { %1428 = vtanh.f32 %v1214_v53 }
0x23d2   :  { %v1429_v54 = vpop.eup %1428 }
0x23d3   :  { %1218 = vrot.lane.b32.xlu2 %v1429_v54, %s1433_s23 }
0x242d   :  { %v1219_v57 = vpop.permute.xlu2 %1218 }
0x242e   :  { %v1221_v59 = vmul.f32 %v1219_v57, %v1216_v56 }
0x2430   :  { %v1227_v60 = vadd.f32 %v1226_v58, %v1221_v59 }
0x2432   :  { %1230 = vrot.lane.b32.xlu1 %v1227_v60, %s1433_s23 }
0x24a4   :  { %v1231_v62 = vpop.permute.xlu1 %1230 }
0x24a5   :  { %v1233_v63 = vsel %vm1228_vm10, %v1231_v62, %v1163_v30  ;;  %v1235_v1 = vsel %vm1228_vm10, %v1231_v62, 0.0 }
0x24a6   :  { %1234 = vst.msk [vmem:[#allocation2] sm:$0x3] %vm18_vm0, %v1233_v63 }
0x24a7   :  { %1326 = vst.msk [vmem:[%s1811_s4 + $0x1e] sm:$0x3] %vm18_vm0, %v1235_v1 }

</bundles_post_ra>
